<compile_context>
chip_gen: v5e
topology: v5e:2x2
jax: 0.10.0
libtpu: 0.0.40
codegen_flags: <defaults>
</compile_context>

<pallas_src>
import jax
import jax.numpy as jnp
from jax.experimental import pallas as pl
from jax.experimental.pallas import tpu as pltpu

H = 1024            # hidden size fixed by the module (Linear(1024, 1024))
SUBLANE_PACK = 16   # bf16 packs 16 rows per vreg sublane group
MAX_BATCH_TILE = 256  # matches 2x256^2 MXU on v6e/v7x; fine (2 passes) on v5e


def _pooler_mlp_kernel(cls_ref, wp_ref, bp_ref, w1_ref, b1_ref, w2_ref, b2_ref,
                       out_ref):
    """Fused: tanh(cls @ Wp + bp) -> relu(. @ W1 + b1) -> . @ W2 + b2.

    Each Linear accumulates in f32 on the MXU, rounds its (matmul + bias)
    output to bf16, and the activation is applied to the bf16 Linear output
    (mirrors PyTorch bf16 nn.Linear -> nn.Tanh / nn.ReLU rounding points).
    """
    cls = cls_ref[...]  # (bt, H) bf16

    # BERT pooler: dense + tanh on the [CLS] token.
    pooled = jnp.dot(cls, wp_ref[...], preferred_element_type=jnp.float32)
    pooled = (pooled + bp_ref[...].astype(jnp.float32)).astype(jnp.bfloat16)
    pooled = jnp.tanh(pooled)  # bf16 in / bf16 out (EUP)

    # extra_pooler[0] + ReLU.
    h = jnp.dot(pooled, w1_ref[...], preferred_element_type=jnp.float32)
    h = (h + b1_ref[...].astype(jnp.float32)).astype(jnp.bfloat16)
    h = jnp.maximum(h, jnp.bfloat16(0.0))

    # extra_pooler[2].
    o = jnp.dot(h, w2_ref[...], preferred_element_type=jnp.float32)
    o = (o + b2_ref[...].astype(jnp.float32)).astype(jnp.bfloat16)
    out_ref[...] = o


def pooler_and_extra_pooler(cls_tok, wp, bp, w1, b1, w2, b2):
    """cls_tok: (B, H) bf16; weights (H, H) bf16 [in,out]; biases (1, H) bf16."""
    B = cls_tok.shape[0]

    # Pad batch to a multiple of 16 (unmasked bf16 stores / full-tile MXU
    # pushes), then choose a batch tile and round the pad up to the tile.
    b_pad = pl.cdiv(B, SUBLANE_PACK) * SUBLANE_PACK
    bt = min(MAX_BATCH_TILE, b_pad)
    b_pad = pl.cdiv(b_pad, bt) * bt
    if b_pad != B:
        cls_tok = jnp.pad(cls_tok, ((0, b_pad - B), (0, 0)))

    grid_steps = b_pad // bt
    grid = (grid_steps,)

    act_spec = pl.BlockSpec((bt, H), lambda i: (i, 0))
    # Constant index maps: weights/biases are fetched exactly once and remain
    # VMEM-resident across every batch tile.  Single-buffer them (Buffered(1)):
    # double-buffering a block that is never re-DMA'd only doubles its VMEM
    # footprint (12 MiB -> 6 MiB of weights).
    w_spec = pl.BlockSpec((H, H), lambda i: (0, 0), pipeline_mode=pl.Buffered(1))
    b_spec = pl.BlockSpec((1, H), lambda i: (0, 0), pipeline_mode=pl.Buffered(1))

    # Megacore-shard the batch axis only when there is enough work to amortize
    # each core fetching its own private copy of the 6 MiB of weights (v7x).
    semantics = ("parallel",) if grid_steps >= 4 else ("arbitrary",)

    # Honest advisory profile for XLA's scheduler: tiny compute, weight-heavy.
    cost = pl.CostEstimate(
        flops=3 * 2 * b_pad * H * H,
        transcendentals=b_pad * H,                        # tanh
        bytes_accessed=3 * H * H * 2 + 3 * H * 2          # weights + biases
        + 2 * b_pad * H * 2,                              # activations in + out
    )

    out_padded = pl.pallas_call(
        _pooler_mlp_kernel,
        out_shape=jax.ShapeDtypeStruct((b_pad, H), jnp.bfloat16),
        grid=grid,
        in_specs=[
            act_spec,  # cls token embeddings
            w_spec,    # bert pooler dense weight
            b_spec,    # bert pooler dense bias
            w_spec,    # extra_pooler linear 1 weight
            b_spec,    # extra_pooler linear 1 bias
            w_spec,    # extra_pooler linear 2 weight
            b_spec,    # extra_pooler linear 2 bias
        ],
        out_specs=act_spec,
        compiler_params=pltpu.CompilerParams(
            dimension_semantics=semantics,
            # ~6 MiB single-buffered weights + ~2 MiB double-buffered acts
            # + ~3 MiB f32 intermediates at bt=256; 32 MiB leaves headroom
            # (and scoped VMEM for surrounding fusions) on every chip incl. v7x.
            vmem_limit_bytes=32 << 20,
        ),
        cost_estimate=cost,
    )(cls_tok, wp, bp, w1, b1, w2, b2)

    return out_padded[:B]


def modified_model_forward(last_hidden_state, params):
    """last_hidden_state: (B, S, H) bf16 — output of the BERT encoder stack."""
    # CLS slice stays in the wrapper: an in-kernel (bt, 1, H) block on the seq
    # axis would need a size-1 second-minor block (layout cliff); this slice is
    # a trivially fused XLA op and is not on the critical path.
    cls_tok = last_hidden_state[:, 0, :]  # (B, H)
    return pooler_and_extra_pooler(
        cls_tok,
        params["wp"], params["bp"],
        params["w1"], params["b1"],
        params["w2"], params["b2"],
    )


def _reference_forward(last_hidden_state, params):
    """Pure-JAX mirror with PyTorch-style bf16 Linear/activation rounding."""
    cls = last_hidden_state[:, 0, :]
    pooled = jnp.dot(cls, params["wp"], preferred_element_type=jnp.float32)
    pooled = (pooled + params["bp"].astype(jnp.float32)).astype(jnp.bfloat16)
    pooled = jnp.tanh(pooled)
    h = jnp.dot(pooled, params["w1"], preferred_element_type=jnp.float32)
    h = (h + params["b1"].astype(jnp.float32)).astype(jnp.bfloat16)
    h = jnp.maximum(h, jnp.bfloat16(0.0))
    o = jnp.dot(h, params["w2"], preferred_element_type=jnp.float32)
    o = (o + params["b2"].astype(jnp.float32)).astype(jnp.bfloat16)
    return o


def init_params(key):
    ks = jax.random.split(key, 6)
    scale = 0.02
    return {
        "wp": (jax.random.normal(ks[0], (H, H), jnp.float32) * scale).astype(jnp.bfloat16),
        "bp": jnp.zeros((1, H), jnp.bfloat16),
        "w1": (jax.random.normal(ks[1], (H, H), jnp.float32) * scale).astype(jnp.bfloat16),
        "b1": (jax.random.normal(ks[2], (1, H), jnp.float32) * scale).astype(jnp.bfloat16),
        "w2": (jax.random.normal(ks[3], (H, H), jnp.float32) * scale).astype(jnp.bfloat16),
        "b2": (jax.random.normal(ks[4], (1, H), jnp.float32) * scale).astype(jnp.bfloat16),
    }


if __name__ == "__main__":
    key = jax.random.PRNGKey(0)
    k_params, k_x = jax.random.split(key)

    B, S = 2, 8  # small batch / sequence; hidden fixed at 1024 by the module
    params = init_params(k_params)

    # Stand-in for bert(**inputs).last_hidden_state (encoder stack not reproduced).
    last_hidden_state = jax.random.normal(k_x, (B, S, H), jnp.float32).astype(jnp.bfloat16)

    out = modified_model_forward(last_hidden_state, params)
    out = jax.block_until_ready(out)

    assert out.shape == (B, H) and out.dtype == jnp.bfloat16

    ref = jax.block_until_ready(_reference_forward(last_hidden_state, params))
    assert jnp.allclose(out.astype(jnp.float32), ref.astype(jnp.float32),
                        atol=5e-2, rtol=5e-2), "kernel/reference mismatch"

    print("KERNEL_OK")
</pallas_src>

<mosaic_0001>
module attributes {stable_mosaic.version = 11 : i64} {
  func.func @_pooler_mlp_kernel(%arg0: i32, %arg1: memref<16x1024xbf16, #tpu.memory_space<vmem>>, %arg2: memref<1024x1024xbf16, #tpu.memory_space<vmem>>, %arg3: memref<1x1024xbf16, #tpu.memory_space<vmem>>, %arg4: memref<1024x1024xbf16, #tpu.memory_space<vmem>>, %arg5: memref<1x1024xbf16, #tpu.memory_space<vmem>>, %arg6: memref<1024x1024xbf16, #tpu.memory_space<vmem>>, %arg7: memref<1x1024xbf16, #tpu.memory_space<vmem>>, %arg8: memref<16x1024xbf16, #tpu.memory_space<vmem>>) attributes {dimension_semantics = [#tpu.dimension_semantics<arbitrary>], iteration_bounds = array<i64: 1>, scalar_prefetch = 0 : i64, scratch_operands = 0 : i64, tpu.core_type = #tpu.core_type<tc>, window_params = [{transform_indices = @transform_0, window_bounds = array<i64: 16, 1024>}, {pipeline_mode = #tpu.pipeline_mode<synchronous>, transform_indices = @transform_1, window_bounds = array<i64: 1024, 1024>}, {pipeline_mode = #tpu.pipeline_mode<synchronous>, transform_indices = @transform_2, window_bounds = array<i64: 1, 1024>}, {pipeline_mode = #tpu.pipeline_mode<synchronous>, transform_indices = @transform_3, window_bounds = array<i64: 1024, 1024>}, {pipeline_mode = #tpu.pipeline_mode<synchronous>, transform_indices = @transform_4, window_bounds = array<i64: 1, 1024>}, {pipeline_mode = #tpu.pipeline_mode<synchronous>, transform_indices = @transform_5, window_bounds = array<i64: 1024, 1024>}, {pipeline_mode = #tpu.pipeline_mode<synchronous>, transform_indices = @transform_6, window_bounds = array<i64: 1, 1024>}, {transform_indices = @transform_7, window_bounds = array<i64: 16, 1024>}]} {
    %c0 = arith.constant 0 : index
    %c0_0 = arith.constant 0 : index
    %0 = vector.load %arg1[%c0, %c0_0] : memref<16x1024xbf16, #tpu.memory_space<vmem>>, vector<16x1024xbf16>
    %c0_1 = arith.constant 0 : index
    %c0_2 = arith.constant 0 : index
    %1 = vector.load %arg2[%c0_1, %c0_2] : memref<1024x1024xbf16, #tpu.memory_space<vmem>>, vector<1024x1024xbf16>
    %cst = arith.constant dense<0.000000e+00> : vector<16x1024xf32>
    %2 = tpu.matmul %0, %1, %cst {dimension_numbers = #tpu.dot_dimension_numbers<[1], [0], [0], [1], [0, 0, 1, 1], [], []>} : vector<16x1024xbf16>, vector<1024x1024xbf16>, vector<16x1024xf32> -> vector<16x1024xf32>
    %c0_3 = arith.constant 0 : index
    %c0_4 = arith.constant 0 : index
    %3 = vector.load %arg3[%c0_3, %c0_4] : memref<1x1024xbf16, #tpu.memory_space<vmem>>, vector<1x1024xbf16>
    %4 = arith.extf %3 : vector<1x1024xbf16> to vector<1x1024xf32>
    %5 = vector.broadcast %4 : vector<1x1024xf32> to vector<16x1024xf32>
    %6 = arith.addf %2, %5 : vector<16x1024xf32>
    %7 = arith.truncf %6 : vector<16x1024xf32> to vector<16x1024xbf16>
    %8 = math.tanh %7 : vector<16x1024xbf16>
    %c0_5 = arith.constant 0 : index
    %c0_6 = arith.constant 0 : index
    %9 = vector.load %arg4[%c0_5, %c0_6] : memref<1024x1024xbf16, #tpu.memory_space<vmem>>, vector<1024x1024xbf16>
    %cst_7 = arith.constant dense<0.000000e+00> : vector<16x1024xf32>
    %10 = tpu.matmul %8, %9, %cst_7 {dimension_numbers = #tpu.dot_dimension_numbers<[1], [0], [0], [1], [0, 0, 1, 1], [], []>} : vector<16x1024xbf16>, vector<1024x1024xbf16>, vector<16x1024xf32> -> vector<16x1024xf32>
    %c0_8 = arith.constant 0 : index
    %c0_9 = arith.constant 0 : index
    %11 = vector.load %arg5[%c0_8, %c0_9] : memref<1x1024xbf16, #tpu.memory_space<vmem>>, vector<1x1024xbf16>
    %12 = arith.extf %11 : vector<1x1024xbf16> to vector<1x1024xf32>
    %13 = vector.broadcast %12 : vector<1x1024xf32> to vector<16x1024xf32>
    %14 = arith.addf %10, %13 : vector<16x1024xf32>
    %15 = arith.truncf %14 : vector<16x1024xf32> to vector<16x1024xbf16>
    %cst_10 = arith.constant 0.000000e+00 : bf16
    %16 = vector.broadcast %cst_10 : bf16 to vector<16x1024xbf16>
    %17 = arith.maximumf %15, %16 : vector<16x1024xbf16>
    %c0_11 = arith.constant 0 : index
    %c0_12 = arith.constant 0 : index
    %18 = vector.load %arg6[%c0_11, %c0_12] : memref<1024x1024xbf16, #tpu.memory_space<vmem>>, vector<1024x1024xbf16>
    %cst_13 = arith.constant dense<0.000000e+00> : vector<16x1024xf32>
    %19 = tpu.matmul %17, %18, %cst_13 {dimension_numbers = #tpu.dot_dimension_numbers<[1], [0], [0], [1], [0, 0, 1, 1], [], []>} : vector<16x1024xbf16>, vector<1024x1024xbf16>, vector<16x1024xf32> -> vector<16x1024xf32>
    %c0_14 = arith.constant 0 : index
    %c0_15 = arith.constant 0 : index
    %20 = vector.load %arg7[%c0_14, %c0_15] : memref<1x1024xbf16, #tpu.memory_space<vmem>>, vector<1x1024xbf16>
    %21 = arith.extf %20 : vector<1x1024xbf16> to vector<1x1024xf32>
    %22 = vector.broadcast %21 : vector<1x1024xf32> to vector<16x1024xf32>
    %23 = arith.addf %19, %22 : vector<16x1024xf32>
    %24 = arith.truncf %23 : vector<16x1024xf32> to vector<16x1024xbf16>
    %c0_16 = arith.constant 0 : index
    %c0_17 = arith.constant 0 : index
    %25 = vector.load %arg8[%c0_16, %c0_17] : memref<16x1024xbf16, #tpu.memory_space<vmem>>, vector<16x1024xbf16>
    tpu.vector_store %arg8[%c0_16, %c0_17], %24 {strides = array<i32>} : memref<16x1024xbf16, #tpu.memory_space<vmem>>, vector<16x1024xbf16>,
    return
  }
  func.func @transform_0(%arg0: i32) -> (i32, i32) {
    %c0_i32 = arith.constant 0 : i32
    %c0_i32_0 = arith.constant 0 : i32
    return %arg0, %c0_i32 : i32, i32
  }
  func.func @transform_1(%arg0: i32) -> (i32, i32) {
    %c0_i32 = arith.constant 0 : i32
    %c0_i32_0 = arith.constant 0 : i32
    %c0_i32_1 = arith.constant 0 : i32
    return %c0_i32, %c0_i32_0 : i32, i32
  }
  func.func @transform_2(%arg0: i32) -> (i32, i32) {
    %c0_i32 = arith.constant 0 : i32
    %c0_i32_0 = arith.constant 0 : i32
    %c0_i32_1 = arith.constant 0 : i32
    return %c0_i32, %c0_i32_0 : i32, i32
  }
  func.func @transform_3(%arg0: i32) -> (i32, i32) {
    %c0_i32 = arith.constant 0 : i32
    %c0_i32_0 = arith.constant 0 : i32
    %c0_i32_1 = arith.constant 0 : i32
    return %c0_i32, %c0_i32_0 : i32, i32
  }
  func.func @transform_4(%arg0: i32) -> (i32, i32) {
    %c0_i32 = arith.constant 0 : i32
    %c0_i32_0 = arith.constant 0 : i32
    %c0_i32_1 = arith.constant 0 : i32
    return %c0_i32, %c0_i32_0 : i32, i32
  }
  func.func @transform_5(%arg0: i32) -> (i32, i32) {
    %c0_i32 = arith.constant 0 : i32
    %c0_i32_0 = arith.constant 0 : i32
    %c0_i32_1 = arith.constant 0 : i32
    return %c0_i32, %c0_i32_0 : i32, i32
  }
  func.func @transform_6(%arg0: i32) -> (i32, i32) {
    %c0_i32 = arith.constant 0 : i32
    %c0_i32_0 = arith.constant 0 : i32
    %c0_i32_1 = arith.constant 0 : i32
    return %c0_i32, %c0_i32_0 : i32, i32
  }
  func.func @transform_7(%arg0: i32) -> (i32, i32) {
    %c0_i32 = arith.constant 0 : i32
    %c0_i32_0 = arith.constant 0 : i32
    return %arg0, %c0_i32 : i32, i32
  }
}

</mosaic_0001>

<bundles_post_ra>
// kernel: tpu_custom_call.1
= control target key start
LH: loop header
LB: loop body
LE: loop exit
PB: predicated region body
PF: predicated region fallthrough
CT: control target
= control target key end

     0   :  { %12 = vsyncpa [#allocation3], 0  ;;  %s21243_s0 = inlined_call_operand.hbm [shape: bf16[16,1024], index: 0, kind: input, shape index: {}]   ;;  %s21244_s1 = inlined_call_operand.hbm [shape: bf16[1024,1024], index: 1, kind: input, shape index: {}]   ;;  %s21245_s2 = inlined_call_operand.hbm [shape: bf16[1,1024], index: 2, kind: input, shape index: {}]   ;;  %s21246_s3 = inlined_call_operand.hbm [shape: bf16[1024,1024], index: 3, kind: input, shape index: {}]   ;;  %s21247_s4 = inlined_call_operand.hbm [shape: bf16[1,1024], index: 4, kind: input, shape index: {}]   ;;  %s21248_s5 = inlined_call_operand.hbm [shape: bf16[1024,1024], index: 5, kind: input, shape index: {}]   ;;  %s21249_s6 = inlined_call_operand.hbm [shape: bf16[1,1024], index: 6, kind: input, shape index: {}]   ;;  %s21250_s7 = inlined_call_operand.hbm [shape: bf16[16,1024], index: 7, kind: output, shape index: {}]  }
   0x1   :  { %13 = vsyncpa [#allocation6], 0 }
   0x2   :  { %14 = vsyncpa [#allocation9], 0 }
   0x3   :  { %15 = vsyncpa [#allocation12], 0 }
   0x4   :  { %16 = vsyncpa [#allocation4], 0  ;;  %s34_s26 = sshll.u32 %s21244_s1, 4  ;;  %s20270_s27 = smov [#allocation5]   ;;  %s35_s26 = int_to_ptr.hbm [resolvable:$true] %s34_s26 }
   0x5   :  { %s36_s28 = sshll.u32 %s20270_s27, 4  ;;  %s58_s8 = sshll.u32 %s21246_s3, 4  ;;  %s37_s28 = int_to_ptr.vmem [resolvable:$true] %s36_s28  ;;  %s59_s8 = int_to_ptr.hbm [resolvable:$true] %s58_s8 }
   0x6   :  { %s20271_s9 = smov 512   ;;  %s20272_s10 = smov 32  }
   0x7   :  { %42 = dma.hbm_to_vmem [thread:$0]  %s35_s26, 65536, %s37_s28, [#allocation6], %s20271_s9, %s20271_s9, %s20272_s10  }
   0x8   :  { %s20273_s11 = smov [#allocation8]   ;;  %s82_s1 = sshll.u32 %s21248_s5, 4  ;;  %s83_s1 = int_to_ptr.hbm [resolvable:$true] %s82_s1 }
   0x9   :  { %s60_s12 = sshll.u32 %s20273_s11, 4  ;;  %s21_s16 = sshll.u32 %s21243_s0, 4  ;;  %s61_s12 = int_to_ptr.vmem [resolvable:$true] %s60_s12  ;;  %s22_s16 = int_to_ptr.hbm [resolvable:$true] %s21_s16 }
   0xa   :  { %66 = dma.hbm_to_vmem [thread:$0]  %s59_s8, 65536, %s61_s12, [#allocation9], %s20271_s9, %s20271_s9, %s20272_s10  }
   0xb   :  { %s20274_s17 = smov [#allocation11]   ;;  %s20275_s19 = smov [#allocation2]  }
   0xc   :  { %s84_s18 = sshll.u32 %s20274_s17, 4  ;;  %s23_s5 = sshll.u32 %s20275_s19, 4  ;;  %s85_s18 = int_to_ptr.vmem [resolvable:$true] %s84_s18  ;;  %s24_s5 = int_to_ptr.vmem [resolvable:$true] %s23_s5 }
   0xd   :  { %90 = dma.hbm_to_vmem [thread:$0]  %s83_s1, 65536, %s85_s18, [#allocation12], %s20271_s9, %s20271_s9, %s20272_s10  }
   0xe   :  { %s48_s22 = sshll.u32 %s21245_s2, 4  ;;  %s72_s24 = sshll.u32 %s21247_s4, 4  ;;  %s49_s22 = int_to_ptr.hbm [resolvable:$true] %s48_s22  ;;  %s73_s24 = int_to_ptr.hbm [resolvable:$true] %s72_s24 }
   0xf   :  { %29 = dma.hbm_to_vmem [thread:$0]  %s22_s16, 1024, %s24_s5, [#allocation3], %s20271_s9, %s20271_s9, %s20272_s10  }
  0x10   :  { %s20276_s25 = smov [#allocation7]   ;;  %s20277_s27 = smov [#allocation10]  }
  0x11   :  { %s50_s26 = sshll.u32 %s20276_s25, 4  ;;  %s74_s28 = sshll.u32 %s20277_s27, 4  ;;  %s51_s26 = int_to_ptr.vmem [resolvable:$true] %s50_s26  ;;  %s75_s28 = int_to_ptr.vmem [resolvable:$true] %s74_s28 }
  0x12   :  { %53 = dma.hbm_to_vmem [thread:$0]  %s49_s22, 128, %s51_s26, [#allocation6]  }
  0x13   :  { %s96_s2 = sshll.u32 %s21249_s6, 4  ;;  %s20278_s8 = smov [#allocation13]   ;;  %s97_s2 = int_to_ptr.hbm [resolvable:$true] %s96_s2 }
  0x14   :  { %77 = dma.hbm_to_vmem [thread:$0]  %s73_s24, 128, %s75_s28, [#allocation9]  }
  0x15   :  { %s98_s11 = sshll.u32 %s20278_s8, 4  ;;  %s99_s11 = int_to_ptr.vmem [resolvable:$true] %s98_s11 }
  0x16   :  { %101 = dma.hbm_to_vmem [thread:$0]  %s97_s2, 128, %s99_s11, [#allocation12]  }
  0x17   :  { %20260 = dma.done.wait [#allocation3], 1024  }
  0x18   :  { %20261 = vsyncadd [#allocation3], 4294966272 }
  0x19   :  { %20262 = dma.done.wait [#allocation6], 65664  }
  0x1a   :  { %20263 = vsyncadd [#allocation6], 4294901632 }
  0x1b   :  { %20264 = dma.done.wait [#allocation9], 65664  }
  0x1c   :  { %20265 = vsyncadd [#allocation9], 4294901632 }
  0x1d   :  { %20266 = dma.done.wait [#allocation12], 65664  }
  0x1e   :  { %20267 = vsyncadd [#allocation12], 4294901632  ;;  %v12561_v0 = vld [vmem:[#allocation5 + $0x1c0] sm:$0xf]  ;;  %s20279_s4 = smov [#allocation14]   ;;  %s12287_s14 = sshll.u32 %s21250_s7, 4  ;;  %s12288_s14 = int_to_ptr.hbm [resolvable:$true] %s12287_s14 }
  0x1f   :  { %v18547_v1 = vld [vmem:[#allocation5 + $0x1dc] sm:$0xf0]  ;;  %s12285_s6 = sshll.u32 %s20279_s4, 4  ;;  %s12286_s6 = int_to_ptr.vmem [resolvable:$true] %s12285_s6 }
  0x20   :  { %v12817_v2 = vld [vmem:[#allocation5 + $0x3c0] sm:$0xf]  ;;  %v12562_v3 = vor.u32 %v18547_v1, %v12561_v0 }
  0x21   :  { %v18611_v4 = vld [vmem:[#allocation5 + $0x3dc] sm:$0xf0] }
  0x22   :  { %v13073_v5 = vld [vmem:[#allocation5 + $0x5c0] sm:$0xf]  ;;  %v12818_v7 = vor.u32 %v18611_v4, %v12817_v2  ;;  %3279 = vmatpush.bf16.msra.mxu0 %v12562_v3 }
  0x23   :  { %v18675_v6 = vld [vmem:[#allocation5 + $0x5dc] sm:$0xf0] }
  0x24   :  { %v13074_v8 = vor.u32 %v18675_v6, %v13073_v5  ;;  %v13329_v9 = vld [vmem:[#allocation5 + $0x7c0] sm:$0xf]  ;;  %3293 = vmatpush.bf16.msra.mxu1 %v12818_v7 }
  0x25   :  { %v18739_v10 = vld [vmem:[#allocation5 + $0x7dc] sm:$0xf0] }
  0x26   :  { %v12529_v11 = vld [vmem:[#allocation5 + $0x180] sm:$0xf]  ;;  %v13330_v12 = vor.u32 %v18739_v10, %v13329_v9  ;;  %3307 = vmatpush.bf16.msra.mxu2 %v13074_v8 }
  0x27   :  { %v18539_v13 = vld [vmem:[#allocation5 + $0x19c] sm:$0xf0] }
  0x28   :  { %v12785_v14 = vld [vmem:[#allocation5 + $0x380] sm:$0xf]  ;;  %v12530_v16 = vor.u32 %v18539_v13, %v12529_v11  ;;  %3321 = vmatpush.bf16.msra.mxu3 %v13330_v12 }
  0x29   :  { %v18603_v15 = vld [vmem:[#allocation5 + $0x39c] sm:$0xf0] }
  0x2a   :  { %v12786_v17 = vor.u32 %v18603_v15, %v12785_v14  ;;  %v13041_v18 = vld [vmem:[#allocation5 + $0x580] sm:$0xf]  ;;  %3280 = vmatpush.bf16.msra.mxu0 %v12530_v16 }
  0x2b   :  { %v18667_v19 = vld [vmem:[#allocation5 + $0x59c] sm:$0xf0] }
  0x2c   :  { %v13297_v20 = vld [vmem:[#allocation5 + $0x780] sm:$0xf]  ;;  %v13042_v21 = vor.u32 %v18667_v19, %v13041_v18  ;;  %3294 = vmatpush.bf16.msra.mxu1 %v12786_v17 }
  0x2d   :  { %v18731_v22 = vld [vmem:[#allocation5 + $0x79c] sm:$0xf0] }
  0x2e   :  { %v12497_v23 = vld [vmem:[#allocation5 + $0x140] sm:$0xf]  ;;  %v13298_v25 = vor.u32 %v18731_v22, %v13297_v20  ;;  %3308 = vmatpush.bf16.msra.mxu2 %v13042_v21 }
  0x2f   :  { %v18531_v24 = vld [vmem:[#allocation5 + $0x15c] sm:$0xf0] }
  0x30   :  { %v12753_v26 = vld [vmem:[#allocation5 + $0x340] sm:$0xf]  ;;  %v12498_v29 = vor.u32 %v18531_v24, %v12497_v23  ;;  %3322 = vmatpush.bf16.msra.mxu3 %v13298_v25 }
  0x31   :  { %v18595_v27 = vld [vmem:[#allocation5 + $0x35c] sm:$0xf0] }
  0x32   :  { %v13009_v28 = vld [vmem:[#allocation5 + $0x540] sm:$0xf]  ;;  %v12754_v33 = vor.u32 %v18595_v27, %v12753_v26  ;;  %3281 = vmatpush.bf16.msra.mxu0 %v12498_v29 }
  0x33   :  { %v18659_v30 = vld [vmem:[#allocation5 + $0x55c] sm:$0xf0] }
  0x34   :  { %v13265_v31 = vld [vmem:[#allocation5 + $0x740] sm:$0xf]  ;;  %v13010_v34 = vor.u32 %v18659_v30, %v13009_v28  ;;  %3295 = vmatpush.bf16.msra.mxu1 %v12754_v33 }
  0x35   :  { %v18723_v32 = vld [vmem:[#allocation5 + $0x75c] sm:$0xf0] }
  0x36   :  { %v12465_v35 = vld [vmem:[#allocation5 + $0x100] sm:$0xf]  ;;  %v13266_v38 = vor.u32 %v18723_v32, %v13265_v31  ;;  %3309 = vmatpush.bf16.msra.mxu2 %v13010_v34 }
  0x37   :  { %v18523_v36 = vld [vmem:[#allocation5 + $0x11c] sm:$0xf0] }
  0x38   :  { %v12721_v37 = vld [vmem:[#allocation5 + $0x300] sm:$0xf]  ;;  %v12466_v44 = vor.u32 %v18523_v36, %v12465_v35  ;;  %3323 = vmatpush.bf16.msra.mxu3 %v13266_v38 }
  0x39   :  { %v18587_v39 = vld [vmem:[#allocation5 + $0x31c] sm:$0xf0] }
  0x3a   :  { %v12977_v40 = vld [vmem:[#allocation5 + $0x500] sm:$0xf]  ;;  %v12722_v45 = vor.u32 %v18587_v39, %v12721_v37  ;;  %3282 = vmatpush.bf16.msra.mxu0 %v12466_v44 }
  0x3b   :  { %v18651_v41 = vld [vmem:[#allocation5 + $0x51c] sm:$0xf0] }
  0x3c   :  { %v13233_v42 = vld [vmem:[#allocation5 + $0x700] sm:$0xf]  ;;  %v12978_v46 = vor.u32 %v18651_v41, %v12977_v40  ;;  %3296 = vmatpush.bf16.msra.mxu1 %v12722_v45 }
  0x3d   :  { %v18715_v43 = vld [vmem:[#allocation5 + $0x71c] sm:$0xf0] }
  0x3e   :  { %v12433_v47 = vld [vmem:[#allocation5 + $0xc0] sm:$0xf]  ;;  %v13234_v50 = vor.u32 %v18715_v43, %v13233_v42  ;;  %3310 = vmatpush.bf16.msra.mxu2 %v12978_v46 }
  0x3f   :  { %v18515_v48 = vld [vmem:[#allocation5 + $0xdc] sm:$0xf0] }
  0x40   :  { %v12689_v49 = vld [vmem:[#allocation5 + $0x2c0] sm:$0xf]  ;;  %v12434_v56 = vor.u32 %v18515_v48, %v12433_v47  ;;  %3324 = vmatpush.bf16.msra.mxu3 %v13234_v50 }
  0x41   :  { %v18579_v51 = vld [vmem:[#allocation5 + $0x2dc] sm:$0xf0] }
  0x42   :  { %v12945_v52 = vld [vmem:[#allocation5 + $0x4c0] sm:$0xf]  ;;  %v12690_v57 = vor.u32 %v18579_v51, %v12689_v49  ;;  %3283 = vmatpush.bf16.msra.mxu0 %v12434_v56 }
  0x43   :  { %v18643_v53 = vld [vmem:[#allocation5 + $0x4dc] sm:$0xf0] }
  0x44   :  { %v13201_v54 = vld [vmem:[#allocation5 + $0x6c0] sm:$0xf]  ;;  %v12946_v58 = vor.u32 %v18643_v53, %v12945_v52  ;;  %3297 = vmatpush.bf16.msra.mxu1 %v12690_v57 }
  0x45   :  { %v18707_v55 = vld [vmem:[#allocation5 + $0x6dc] sm:$0xf0] }
  0x46   :  { %v12401_v59 = vld [vmem:[#allocation5 + $0x80] sm:$0xf]  ;;  %v13202_v62 = vor.u32 %v18707_v55, %v13201_v54  ;;  %3311 = vmatpush.bf16.msra.mxu2 %v12946_v58  ;;  %v12313_v54 = vld [vmem:[#allocation2 + $0x8] sm:$0xf] }
  0x47   :  { %v18507_v60 = vld [vmem:[#allocation5 + $0x9c] sm:$0xf0] }
  0x48   :  { %v12657_v61 = vld [vmem:[#allocation5 + $0x280] sm:$0xf]  ;;  %v12402_v4 = vor.u32 %v18507_v60, %v12401_v59  ;;  %3325 = vmatpush.bf16.msra.mxu3 %v13202_v62  ;;  %v18484_v59 = vld [vmem:[#allocation2 + $0x24] sm:$0xf0] }
  0x49   :  { %v18571_v63 = vld [vmem:[#allocation5 + $0x29c] sm:$0xf0] }
  0x4a   :  { %v12913_v0 = vld [vmem:[#allocation5 + $0x480] sm:$0xf]  ;;  %v12658_v5 = vor.u32 %v18571_v63, %v12657_v61  ;;  %3284 = vmatpush.bf16.msra.mxu0 %v12402_v4 }
  0x4b   :  { %v18635_v1 = vld [vmem:[#allocation5 + $0x49c] sm:$0xf0] }
  0x4c   :  { %v13169_v2 = vld [vmem:[#allocation5 + $0x680] sm:$0xf]  ;;  %v12914_v6 = vor.u32 %v18635_v1, %v12913_v0  ;;  %3298 = vmatpush.bf16.msra.mxu1 %v12658_v5  ;;  %v20355_v1 = vor.u32 %v18484_v59, %v12313_v54 }
  0x4d   :  { %v18699_v3 = vld [vmem:[#allocation5 + $0x69c] sm:$0xf0] }
  0x4e   :  { %v12369_v7 = vld [vmem:[#allocation5 + $0x40] sm:$0xf]  ;;  %v13170_v10 = vor.u32 %v18699_v3, %v13169_v2  ;;  %3312 = vmatpush.bf16.msra.mxu2 %v12914_v6  ;;  %v18479_v6 = vld [vmem:[#allocation2 + $0x4] sm:$0xf] }
  0x4f   :  { %v18499_v8 = vld [vmem:[#allocation5 + $0x5c] sm:$0xf0] }
  0x50   :  { %v12625_v9 = vld [vmem:[#allocation5 + $0x240] sm:$0xf]  ;;  %v12370_v16 = vor.u32 %v18499_v8, %v12369_v7  ;;  %3326 = vmatpush.bf16.msra.mxu3 %v13170_v10  ;;  %v12307_v7 = vld [vmem:[#allocation2 + $0x20] sm:$0xf0]  ;;  %v18480_v8 = vld [vmem:[#allocation2 + $0xc] sm:$0xf] }
  0x51   :  { %v18563_v11 = vld [vmem:[#allocation5 + $0x25c] sm:$0xf0]  ;;  %v20359_v10 = vor.u32 %v18479_v6, %v12307_v7 }
  0x52   :  { %v12881_v12 = vld [vmem:[#allocation5 + $0x440] sm:$0xf]  ;;  %v12626_v19 = vor.u32 %v18563_v11, %v12625_v9  ;;  %3285 = vmatpush.bf16.msra.mxu0 %v12370_v16  ;;  %v12315_v11 = vld [vmem:[#allocation2 + $0x28] sm:$0xf0] }
  0x53   :  { %v18627_v13 = vld [vmem:[#allocation5 + $0x45c] sm:$0xf0] }
  0x54   :  { %v13137_v14 = vld [vmem:[#allocation5 + $0x640] sm:$0xf]  ;;  %v12882_v20 = vor.u32 %v18627_v13, %v12881_v12  ;;  %3299 = vmatpush.bf16.msra.mxu1 %v12626_v19 }
  0x55   :  { %v18691_v15 = vld [vmem:[#allocation5 + $0x65c] sm:$0xf0] }
  0x56   :  { %v12337_v17 = vld [vmem:[#allocation5] sm:$0xf]  ;;  %v13138_v24 = vor.u32 %v18691_v15, %v13137_v14  ;;  %3313 = vmatpush.bf16.msra.mxu2 %v12882_v20 }
  0x57   :  { %v18491_v18 = vld [vmem:[#allocation5 + $0x1c] sm:$0xf0] }
  0x58   :  { %v12593_v21 = vld [vmem:[#allocation5 + $0x200] sm:$0xf]  ;;  %v12338_v31 = vor.u32 %v18491_v18, %v12337_v17  ;;  %3327 = vmatpush.bf16.msra.mxu3 %v13138_v24  ;;  %v20361_v17 = vor.u32 %v18480_v8, %v12315_v11 }
  0x59   :  { %v18555_v22 = vld [vmem:[#allocation5 + $0x21c] sm:$0xf0] }
  0x5a   :  { %v12849_v23 = vld [vmem:[#allocation5 + $0x400] sm:$0xf]  ;;  %v12594_v35 = vor.u32 %v18555_v22, %v12593_v21  ;;  %3286 = vmatpush.bf16.msra.mxu0 %v12338_v31 }
  0x5b   :  { %v18619_v25 = vld [vmem:[#allocation5 + $0x41c] sm:$0xf0] }
  0x5c   :  { %v13105_v26 = vld [vmem:[#allocation5 + $0x600] sm:$0xf]  ;;  %v12850_v36 = vor.u32 %v18619_v25, %v12849_v23  ;;  %3300 = vmatpush.bf16.msra.mxu1 %v12594_v35 }
  0x5d   :  { %v18683_v27 = vld [vmem:[#allocation5 + $0x61c] sm:$0xf0] }
  0x5e   :  { %v13585_v28 = vld [vmem:[#allocation5 + $0x9c0] sm:$0xf]  ;;  %v13106_v39 = vor.u32 %v18683_v27, %v13105_v26  ;;  %3314 = vmatpush.bf16.msra.mxu2 %v12850_v36 }
  0x5f   :  { %v18803_v29 = vld [vmem:[#allocation5 + $0x9dc] sm:$0xf0]  ;;  %3301 = vmatmul.bf16.vlgmr.msra.gmra.mxu1 %v20359_v10 }
  0x60   :  { %v13841_v30 = vld [vmem:[#allocation5 + $0xbc0] sm:$0xf]  ;;  %v13586_v40 = vor.u32 %v18803_v29, %v13585_v28  ;;  %3328 = vmatpush.bf16.msra.mxu3 %v13106_v39 }
  0x61   :  { %v18867_v32 = vld [vmem:[#allocation5 + $0xbdc] sm:$0xf0]  ;;  %3315 = vmatmul.bf16.vlgmr.msra.gmra.mxu2 %v20355_v1 }
  0x62   :  { %v14097_v33 = vld [vmem:[#allocation5 + $0xdc0] sm:$0xf]  ;;  %v13842_v43 = vor.u32 %v18867_v32, %v13841_v30  ;;  %3335 = vmatpush.bf16.msrb.mxu0 %v13586_v40 }
  0x63   :  { %v18931_v34 = vld [vmem:[#allocation5 + $0xddc] sm:$0xf0]  ;;  %3329 = vmatmul.bf16.vlgmr.msra.gmra.mxu3 %v20361_v17 }
  0x64   :  { %v14353_v37 = vld [vmem:[#allocation5 + $0xfc0] sm:$0xf]  ;;  %v14098_v44 = vor.u32 %v18931_v34, %v14097_v33  ;;  %3349 = vmatpush.bf16.msrb.mxu1 %v13842_v43 }
  0x65   :  { %v18995_v38 = vld [vmem:[#allocation5 + $0xfdc] sm:$0xf0] }
  0x66   :  { %v13553_v41 = vld [vmem:[#allocation5 + $0x980] sm:$0xf]  ;;  %v14354_v48 = vor.u32 %v18995_v38, %v14353_v37  ;;  %3363 = vmatpush.bf16.msrb.mxu2 %v14098_v44 }
  0x67   :  { %v18795_v42 = vld [vmem:[#allocation5 + $0x99c] sm:$0xf0] }
  0x68   :  { %v13809_v45 = vld [vmem:[#allocation5 + $0xb80] sm:$0xf]  ;;  %v13554_v55 = vor.u32 %v18795_v42, %v13553_v41  ;;  %3377 = vmatpush.bf16.msrb.mxu3 %v14354_v48 }
  0x69   :  { %v18859_v46 = vld [vmem:[#allocation5 + $0xb9c] sm:$0xf0] }
  0x6a   :  { %v14065_v47 = vld [vmem:[#allocation5 + $0xd80] sm:$0xf]  ;;  %v13810_v60 = vor.u32 %v18859_v46, %v13809_v45  ;;  %3336 = vmatpush.bf16.msrb.mxu0 %v13554_v55 }
  0x6b   :  { %v18923_v49 = vld [vmem:[#allocation5 + $0xd9c] sm:$0xf0] }
  0x6c   :  { %v14321_v50 = vld [vmem:[#allocation5 + $0xf80] sm:$0xf]  ;;  %v14066_v61 = vor.u32 %v18923_v49, %v14065_v47  ;;  %3350 = vmatpush.bf16.msrb.mxu1 %v13810_v60 }
  0x6d   :  { %v18987_v51 = vld [vmem:[#allocation5 + $0xf9c] sm:$0xf0] }
  0x6e   :  { %v12305_v52 = vld [vmem:[#allocation2] sm:$0xf]  ;;  %v14322_v2 = vor.u32 %v18987_v51, %v14321_v50  ;;  %3364 = vmatpush.bf16.msrb.mxu2 %v14066_v61 }
  0x6f   :  { %v18483_v53 = vld [vmem:[#allocation2 + $0x1c] sm:$0xf0] }
  0x70   :  { %v13521_v56 = vld [vmem:[#allocation5 + $0x940] sm:$0xf]  ;;  %v20353_v58 = vor.u32 %v18483_v53, %v12305_v52  ;;  %3378 = vmatpush.bf16.msrb.mxu3 %v14322_v2 }
  0x71   :  { %v18787_v57 = vld [vmem:[#allocation5 + $0x95c] sm:$0xf0] }
  0x72   :  { %v13777_v62 = vld [vmem:[#allocation5 + $0xb40] sm:$0xf]  ;;  %3287 = vmatmul.bf16.vlgmr.msra.gmra.mxu0 %v20353_v58  ;;  %v13522_v9 = vor.u32 %v18787_v57, %v13521_v56 }
  0x73   :  { %v18851_v63 = vld [vmem:[#allocation5 + $0xb5c] sm:$0xf0] }
  0x74   :  { %v14033_v0 = vld [vmem:[#allocation5 + $0xd40] sm:$0xf]  ;;  %v13778_v12 = vor.u32 %v18851_v63, %v13777_v62  ;;  %3337 = vmatpush.bf16.msrb.mxu0 %v13522_v9  ;;  %v18543_v9 = vld [vmem:[#allocation5 + $0x1c4] sm:$0xf] }
  0x75   :  { %v18915_v3 = vld [vmem:[#allocation5 + $0xd5c] sm:$0xf0] }
  0x76   :  { %v14289_v4 = vld [vmem:[#allocation5 + $0xf40] sm:$0xf]  ;;  %v14034_v13 = vor.u32 %v18915_v3, %v14033_v0  ;;  %3351 = vmatpush.bf16.msrb.mxu1 %v13778_v12  ;;  %v12563_v12 = vld [vmem:[#allocation5 + $0x1e0] sm:$0xf0] }
  0x77   :  { %v18979_v5 = vld [vmem:[#allocation5 + $0xf5c] sm:$0xf0] }
  0x78   :  { %v13489_v14 = vld [vmem:[#allocation5 + $0x900] sm:$0xf]  ;;  %v14290_v18 = vor.u32 %v18979_v5, %v14289_v4  ;;  %3365 = vmatpush.bf16.msrb.mxu2 %v14034_v13  ;;  %v18607_v13 = vld [vmem:[#allocation5 + $0x3c4] sm:$0xf] }
  0x79   :  { %v18779_v15 = vld [vmem:[#allocation5 + $0x91c] sm:$0xf0] }
  0x7a   :  { %v13745_v16 = vld [vmem:[#allocation5 + $0xb00] sm:$0xf]  ;;  %v13490_v24 = vor.u32 %v18779_v15, %v13489_v14  ;;  %3379 = vmatpush.bf16.msrb.mxu3 %v14290_v18  ;;  %v12819_v14 = vld [vmem:[#allocation5 + $0x3e0] sm:$0xf0] }
  0x7b   :  { %v18843_v19 = vld [vmem:[#allocation5 + $0xb1c] sm:$0xf0]  ;;  %v18671_v15 = vld [vmem:[#allocation5 + $0x5c4] sm:$0xf] }
  0x7c   :  { %v14001_v20 = vld [vmem:[#allocation5 + $0xd00] sm:$0xf]  ;;  %v13746_v25 = vor.u32 %v18843_v19, %v13745_v16  ;;  %3338 = vmatpush.bf16.msrb.mxu0 %v13490_v24  ;;  %v13075_v16 = vld [vmem:[#allocation5 + $0x5e0] sm:$0xf0] }
  0x7d   :  { %v18907_v21 = vld [vmem:[#allocation5 + $0xd1c] sm:$0xf0]  ;;  %v18735_v18 = vld [vmem:[#allocation5 + $0x7c4] sm:$0xf] }
  0x7e   :  { %v14257_v22 = vld [vmem:[#allocation5 + $0xf00] sm:$0xf]  ;;  %v14002_v26 = vor.u32 %v18907_v21, %v14001_v20  ;;  %3352 = vmatpush.bf16.msrb.mxu1 %v13746_v25  ;;  %v13331_v20 = vld [vmem:[#allocation5 + $0x7e0] sm:$0xf0]  ;;  %v12321_v21 = vld [vmem:[#allocation2 + $0x10] sm:$0xf] }
  0x7f   :  { %v18971_v23 = vld [vmem:[#allocation5 + $0xf1c] sm:$0xf0]  ;;  %v12329_v25 = vld [vmem:[#allocation2 + $0x18] sm:$0xf] }
  0x80   :  { %v13457_v27 = vld [vmem:[#allocation5 + $0x8c0] sm:$0xf]  ;;  %v14258_v30 = vor.u32 %v18971_v23, %v14257_v22  ;;  %3366 = vmatpush.bf16.msrb.mxu2 %v14002_v26  ;;  %v18485_v22 = vld [vmem:[#allocation2 + $0x2c] sm:$0xf0]  ;;  %v18486_v26 = vld [vmem:[#allocation2 + $0x34] sm:$0xf0] }
  0x81   :  { %v18771_v28 = vld [vmem:[#allocation5 + $0x8dc] sm:$0xf0] }
  0x82   :  { %v13713_v29 = vld [vmem:[#allocation5 + $0xac0] sm:$0xf]  ;;  %v13458_v36 = vor.u32 %v18771_v28, %v13457_v27  ;;  %3380 = vmatpush.bf16.msrb.mxu3 %v14258_v30  ;;  %v18481_v27 = vld [vmem:[#allocation2 + $0x14] sm:$0xf] }
  0x83   :  { %v18835_v31 = vld [vmem:[#allocation5 + $0xadc] sm:$0xf0]  ;;  %v12323_v30 = vld [vmem:[#allocation2 + $0x30] sm:$0xf0] }
  0x84   :  { %v13969_v32 = vld [vmem:[#allocation5 + $0xcc0] sm:$0xf]  ;;  %v13714_v37 = vor.u32 %v18835_v31, %v13713_v29  ;;  %3339 = vmatpush.bf16.msrb.mxu0 %v13458_v36  ;;  %v12566_v29 = vor.u32 %v18543_v9, %v12563_v12  ;;  %v18482_v31 = vld [vmem:[#allocation2 + $0x1c] sm:$0xf]  ;;  %v12531_v36 = vld [vmem:[#allocation5 + $0x1a0] sm:$0xf0] }
  0x85   :  { %v18899_v33 = vld [vmem:[#allocation5 + $0xcdc] sm:$0xf0]  ;;  %v13235_v9 = vld [vmem:[#allocation5 + $0x720] sm:$0xf0] }
  0x86   :  { %v14225_v34 = vld [vmem:[#allocation5 + $0xec0] sm:$0xf]  ;;  %v13970_v38 = vor.u32 %v18899_v33, %v13969_v32  ;;  %3353 = vmatpush.bf16.msrb.mxu1 %v13714_v37  ;;  %v12331_v32 = vld [vmem:[#allocation2 + $0x38] sm:$0xf0]  ;;  %v12822_v33 = vor.u32 %v18607_v13, %v12819_v14  ;;  %v18599_v37 = vld [vmem:[#allocation5 + $0x384] sm:$0xf] }
  0x87   :  { %v18963_v35 = vld [vmem:[#allocation5 + $0xedc] sm:$0xf0]  ;;  %v18511_v14 = vld [vmem:[#allocation5 + $0xc4] sm:$0xf] }
  0x88   :  { %v13425_v39 = vld [vmem:[#allocation5 + $0x880] sm:$0xf]  ;;  %v14226_v42 = vor.u32 %v18963_v35, %v14225_v34  ;;  %3367 = vmatpush.bf16.msrb.mxu2 %v13970_v38  ;;  %v13078_v34 = vor.u32 %v18671_v15, %v13075_v16  ;;  %v18535_v35 = vld [vmem:[#allocation5 + $0x184] sm:$0xf]  ;;  %v13334_v38 = vor.u32 %v18735_v18, %v13331_v20 }
  0x89   :  { %v18763_v40 = vld [vmem:[#allocation5 + $0x89c] sm:$0xf0]  ;;  %v12435_v15 = vld [vmem:[#allocation5 + $0xe0] sm:$0xf0] }
  0x8a   :  { %v13681_v41 = vld [vmem:[#allocation5 + $0xa80] sm:$0xf]  ;;  %v13426_v48 = vor.u32 %v18763_v40, %v13425_v39  ;;  %3381 = vmatpush.bf16.msrb.mxu3 %v14226_v42  ;;  %v20365_v39 = vor.u32 %v18485_v22, %v12321_v21  ;;  %v12787_v40 = vld [vmem:[#allocation5 + $0x3a0] sm:$0xf0] }
  0x8b   :  { %v18827_v43 = vld [vmem:[#allocation5 + $0xa9c] sm:$0xf0]  ;;  %v13043_v42 = vld [vmem:[#allocation5 + $0x5a0] sm:$0xf0] }
  0x8c   :  { %v13937_v44 = vld [vmem:[#allocation5 + $0xc80] sm:$0xf]  ;;  %v13682_v50 = vor.u32 %v18827_v43, %v13681_v41  ;;  %3340 = vmatpush.bf16.msrb.mxu0 %v13426_v48  ;;  %v18663_v41 = vld [vmem:[#allocation5 + $0x584] sm:$0xf]  ;;  %v20367_v43 = vor.u32 %v18486_v26, %v12329_v25  ;;  %v12534_v48 = vor.u32 %v18535_v35, %v12531_v36 }
  0x8d   :  { %v18891_v45 = vld [vmem:[#allocation5 + $0xc9c] sm:$0xf0]  ;;  %v18575_v16 = vld [vmem:[#allocation5 + $0x2c4] sm:$0xf] }
  0x8e   :  { %v14193_v46 = vld [vmem:[#allocation5 + $0xe80] sm:$0xf]  ;;  %v13938_v51 = vor.u32 %v18891_v45, %v13937_v44  ;;  %3354 = vmatpush.bf16.msrb.mxu1 %v13682_v50  ;;  %21255 = vst [vmem:[#allocation20_spill] sm:$0xff] %v20367_v43  ;;  %v20369_v44 = vor.u32 %v18481_v27, %v12323_v30  ;;  %v18727_v45 = vld [vmem:[#allocation5 + $0x784] sm:$0xf]  ;;  %v13046_v50 = vor.u32 %v18663_v41, %v13043_v42 }
  0x8f   :  { %v18955_v47 = vld [vmem:[#allocation5 + $0xe9c] sm:$0xf0]  ;;  %v18639_v20 = vld [vmem:[#allocation5 + $0x4c4] sm:$0xf] }
  0x90   :  { %v13393_v49 = vld [vmem:[#allocation5 + $0x840] sm:$0xf]  ;;  %v14194_v55 = vor.u32 %v18955_v47, %v14193_v46  ;;  %3368 = vmatpush.bf16.msrb.mxu2 %v13938_v51  ;;  %21256 = vst [vmem:[#allocation21_spill] sm:$0xff] %v20369_v44  ;;  %v13299_v46 = vld [vmem:[#allocation5 + $0x7a0] sm:$0xf0]  ;;  %v20371_v47 = vor.u32 %v18482_v31, %v12331_v32 }
  0x91   :  { %v18755_v52 = vld [vmem:[#allocation5 + $0x85c] sm:$0xf0]  ;;  %v18527_v51 = vld [vmem:[#allocation5 + $0x144] sm:$0xf] }
  0x92   :  { %v13649_v53 = vld [vmem:[#allocation5 + $0xa40] sm:$0xf]  ;;  %v13394_v63 = vor.u32 %v18755_v52, %v13393_v49  ;;  %3382 = vmatpush.bf16.msrb.mxu3 %v14194_v55  ;;  %21257 = vst [vmem:[#allocation22_spill] sm:$0xff] %v20371_v47  ;;  %v12790_v49 = vor.u32 %v18599_v37, %v12787_v40  ;;  %v12499_v52 = vld [vmem:[#allocation5 + $0x160] sm:$0xf0] }
  0x93   :  { %v18819_v54 = vld [vmem:[#allocation5 + $0xa5c] sm:$0xf0]  ;;  %v12755_v55 = vld [vmem:[#allocation5 + $0x360] sm:$0xf0] }
  0x94   :  { %v13905_v56 = vld [vmem:[#allocation5 + $0xc40] sm:$0xf]  ;;  %v13650_v5 = vor.u32 %v18819_v54, %v13649_v53  ;;  %3341 = vmatpush.bf16.msrb.mxu0 %v13394_v63  ;;  %v18591_v53 = vld [vmem:[#allocation5 + $0x344] sm:$0xf]  ;;  %v13302_v54 = vor.u32 %v18727_v45, %v13299_v46 }
  0x95   :  { %v18883_v57 = vld [vmem:[#allocation5 + $0xc5c] sm:$0xf0]  ;;  %v12947_v21 = vld [vmem:[#allocation5 + $0x4e0] sm:$0xf0] }
  0x96   :  { %v14161_v59 = vld [vmem:[#allocation5 + $0xe40] sm:$0xf]  ;;  %v13906_v6 = vor.u32 %v18883_v57, %v13905_v56  ;;  %3355 = vmatpush.bf16.msrb.mxu1 %v13650_v5  ;;  %v18655_v56 = vld [vmem:[#allocation5 + $0x544] sm:$0xf]  ;;  %v12950_v26 = vor.u32 %v18639_v20, %v12947_v21 }
  0x97   :  { %v18947_v60 = vld [vmem:[#allocation5 + $0xe5c] sm:$0xf0]  ;;  %v13011_v57 = vld [vmem:[#allocation5 + $0x560] sm:$0xf0] }
  0x98   :  { %v13361_v61 = vld [vmem:[#allocation5 + $0x800] sm:$0xf]  ;;  %v14162_v11 = vor.u32 %v18947_v60, %v14161_v59  ;;  %3369 = vmatpush.bf16.msrb.mxu2 %v13906_v6  ;;  %v18719_v59 = vld [vmem:[#allocation5 + $0x744] sm:$0xf]  ;;  %v13014_v63 = vor.u32 %v18655_v56, %v13011_v57 }
  0x99   :  { %v18747_v62 = vld [vmem:[#allocation5 + $0x81c] sm:$0xf0]  ;;  %v13267_v60 = vld [vmem:[#allocation5 + $0x760] sm:$0xf0] }
  0x9a   :  { %v13617_v0 = vld [vmem:[#allocation5 + $0xa00] sm:$0xf]  ;;  %v13362_v19 = vor.u32 %v18747_v62, %v13361_v61  ;;  %3383 = vmatpush.bf16.msrb.mxu3 %v14162_v11  ;;  %v12502_v61 = vor.u32 %v18527_v51, %v12499_v52  ;;  %v12758_v62 = vor.u32 %v18591_v53, %v12755_v55  ;;  %v12723_v5 = vld [vmem:[#allocation5 + $0x320] sm:$0xf0] }
  0x9b   :  { %v18811_v2 = vld [vmem:[#allocation5 + $0xa1c] sm:$0xf0]  ;;  %v18647_v6 = vld [vmem:[#allocation5 + $0x504] sm:$0xf] }
  0x9c   :  { %v13873_v3 = vld [vmem:[#allocation5 + $0xc00] sm:$0xf]  ;;  %v13618_v23 = vor.u32 %v18811_v2, %v13617_v0  ;;  %3342 = vmatpush.bf16.msrb.mxu0 %v13362_v19  ;;  %v18519_v0 = vld [vmem:[#allocation5 + $0x104] sm:$0xf] }
  0x9d   :  { %v18875_v4 = vld [vmem:[#allocation5 + $0xc1c] sm:$0xf0]  ;;  %v12467_v2 = vld [vmem:[#allocation5 + $0x120] sm:$0xf0] }
  0x9e   :  { %v14129_v7 = vld [vmem:[#allocation5 + $0xe00] sm:$0xf]  ;;  %v13874_v24 = vor.u32 %v18875_v4, %v13873_v3  ;;  %3356 = vmatpush.bf16.msrb.mxu1 %v13618_v23  ;;  %v18583_v3 = vld [vmem:[#allocation5 + $0x304] sm:$0xf]  ;;  %v13270_v4 = vor.u32 %v18719_v59, %v13267_v60  ;;  %v12470_v11 = vor.u32 %v18519_v0, %v12467_v2 }
  0x9f   :  { %v18939_v8 = vld [vmem:[#allocation5 + $0xe1c] sm:$0xf0]  ;;  %3343 = vmatmul.bf16.vlgmr.msrb.gmra.mxu0 %v20365_v39  ;;  %v12726_v12 = vor.u32 %v18583_v3, %v12723_v5  ;;  %v12691_v19 = vld [vmem:[#allocation5 + $0x2e0] sm:$0xf0] }
  0xa0   :  { %v14130_v28 = vor.u32 %v18939_v8, %v14129_v7  ;;  %3370 = vmatpush.bf16.msrb.mxu2 %v13874_v24  ;;  %3391 = vmatpush.bf16.msra.mxu0 %v12566_v29  ;;  %v12979_v7 = vld [vmem:[#allocation5 + $0x520] sm:$0xf0]  ;;  %v12438_v24 = vor.u32 %v18511_v14, %v12435_v15  ;;  %v12694_v25 = vor.u32 %v18575_v16, %v12691_v19 }
  0xa1   :  { %3357 = vmatmul.bf16.vlgmr.msrb.gmra.mxu1 %v20369_v44  ;;  %v18711_v8 = vld [vmem:[#allocation5 + $0x704] sm:$0xf]  ;;  %v12982_v13 = vor.u32 %v18647_v6, %v12979_v7 }
  0xa2   :  { %3384 = vmatpush.bf16.msrb.mxu3 %v14130_v28  ;;  %3405 = vmatpush.bf16.msra.mxu1 %v12822_v33  ;;  %v13238_v18 = vor.u32 %v18711_v8, %v13235_v9  ;;  %v18703_v22 = vld [vmem:[#allocation5 + $0x6c4] sm:$0xf] }
  0xa3   :  { %3371 = vmatmul.bf16.vlgmr.msrb.gmra.mxu2 %v20367_v43  ;;  %v13203_v23 = vld [vmem:[#allocation5 + $0x6e0] sm:$0xf0] }
  0xa4   :  { %3419 = vmatpush.bf16.msra.mxu2 %v13078_v34  ;;  %3392 = vmatpush.bf16.msra.mxu0 %v12534_v48  ;;  %v18503_v27 = vld [vmem:[#allocation5 + $0x84] sm:$0xf]  ;;  %v13206_v30 = vor.u32 %v18703_v22, %v13203_v23 }
  0xa5   :  { %3385 = vmatmul.bf16.vlgmr.msrb.gmra.mxu3 %v20371_v47  ;;  %v12403_v28 = vld [vmem:[#allocation5 + $0xa0] sm:$0xf0] }
  0xa6   :  { %3433 = vmatpush.bf16.msra.mxu3 %v13334_v38  ;;  %3406 = vmatpush.bf16.msra.mxu1 %v12790_v49  ;;  %v18567_v29 = vld [vmem:[#allocation5 + $0x284] sm:$0xf]  ;;  %v12406_v36 = vor.u32 %v18503_v27, %v12403_v28 }
  0xa7   :  { %v12659_v31 = vld [vmem:[#allocation5 + $0x2a0] sm:$0xf0] }
  0xa8   :  { %3420 = vmatpush.bf16.msra.mxu2 %v13046_v50  ;;  %3393 = vmatpush.bf16.msra.mxu0 %v12502_v61  ;;  %v18631_v32 = vld [vmem:[#allocation5 + $0x484] sm:$0xf]  ;;  %v12662_v37 = vor.u32 %v18567_v29, %v12659_v31 }
  0xa9   :  { %v12915_v33 = vld [vmem:[#allocation5 + $0x4a0] sm:$0xf0] }
  0xaa   :  { %3434 = vmatpush.bf16.msra.mxu3 %v13302_v54  ;;  %3407 = vmatpush.bf16.msra.mxu1 %v12758_v62  ;;  %v18695_v34 = vld [vmem:[#allocation5 + $0x684] sm:$0xf]  ;;  %v12918_v38 = vor.u32 %v18631_v32, %v12915_v33 }
  0xab   :  { %v13171_v35 = vld [vmem:[#allocation5 + $0x6a0] sm:$0xf0] }
  0xac   :  { %3421 = vmatpush.bf16.msra.mxu2 %v13014_v63  ;;  %3394 = vmatpush.bf16.msra.mxu0 %v12470_v11  ;;  %v18495_v40 = vld [vmem:[#allocation5 + $0x44] sm:$0xf]  ;;  %v13174_v45 = vor.u32 %v18695_v34, %v13171_v35 }
  0xad   :  { %v12371_v41 = vld [vmem:[#allocation5 + $0x60] sm:$0xf0] }
  0xae   :  { %3435 = vmatpush.bf16.msra.mxu3 %v13270_v4  ;;  %3408 = vmatpush.bf16.msra.mxu1 %v12726_v12  ;;  %v18559_v42 = vld [vmem:[#allocation5 + $0x244] sm:$0xf]  ;;  %v12374_v52 = vor.u32 %v18495_v40, %v12371_v41 }
  0xaf   :  { %v12627_v46 = vld [vmem:[#allocation5 + $0x260] sm:$0xf0] }
  0xb0   :  { %3422 = vmatpush.bf16.msra.mxu2 %v12982_v13  ;;  %3395 = vmatpush.bf16.msra.mxu0 %v12438_v24  ;;  %v18623_v48 = vld [vmem:[#allocation5 + $0x444] sm:$0xf]  ;;  %v12630_v55 = vor.u32 %v18559_v42, %v12627_v46 }
  0xb1   :  { %v12883_v49 = vld [vmem:[#allocation5 + $0x460] sm:$0xf0] }
  0xb2   :  { %3436 = vmatpush.bf16.msra.mxu3 %v13238_v18  ;;  %3409 = vmatpush.bf16.msra.mxu1 %v12694_v25  ;;  %v18687_v50 = vld [vmem:[#allocation5 + $0x644] sm:$0xf]  ;;  %v12886_v56 = vor.u32 %v18623_v48, %v12883_v49 }
  0xb3   :  { %v13139_v51 = vld [vmem:[#allocation5 + $0x660] sm:$0xf0] }
  0xb4   :  { %3423 = vmatpush.bf16.msra.mxu2 %v12950_v26  ;;  %3396 = vmatpush.bf16.msra.mxu0 %v12406_v36  ;;  %v18487_v53 = vld [vmem:[#allocation5 + $0x4] sm:$0xf]  ;;  %v13142_v61 = vor.u32 %v18687_v50, %v13139_v51 }
  0xb5   :  { %v12339_v54 = vld [vmem:[#allocation5 + $0x20] sm:$0xf0] }
  0xb6   :  { %3437 = vmatpush.bf16.msra.mxu3 %v13206_v30  ;;  %3410 = vmatpush.bf16.msra.mxu1 %v12662_v37  ;;  %v18551_v57 = vld [vmem:[#allocation5 + $0x204] sm:$0xf]  ;;  %v12342_v5 = vor.u32 %v18487_v53, %v12339_v54 }
  0xb7   :  { %v12595_v59 = vld [vmem:[#allocation5 + $0x220] sm:$0xf0] }
  0xb8   :  { %3424 = vmatpush.bf16.msra.mxu2 %v12918_v38  ;;  %v18615_v60 = vld [vmem:[#allocation5 + $0x404] sm:$0xf]  ;;  %3397 = vmatpush.bf16.msra.mxu0 %v12374_v52  ;;  %v12598_v9 = vor.u32 %v18551_v57, %v12595_v59 }
  0xb9   :  { %v12851_v62 = vld [vmem:[#allocation5 + $0x420] sm:$0xf0] }
  0xba   :  { %3438 = vmatpush.bf16.msra.mxu3 %v13174_v45  ;;  %v18679_v63 = vld [vmem:[#allocation5 + $0x604] sm:$0xf]  ;;  %3411 = vmatpush.bf16.msra.mxu1 %v12630_v55  ;;  %v12854_v11 = vor.u32 %v18615_v60, %v12851_v62 }
  0xbb   :  { %v13107_v0 = vld [vmem:[#allocation5 + $0x620] sm:$0xf0] }
  0xbc   :  { %v18799_v2 = vld [vmem:[#allocation5 + $0x9c4] sm:$0xf]  ;;  %3425 = vmatpush.bf16.msra.mxu2 %v12886_v56  ;;  %v13110_v14 = vor.u32 %v18679_v63, %v13107_v0  ;;  %3398 = vmatpush.bf16.msra.mxu0 %v12342_v5 }
  0xbd   :  { %v13587_v3 = vld [vmem:[#allocation5 + $0x9e0] sm:$0xf0] }
  0xbe   :  { %v18863_v4 = vld [vmem:[#allocation5 + $0xbc4] sm:$0xf]  ;;  %3439 = vmatpush.bf16.msra.mxu3 %v13142_v61  ;;  %v13590_v15 = vor.u32 %v18799_v2, %v13587_v3  ;;  %3412 = vmatpush.bf16.msra.mxu1 %v12598_v9 }
  0xbf   :  { %v13843_v6 = vld [vmem:[#allocation5 + $0xbe0] sm:$0xf0]  ;;  %3399 = vmatmul.bf16.vlgmr.msra.gmra.mxu0 %v20353_v58 }
  0xc0   :  { %v18927_v7 = vld [vmem:[#allocation5 + $0xdc4] sm:$0xf]  ;;  %v13846_v16 = vor.u32 %v18863_v4, %v13843_v6  ;;  %3426 = vmatpush.bf16.msra.mxu2 %v12854_v11  ;;  %3447 = vmatpush.bf16.msrb.mxu0 %v13590_v15 }
  0xc1   :  { %v14099_v8 = vld [vmem:[#allocation5 + $0xde0] sm:$0xf0]  ;;  %3413 = vmatmul.bf16.vlgmr.msra.gmra.mxu1 %v20359_v10 }
  0xc2   :  { %v18991_v12 = vld [vmem:[#allocation5 + $0xfc4] sm:$0xf]  ;;  %v14102_v18 = vor.u32 %v18927_v7, %v14099_v8  ;;  %3440 = vmatpush.bf16.msra.mxu3 %v13110_v14  ;;  %3461 = vmatpush.bf16.msrb.mxu1 %v13846_v16 }
  0xc3   :  { %v14355_v13 = vld [vmem:[#allocation5 + $0xfe0] sm:$0xf0]  ;;  %3427 = vmatmul.bf16.vlgmr.msra.gmra.mxu2 %v20355_v1 }
  0xc4   :  { %v18791_v19 = vld [vmem:[#allocation5 + $0x984] sm:$0xf]  ;;  %v14358_v22 = vor.u32 %v18991_v12, %v14355_v13  ;;  %3475 = vmatpush.bf16.msrb.mxu2 %v14102_v18 }
  0xc5   :  { %v13555_v20 = vld [vmem:[#allocation5 + $0x9a0] sm:$0xf0]  ;;  %3441 = vmatmul.bf16.vlgmr.msra.gmra.mxu3 %v20361_v17 }
  0xc6   :  { %v18855_v21 = vld [vmem:[#allocation5 + $0xb84] sm:$0xf]  ;;  %v13558_v28 = vor.u32 %v18791_v19, %v13555_v20  ;;  %3489 = vmatpush.bf16.msrb.mxu3 %v14358_v22 }
  0xc7   :  { %v13811_v23 = vld [vmem:[#allocation5 + $0xba0] sm:$0xf0] }
  0xc8   :  { %v18919_v24 = vld [vmem:[#allocation5 + $0xd84] sm:$0xf]  ;;  %v13814_v29 = vor.u32 %v18855_v21, %v13811_v23  ;;  %3448 = vmatpush.bf16.msrb.mxu0 %v13558_v28 }
  0xc9   :  { %v14067_v25 = vld [vmem:[#allocation5 + $0xda0] sm:$0xf0] }
  0xca   :  { %v18983_v26 = vld [vmem:[#allocation5 + $0xf84] sm:$0xf]  ;;  %v14070_v30 = vor.u32 %v18919_v24, %v14067_v25  ;;  %3462 = vmatpush.bf16.msrb.mxu1 %v13814_v29 }
  0xcb   :  { %v14323_v27 = vld [vmem:[#allocation5 + $0xfa0] sm:$0xf0] }
  0xcc   :  { %v18783_v31 = vld [vmem:[#allocation5 + $0x944] sm:$0xf]  ;;  %v14326_v34 = vor.u32 %v18983_v26, %v14323_v27  ;;  %3476 = vmatpush.bf16.msrb.mxu2 %v14070_v30 }
  0xcd   :  { %v13523_v32 = vld [vmem:[#allocation5 + $0x960] sm:$0xf0] }
  0xce   :  { %v18847_v33 = vld [vmem:[#allocation5 + $0xb44] sm:$0xf]  ;;  %v13526_v41 = vor.u32 %v18783_v31, %v13523_v32  ;;  %3490 = vmatpush.bf16.msrb.mxu3 %v14326_v34 }
  0xcf   :  { %v13779_v35 = vld [vmem:[#allocation5 + $0xb60] sm:$0xf0] }
  0xd0   :  { %v18911_v36 = vld [vmem:[#allocation5 + $0xd44] sm:$0xf]  ;;  %v13782_v42 = vor.u32 %v18847_v33, %v13779_v35  ;;  %3449 = vmatpush.bf16.msrb.mxu0 %v13526_v41 }
  0xd1   :  { %v14035_v37 = vld [vmem:[#allocation5 + $0xd60] sm:$0xf0] }
  0xd2   :  { %v18975_v38 = vld [vmem:[#allocation5 + $0xf44] sm:$0xf]  ;;  %v14038_v45 = vor.u32 %v18911_v36, %v14035_v37  ;;  %3463 = vmatpush.bf16.msrb.mxu1 %v13782_v42 }
  0xd3   :  { %v14291_v40 = vld [vmem:[#allocation5 + $0xf60] sm:$0xf0] }
  0xd4   :  { %v18775_v46 = vld [vmem:[#allocation5 + $0x904] sm:$0xf]  ;;  %v14294_v50 = vor.u32 %v18975_v38, %v14291_v40  ;;  %3477 = vmatpush.bf16.msrb.mxu2 %v14038_v45 }
  0xd5   :  { %v13491_v48 = vld [vmem:[#allocation5 + $0x920] sm:$0xf0] }
  0xd6   :  { %v18839_v49 = vld [vmem:[#allocation5 + $0xb04] sm:$0xf]  ;;  %v13494_v56 = vor.u32 %v18775_v46, %v13491_v48  ;;  %3491 = vmatpush.bf16.msrb.mxu3 %v14294_v50  ;;  %v12569_v48 = vld [vmem:[#allocation5 + $0x1c8] sm:$0xf] }
  0xd7   :  { %v13747_v51 = vld [vmem:[#allocation5 + $0xb20] sm:$0xf0]  ;;  %v12825_v50 = vld [vmem:[#allocation5 + $0x3c8] sm:$0xf] }
  0xd8   :  { %v18903_v52 = vld [vmem:[#allocation5 + $0xd04] sm:$0xf]  ;;  %v13750_v57 = vor.u32 %v18839_v49, %v13747_v51  ;;  %3450 = vmatpush.bf16.msrb.mxu0 %v13494_v56  ;;  %v18548_v49 = vld [vmem:[#allocation5 + $0x1e4] sm:$0xf0] }
  0xd9   :  { %v14003_v53 = vld [vmem:[#allocation5 + $0xd20] sm:$0xf0] }
  0xda   :  { %v18967_v54 = vld [vmem:[#allocation5 + $0xf04] sm:$0xf]  ;;  %v14006_v59 = vor.u32 %v18903_v52, %v14003_v53  ;;  %3464 = vmatpush.bf16.msrb.mxu1 %v13750_v57  ;;  %v18612_v52 = vld [vmem:[#allocation5 + $0x3e4] sm:$0xf0] }
  0xdb   :  { %v14259_v55 = vld [vmem:[#allocation5 + $0xf20] sm:$0xf0]  ;;  %v13081_v53 = vld [vmem:[#allocation5 + $0x5c8] sm:$0xf] }
  0xdc   :  { %v18767_v60 = vld [vmem:[#allocation5 + $0x8c4] sm:$0xf]  ;;  %v14262_v63 = vor.u32 %v18967_v54, %v14259_v55  ;;  %3478 = vmatpush.bf16.msrb.mxu2 %v14006_v59  ;;  %v18676_v54 = vld [vmem:[#allocation5 + $0x5e4] sm:$0xf0] }
  0xdd   :  { %v13459_v61 = vld [vmem:[#allocation5 + $0x8e0] sm:$0xf0]  ;;  %v13337_v57 = vld [vmem:[#allocation5 + $0x7c8] sm:$0xf] }
  0xde   :  { %v18831_v62 = vld [vmem:[#allocation5 + $0xac4] sm:$0xf]  ;;  %v13462_v6 = vor.u32 %v18767_v60, %v13459_v61  ;;  %3492 = vmatpush.bf16.msrb.mxu3 %v14262_v63  ;;  %v18740_v59 = vld [vmem:[#allocation5 + $0x7e4] sm:$0xf0]  ;;  %v12570_v61 = vor.u32 %v18548_v49, %v12569_v48  ;;  %v13082_v63 = vor.u32 %v18676_v54, %v13081_v53 }
  0xdf   :  { %v13715_v0 = vld [vmem:[#allocation5 + $0xae0] sm:$0xf0]  ;;  %v12953_v48 = vld [vmem:[#allocation5 + $0x4c8] sm:$0xf] }
  0xe0   :  { %v18895_v2 = vld [vmem:[#allocation5 + $0xcc4] sm:$0xf]  ;;  %v13718_v7 = vor.u32 %v18831_v62, %v13715_v0  ;;  %3451 = vmatpush.bf16.msrb.mxu0 %v13462_v6  ;;  %v12826_v62 = vor.u32 %v18612_v52, %v12825_v50  ;;  %v12537_v0 = vld [vmem:[#allocation5 + $0x188] sm:$0xf] }
  0xe1   :  { %v13971_v3 = vld [vmem:[#allocation5 + $0xce0] sm:$0xf0]  ;;  %v13049_v6 = vld [vmem:[#allocation5 + $0x588] sm:$0xf] }
  0xe2   :  { %v18959_v4 = vld [vmem:[#allocation5 + $0xec4] sm:$0xf]  ;;  %v13974_v8 = vor.u32 %v18895_v2, %v13971_v3  ;;  %3465 = vmatpush.bf16.msrb.mxu1 %v13718_v7  ;;  %v18540_v2 = vld [vmem:[#allocation5 + $0x1a4] sm:$0xf0] }
  0xe3   :  { %v14227_v5 = vld [vmem:[#allocation5 + $0xee0] sm:$0xf0]  ;;  %v12793_v3 = vld [vmem:[#allocation5 + $0x388] sm:$0xf] }
  0xe4   :  { %v18759_v9 = vld [vmem:[#allocation5 + $0x884] sm:$0xf]  ;;  %v14230_v13 = vor.u32 %v18959_v4, %v14227_v5  ;;  %3479 = vmatpush.bf16.msrb.mxu2 %v13974_v8  ;;  %v13338_v4 = vor.u32 %v18740_v59, %v13337_v57  ;;  %v18604_v5 = vld [vmem:[#allocation5 + $0x3a4] sm:$0xf0] }
  0xe5   :  { %v13427_v11 = vld [vmem:[#allocation5 + $0x8a0] sm:$0xf0]  ;;  %v18668_v7 = vld [vmem:[#allocation5 + $0x5a4] sm:$0xf0] }
  0xe6   :  { %v18823_v12 = vld [vmem:[#allocation5 + $0xa84] sm:$0xf]  ;;  %v13430_v20 = vor.u32 %v18759_v9, %v13427_v11  ;;  %3493 = vmatpush.bf16.msrb.mxu3 %v14230_v13  ;;  %v13305_v8 = vld [vmem:[#allocation5 + $0x788] sm:$0xf]  ;;  %v12538_v11 = vor.u32 %v18540_v2, %v12537_v0  ;;  %v13050_v13 = vor.u32 %v18668_v7, %v13049_v6 }
  0xe7   :  { %v13683_v14 = vld [vmem:[#allocation5 + $0xaa0] sm:$0xf0]  ;;  %v18732_v9 = vld [vmem:[#allocation5 + $0x7a4] sm:$0xf0] }
  0xe8   :  { %v18887_v15 = vld [vmem:[#allocation5 + $0xc84] sm:$0xf]  ;;  %v13686_v21 = vor.u32 %v18823_v12, %v13683_v14  ;;  %3452 = vmatpush.bf16.msrb.mxu0 %v13430_v20  ;;  %v12794_v12 = vor.u32 %v18604_v5, %v12793_v3  ;;  %v12505_v14 = vld [vmem:[#allocation5 + $0x148] sm:$0xf] }
  0xe9   :  { %v13939_v16 = vld [vmem:[#allocation5 + $0xca0] sm:$0xf0]  ;;  %v13017_v20 = vld [vmem:[#allocation5 + $0x548] sm:$0xf] }
  0xea   :  { %v18951_v18 = vld [vmem:[#allocation5 + $0xe84] sm:$0xf]  ;;  %v13942_v22 = vor.u32 %v18887_v15, %v13939_v16  ;;  %3466 = vmatpush.bf16.msrb.mxu1 %v13686_v21  ;;  %v18532_v15 = vld [vmem:[#allocation5 + $0x164] sm:$0xf0] }
  0xeb   :  { %v14195_v19 = vld [vmem:[#allocation5 + $0xea0] sm:$0xf0]  ;;  %v12761_v16 = vld [vmem:[#allocation5 + $0x348] sm:$0xf] }
  0xec   :  { %v18751_v23 = vld [vmem:[#allocation5 + $0x844] sm:$0xf]  ;;  %v14198_v26 = vor.u32 %v18951_v18, %v14195_v19  ;;  %3480 = vmatpush.bf16.msrb.mxu2 %v13942_v22  ;;  %v13306_v18 = vor.u32 %v18732_v9, %v13305_v8  ;;  %v18596_v19 = vld [vmem:[#allocation5 + $0x364] sm:$0xf0] }
  0xed   :  { %v13395_v24 = vld [vmem:[#allocation5 + $0x860] sm:$0xf0]  ;;  %v18660_v21 = vld [vmem:[#allocation5 + $0x564] sm:$0xf0] }
  0xee   :  { %v18815_v25 = vld [vmem:[#allocation5 + $0xa44] sm:$0xf]  ;;  %v13398_v32 = vor.u32 %v18751_v23, %v13395_v24  ;;  %3494 = vmatpush.bf16.msrb.mxu3 %v14198_v26  ;;  %v13273_v22 = vld [vmem:[#allocation5 + $0x748] sm:$0xf]  ;;  %v12506_v24 = vor.u32 %v18532_v15, %v12505_v14  ;;  %v13018_v26 = vor.u32 %v18660_v21, %v13017_v20 }
  0xef   :  { %v13651_v27 = vld [vmem:[#allocation5 + $0xa60] sm:$0xf0]  ;;  %v18724_v23 = vld [vmem:[#allocation5 + $0x764] sm:$0xf0] }
  0xf0   :  { %v18879_v28 = vld [vmem:[#allocation5 + $0xc44] sm:$0xf]  ;;  %v13654_v35 = vor.u32 %v18815_v25, %v13651_v27  ;;  %3453 = vmatpush.bf16.msrb.mxu0 %v13398_v32  ;;  %v12762_v25 = vor.u32 %v18596_v19, %v12761_v16  ;;  %v12473_v27 = vld [vmem:[#allocation5 + $0x108] sm:$0xf] }
  0xf1   :  { %v13907_v29 = vld [vmem:[#allocation5 + $0xc60] sm:$0xf0]  ;;  %v12985_v32 = vld [vmem:[#allocation5 + $0x508] sm:$0xf] }
  0xf2   :  { %v18943_v30 = vld [vmem:[#allocation5 + $0xe44] sm:$0xf]  ;;  %v13910_v36 = vor.u32 %v18879_v28, %v13907_v29  ;;  %3467 = vmatpush.bf16.msrb.mxu1 %v13654_v35  ;;  %v18524_v28 = vld [vmem:[#allocation5 + $0x124] sm:$0xf0] }
  0xf3   :  { %v14163_v31 = vld [vmem:[#allocation5 + $0xe60] sm:$0xf0]  ;;  %v12729_v29 = vld [vmem:[#allocation5 + $0x308] sm:$0xf] }
  0xf4   :  { %v18743_v33 = vld [vmem:[#allocation5 + $0x804] sm:$0xf]  ;;  %v14166_v41 = vor.u32 %v18943_v30, %v14163_v31  ;;  %3481 = vmatpush.bf16.msrb.mxu2 %v13910_v36  ;;  %v13274_v30 = vor.u32 %v18724_v23, %v13273_v22  ;;  %v18588_v31 = vld [vmem:[#allocation5 + $0x324] sm:$0xf0]  ;;  %v12474_v36 = vor.u32 %v18524_v28, %v12473_v27 }
  0xf5   :  { %v13363_v34 = vld [vmem:[#allocation5 + $0x820] sm:$0xf0]  ;;  %v18716_v35 = vld [vmem:[#allocation5 + $0x724] sm:$0xf0] }
  0xf6   :  { %v18807_v37 = vld [vmem:[#allocation5 + $0xa04] sm:$0xf]  ;;  %v13366_v51 = vor.u32 %v18743_v33, %v13363_v34  ;;  %3495 = vmatpush.bf16.msrb.mxu3 %v14166_v41  ;;  %v18652_v33 = vld [vmem:[#allocation5 + $0x524] sm:$0xf0] }
  0xf7   :  { %v13619_v38 = vld [vmem:[#allocation5 + $0xa20] sm:$0xf0]  ;;  %v13241_v34 = vld [vmem:[#allocation5 + $0x708] sm:$0xf] }
  0xf8   :  { %v18871_v40 = vld [vmem:[#allocation5 + $0xc04] sm:$0xf]  ;;  %v13622_v55 = vor.u32 %v18807_v37, %v13619_v38  ;;  %3454 = vmatpush.bf16.msrb.mxu0 %v13366_v51  ;;  %v12730_v37 = vor.u32 %v18588_v31, %v12729_v29  ;;  %v12986_v38 = vor.u32 %v18652_v33, %v12985_v32  ;;  %v18516_v41 = vld [vmem:[#allocation5 + $0xe4] sm:$0xf0] }
  0xf9   :  { %v13875_v42 = vld [vmem:[#allocation5 + $0xc20] sm:$0xf0]  ;;  %v18644_v49 = vld [vmem:[#allocation5 + $0x4e4] sm:$0xf0] }
  0xfa   :  { %v18935_v45 = vld [vmem:[#allocation5 + $0xe04] sm:$0xf]  ;;  %v13878_v56 = vor.u32 %v18871_v40, %v13875_v42  ;;  %3468 = vmatpush.bf16.msrb.mxu1 %v13622_v55  ;;  %v12441_v40 = vld [vmem:[#allocation5 + $0xc8] sm:$0xf]  ;;  %v12954_v54 = vor.u32 %v18644_v49, %v12953_v48 }
  0xfb   :  { %v14131_v46 = vld [vmem:[#allocation5 + $0xe20] sm:$0xf0]  ;;  %3455 = vmatmul.bf16.vlgmr.msrb.gmra.mxu0 %v20365_v39  ;;  %v12697_v42 = vld [vmem:[#allocation5 + $0x2c8] sm:$0xf]  ;;  %v12442_v52 = vor.u32 %v18516_v41, %v12441_v40 }
  0xfc   :  { %v14134_v60 = vor.u32 %v18935_v45, %v14131_v46  ;;  %3482 = vmatpush.bf16.msrb.mxu2 %v13878_v56  ;;  %3503 = vmatpush.bf16.msra.mxu0 %v12570_v61  ;;  %v13242_v45 = vor.u32 %v18716_v35, %v13241_v34  ;;  %v18580_v46 = vld [vmem:[#allocation5 + $0x2e4] sm:$0xf0]  ;;  %v650_v31 = vld [vmem:[#allocation7] sm:$0xff] }
  0xfd   :  { %3469 = vmatmul.bf16.vlgmr.msrb.gmra.mxu1 %v20369_v44  ;;  %v13209_v50 = vld [vmem:[#allocation5 + $0x6c8] sm:$0xf]  ;;  %v12698_v53 = vor.u32 %v18580_v46, %v12697_v42 }
  0xfe   :  { %3496 = vmatpush.bf16.msrb.mxu3 %v14134_v60  ;;  %3517 = vmatpush.bf16.msra.mxu1 %v12826_v62  ;;  %v18708_v51 = vld [vmem:[#allocation5 + $0x6e4] sm:$0xf0] }
  0xff   :  { %3483 = vmatmul.bf16.vlgmr.msrb.gmra.mxu2 %v20367_v43  ;;  %v12409_v55 = vld [vmem:[#allocation5 + $0x88] sm:$0xf]  ;;  %v13210_v59 = vor.u32 %v18708_v51, %v13209_v50 }
 0x100   :  { %3531 = vmatpush.bf16.msra.mxu2 %v13082_v63  ;;  %3504 = vmatpush.bf16.msra.mxu0 %v12538_v11  ;;  %v18508_v56 = vld [vmem:[#allocation5 + $0xa4] sm:$0xf0] }
 0x101   :  { %3497 = vmatmul.bf16.vlgmr.msrb.gmra.mxu3 %v20371_v47  ;;  %v12665_v57 = vld [vmem:[#allocation5 + $0x288] sm:$0xf]  ;;  %v12410_v2 = vor.u32 %v18508_v56, %v12409_v55 }
 0x102   :  { %3545 = vmatpush.bf16.msra.mxu3 %v13338_v4  ;;  %3518 = vmatpush.bf16.msra.mxu1 %v12794_v12  ;;  %v18572_v60 = vld [vmem:[#allocation5 + $0x2a4] sm:$0xf0] }
 0x103   :  { %v12921_v61 = vld [vmem:[#allocation5 + $0x488] sm:$0xf]  ;;  %v12666_v3 = vor.u32 %v18572_v60, %v12665_v57 }
 0x104   :  { %3532 = vmatpush.bf16.msra.mxu2 %v13050_v13  ;;  %3505 = vmatpush.bf16.msra.mxu0 %v12506_v24  ;;  %v18636_v62 = vld [vmem:[#allocation5 + $0x4a4] sm:$0xf0] }
 0x105   :  { %v13177_v63 = vld [vmem:[#allocation5 + $0x688] sm:$0xf]  ;;  %v12922_v4 = vor.u32 %v18636_v62, %v12921_v61 }
 0x106   :  { %3546 = vmatpush.bf16.msra.mxu3 %v13306_v18  ;;  %3519 = vmatpush.bf16.msra.mxu1 %v12762_v25  ;;  %v18700_v0 = vld [vmem:[#allocation5 + $0x6a4] sm:$0xf0] }
 0x107   :  { %v12377_v5 = vld [vmem:[#allocation5 + $0x48] sm:$0xf]  ;;  %v13178_v8 = vor.u32 %v18700_v0, %v13177_v63 }
 0x108   :  { %3533 = vmatpush.bf16.msra.mxu2 %v13018_v26  ;;  %3506 = vmatpush.bf16.msra.mxu0 %v12474_v36  ;;  %v18500_v6 = vld [vmem:[#allocation5 + $0x64] sm:$0xf0] }
 0x109   :  { %v12633_v7 = vld [vmem:[#allocation5 + $0x248] sm:$0xf]  ;;  %v12378_v15 = vor.u32 %v18500_v6, %v12377_v5 }
 0x10a   :  { %3547 = vmatpush.bf16.msra.mxu3 %v13274_v30  ;;  %3520 = vmatpush.bf16.msra.mxu1 %v12730_v37  ;;  %v18564_v9 = vld [vmem:[#allocation5 + $0x264] sm:$0xf0] }
 0x10b   :  { %v12889_v11 = vld [vmem:[#allocation5 + $0x448] sm:$0xf]  ;;  %v12634_v20 = vor.u32 %v18564_v9, %v12633_v7 }
 0x10c   :  { %3534 = vmatpush.bf16.msra.mxu2 %v12986_v38  ;;  %3507 = vmatpush.bf16.msra.mxu0 %v12442_v52  ;;  %v18628_v12 = vld [vmem:[#allocation5 + $0x464] sm:$0xf0] }
 0x10d   :  { %v13145_v13 = vld [vmem:[#allocation5 + $0x648] sm:$0xf]  ;;  %v12890_v21 = vor.u32 %v18628_v12, %v12889_v11 }
 0x10e   :  { %3548 = vmatpush.bf16.msra.mxu3 %v13242_v45  ;;  %3521 = vmatpush.bf16.msra.mxu1 %v12698_v53  ;;  %v18692_v14 = vld [vmem:[#allocation5 + $0x664] sm:$0xf0]  ;;  %v20385_v45 = vunpack.c.l.bf16 %v650_v31 }
 0x10f   :  { %v12345_v16 = vld [vmem:[#allocation5 + $0x8] sm:$0xf]  ;;  %v13146_v25 = vor.u32 %v18692_v14, %v13145_v13 }
 0x110   :  { %3535 = vmatpush.bf16.msra.mxu2 %v12954_v54  ;;  %3508 = vmatpush.bf16.msra.mxu0 %v12410_v2  ;;  %v18492_v18 = vld [vmem:[#allocation5 + $0x24] sm:$0xf0]  ;;  %v655_v60 = vperm.slane %v20385_v45, 0 }
 0x111   :  { %v12601_v19 = vld [vmem:[#allocation5 + $0x208] sm:$0xf]  ;;  %v12346_v32 = vor.u32 %v18492_v18, %v12345_v16 }
 0x112   :  { %3549 = vmatpush.bf16.msra.mxu3 %v13210_v59  ;;  %3522 = vmatpush.bf16.msra.mxu1 %v12666_v3  ;;  %v18556_v22 = vld [vmem:[#allocation5 + $0x224] sm:$0xf0]  ;;  %v20392_v11 = vperm.slane %v655_v60, 0 }
 0x113   :  { %v12857_v23 = vld [vmem:[#allocation5 + $0x408] sm:$0xf]  ;;  %v12602_v36 = vor.u32 %v18556_v22, %v12601_v19 }
 0x114   :  { %3536 = vmatpush.bf16.msra.mxu2 %v12922_v4  ;;  %v18620_v24 = vld [vmem:[#allocation5 + $0x424] sm:$0xf0]  ;;  %3509 = vmatpush.bf16.msra.mxu0 %v12378_v15 }
 0x115   :  { %v13113_v26 = vld [vmem:[#allocation5 + $0x608] sm:$0xf]  ;;  %v12858_v37 = vor.u32 %v18620_v24, %v12857_v23  ;;  %v3288_v24 = vpop.f32.mrf.mxu0 }
 0x116   :  { %3550 = vmatpush.bf16.msra.mxu3 %v13178_v8  ;;  %v18684_v27 = vld [vmem:[#allocation5 + $0x624] sm:$0xf0]  ;;  %3523 = vmatpush.bf16.msra.mxu1 %v12634_v20 }
 0x117   :  { %v13593_v28 = vld [vmem:[#allocation5 + $0x9c8] sm:$0xf]  ;;  %v13114_v41 = vor.u32 %v18684_v27, %v13113_v26  ;;  %v3289_v26 = vadd.f32 %v3288_v24, %v20392_v11 }
 0x118   :  { %v18804_v29 = vld [vmem:[#allocation5 + $0x9e4] sm:$0xf0]  ;;  %3537 = vmatpush.bf16.msra.mxu2 %v12890_v21  ;;  %3510 = vmatpush.bf16.msra.mxu0 %v12346_v32 }
 0x119   :  { %v13849_v30 = vld [vmem:[#allocation5 + $0xbc8] sm:$0xf]  ;;  %v13594_v42 = vor.u32 %v18804_v29, %v13593_v28 }
 0x11a   :  { %v18868_v33 = vld [vmem:[#allocation5 + $0xbe4] sm:$0xf0]  ;;  %3551 = vmatpush.bf16.msra.mxu3 %v13146_v25  ;;  %3524 = vmatpush.bf16.msra.mxu1 %v12602_v36 }
 0x11b   :  { %v14105_v34 = vld [vmem:[#allocation5 + $0xdc8] sm:$0xf]  ;;  %v13850_v46 = vor.u32 %v18868_v33, %v13849_v30  ;;  %3511 = vmatmul.bf16.vlgmr.msra.gmra.mxu0 %v20353_v58 }
 0x11c   :  { %v18932_v35 = vld [vmem:[#allocation5 + $0xde4] sm:$0xf0]  ;;  %3538 = vmatpush.bf16.msra.mxu2 %v12858_v37  ;;  %3559 = vmatpush.bf16.msrb.mxu0 %v13594_v42 }
 0x11d   :  { %v14361_v38 = vld [vmem:[#allocation5 + $0xfc8] sm:$0xf]  ;;  %v14106_v48 = vor.u32 %v18932_v35, %v14105_v34  ;;  %3525 = vmatmul.bf16.vlgmr.msra.gmra.mxu1 %v20359_v10 }
 0x11e   :  { %v18996_v40 = vld [vmem:[#allocation5 + $0xfe4] sm:$0xf0]  ;;  %3552 = vmatpush.bf16.msra.mxu3 %v13114_v41  ;;  %3573 = vmatpush.bf16.msrb.mxu1 %v13850_v46 }
 0x11f   :  { %v13561_v49 = vld [vmem:[#allocation5 + $0x988] sm:$0xf]  ;;  %v14362_v52 = vor.u32 %v18996_v40, %v14361_v38  ;;  %3539 = vmatmul.bf16.vlgmr.msra.gmra.mxu2 %v20355_v1  ;;  %v3302_v38 = vpop.f32.mrf.mxu1 }
 0x120   :  { %v18796_v50 = vld [vmem:[#allocation5 + $0x9a4] sm:$0xf0]  ;;  %3587 = vmatpush.bf16.msrb.mxu2 %v14106_v48  ;;  %v3303_v41 = vadd.f32 %v3302_v38, %v3289_v26  ;;  %v18544_v26 = vld [vmem:[#allocation5 + $0x1cc] sm:$0xf] }
 0x121   :  { %v13817_v51 = vld [vmem:[#allocation5 + $0xb88] sm:$0xf]  ;;  %v13562_v59 = vor.u32 %v18796_v50, %v13561_v49  ;;  %3553 = vmatmul.bf16.vlgmr.msra.gmra.mxu3 %v20361_v17 }
 0x122   :  { %v18860_v53 = vld [vmem:[#allocation5 + $0xba4] sm:$0xf0]  ;;  %3601 = vmatpush.bf16.msrb.mxu3 %v14362_v52 }
 0x123   :  { %v14073_v54 = vld [vmem:[#allocation5 + $0xd88] sm:$0xf]  ;;  %v13818_v61 = vor.u32 %v18860_v53, %v13817_v51  ;;  %3560 = vmatpush.bf16.msrb.mxu0 %v13562_v59 }
 0x124   :  { %v18924_v55 = vld [vmem:[#allocation5 + $0xda4] sm:$0xf0] }
 0x125   :  { %v14329_v56 = vld [vmem:[#allocation5 + $0xf88] sm:$0xf]  ;;  %v14074_v62 = vor.u32 %v18924_v55, %v14073_v54  ;;  %3574 = vmatpush.bf16.msrb.mxu1 %v13818_v61  ;;  %v3316_v55 = vpop.f32.mrf.mxu2 }
 0x126   :  { %v18988_v57 = vld [vmem:[#allocation5 + $0xfa4] sm:$0xf0]  ;;  %v3317_v59 = vadd.f32 %v3316_v55, %v3303_v41  ;;  %v13307_v55 = vld [vmem:[#allocation5 + $0x7a8] sm:$0xf0] }
 0x127   :  { %v13529_v63 = vld [vmem:[#allocation5 + $0x948] sm:$0xf]  ;;  %v14330_v3 = vor.u32 %v18988_v57, %v14329_v56  ;;  %3588 = vmatpush.bf16.msrb.mxu2 %v14074_v62 }
 0x128   :  { %v18788_v0 = vld [vmem:[#allocation5 + $0x964] sm:$0xf0] }
 0x129   :  { %v13785_v2 = vld [vmem:[#allocation5 + $0xb48] sm:$0xf]  ;;  %v13530_v9 = vor.u32 %v18788_v0, %v13529_v63  ;;  %3602 = vmatpush.bf16.msrb.mxu3 %v14330_v3 }
 0x12a   :  { %v18852_v4 = vld [vmem:[#allocation5 + $0xb64] sm:$0xf0] }
 0x12b   :  { %v14041_v5 = vld [vmem:[#allocation5 + $0xd48] sm:$0xf]  ;;  %v13786_v12 = vor.u32 %v18852_v4, %v13785_v2  ;;  %3561 = vmatpush.bf16.msrb.mxu0 %v13530_v9 }
 0x12c   :  { %v18916_v6 = vld [vmem:[#allocation5 + $0xd64] sm:$0xf0] }
 0x12d   :  { %v14297_v7 = vld [vmem:[#allocation5 + $0xf48] sm:$0xf]  ;;  %v14042_v13 = vor.u32 %v18916_v6, %v14041_v5  ;;  %3575 = vmatpush.bf16.msrb.mxu1 %v13786_v12 }
 0x12e   :  { %v18980_v8 = vld [vmem:[#allocation5 + $0xf64] sm:$0xf0] }
 0x12f   :  { %v13497_v14 = vld [vmem:[#allocation5 + $0x908] sm:$0xf]  ;;  %v14298_v18 = vor.u32 %v18980_v8, %v14297_v7  ;;  %3589 = vmatpush.bf16.msrb.mxu2 %v14042_v13  ;;  %v3330_v7 = vpop.f32.mrf.mxu3 }
 0x130   :  { %v18780_v15 = vld [vmem:[#allocation5 + $0x924] sm:$0xf0]  ;;  %v20395_v12 = vadd.f32 %v3330_v7, %v3317_v59 }
 0x131   :  { %v13753_v16 = vld [vmem:[#allocation5 + $0xb08] sm:$0xf]  ;;  %v13498_v25 = vor.u32 %v18780_v15, %v13497_v14  ;;  %3603 = vmatpush.bf16.msrb.mxu3 %v14298_v18 }
 0x132   :  { %v18844_v19 = vld [vmem:[#allocation5 + $0xb24] sm:$0xf0] }
 0x133   :  { %v14009_v20 = vld [vmem:[#allocation5 + $0xd08] sm:$0xf]  ;;  %v13754_v27 = vor.u32 %v18844_v19, %v13753_v16  ;;  %3562 = vmatpush.bf16.msrb.mxu0 %v13498_v25 }
 0x134   :  { %v18908_v21 = vld [vmem:[#allocation5 + $0xd24] sm:$0xf0] }
 0x135   :  { %v14265_v22 = vld [vmem:[#allocation5 + $0xf08] sm:$0xf]  ;;  %v14010_v28 = vor.u32 %v18908_v21, %v14009_v20  ;;  %3576 = vmatpush.bf16.msrb.mxu1 %v13754_v27  ;;  %v12571_v27 = vld [vmem:[#allocation5 + $0x1e8] sm:$0xf0] }
 0x136   :  { %v18972_v23 = vld [vmem:[#allocation5 + $0xf24] sm:$0xf0]  ;;  %v12574_v38 = vor.u32 %v18544_v26, %v12571_v27 }
 0x137   :  { %v13465_v29 = vld [vmem:[#allocation5 + $0x8c8] sm:$0xf]  ;;  %v14266_v32 = vor.u32 %v18972_v23, %v14265_v22  ;;  %3590 = vmatpush.bf16.msrb.mxu2 %v14010_v28  ;;  %v18608_v28 = vld [vmem:[#allocation5 + $0x3cc] sm:$0xf] }
 0x138   :  { %v18772_v30 = vld [vmem:[#allocation5 + $0x8e4] sm:$0xf0] }
 0x139   :  { %v13721_v31 = vld [vmem:[#allocation5 + $0xac8] sm:$0xf]  ;;  %v13466_v40 = vor.u32 %v18772_v30, %v13465_v29  ;;  %3604 = vmatpush.bf16.msrb.mxu3 %v14266_v32  ;;  %v12827_v30 = vld [vmem:[#allocation5 + $0x3e8] sm:$0xf0] }
 0x13a   :  { %v18836_v33 = vld [vmem:[#allocation5 + $0xae4] sm:$0xf0]  ;;  %v13083_v32 = vld [vmem:[#allocation5 + $0x5e8] sm:$0xf0] }
 0x13b   :  { %v13977_v34 = vld [vmem:[#allocation5 + $0xcc8] sm:$0xf]  ;;  %v13722_v42 = vor.u32 %v18836_v33, %v13721_v31  ;;  %3563 = vmatpush.bf16.msrb.mxu0 %v13466_v40  ;;  %v18672_v31 = vld [vmem:[#allocation5 + $0x5cc] sm:$0xf]  ;;  %v12830_v40 = vor.u32 %v18608_v28, %v12827_v30 }
 0x13c   :  { %v18900_v35 = vld [vmem:[#allocation5 + $0xce4] sm:$0xf0]  ;;  %v13086_v41 = vor.u32 %v18672_v31, %v13083_v32  ;;  %v18512_v31 = vld [vmem:[#allocation5 + $0xcc] sm:$0xf] }
 0x13d   :  { %v14233_v36 = vld [vmem:[#allocation5 + $0xec8] sm:$0xf]  ;;  %v13978_v46 = vor.u32 %v18900_v35, %v13977_v34  ;;  %3577 = vmatpush.bf16.msrb.mxu1 %v13722_v42  ;;  %v18736_v35 = vld [vmem:[#allocation5 + $0x7cc] sm:$0xf]  ;;  %v20397_v42 = vpop.f32.mrf.mxu0 }
 0x13e   :  { %v18964_v37 = vld [vmem:[#allocation5 + $0xee4] sm:$0xf0]  ;;  %v12443_v32 = vld [vmem:[#allocation5 + $0xe8] sm:$0xf0] }
 0x13f   :  { %v13433_v48 = vld [vmem:[#allocation5 + $0x888] sm:$0xf]  ;;  %v14234_v51 = vor.u32 %v18964_v37, %v14233_v36  ;;  %3591 = vmatpush.bf16.msrb.mxu2 %v13978_v46  ;;  %v13339_v36 = vld [vmem:[#allocation5 + $0x7e8] sm:$0xf0] }
 0x140   :  { %v18764_v49 = vld [vmem:[#allocation5 + $0x8a4] sm:$0xf0]  ;;  %v18536_v46 = vld [vmem:[#allocation5 + $0x18c] sm:$0xf] }
 0x141   :  { %v13689_v50 = vld [vmem:[#allocation5 + $0xa88] sm:$0xf]  ;;  %v13434_v60 = vor.u32 %v18764_v49, %v13433_v48  ;;  %3605 = vmatpush.bf16.msrb.mxu3 %v14234_v51  ;;  %v12539_v48 = vld [vmem:[#allocation5 + $0x1a8] sm:$0xf0] }
 0x142   :  { %v18828_v52 = vld [vmem:[#allocation5 + $0xaa4] sm:$0xf0]  ;;  %v18600_v49 = vld [vmem:[#allocation5 + $0x38c] sm:$0xf] }
 0x143   :  { %v13945_v53 = vld [vmem:[#allocation5 + $0xc88] sm:$0xf]  ;;  %v13690_v61 = vor.u32 %v18828_v52, %v13689_v50  ;;  %3564 = vmatpush.bf16.msrb.mxu0 %v13434_v60  ;;  %v13342_v50 = vor.u32 %v18736_v35, %v13339_v36  ;;  %v12795_v51 = vld [vmem:[#allocation5 + $0x3a8] sm:$0xf0] }
 0x144   :  { %v18892_v54 = vld [vmem:[#allocation5 + $0xca4] sm:$0xf0]  ;;  %v18664_v52 = vld [vmem:[#allocation5 + $0x58c] sm:$0xf]  ;;  %v12798_v59 = vor.u32 %v18600_v49, %v12795_v51 }
 0x145   :  { %v14201_v56 = vld [vmem:[#allocation5 + $0xe88] sm:$0xf]  ;;  %v13946_v62 = vor.u32 %v18892_v54, %v13945_v53  ;;  %3578 = vmatpush.bf16.msrb.mxu1 %v13690_v61  ;;  %v13051_v53 = vld [vmem:[#allocation5 + $0x5a8] sm:$0xf0] }
 0x146   :  { %v18956_v57 = vld [vmem:[#allocation5 + $0xea4] sm:$0xf0]  ;;  %v18728_v54 = vld [vmem:[#allocation5 + $0x78c] sm:$0xf]  ;;  %v13054_v60 = vor.u32 %v18664_v52, %v13051_v53 }
 0x147   :  { %v13401_v63 = vld [vmem:[#allocation5 + $0x848] sm:$0xf]  ;;  %v14202_v3 = vor.u32 %v18956_v57, %v14201_v56  ;;  %3592 = vmatpush.bf16.msrb.mxu2 %v13946_v62  ;;  %v20399_v56 = vpop.f32.mrf.mxu1  ;;  %v12542_v57 = vor.u32 %v18536_v46, %v12539_v48  ;;  %v18528_v61 = vld [vmem:[#allocation5 + $0x14c] sm:$0xf]  ;;  %v12446_v46 = vor.u32 %v18512_v31, %v12443_v32 }
 0x148   :  { %v18756_v0 = vld [vmem:[#allocation5 + $0x864] sm:$0xf0]  ;;  %v12507_v62 = vld [vmem:[#allocation5 + $0x168] sm:$0xf0] }
 0x149   :  { %v13657_v2 = vld [vmem:[#allocation5 + $0xa48] sm:$0xf]  ;;  %v13402_v13 = vor.u32 %v18756_v0, %v13401_v63  ;;  %3606 = vmatpush.bf16.msrb.mxu3 %v14202_v3  ;;  %v18592_v63 = vld [vmem:[#allocation5 + $0x34c] sm:$0xf]  ;;  %v13310_v0 = vor.u32 %v18728_v54, %v13307_v55  ;;  %v12510_v7 = vor.u32 %v18528_v61, %v12507_v62 }
 0x14a   :  { %v18820_v4 = vld [vmem:[#allocation5 + $0xa64] sm:$0xf0]  ;;  %v18656_v3 = vld [vmem:[#allocation5 + $0x54c] sm:$0xf] }
 0x14b   :  { %v13913_v5 = vld [vmem:[#allocation5 + $0xc48] sm:$0xf]  ;;  %v13658_v16 = vor.u32 %v18820_v4, %v13657_v2  ;;  %3565 = vmatpush.bf16.msrb.mxu0 %v13402_v13  ;;  %v12763_v2 = vld [vmem:[#allocation5 + $0x368] sm:$0xf0] }
 0x14c   :  { %v18884_v6 = vld [vmem:[#allocation5 + $0xc64] sm:$0xf0]  ;;  %v13019_v4 = vld [vmem:[#allocation5 + $0x568] sm:$0xf0] }
 0x14d   :  { %v14169_v8 = vld [vmem:[#allocation5 + $0xe48] sm:$0xf]  ;;  %v13914_v18 = vor.u32 %v18884_v6, %v13913_v5  ;;  %3579 = vmatpush.bf16.msrb.mxu1 %v13658_v16  ;;  %v18720_v5 = vld [vmem:[#allocation5 + $0x74c] sm:$0xf]  ;;  %v13022_v13 = vor.u32 %v18656_v3, %v13019_v4 }
 0x14e   :  { %v18948_v9 = vld [vmem:[#allocation5 + $0xe64] sm:$0xf0]  ;;  %v13275_v6 = vld [vmem:[#allocation5 + $0x768] sm:$0xf0] }
 0x14f   :  { %v13369_v14 = vld [vmem:[#allocation5 + $0x808] sm:$0xf]  ;;  %v14170_v22 = vor.u32 %v18948_v9, %v14169_v8  ;;  %3593 = vmatpush.bf16.msrb.mxu2 %v13914_v18  ;;  %v20405_v8 = vpop.f32.mrf.mxu2  ;;  %v12766_v9 = vor.u32 %v18592_v63, %v12763_v2  ;;  %v18584_v16 = vld [vmem:[#allocation5 + $0x30c] sm:$0xf]  ;;  %v13278_v18 = vor.u32 %v18720_v5, %v13275_v6  ;;  %v3358_v30 = vpop.f32.mrf.mxu1 }
 0x150   :  { %v18748_v15 = vld [vmem:[#allocation5 + $0x824] sm:$0xf0]  ;;  %v12699_v36 = vld [vmem:[#allocation5 + $0x2e8] sm:$0xf0] }
 0x151   :  { %v13625_v19 = vld [vmem:[#allocation5 + $0xa08] sm:$0xf]  ;;  %v13370_v29 = vor.u32 %v18748_v15, %v13369_v14  ;;  %3607 = vmatpush.bf16.msrb.mxu3 %v14170_v22  ;;  %v18520_v14 = vld [vmem:[#allocation5 + $0x10c] sm:$0xf] }
 0x152   :  { %v18812_v20 = vld [vmem:[#allocation5 + $0xa24] sm:$0xf0]  ;;  %v12475_v15 = vld [vmem:[#allocation5 + $0x128] sm:$0xf0] }
 0x153   :  { %v13881_v21 = vld [vmem:[#allocation5 + $0xc08] sm:$0xf]  ;;  %v13626_v33 = vor.u32 %v18812_v20, %v13625_v19  ;;  %3566 = vmatpush.bf16.msrb.mxu0 %v13370_v29  ;;  %v20407_v19 = vpop.f32.mrf.mxu3  ;;  %v12731_v20 = vld [vmem:[#allocation5 + $0x328] sm:$0xf0]  ;;  %v12478_v27 = vor.u32 %v18520_v14, %v12475_v15 }
 0x154   :  { %v18876_v23 = vld [vmem:[#allocation5 + $0xc24] sm:$0xf0]  ;;  %v12987_v22 = vld [vmem:[#allocation5 + $0x528] sm:$0xf0]  ;;  %v12734_v28 = vor.u32 %v18584_v16, %v12731_v20 }
 0x155   :  { %v14137_v24 = vld [vmem:[#allocation5 + $0xe08] sm:$0xf]  ;;  %v13882_v34 = vor.u32 %v18876_v23, %v13881_v21  ;;  %3580 = vmatpush.bf16.msrb.mxu1 %v13626_v33  ;;  %v18648_v21 = vld [vmem:[#allocation5 + $0x50c] sm:$0xf]  ;;  %v3344_v23 = vpop.f32.mrf.mxu0 }
 0x156   :  { %v18940_v25 = vld [vmem:[#allocation5 + $0xe24] sm:$0xf0]  ;;  %3567 = vmatmul.bf16.vlgmr.msrb.gmra.mxu0 %v20365_v39  ;;  %v3345_v26 = vadd.f32 %v3344_v23, %v20395_v12  ;;  %v12990_v29 = vor.u32 %v18648_v21, %v12987_v22  ;;  %v18576_v33 = vld [vmem:[#allocation5 + $0x2cc] sm:$0xf] }
 0x157   :  { %v14138_v37 = vor.u32 %v18940_v25, %v14137_v24  ;;  %3594 = vmatpush.bf16.msrb.mxu2 %v13882_v34  ;;  %3615 = vmatpush.bf16.msra.mxu0 %v12574_v38  ;;  %v18712_v24 = vld [vmem:[#allocation5 + $0x70c] sm:$0xf]  ;;  %v12702_v12 = vor.u32 %v18576_v33, %v12699_v36  ;;  %v3372_v53 = vpop.f32.mrf.mxu2 }
 0x158   :  { %3581 = vmatmul.bf16.vlgmr.msrb.gmra.mxu1 %v20369_v44  ;;  %v13243_v25 = vld [vmem:[#allocation5 + $0x728] sm:$0xf0]  ;;  %v3359_v35 = vadd.f32 %v3358_v30, %v3345_v26 }
 0x159   :  { %3608 = vmatpush.bf16.msrb.mxu3 %v14138_v37  ;;  %3629 = vmatpush.bf16.msra.mxu1 %v12830_v40  ;;  %v13246_v34 = vor.u32 %v18712_v24, %v13243_v25  ;;  %v18640_v37 = vld [vmem:[#allocation5 + $0x4cc] sm:$0xf] }
 0x15a   :  { %3595 = vmatmul.bf16.vlgmr.msrb.gmra.mxu2 %v20367_v43  ;;  %v12955_v38 = vld [vmem:[#allocation5 + $0x4e8] sm:$0xf0] }
 0x15b   :  { %3643 = vmatpush.bf16.msra.mxu2 %v13086_v41  ;;  %3616 = vmatpush.bf16.msra.mxu0 %v12542_v57  ;;  %v18704_v40 = vld [vmem:[#allocation5 + $0x6cc] sm:$0xf]  ;;  %v12958_v48 = vor.u32 %v18640_v37, %v12955_v38  ;;  %v3386_v62 = vpop.f32.mrf.mxu3 }
 0x15c   :  { %3609 = vmatmul.bf16.vlgmr.msrb.gmra.mxu3 %v20371_v47  ;;  %v13211_v41 = vld [vmem:[#allocation5 + $0x6e8] sm:$0xf0] }
 0x15d   :  { %3657 = vmatpush.bf16.msra.mxu3 %v13342_v50  ;;  %3630 = vmatpush.bf16.msra.mxu1 %v12798_v59  ;;  %v18504_v49 = vld [vmem:[#allocation5 + $0x8c] sm:$0xf]  ;;  %v13214_v52 = vor.u32 %v18704_v40, %v13211_v41  ;;  %v3373_v59 = vadd.f32 %v3372_v53, %v3359_v35 }
 0x15e   :  { %v12411_v50 = vld [vmem:[#allocation5 + $0xa8] sm:$0xf0] }
 0x15f   :  { %3644 = vmatpush.bf16.msra.mxu2 %v13054_v60  ;;  %3617 = vmatpush.bf16.msra.mxu0 %v12510_v7  ;;  %v18568_v51 = vld [vmem:[#allocation5 + $0x28c] sm:$0xf]  ;;  %v12414_v63 = vor.u32 %v18504_v49, %v12411_v50 }
 0x160   :  { %v12667_v54 = vld [vmem:[#allocation5 + $0x2a8] sm:$0xf0] }
 0x161   :  { %3658 = vmatpush.bf16.msra.mxu3 %v13310_v0  ;;  %3631 = vmatpush.bf16.msra.mxu1 %v12766_v9  ;;  %v18632_v55 = vld [vmem:[#allocation5 + $0x48c] sm:$0xf]  ;;  %v20410_v0 = vadd.f32 %v3386_v62, %v3373_v59  ;;  %v12670_v2 = vor.u32 %v18568_v51, %v12667_v54 }
 0x162   :  { %v12923_v57 = vld [vmem:[#allocation5 + $0x4a8] sm:$0xf0] }
 0x163   :  { %3645 = vmatpush.bf16.msra.mxu2 %v13022_v13  ;;  %3618 = vmatpush.bf16.msra.mxu0 %v12478_v27  ;;  %v18696_v60 = vld [vmem:[#allocation5 + $0x68c] sm:$0xf]  ;;  %21258 = vst [vmem:[#allocation23_spill] sm:$0xff] %v20410_v0  ;;  %v12926_v3 = vor.u32 %v18632_v55, %v12923_v57  ;;  %v18950_v0 = vld [vmem:[#allocation5 + $0xe74] sm:$0xf0] }
 0x164   :  { %v13179_v61 = vld [vmem:[#allocation5 + $0x6a8] sm:$0xf0] }
 0x165   :  { %3659 = vmatpush.bf16.msra.mxu3 %v13278_v18  ;;  %3632 = vmatpush.bf16.msra.mxu1 %v12734_v28  ;;  %v18496_v4 = vld [vmem:[#allocation5 + $0x4c] sm:$0xf]  ;;  %v13182_v7 = vor.u32 %v18696_v60, %v13179_v61  ;;  %v20412_v60 = vpop.f32.mrf.mxu0 }
 0x166   :  { %v12379_v5 = vld [vmem:[#allocation5 + $0x68] sm:$0xf0] }
 0x167   :  { %3646 = vmatpush.bf16.msra.mxu2 %v12990_v29  ;;  %3619 = vmatpush.bf16.msra.mxu0 %v12446_v46  ;;  %v18560_v6 = vld [vmem:[#allocation5 + $0x24c] sm:$0xf]  ;;  %v12382_v18 = vor.u32 %v18496_v4, %v12379_v5 }
 0x168   :  { %v12635_v9 = vld [vmem:[#allocation5 + $0x268] sm:$0xf0] }
 0x169   :  { %3660 = vmatpush.bf16.msra.mxu3 %v13246_v34  ;;  %3633 = vmatpush.bf16.msra.mxu1 %v12702_v12  ;;  %v18624_v13 = vld [vmem:[#allocation5 + $0x44c] sm:$0xf]  ;;  %v12638_v22 = vor.u32 %v18560_v6, %v12635_v9 }
 0x16a   :  { %v12891_v14 = vld [vmem:[#allocation5 + $0x468] sm:$0xf0] }
 0x16b   :  { %3647 = vmatpush.bf16.msra.mxu2 %v12958_v48  ;;  %v18688_v15 = vld [vmem:[#allocation5 + $0x64c] sm:$0xf]  ;;  %3620 = vmatpush.bf16.msra.mxu0 %v12414_v63  ;;  %v12894_v23 = vor.u32 %v18624_v13, %v12891_v14 }
 0x16c   :  { %v13147_v16 = vld [vmem:[#allocation5 + $0x668] sm:$0xf0] }
 0x16d   :  { %3661 = vmatpush.bf16.msra.mxu3 %v13214_v52  ;;  %v18488_v20 = vld [vmem:[#allocation5 + $0xc] sm:$0xf]  ;;  %3634 = vmatpush.bf16.msra.mxu1 %v12670_v2  ;;  %v13150_v27 = vor.u32 %v18688_v15, %v13147_v16  ;;  %v656_v2 = vperm.slane %v20385_v45, 2 }
 0x16e   :  { %v12347_v21 = vld [vmem:[#allocation5 + $0x28] sm:$0xf0] }
 0x16f   :  { %3648 = vmatpush.bf16.msra.mxu2 %v12926_v3  ;;  %v18552_v24 = vld [vmem:[#allocation5 + $0x20c] sm:$0xf]  ;;  %3621 = vmatpush.bf16.msra.mxu0 %v12382_v18  ;;  %v12350_v34 = vor.u32 %v18488_v20, %v12347_v21  ;;  %v20415_v3 = vpop.f32.mrf.mxu1 }
 0x170   :  { %v12603_v25 = vld [vmem:[#allocation5 + $0x228] sm:$0xf0] }
 0x171   :  { %v18616_v26 = vld [vmem:[#allocation5 + $0x40c] sm:$0xf]  ;;  %3662 = vmatpush.bf16.msra.mxu3 %v13182_v7  ;;  %3635 = vmatpush.bf16.msra.mxu1 %v12638_v22  ;;  %v12606_v38 = vor.u32 %v18552_v24, %v12603_v25  ;;  %v20421_v22 = vperm.slane %v656_v2, 0 }
 0x172   :  { %v12859_v28 = vld [vmem:[#allocation5 + $0x428] sm:$0xf0] }
 0x173   :  { %v18680_v29 = vld [vmem:[#allocation5 + $0x60c] sm:$0xf]  ;;  %3649 = vmatpush.bf16.msra.mxu2 %v12894_v23  ;;  %v12862_v40 = vor.u32 %v18616_v26, %v12859_v28  ;;  %3622 = vmatpush.bf16.msra.mxu0 %v12350_v34  ;;  %v20423_v28 = vpop.f32.mrf.mxu2 }
 0x174   :  { %v13115_v30 = vld [vmem:[#allocation5 + $0x628] sm:$0xf0]  ;;  %21259 = vst [vmem:[#allocation24_spill] sm:$0xff] %v20423_v28  ;;  %v13067_v28 = vld [vmem:[#allocation5 + $0x5b8] sm:$0xf0] }
 0x175   :  { %v18800_v31 = vld [vmem:[#allocation5 + $0x9cc] sm:$0xf]  ;;  %3663 = vmatpush.bf16.msra.mxu3 %v13150_v27  ;;  %v13118_v12 = vor.u32 %v18680_v29, %v13115_v30  ;;  %3636 = vmatpush.bf16.msra.mxu1 %v12606_v38 }
 0x176   :  { %v13595_v32 = vld [vmem:[#allocation5 + $0x9e8] sm:$0xf0]  ;;  %3623 = vmatmul.bf16.vlgmr.msra.gmra.mxu0 %v20353_v58 }
 0x177   :  { %v18864_v33 = vld [vmem:[#allocation5 + $0xbcc] sm:$0xf]  ;;  %v13598_v48 = vor.u32 %v18800_v31, %v13595_v32  ;;  %3650 = vmatpush.bf16.msra.mxu2 %v12862_v40 }
 0x178   :  { %v13851_v35 = vld [vmem:[#allocation5 + $0xbe8] sm:$0xf0]  ;;  %3637 = vmatmul.bf16.vlgmr.msra.gmra.mxu1 %v20359_v10 }
 0x179   :  { %v18928_v36 = vld [vmem:[#allocation5 + $0xdcc] sm:$0xf]  ;;  %v13854_v49 = vor.u32 %v18864_v33, %v13851_v35  ;;  %3664 = vmatpush.bf16.msra.mxu3 %v13118_v12  ;;  %3671 = vmatpush.bf16.msrb.mxu0 %v13598_v48  ;;  %v3400_v35 = vpop.f32.mrf.mxu0 }
 0x17a   :  { %v14107_v37 = vld [vmem:[#allocation5 + $0xde8] sm:$0xf0]  ;;  %3651 = vmatmul.bf16.vlgmr.msra.gmra.mxu2 %v20355_v1  ;;  %v3401_v38 = vadd.f32 %v3400_v35, %v20421_v22 }
 0x17b   :  { %v18992_v41 = vld [vmem:[#allocation5 + $0xfcc] sm:$0xf]  ;;  %v14110_v50 = vor.u32 %v18928_v36, %v14107_v37  ;;  %3685 = vmatpush.bf16.msrb.mxu1 %v13854_v49  ;;  %v20425_v36 = vpop.f32.mrf.mxu3  ;;  %v3414_v49 = vpop.f32.mrf.mxu1 }
 0x17c   :  { %v14363_v46 = vld [vmem:[#allocation5 + $0xfe8] sm:$0xf0]  ;;  %3665 = vmatmul.bf16.vlgmr.msra.gmra.mxu3 %v20361_v17  ;;  %21260 = vst [vmem:[#allocation25_spill] sm:$0xff] %v20425_v36 }
 0x17d   :  { %v18792_v51 = vld [vmem:[#allocation5 + $0x98c] sm:$0xf]  ;;  %v14366_v54 = vor.u32 %v18992_v41, %v14363_v46  ;;  %3699 = vmatpush.bf16.msrb.mxu2 %v14110_v50 }
 0x17e   :  { %v13563_v52 = vld [vmem:[#allocation5 + $0x9a8] sm:$0xf0] }
 0x17f   :  { %v18856_v53 = vld [vmem:[#allocation5 + $0xb8c] sm:$0xf]  ;;  %v13566_v63 = vor.u32 %v18792_v51, %v13563_v52  ;;  %3713 = vmatpush.bf16.msrb.mxu3 %v14366_v54  ;;  %v3415_v54 = vadd.f32 %v3414_v49, %v3401_v38 }
 0x180   :  { %v13819_v55 = vld [vmem:[#allocation5 + $0xba8] sm:$0xf0] }
 0x181   :  { %v18920_v57 = vld [vmem:[#allocation5 + $0xd8c] sm:$0xf]  ;;  %v13822_v4 = vor.u32 %v18856_v53, %v13819_v55  ;;  %3672 = vmatpush.bf16.msrb.mxu0 %v13566_v63 }
 0x182   :  { %v14075_v59 = vld [vmem:[#allocation5 + $0xda8] sm:$0xf0] }
 0x183   :  { %v18984_v61 = vld [vmem:[#allocation5 + $0xf8c] sm:$0xf]  ;;  %v14078_v5 = vor.u32 %v18920_v57, %v14075_v59  ;;  %3686 = vmatpush.bf16.msrb.mxu1 %v13822_v4 }
 0x184   :  { %v14331_v62 = vld [vmem:[#allocation5 + $0xfa8] sm:$0xf0] }
 0x185   :  { %v18784_v6 = vld [vmem:[#allocation5 + $0x94c] sm:$0xf]  ;;  %v14334_v13 = vor.u32 %v18984_v61, %v14331_v62  ;;  %3700 = vmatpush.bf16.msrb.mxu2 %v14078_v5 }
 0x186   :  { %v13531_v7 = vld [vmem:[#allocation5 + $0x968] sm:$0xf0] }
 0x187   :  { %v18848_v9 = vld [vmem:[#allocation5 + $0xb4c] sm:$0xf]  ;;  %v13534_v21 = vor.u32 %v18784_v6, %v13531_v7  ;;  %3714 = vmatpush.bf16.msrb.mxu3 %v14334_v13  ;;  %v3428_v13 = vpop.f32.mrf.mxu2 }
 0x188   :  { %v13787_v14 = vld [vmem:[#allocation5 + $0xb68] sm:$0xf0] }
 0x189   :  { %v18912_v15 = vld [vmem:[#allocation5 + $0xd4c] sm:$0xf]  ;;  %v13790_v23 = vor.u32 %v18848_v9, %v13787_v14  ;;  %3673 = vmatpush.bf16.msrb.mxu0 %v13534_v21 }
 0x18a   :  { %v14043_v16 = vld [vmem:[#allocation5 + $0xd68] sm:$0xf0] }
 0x18b   :  { %v18976_v18 = vld [vmem:[#allocation5 + $0xf4c] sm:$0xf]  ;;  %v14046_v24 = vor.u32 %v18912_v15, %v14043_v16  ;;  %3687 = vmatpush.bf16.msrb.mxu1 %v13790_v23  ;;  %v3429_v16 = vadd.f32 %v3428_v13, %v3415_v54  ;;  %v18549_v54 = vld [vmem:[#allocation5 + $0x1ec] sm:$0xf0] }
 0x18c   :  { %v14299_v20 = vld [vmem:[#allocation5 + $0xf68] sm:$0xf0] }
 0x18d   :  { %v18776_v25 = vld [vmem:[#allocation5 + $0x90c] sm:$0xf]  ;;  %v14302_v29 = vor.u32 %v18976_v18, %v14299_v20  ;;  %3701 = vmatpush.bf16.msrb.mxu2 %v14046_v24  ;;  %v3442_v20 = vpop.f32.mrf.mxu3 }
 0x18e   :  { %v13499_v26 = vld [vmem:[#allocation5 + $0x928] sm:$0xf0] }
 0x18f   :  { %v18840_v27 = vld [vmem:[#allocation5 + $0xb0c] sm:$0xf]  ;;  %v13502_v37 = vor.u32 %v18776_v25, %v13499_v26  ;;  %3715 = vmatpush.bf16.msrb.mxu3 %v14302_v29 }
 0x190   :  { %v13755_v30 = vld [vmem:[#allocation5 + $0xb28] sm:$0xf0] }
 0x191   :  { %v18904_v31 = vld [vmem:[#allocation5 + $0xd0c] sm:$0xf]  ;;  %v13758_v40 = vor.u32 %v18840_v27, %v13755_v30  ;;  %3674 = vmatpush.bf16.msrb.mxu0 %v13502_v37  ;;  %v20428_v27 = vadd.f32 %v3442_v20, %v3429_v16  ;;  %v18541_v16 = vld [vmem:[#allocation5 + $0x1ac] sm:$0xf0] }
 0x192   :  { %v14011_v32 = vld [vmem:[#allocation5 + $0xd28] sm:$0xf0] }
 0x193   :  { %v18968_v33 = vld [vmem:[#allocation5 + $0xf0c] sm:$0xf]  ;;  %v14014_v41 = vor.u32 %v18904_v31, %v14011_v32  ;;  %3688 = vmatpush.bf16.msrb.mxu1 %v13758_v40 }
 0x194   :  { %v14267_v34 = vld [vmem:[#allocation5 + $0xf28] sm:$0xf0] }
 0x195   :  { %v18768_v46 = vld [vmem:[#allocation5 + $0x8cc] sm:$0xf]  ;;  %v14270_v50 = vor.u32 %v18968_v33, %v14267_v34  ;;  %3702 = vmatpush.bf16.msrb.mxu2 %v14014_v41 }
 0x196   :  { %v13467_v12 = vld [vmem:[#allocation5 + $0x8e8] sm:$0xf0] }
 0x197   :  { %v18832_v48 = vld [vmem:[#allocation5 + $0xacc] sm:$0xf]  ;;  %v13470_v59 = vor.u32 %v18768_v46, %v13467_v12  ;;  %3716 = vmatpush.bf16.msrb.mxu3 %v14270_v50 }
 0x198   :  { %v13723_v51 = vld [vmem:[#allocation5 + $0xae8] sm:$0xf0] }
 0x199   :  { %v18896_v52 = vld [vmem:[#allocation5 + $0xccc] sm:$0xf]  ;;  %v13726_v61 = vor.u32 %v18832_v48, %v13723_v51  ;;  %3675 = vmatpush.bf16.msrb.mxu0 %v13470_v59  ;;  %v18613_v59 = vld [vmem:[#allocation5 + $0x3ec] sm:$0xf0] }
 0x19a   :  { %v13979_v53 = vld [vmem:[#allocation5 + $0xce8] sm:$0xf0] }
 0x19b   :  { %v18960_v55 = vld [vmem:[#allocation5 + $0xecc] sm:$0xf]  ;;  %v13982_v62 = vor.u32 %v18896_v52, %v13979_v53  ;;  %3689 = vmatpush.bf16.msrb.mxu1 %v13726_v61  ;;  %v12577_v53 = vld [vmem:[#allocation5 + $0x1d0] sm:$0xf] }
 0x19c   :  { %v14235_v57 = vld [vmem:[#allocation5 + $0xee8] sm:$0xf0]  ;;  %v13089_v61 = vld [vmem:[#allocation5 + $0x5d0] sm:$0xf] }
 0x19d   :  { %v18760_v63 = vld [vmem:[#allocation5 + $0x88c] sm:$0xf]  ;;  %v14238_v5 = vor.u32 %v18960_v55, %v14235_v57  ;;  %3703 = vmatpush.bf16.msrb.mxu2 %v13982_v62  ;;  %v12833_v55 = vld [vmem:[#allocation5 + $0x3d0] sm:$0xf] }
 0x19e   :  { %v13435_v2 = vld [vmem:[#allocation5 + $0x8a8] sm:$0xf0]  ;;  %v18677_v62 = vld [vmem:[#allocation5 + $0x5ec] sm:$0xf0] }
 0x19f   :  { %v18824_v4 = vld [vmem:[#allocation5 + $0xa8c] sm:$0xf]  ;;  %v13438_v18 = vor.u32 %v18760_v63, %v13435_v2  ;;  %3717 = vmatpush.bf16.msrb.mxu3 %v14238_v5  ;;  %v18741_v5 = vld [vmem:[#allocation5 + $0x7ec] sm:$0xf0]  ;;  %v13090_v13 = vor.u32 %v18677_v62, %v13089_v61 }
 0x1a0   :  { %v13691_v6 = vld [vmem:[#allocation5 + $0xaa8] sm:$0xf0]  ;;  %v12993_v61 = vld [vmem:[#allocation5 + $0x510] sm:$0xf] }
 0x1a1   :  { %v18888_v7 = vld [vmem:[#allocation5 + $0xc8c] sm:$0xf]  ;;  %v13694_v21 = vor.u32 %v18824_v4, %v13691_v6  ;;  %3676 = vmatpush.bf16.msrb.mxu0 %v13438_v18  ;;  %v13345_v4 = vld [vmem:[#allocation5 + $0x7d0] sm:$0xf] }
 0x1a2   :  { %v13947_v9 = vld [vmem:[#allocation5 + $0xca8] sm:$0xf0]  ;;  %v12801_v18 = vld [vmem:[#allocation5 + $0x390] sm:$0xf]  ;;  %v13346_v20 = vor.u32 %v18741_v5, %v13345_v4 }
 0x1a3   :  { %v18952_v14 = vld [vmem:[#allocation5 + $0xe8c] sm:$0xf]  ;;  %v13950_v23 = vor.u32 %v18888_v7, %v13947_v9  ;;  %3690 = vmatpush.bf16.msrb.mxu1 %v13694_v21  ;;  %v12578_v7 = vor.u32 %v18549_v54, %v12577_v53  ;;  %v12834_v9 = vor.u32 %v18613_v59, %v12833_v55  ;;  %v18605_v21 = vld [vmem:[#allocation5 + $0x3ac] sm:$0xf0] }
 0x1a4   :  { %v14203_v15 = vld [vmem:[#allocation5 + $0xea8] sm:$0xf0]  ;;  %v18525_v53 = vld [vmem:[#allocation5 + $0x12c] sm:$0xf0] }
 0x1a5   :  { %v18752_v24 = vld [vmem:[#allocation5 + $0x84c] sm:$0xf]  ;;  %v14206_v29 = vor.u32 %v18952_v14, %v14203_v15  ;;  %3704 = vmatpush.bf16.msrb.mxu2 %v13950_v23  ;;  %v20430_v14 = vpop.f32.mrf.mxu0  ;;  %v12545_v15 = vld [vmem:[#allocation5 + $0x190] sm:$0xf] }
 0x1a6   :  { %v13403_v25 = vld [vmem:[#allocation5 + $0x868] sm:$0xf0]  ;;  %v13057_v23 = vld [vmem:[#allocation5 + $0x590] sm:$0xf] }
 0x1a7   :  { %v18816_v26 = vld [vmem:[#allocation5 + $0xa4c] sm:$0xf]  ;;  %v13406_v35 = vor.u32 %v18752_v24, %v13403_v25  ;;  %3718 = vmatpush.bf16.msrb.mxu3 %v14206_v29  ;;  %v18669_v24 = vld [vmem:[#allocation5 + $0x5ac] sm:$0xf0]  ;;  %v20432_v29 = vpop.f32.mrf.mxu1 }
 0x1a8   :  { %v13659_v30 = vld [vmem:[#allocation5 + $0xa68] sm:$0xf0]  ;;  %v13313_v25 = vld [vmem:[#allocation5 + $0x790] sm:$0xf] }
 0x1a9   :  { %v18880_v31 = vld [vmem:[#allocation5 + $0xc4c] sm:$0xf]  ;;  %v13662_v40 = vor.u32 %v18816_v26, %v13659_v30  ;;  %3677 = vmatpush.bf16.msrb.mxu0 %v13406_v35  ;;  %v18733_v26 = vld [vmem:[#allocation5 + $0x7ac] sm:$0xf0]  ;;  %v12546_v30 = vor.u32 %v18541_v16, %v12545_v15 }
 0x1aa   :  { %v13915_v32 = vld [vmem:[#allocation5 + $0xc68] sm:$0xf0]  ;;  %v12769_v35 = vld [vmem:[#allocation5 + $0x350] sm:$0xf] }
 0x1ab   :  { %v18944_v33 = vld [vmem:[#allocation5 + $0xe4c] sm:$0xf]  ;;  %v13918_v41 = vor.u32 %v18880_v31, %v13915_v32  ;;  %3691 = vmatpush.bf16.msrb.mxu1 %v13662_v40  ;;  %v12802_v31 = vor.u32 %v18605_v21, %v12801_v18  ;;  %v13058_v32 = vor.u32 %v18669_v24, %v13057_v23  ;;  %v13025_v40 = vld [vmem:[#allocation5 + $0x550] sm:$0xf] }
 0x1ac   :  { %v14171_v34 = vld [vmem:[#allocation5 + $0xe68] sm:$0xf0]  ;;  %v12737_v54 = vld [vmem:[#allocation5 + $0x310] sm:$0xf] }
 0x1ad   :  { %v18744_v37 = vld [vmem:[#allocation5 + $0x80c] sm:$0xf]  ;;  %v14174_v49 = vor.u32 %v18944_v33, %v14171_v34  ;;  %3705 = vmatpush.bf16.msrb.mxu2 %v13918_v41  ;;  %v12513_v33 = vld [vmem:[#allocation5 + $0x150] sm:$0xf] }
 0x1ae   :  { %v13371_v38 = vld [vmem:[#allocation5 + $0x828] sm:$0xf0]  ;;  %v18533_v34 = vld [vmem:[#allocation5 + $0x16c] sm:$0xf0] }
 0x1af   :  { %v18808_v46 = vld [vmem:[#allocation5 + $0xa0c] sm:$0xf]  ;;  %v13374_v57 = vor.u32 %v18744_v37, %v13371_v38  ;;  %3719 = vmatpush.bf16.msrb.mxu3 %v14174_v49  ;;  %v13314_v37 = vor.u32 %v18733_v26, %v13313_v25  ;;  %v18597_v38 = vld [vmem:[#allocation5 + $0x36c] sm:$0xf0]  ;;  %v20438_v49 = vpop.f32.mrf.mxu2 }
 0x1b0   :  { %v13627_v12 = vld [vmem:[#allocation5 + $0xa28] sm:$0xf0]  ;;  %v18661_v41 = vld [vmem:[#allocation5 + $0x56c] sm:$0xf0] }
 0x1b1   :  { %v18872_v48 = vld [vmem:[#allocation5 + $0xc0c] sm:$0xf]  ;;  %v13630_v63 = vor.u32 %v18808_v46, %v13627_v12  ;;  %3678 = vmatpush.bf16.msrb.mxu0 %v13374_v57  ;;  %v13281_v46 = vld [vmem:[#allocation5 + $0x750] sm:$0xf]  ;;  %v20440_v57 = vpop.f32.mrf.mxu3 }
 0x1b2   :  { %v13883_v50 = vld [vmem:[#allocation5 + $0xc28] sm:$0xf0]  ;;  %v18725_v12 = vld [vmem:[#allocation5 + $0x76c] sm:$0xf0] }
 0x1b3   :  { %v18936_v51 = vld [vmem:[#allocation5 + $0xe0c] sm:$0xf]  ;;  %v13886_v2 = vor.u32 %v18872_v48, %v13883_v50  ;;  %3692 = vmatpush.bf16.msrb.mxu1 %v13630_v63  ;;  %v12514_v48 = vor.u32 %v18533_v34, %v12513_v33  ;;  %v12770_v50 = vor.u32 %v18597_v38, %v12769_v35  ;;  %v13282_v55 = vor.u32 %v18725_v12, %v13281_v46  ;;  %v18589_v59 = vld [vmem:[#allocation5 + $0x32c] sm:$0xf0]  ;;  %v3456_v63 = vpop.f32.mrf.mxu0 }
 0x1b4   :  { %v14139_v52 = vld [vmem:[#allocation5 + $0xe28] sm:$0xf0]  ;;  %3679 = vmatmul.bf16.vlgmr.msrb.gmra.mxu0 %v20365_v39  ;;  %v18653_v62 = vld [vmem:[#allocation5 + $0x52c] sm:$0xf0]  ;;  %v3457_v5 = vadd.f32 %v3456_v63, %v20428_v27 }
 0x1b5   :  { %v14142_v6 = vor.u32 %v18936_v51, %v14139_v52  ;;  %3706 = vmatpush.bf16.msrb.mxu2 %v13886_v2  ;;  %3727 = vmatpush.bf16.msra.mxu0 %v12578_v7  ;;  %v13026_v51 = vor.u32 %v18661_v41, %v13025_v40  ;;  %v12481_v52 = vld [vmem:[#allocation5 + $0x110] sm:$0xf]  ;;  %v12738_v7 = vor.u32 %v18589_v59, %v12737_v54 }
 0x1b6   :  { %3693 = vmatmul.bf16.vlgmr.msrb.gmra.mxu1 %v20369_v44  ;;  %v13249_v2 = vld [vmem:[#allocation5 + $0x710] sm:$0xf] }
 0x1b7   :  { %3720 = vmatpush.bf16.msrb.mxu3 %v14142_v6  ;;  %3741 = vmatpush.bf16.msra.mxu1 %v12834_v9  ;;  %v18717_v4 = vld [vmem:[#allocation5 + $0x72c] sm:$0xf0]  ;;  %v12482_v6 = vor.u32 %v18525_v53, %v12481_v52  ;;  %v12994_v9 = vor.u32 %v18653_v62, %v12993_v61  ;;  %v3484_v38 = vpop.f32.mrf.mxu2 }
 0x1b8   :  { %3707 = vmatmul.bf16.vlgmr.msrb.gmra.mxu2 %v20367_v43  ;;  %v12449_v15 = vld [vmem:[#allocation5 + $0xd0] sm:$0xf] }
 0x1b9   :  { %3755 = vmatpush.bf16.msra.mxu2 %v13090_v13  ;;  %3728 = vmatpush.bf16.msra.mxu0 %v12546_v30  ;;  %v3470_v13 = vpop.f32.mrf.mxu1  ;;  %v18517_v16 = vld [vmem:[#allocation5 + $0xec] sm:$0xf0] }
 0x1ba   :  { %3721 = vmatmul.bf16.vlgmr.msrb.gmra.mxu3 %v20371_v47  ;;  %v12705_v18 = vld [vmem:[#allocation5 + $0x2d0] sm:$0xf]  ;;  %v3471_v21 = vadd.f32 %v3470_v13, %v3457_v5 }
 0x1bb   :  { %3769 = vmatpush.bf16.msra.mxu3 %v13346_v20  ;;  %3742 = vmatpush.bf16.msra.mxu1 %v12802_v31  ;;  %v13250_v20 = vor.u32 %v18717_v4, %v13249_v2  ;;  %v18581_v23 = vld [vmem:[#allocation5 + $0x2ec] sm:$0xf0]  ;;  %v12450_v31 = vor.u32 %v18517_v16, %v12449_v15 }
 0x1bc   :  { %v12961_v24 = vld [vmem:[#allocation5 + $0x4d0] sm:$0xf]  ;;  %v12706_v27 = vor.u32 %v18581_v23, %v12705_v18  ;;  %v3485_v12 = vadd.f32 %v3484_v38, %v3471_v21 }
 0x1bd   :  { %3756 = vmatpush.bf16.msra.mxu2 %v13058_v32  ;;  %3729 = vmatpush.bf16.msra.mxu0 %v12514_v48  ;;  %v18645_v25 = vld [vmem:[#allocation5 + $0x4ec] sm:$0xf0] }
 0x1be   :  { %v13217_v26 = vld [vmem:[#allocation5 + $0x6d0] sm:$0xf]  ;;  %v12962_v32 = vor.u32 %v18645_v25, %v12961_v24 }
 0x1bf   :  { %3770 = vmatpush.bf16.msra.mxu3 %v13314_v37  ;;  %3743 = vmatpush.bf16.msra.mxu1 %v12770_v50  ;;  %v18709_v30 = vld [vmem:[#allocation5 + $0x6ec] sm:$0xf0] }
 0x1c0   :  { %v12417_v33 = vld [vmem:[#allocation5 + $0x90] sm:$0xf]  ;;  %v13218_v37 = vor.u32 %v18709_v30, %v13217_v26 }
 0x1c1   :  { %3757 = vmatpush.bf16.msra.mxu2 %v13026_v51  ;;  %3730 = vmatpush.bf16.msra.mxu0 %v12482_v6  ;;  %v18509_v34 = vld [vmem:[#allocation5 + $0xac] sm:$0xf0]  ;;  %v3498_v51 = vpop.f32.mrf.mxu3 }
 0x1c2   :  { %v12673_v35 = vld [vmem:[#allocation5 + $0x290] sm:$0xf]  ;;  %v12418_v52 = vor.u32 %v18509_v34, %v12417_v33  ;;  %v20443_v53 = vadd.f32 %v3498_v51, %v3485_v12 }
 0x1c3   :  { %3771 = vmatpush.bf16.msra.mxu3 %v13282_v55  ;;  %3744 = vmatpush.bf16.msra.mxu1 %v12738_v7  ;;  %v18573_v40 = vld [vmem:[#allocation5 + $0x2ac] sm:$0xf0] }
 0x1c4   :  { %v12929_v41 = vld [vmem:[#allocation5 + $0x490] sm:$0xf]  ;;  %21261 = vst [vmem:[#allocation26_spill] sm:$0xff] %v20443_v53  ;;  %v12674_v54 = vor.u32 %v18573_v40, %v12673_v35  ;;  %v14083_v53 = vld [vmem:[#allocation5 + $0xdb0] sm:$0xf0] }
 0x1c5   :  { %3758 = vmatpush.bf16.msra.mxu2 %v12994_v9  ;;  %v18637_v46 = vld [vmem:[#allocation5 + $0x4ac] sm:$0xf0]  ;;  %3731 = vmatpush.bf16.msra.mxu0 %v12450_v31 }
 0x1c6   :  { %v13185_v48 = vld [vmem:[#allocation5 + $0x690] sm:$0xf]  ;;  %v12930_v55 = vor.u32 %v18637_v46, %v12929_v41 }
 0x1c7   :  { %3772 = vmatpush.bf16.msra.mxu3 %v13250_v20  ;;  %v18701_v50 = vld [vmem:[#allocation5 + $0x6ac] sm:$0xf0]  ;;  %3745 = vmatpush.bf16.msra.mxu1 %v12706_v27 }
 0x1c8   :  { %v12385_v59 = vld [vmem:[#allocation5 + $0x50] sm:$0xf]  ;;  %v13186_v63 = vor.u32 %v18701_v50, %v13185_v48 }
 0x1c9   :  { %3759 = vmatpush.bf16.msra.mxu2 %v12962_v32  ;;  %v18501_v61 = vld [vmem:[#allocation5 + $0x6c] sm:$0xf0]  ;;  %3732 = vmatpush.bf16.msra.mxu0 %v12418_v52 }
 0x1ca   :  { %v12641_v62 = vld [vmem:[#allocation5 + $0x250] sm:$0xf]  ;;  %v12386_v9 = vor.u32 %v18501_v61, %v12385_v59 }
 0x1cb   :  { %3773 = vmatpush.bf16.msra.mxu3 %v13218_v37  ;;  %v18565_v2 = vld [vmem:[#allocation5 + $0x26c] sm:$0xf0]  ;;  %3746 = vmatpush.bf16.msra.mxu1 %v12674_v54 }
 0x1cc   :  { %v12897_v4 = vld [vmem:[#allocation5 + $0x450] sm:$0xf]  ;;  %v12642_v16 = vor.u32 %v18565_v2, %v12641_v62  ;;  %v20445_v2 = vpop.f32.mrf.mxu0 }
 0x1cd   :  { %v18629_v5 = vld [vmem:[#allocation5 + $0x46c] sm:$0xf0]  ;;  %3760 = vmatpush.bf16.msra.mxu2 %v12930_v55  ;;  %3733 = vmatpush.bf16.msra.mxu0 %v12386_v9  ;;  %v20448_v9 = vpop.f32.mrf.mxu1 }
 0x1ce   :  { %v13153_v6 = vld [vmem:[#allocation5 + $0x650] sm:$0xf]  ;;  %v12898_v18 = vor.u32 %v18629_v5, %v12897_v4  ;;  %21262 = vst [vmem:[#allocation27_spill] sm:$0xff] %v20448_v9  ;;  %v12555_v9 = vld [vmem:[#allocation5 + $0x1b8] sm:$0xf0] }
 0x1cf   :  { %v18693_v7 = vld [vmem:[#allocation5 + $0x66c] sm:$0xf0]  ;;  %3774 = vmatpush.bf16.msra.mxu3 %v13186_v63  ;;  %3747 = vmatpush.bf16.msra.mxu1 %v12642_v16 }
 0x1d0   :  { %v12353_v13 = vld [vmem:[#allocation5 + $0x10] sm:$0xf]  ;;  %v13154_v24 = vor.u32 %v18693_v7, %v13153_v6  ;;  %v657_v7 = vperm.slane %v20385_v45, 4 }
 0x1d1   :  { %v18493_v15 = vld [vmem:[#allocation5 + $0x2c] sm:$0xf0]  ;;  %3761 = vmatpush.bf16.msra.mxu2 %v12898_v18 }
 0x1d2   :  { %v12609_v20 = vld [vmem:[#allocation5 + $0x210] sm:$0xf]  ;;  %v12354_v33 = vor.u32 %v18493_v15, %v12353_v13 }
 0x1d3   :  { %v18557_v21 = vld [vmem:[#allocation5 + $0x22c] sm:$0xf0]  ;;  %3775 = vmatpush.bf16.msra.mxu3 %v13154_v24 }
 0x1d4   :  { %v12865_v23 = vld [vmem:[#allocation5 + $0x410] sm:$0xf]  ;;  %v12610_v38 = vor.u32 %v18557_v21, %v12609_v20  ;;  %3734 = vmatpush.bf16.msra.mxu0 %v12354_v33 }
 0x1d5   :  { %v18621_v25 = vld [vmem:[#allocation5 + $0x42c] sm:$0xf0] }
 0x1d6   :  { %v13121_v26 = vld [vmem:[#allocation5 + $0x610] sm:$0xf]  ;;  %v12866_v40 = vor.u32 %v18621_v25, %v12865_v23  ;;  %3748 = vmatpush.bf16.msra.mxu1 %v12610_v38  ;;  %v20456_v38 = vpop.f32.mrf.mxu2 }
 0x1d7   :  { %v18685_v30 = vld [vmem:[#allocation5 + $0x62c] sm:$0xf0]  ;;  %3735 = vmatmul.bf16.vlgmr.msra.gmra.mxu0 %v20353_v58  ;;  %21263 = vst [vmem:[#allocation28_spill] sm:$0xff] %v20456_v38 }
 0x1d8   :  { %v13601_v31 = vld [vmem:[#allocation5 + $0x9d0] sm:$0xf]  ;;  %v13122_v12 = vor.u32 %v18685_v30, %v13121_v26  ;;  %3762 = vmatpush.bf16.msra.mxu2 %v12866_v40 }
 0x1d9   :  { %v18805_v27 = vld [vmem:[#allocation5 + $0x9ec] sm:$0xf0]  ;;  %3749 = vmatmul.bf16.vlgmr.msra.gmra.mxu1 %v20359_v10 }
 0x1da   :  { %v13857_v32 = vld [vmem:[#allocation5 + $0xbd0] sm:$0xf]  ;;  %v13602_v48 = vor.u32 %v18805_v27, %v13601_v31  ;;  %3776 = vmatpush.bf16.msra.mxu3 %v13122_v12  ;;  %v20454_v27 = vperm.slane %v657_v7, 0 }
 0x1db   :  { %v18869_v34 = vld [vmem:[#allocation5 + $0xbec] sm:$0xf0]  ;;  %3763 = vmatmul.bf16.vlgmr.msra.gmra.mxu2 %v20355_v1 }
 0x1dc   :  { %v14113_v35 = vld [vmem:[#allocation5 + $0xdd0] sm:$0xf]  ;;  %v13858_v50 = vor.u32 %v18869_v34, %v13857_v32  ;;  %3783 = vmatpush.bf16.msrb.mxu0 %v13602_v48 }
 0x1dd   :  { %v18933_v37 = vld [vmem:[#allocation5 + $0xdec] sm:$0xf0]  ;;  %3777 = vmatmul.bf16.vlgmr.msra.gmra.mxu3 %v20361_v17 }
 0x1de   :  { %v14369_v41 = vld [vmem:[#allocation5 + $0xfd0] sm:$0xf]  ;;  %v14114_v51 = vor.u32 %v18933_v37, %v14113_v35  ;;  %3797 = vmatpush.bf16.msrb.mxu1 %v13858_v50 }
 0x1df   :  { %v18997_v46 = vld [vmem:[#allocation5 + $0xfec] sm:$0xf0] }
 0x1e0   :  { %v13569_v52 = vld [vmem:[#allocation5 + $0x990] sm:$0xf]  ;;  %v14370_v59 = vor.u32 %v18997_v46, %v14369_v41  ;;  %3811 = vmatpush.bf16.msrb.mxu2 %v14114_v51  ;;  %v3512_v51 = vpop.f32.mrf.mxu0 }
 0x1e1   :  { %v18797_v54 = vld [vmem:[#allocation5 + $0x9ac] sm:$0xf0] }
 0x1e2   :  { %v13825_v55 = vld [vmem:[#allocation5 + $0xb90] sm:$0xf]  ;;  %v13570_v6 = vor.u32 %v18797_v54, %v13569_v52  ;;  %3825 = vmatpush.bf16.msrb.mxu3 %v14370_v59  ;;  %v20458_v52 = vpop.f32.mrf.mxu3 }
 0x1e3   :  { %v18861_v61 = vld [vmem:[#allocation5 + $0xbac] sm:$0xf0]  ;;  %21264 = vst [vmem:[#allocation29_spill] sm:$0xff] %v20458_v52  ;;  %v18546_v52 = vld [vmem:[#allocation5 + $0x1dc] sm:$0xf] }
 0x1e4   :  { %v14081_v62 = vld [vmem:[#allocation5 + $0xd90] sm:$0xf]  ;;  %v13826_v13 = vor.u32 %v18861_v61, %v13825_v55  ;;  %3784 = vmatpush.bf16.msrb.mxu0 %v13570_v6  ;;  %v3513_v55 = vadd.f32 %v3512_v51, %v20454_v27 }
 0x1e5   :  { %v18925_v63 = vld [vmem:[#allocation5 + $0xdac] sm:$0xf0] }
 0x1e6   :  { %v14337_v4 = vld [vmem:[#allocation5 + $0xf90] sm:$0xf]  ;;  %v14082_v15 = vor.u32 %v18925_v63, %v14081_v62  ;;  %3798 = vmatpush.bf16.msrb.mxu1 %v13826_v13 }
 0x1e7   :  { %v18989_v5 = vld [vmem:[#allocation5 + $0xfac] sm:$0xf0] }
 0x1e8   :  { %v13537_v16 = vld [vmem:[#allocation5 + $0x950] sm:$0xf]  ;;  %v14338_v21 = vor.u32 %v18989_v5, %v14337_v4  ;;  %3812 = vmatpush.bf16.msrb.mxu2 %v14082_v15  ;;  %v3526_v5 = vpop.f32.mrf.mxu1 }
 0x1e9   :  { %v18789_v18 = vld [vmem:[#allocation5 + $0x96c] sm:$0xf0] }
 0x1ea   :  { %v13793_v20 = vld [vmem:[#allocation5 + $0xb50] sm:$0xf]  ;;  %v13538_v31 = vor.u32 %v18789_v18, %v13537_v16  ;;  %3826 = vmatpush.bf16.msrb.mxu3 %v14338_v21  ;;  %v3527_v16 = vadd.f32 %v3526_v5, %v3513_v55 }
 0x1eb   :  { %v18853_v23 = vld [vmem:[#allocation5 + $0xb6c] sm:$0xf0] }
 0x1ec   :  { %v14049_v24 = vld [vmem:[#allocation5 + $0xd50] sm:$0xf]  ;;  %v13794_v32 = vor.u32 %v18853_v23, %v13793_v20  ;;  %3785 = vmatpush.bf16.msrb.mxu0 %v13538_v31 }
 0x1ed   :  { %v18917_v25 = vld [vmem:[#allocation5 + $0xd6c] sm:$0xf0] }
 0x1ee   :  { %v14305_v26 = vld [vmem:[#allocation5 + $0xf50] sm:$0xf]  ;;  %v14050_v33 = vor.u32 %v18917_v25, %v14049_v24  ;;  %3799 = vmatpush.bf16.msrb.mxu1 %v13794_v32 }
 0x1ef   :  { %v18981_v30 = vld [vmem:[#allocation5 + $0xf6c] sm:$0xf0] }
 0x1f0   :  { %v13505_v34 = vld [vmem:[#allocation5 + $0x910] sm:$0xf]  ;;  %v14306_v40 = vor.u32 %v18981_v30, %v14305_v26  ;;  %3813 = vmatpush.bf16.msrb.mxu2 %v14050_v33 }
 0x1f1   :  { %v18781_v35 = vld [vmem:[#allocation5 + $0x92c] sm:$0xf0] }
 0x1f2   :  { %v13761_v37 = vld [vmem:[#allocation5 + $0xb10] sm:$0xf]  ;;  %v13506_v54 = vor.u32 %v18781_v35, %v13505_v34  ;;  %3827 = vmatpush.bf16.msrb.mxu3 %v14306_v40  ;;  %v3540_v35 = vpop.f32.mrf.mxu2 }
 0x1f3   :  { %v18845_v41 = vld [vmem:[#allocation5 + $0xb2c] sm:$0xf0] }
 0x1f4   :  { %v14017_v46 = vld [vmem:[#allocation5 + $0xd10] sm:$0xf]  ;;  %v13762_v59 = vor.u32 %v18845_v41, %v13761_v37  ;;  %3786 = vmatpush.bf16.msrb.mxu0 %v13506_v54  ;;  %v3541_v41 = vadd.f32 %v3540_v35, %v3527_v16  ;;  %v12835_v35 = vld [vmem:[#allocation5 + $0x3f0] sm:$0xf0] }
 0x1f5   :  { %v18909_v12 = vld [vmem:[#allocation5 + $0xd2c] sm:$0xf0] }
 0x1f6   :  { %v14273_v48 = vld [vmem:[#allocation5 + $0xf10] sm:$0xf]  ;;  %v14018_v61 = vor.u32 %v18909_v12, %v14017_v46  ;;  %3800 = vmatpush.bf16.msrb.mxu1 %v13762_v59  ;;  %v3554_v12 = vpop.f32.mrf.mxu3 }
 0x1f7   :  { %v18973_v50 = vld [vmem:[#allocation5 + $0xf2c] sm:$0xf0]  ;;  %v20461_v59 = vadd.f32 %v3554_v12, %v3541_v41  ;;  %v18737_v12 = vld [vmem:[#allocation5 + $0x7d4] sm:$0xf] }
 0x1f8   :  { %v13473_v62 = vld [vmem:[#allocation5 + $0x8d0] sm:$0xf]  ;;  %v14274_v6 = vor.u32 %v18973_v50, %v14273_v48  ;;  %3814 = vmatpush.bf16.msrb.mxu2 %v14018_v61 }
 0x1f9   :  { %v18773_v63 = vld [vmem:[#allocation5 + $0x8ec] sm:$0xf0] }
 0x1fa   :  { %v13729_v4 = vld [vmem:[#allocation5 + $0xad0] sm:$0xf]  ;;  %v13474_v21 = vor.u32 %v18773_v63, %v13473_v62  ;;  %3828 = vmatpush.bf16.msrb.mxu3 %v14274_v6 }
 0x1fb   :  { %v18837_v7 = vld [vmem:[#allocation5 + $0xaec] sm:$0xf0] }
 0x1fc   :  { %v13985_v13 = vld [vmem:[#allocation5 + $0xcd0] sm:$0xf]  ;;  %v13730_v23 = vor.u32 %v18837_v7, %v13729_v4  ;;  %3787 = vmatpush.bf16.msrb.mxu0 %v13474_v21 }
 0x1fd   :  { %v18901_v15 = vld [vmem:[#allocation5 + $0xcec] sm:$0xf0] }
 0x1fe   :  { %v14241_v18 = vld [vmem:[#allocation5 + $0xed0] sm:$0xf]  ;;  %v13986_v24 = vor.u32 %v18901_v15, %v13985_v13  ;;  %3801 = vmatpush.bf16.msrb.mxu1 %v13730_v23 }
 0x1ff   :  { %v18965_v20 = vld [vmem:[#allocation5 + $0xeec] sm:$0xf0] }
 0x200   :  { %v13441_v25 = vld [vmem:[#allocation5 + $0x890] sm:$0xf]  ;;  %v14242_v31 = vor.u32 %v18965_v20, %v14241_v18  ;;  %3815 = vmatpush.bf16.msrb.mxu2 %v13986_v24 }
 0x201   :  { %v18765_v26 = vld [vmem:[#allocation5 + $0x8ac] sm:$0xf0] }
 0x202   :  { %v13697_v30 = vld [vmem:[#allocation5 + $0xa90] sm:$0xf]  ;;  %v13442_v46 = vor.u32 %v18765_v26, %v13441_v25  ;;  %3829 = vmatpush.bf16.msrb.mxu3 %v14242_v31  ;;  %v18545_v31 = vld [vmem:[#allocation5 + $0x1d4] sm:$0xf] }
 0x203   :  { %v18829_v32 = vld [vmem:[#allocation5 + $0xaac] sm:$0xf0] }
 0x204   :  { %v13953_v33 = vld [vmem:[#allocation5 + $0xc90] sm:$0xf]  ;;  %v13698_v48 = vor.u32 %v18829_v32, %v13697_v30  ;;  %3788 = vmatpush.bf16.msrb.mxu0 %v13442_v46  ;;  %v12579_v32 = vld [vmem:[#allocation5 + $0x1f0] sm:$0xf0] }
 0x205   :  { %v18893_v34 = vld [vmem:[#allocation5 + $0xcac] sm:$0xf0] }
 0x206   :  { %v14209_v37 = vld [vmem:[#allocation5 + $0xe90] sm:$0xf]  ;;  %v13954_v50 = vor.u32 %v18893_v34, %v13953_v33  ;;  %3802 = vmatpush.bf16.msrb.mxu1 %v13698_v48  ;;  %v18609_v33 = vld [vmem:[#allocation5 + $0x3d4] sm:$0xf] }
 0x207   :  { %v18957_v40 = vld [vmem:[#allocation5 + $0xeac] sm:$0xf0]  ;;  %v13347_v48 = vld [vmem:[#allocation5 + $0x7f0] sm:$0xf0] }
 0x208   :  { %v13409_v51 = vld [vmem:[#allocation5 + $0x850] sm:$0xf]  ;;  %v14210_v61 = vor.u32 %v18957_v40, %v14209_v37  ;;  %3816 = vmatpush.bf16.msrb.mxu2 %v13954_v50  ;;  %v18673_v37 = vld [vmem:[#allocation5 + $0x5d4] sm:$0xf] }
 0x209   :  { %v18757_v54 = vld [vmem:[#allocation5 + $0x86c] sm:$0xf0]  ;;  %v13091_v40 = vld [vmem:[#allocation5 + $0x5f0] sm:$0xf0] }
 0x20a   :  { %v13665_v55 = vld [vmem:[#allocation5 + $0xa50] sm:$0xf]  ;;  %v13410_v7 = vor.u32 %v18757_v54, %v13409_v51  ;;  %3830 = vmatpush.bf16.msrb.mxu3 %v14210_v61  ;;  %v12582_v51 = vor.u32 %v18545_v31, %v12579_v32  ;;  %v12838_v54 = vor.u32 %v18609_v33, %v12835_v35  ;;  %v20463_v61 = vpop.f32.mrf.mxu0  ;;  %v12771_v31 = vld [vmem:[#allocation5 + $0x370] sm:$0xf0] }
 0x20b   :  { %v18821_v62 = vld [vmem:[#allocation5 + $0xa6c] sm:$0xf0]  ;;  %v18657_v32 = vld [vmem:[#allocation5 + $0x554] sm:$0xf] }
 0x20c   :  { %v13921_v63 = vld [vmem:[#allocation5 + $0xc50] sm:$0xf]  ;;  %v13666_v16 = vor.u32 %v18821_v62, %v13665_v55  ;;  %3789 = vmatpush.bf16.msrb.mxu0 %v13410_v7  ;;  %v13094_v55 = vor.u32 %v18673_v37, %v13091_v40  ;;  %v18537_v62 = vld [vmem:[#allocation5 + $0x194] sm:$0xf]  ;;  %v20471_v40 = vpop.f32.mrf.mxu2 }
 0x20d   :  { %v18885_v4 = vld [vmem:[#allocation5 + $0xc6c] sm:$0xf0]  ;;  %v18665_v7 = vld [vmem:[#allocation5 + $0x594] sm:$0xf] }
 0x20e   :  { %v14177_v5 = vld [vmem:[#allocation5 + $0xe50] sm:$0xf]  ;;  %v13922_v18 = vor.u32 %v18885_v4, %v13921_v63  ;;  %3803 = vmatpush.bf16.msrb.mxu1 %v13666_v16  ;;  %v12547_v63 = vld [vmem:[#allocation5 + $0x1b0] sm:$0xf0] }
 0x20f   :  { %v18949_v6 = vld [vmem:[#allocation5 + $0xe6c] sm:$0xf0]  ;;  %v18601_v4 = vld [vmem:[#allocation5 + $0x394] sm:$0xf] }
 0x210   :  { %v13377_v13 = vld [vmem:[#allocation5 + $0x810] sm:$0xf]  ;;  %v14178_v24 = vor.u32 %v18949_v6, %v14177_v5  ;;  %3817 = vmatpush.bf16.msrb.mxu2 %v13922_v18  ;;  %v13350_v5 = vor.u32 %v18737_v12, %v13347_v48  ;;  %v12803_v6 = vld [vmem:[#allocation5 + $0x3b0] sm:$0xf0]  ;;  %v20465_v18 = vpop.f32.mrf.mxu1 }
 0x211   :  { %v18749_v15 = vld [vmem:[#allocation5 + $0x82c] sm:$0xf0]  ;;  %v13315_v16 = vld [vmem:[#allocation5 + $0x7b0] sm:$0xf0] }
 0x212   :  { %v13633_v20 = vld [vmem:[#allocation5 + $0xa10] sm:$0xf]  ;;  %v13378_v34 = vor.u32 %v18749_v15, %v13377_v13  ;;  %3831 = vmatpush.bf16.msrb.mxu3 %v14178_v24  ;;  %v13059_v13 = vld [vmem:[#allocation5 + $0x5b0] sm:$0xf0] }
 0x213   :  { %v18813_v21 = vld [vmem:[#allocation5 + $0xa2c] sm:$0xf0]  ;;  %v18729_v15 = vld [vmem:[#allocation5 + $0x794] sm:$0xf] }
 0x214   :  { %v13889_v23 = vld [vmem:[#allocation5 + $0xc10] sm:$0xf]  ;;  %v13634_v41 = vor.u32 %v18813_v21, %v13633_v20  ;;  %3790 = vmatpush.bf16.msrb.mxu0 %v13378_v34  ;;  %v12550_v20 = vor.u32 %v18537_v62, %v12547_v63  ;;  %v12806_v21 = vor.u32 %v18601_v4, %v12803_v6  ;;  %v18529_v24 = vld [vmem:[#allocation5 + $0x154] sm:$0xf]  ;;  %v3568_v4 = vpop.f32.mrf.mxu0 }
 0x215   :  { %v18877_v25 = vld [vmem:[#allocation5 + $0xc2c] sm:$0xf0]  ;;  %v13027_v33 = vld [vmem:[#allocation5 + $0x570] sm:$0xf0] }
 0x216   :  { %v14145_v26 = vld [vmem:[#allocation5 + $0xe10] sm:$0xf]  ;;  %v13890_v46 = vor.u32 %v18877_v25, %v13889_v23  ;;  %3804 = vmatpush.bf16.msrb.mxu1 %v13634_v41  ;;  %v13062_v23 = vor.u32 %v18665_v7, %v13059_v13  ;;  %v12515_v25 = vld [vmem:[#allocation5 + $0x170] sm:$0xf0]  ;;  %v3569_v7 = vadd.f32 %v3568_v4, %v20461_v59 }
 0x217   :  { %v18941_v30 = vld [vmem:[#allocation5 + $0xe2c] sm:$0xf0]  ;;  %3791 = vmatmul.bf16.vlgmr.msrb.gmra.mxu0 %v20365_v39  ;;  %v18721_v34 = vld [vmem:[#allocation5 + $0x754] sm:$0xf]  ;;  %v12518_v37 = vor.u32 %v18529_v24, %v12515_v25 }
 0x218   :  { %v14146_v50 = vor.u32 %v18941_v30, %v14145_v26  ;;  %3818 = vmatpush.bf16.msrb.mxu2 %v13890_v46  ;;  %3839 = vmatpush.bf16.msra.mxu0 %v12582_v51  ;;  %v18593_v26 = vld [vmem:[#allocation5 + $0x354] sm:$0xf]  ;;  %v13318_v30 = vor.u32 %v18729_v15, %v13315_v16  ;;  %v13030_v46 = vor.u32 %v18657_v32, %v13027_v33 }
 0x219   :  { %3805 = vmatmul.bf16.vlgmr.msrb.gmra.mxu1 %v20369_v44  ;;  %v13283_v35 = vld [vmem:[#allocation5 + $0x770] sm:$0xf0]  ;;  %v12774_v41 = vor.u32 %v18593_v26, %v12771_v31 }
 0x21a   :  { %3832 = vmatpush.bf16.msrb.mxu3 %v14146_v50  ;;  %3853 = vmatpush.bf16.msra.mxu1 %v12838_v54  ;;  %v18521_v12 = vld [vmem:[#allocation5 + $0x114] sm:$0xf]  ;;  %v13286_v51 = vor.u32 %v18721_v34, %v13283_v35  ;;  %v20473_v54 = vpop.f32.mrf.mxu3 }
 0x21b   :  { %3819 = vmatmul.bf16.vlgmr.msrb.gmra.mxu2 %v20367_v43  ;;  %v12483_v48 = vld [vmem:[#allocation5 + $0x130] sm:$0xf0]  ;;  %21265 = vst [vmem:[#allocation30_spill] sm:$0xff] %v20473_v54 }
 0x21c   :  { %3867 = vmatpush.bf16.msra.mxu2 %v13094_v55  ;;  %3840 = vmatpush.bf16.msra.mxu0 %v12550_v20  ;;  %v18585_v50 = vld [vmem:[#allocation5 + $0x314] sm:$0xf]  ;;  %v12486_v13 = vor.u32 %v18521_v12, %v12483_v48  ;;  %v3582_v20 = vpop.f32.mrf.mxu1 }
 0x21d   :  { %3833 = vmatmul.bf16.vlgmr.msrb.gmra.mxu3 %v20371_v47  ;;  %v12739_v55 = vld [vmem:[#allocation5 + $0x330] sm:$0xf0]  ;;  %v3583_v26 = vadd.f32 %v3582_v20, %v3569_v7 }
 0x21e   :  { %3881 = vmatpush.bf16.msra.mxu3 %v13350_v5  ;;  %3854 = vmatpush.bf16.msra.mxu1 %v12806_v21  ;;  %v18649_v62 = vld [vmem:[#allocation5 + $0x514] sm:$0xf]  ;;  %v12742_v15 = vor.u32 %v18585_v50, %v12739_v55  ;;  %v3596_v50 = vpop.f32.mrf.mxu2 }
 0x21f   :  { %v12995_v63 = vld [vmem:[#allocation5 + $0x530] sm:$0xf0] }
 0x220   :  { %3868 = vmatpush.bf16.msra.mxu2 %v13062_v23  ;;  %v18713_v5 = vld [vmem:[#allocation5 + $0x714] sm:$0xf]  ;;  %3841 = vmatpush.bf16.msra.mxu0 %v12518_v37  ;;  %v12998_v16 = vor.u32 %v18649_v62, %v12995_v63  ;;  %v3597_v63 = vadd.f32 %v3596_v50, %v3583_v26 }
 0x221   :  { %v13251_v6 = vld [vmem:[#allocation5 + $0x730] sm:$0xf0] }
 0x222   :  { %3882 = vmatpush.bf16.msra.mxu3 %v13318_v30  ;;  %3855 = vmatpush.bf16.msra.mxu1 %v12774_v41  ;;  %v18513_v21 = vld [vmem:[#allocation5 + $0xd4] sm:$0xf]  ;;  %v13254_v25 = vor.u32 %v18713_v5, %v13251_v6  ;;  %v3610_v6 = vpop.f32.mrf.mxu3 }
 0x223   :  { %v12451_v23 = vld [vmem:[#allocation5 + $0xf0] sm:$0xf0] }
 0x224   :  { %3869 = vmatpush.bf16.msra.mxu2 %v13030_v46  ;;  %v18577_v24 = vld [vmem:[#allocation5 + $0x2d4] sm:$0xf]  ;;  %3842 = vmatpush.bf16.msra.mxu0 %v12486_v13  ;;  %v12454_v35 = vor.u32 %v18513_v21, %v12451_v23  ;;  %v20476_v13 = vadd.f32 %v3610_v6, %v3597_v63 }
 0x225   :  { %v12707_v30 = vld [vmem:[#allocation5 + $0x2f0] sm:$0xf0] }
 0x226   :  { %3883 = vmatpush.bf16.msra.mxu3 %v13286_v51  ;;  %v18641_v31 = vld [vmem:[#allocation5 + $0x4d4] sm:$0xf]  ;;  %3856 = vmatpush.bf16.msra.mxu1 %v12742_v15  ;;  %v12710_v59 = vor.u32 %v18577_v24, %v12707_v30  ;;  %21266 = vst [vmem:[#allocation31_spill] sm:$0xff] %v20476_v13 }
 0x227   :  { %v12963_v32 = vld [vmem:[#allocation5 + $0x4f0] sm:$0xf0] }
 0x228   :  { %v18705_v33 = vld [vmem:[#allocation5 + $0x6d4] sm:$0xf]  ;;  %3870 = vmatpush.bf16.msra.mxu2 %v12998_v16  ;;  %v12966_v37 = vor.u32 %v18641_v31, %v12963_v32  ;;  %3843 = vmatpush.bf16.msra.mxu0 %v12454_v35 }
 0x229   :  { %v13219_v34 = vld [vmem:[#allocation5 + $0x6f0] sm:$0xf0] }
 0x22a   :  { %v18505_v41 = vld [vmem:[#allocation5 + $0x94] sm:$0xf]  ;;  %3884 = vmatpush.bf16.msra.mxu3 %v13254_v25  ;;  %v13222_v48 = vor.u32 %v18705_v33, %v13219_v34  ;;  %3857 = vmatpush.bf16.msra.mxu1 %v12710_v59 }
 0x22b   :  { %v12419_v46 = vld [vmem:[#allocation5 + $0xb0] sm:$0xf0] }
 0x22c   :  { %v18569_v12 = vld [vmem:[#allocation5 + $0x294] sm:$0xf]  ;;  %v12422_v7 = vor.u32 %v18505_v41, %v12419_v46  ;;  %3871 = vmatpush.bf16.msra.mxu2 %v12966_v37 }
 0x22d   :  { %v12675_v51 = vld [vmem:[#allocation5 + $0x2b0] sm:$0xf0] }
 0x22e   :  { %v18633_v55 = vld [vmem:[#allocation5 + $0x494] sm:$0xf]  ;;  %v12678_v15 = vor.u32 %v18569_v12, %v12675_v51  ;;  %3885 = vmatpush.bf16.msra.mxu3 %v13222_v48  ;;  %3844 = vmatpush.bf16.msra.mxu0 %v12422_v7 }
 0x22f   :  { %v12931_v62 = vld [vmem:[#allocation5 + $0x4b0] sm:$0xf0] }
 0x230   :  { %v18697_v4 = vld [vmem:[#allocation5 + $0x694] sm:$0xf]  ;;  %v12934_v16 = vor.u32 %v18633_v55, %v12931_v62  ;;  %3858 = vmatpush.bf16.msra.mxu1 %v12678_v15 }
 0x231   :  { %v13187_v5 = vld [vmem:[#allocation5 + $0x6b0] sm:$0xf0] }
 0x232   :  { %v18497_v20 = vld [vmem:[#allocation5 + $0x54] sm:$0xf]  ;;  %v13190_v24 = vor.u32 %v18697_v4, %v13187_v5  ;;  %3872 = vmatpush.bf16.msra.mxu2 %v12934_v16 }
 0x233   :  { %v12387_v21 = vld [vmem:[#allocation5 + $0x70] sm:$0xf0] }
 0x234   :  { %v18561_v23 = vld [vmem:[#allocation5 + $0x254] sm:$0xf]  ;;  %v12390_v33 = vor.u32 %v18497_v20, %v12387_v21  ;;  %3886 = vmatpush.bf16.msra.mxu3 %v13190_v24 }
 0x235   :  { %v12643_v25 = vld [vmem:[#allocation5 + $0x270] sm:$0xf0] }
 0x236   :  { %v18625_v30 = vld [vmem:[#allocation5 + $0x454] sm:$0xf]  ;;  %v12646_v59 = vor.u32 %v18561_v23, %v12643_v25  ;;  %3845 = vmatpush.bf16.msra.mxu0 %v12390_v33 }
 0x237   :  { %v12899_v31 = vld [vmem:[#allocation5 + $0x470] sm:$0xf0] }
 0x238   :  { %v18689_v26 = vld [vmem:[#allocation5 + $0x654] sm:$0xf]  ;;  %v12902_v37 = vor.u32 %v18625_v30, %v12899_v31  ;;  %3859 = vmatpush.bf16.msra.mxu1 %v12646_v59 }
 0x239   :  { %v13155_v32 = vld [vmem:[#allocation5 + $0x670] sm:$0xf0] }
 0x23a   :  { %v18489_v34 = vld [vmem:[#allocation5 + $0x14] sm:$0xf]  ;;  %v13158_v50 = vor.u32 %v18689_v26, %v13155_v32  ;;  %3873 = vmatpush.bf16.msra.mxu2 %v12902_v37 }
 0x23b   :  { %v12355_v35 = vld [vmem:[#allocation5 + $0x30] sm:$0xf0] }
 0x23c   :  { %v18553_v41 = vld [vmem:[#allocation5 + $0x214] sm:$0xf]  ;;  %v12358_v5 = vor.u32 %v18489_v34, %v12355_v35  ;;  %3887 = vmatpush.bf16.msra.mxu3 %v13158_v50 }
 0x23d   :  { %v12611_v46 = vld [vmem:[#allocation5 + $0x230] sm:$0xf0] }
 0x23e   :  { %v18617_v12 = vld [vmem:[#allocation5 + $0x414] sm:$0xf]  ;;  %v12614_v15 = vor.u32 %v18553_v41, %v12611_v46  ;;  %3846 = vmatpush.bf16.msra.mxu0 %v12358_v5 }
 0x23f   :  { %v12867_v48 = vld [vmem:[#allocation5 + $0x430] sm:$0xf0] }
 0x240   :  { %v18681_v51 = vld [vmem:[#allocation5 + $0x614] sm:$0xf]  ;;  %v12870_v16 = vor.u32 %v18617_v12, %v12867_v48  ;;  %3860 = vmatpush.bf16.msra.mxu1 %v12614_v15 }
 0x241   :  { %v13123_v55 = vld [vmem:[#allocation5 + $0x630] sm:$0xf0]  ;;  %3847 = vmatmul.bf16.vlgmr.msra.gmra.mxu0 %v20353_v58 }
 0x242   :  { %v18801_v62 = vld [vmem:[#allocation5 + $0x9d4] sm:$0xf]  ;;  %v13126_v24 = vor.u32 %v18681_v51, %v13123_v55  ;;  %3874 = vmatpush.bf16.msra.mxu2 %v12870_v16 }
 0x243   :  { %v13603_v63 = vld [vmem:[#allocation5 + $0x9f0] sm:$0xf0]  ;;  %3861 = vmatmul.bf16.vlgmr.msra.gmra.mxu1 %v20359_v10 }
 0x244   :  { %v18865_v4 = vld [vmem:[#allocation5 + $0xbd4] sm:$0xf]  ;;  %v13606_v25 = vor.u32 %v18801_v62, %v13603_v63  ;;  %3888 = vmatpush.bf16.msra.mxu3 %v13126_v24 }
 0x245   :  { %v13859_v6 = vld [vmem:[#allocation5 + $0xbf0] sm:$0xf0]  ;;  %3875 = vmatmul.bf16.vlgmr.msra.gmra.mxu2 %v20355_v1 }
 0x246   :  { %v18929_v7 = vld [vmem:[#allocation5 + $0xdd4] sm:$0xf]  ;;  %v13862_v30 = vor.u32 %v18865_v4, %v13859_v6  ;;  %3895 = vmatpush.bf16.msrb.mxu0 %v13606_v25 }
 0x247   :  { %v14115_v20 = vld [vmem:[#allocation5 + $0xdf0] sm:$0xf0]  ;;  %3889 = vmatmul.bf16.vlgmr.msra.gmra.mxu3 %v20361_v17 }
 0x248   :  { %v18993_v21 = vld [vmem:[#allocation5 + $0xfd4] sm:$0xf]  ;;  %v14118_v31 = vor.u32 %v18929_v7, %v14115_v20  ;;  %3909 = vmatpush.bf16.msrb.mxu1 %v13862_v30 }
 0x249   :  { %v14371_v23 = vld [vmem:[#allocation5 + $0xff0] sm:$0xf0] }
 0x24a   :  { %v18793_v26 = vld [vmem:[#allocation5 + $0x994] sm:$0xf]  ;;  %v14374_v33 = vor.u32 %v18993_v21, %v14371_v23  ;;  %3923 = vmatpush.bf16.msrb.mxu2 %v14118_v31 }
 0x24b   :  { %v13571_v32 = vld [vmem:[#allocation5 + $0x9b0] sm:$0xf0] }
 0x24c   :  { %v18857_v13 = vld [vmem:[#allocation5 + $0xb94] sm:$0xf]  ;;  %v13574_v41 = vor.u32 %v18793_v26, %v13571_v32  ;;  %3937 = vmatpush.bf16.msrb.mxu3 %v14374_v33 }
 0x24d   :  { %v13827_v34 = vld [vmem:[#allocation5 + $0xbb0] sm:$0xf0] }
 0x24e   :  { %v18921_v35 = vld [vmem:[#allocation5 + $0xd94] sm:$0xf]  ;;  %v13830_v46 = vor.u32 %v18857_v13, %v13827_v34  ;;  %3896 = vmatpush.bf16.msrb.mxu0 %v13574_v41 }
 0x24f   :  { %v18985_v59 = vld [vmem:[#allocation5 + $0xf94] sm:$0xf]  ;;  %v14086_v12 = vor.u32 %v18921_v35, %v14083_v53 }
 0x250   :  { %v14339_v37 = vld [vmem:[#allocation5 + $0xfb0] sm:$0xf0]  ;;  %3910 = vmatpush.bf16.msrb.mxu1 %v13830_v46 }
 0x251   :  { %v18785_v50 = vld [vmem:[#allocation5 + $0x954] sm:$0xf]  ;;  %v14342_v55 = vor.u32 %v18985_v59, %v14339_v37  ;;  %3924 = vmatpush.bf16.msrb.mxu2 %v14086_v12 }
 0x252   :  { %v13539_v48 = vld [vmem:[#allocation5 + $0x970] sm:$0xf0] }
 0x253   :  { %v18849_v51 = vld [vmem:[#allocation5 + $0xb54] sm:$0xf]  ;;  %v13542_v7 = vor.u32 %v18785_v50, %v13539_v48  ;;  %3938 = vmatpush.bf16.msrb.mxu3 %v14342_v55 }
 0x254   :  { %v13795_v62 = vld [vmem:[#allocation5 + $0xb70] sm:$0xf0] }
 0x255   :  { %v18913_v63 = vld [vmem:[#allocation5 + $0xd54] sm:$0xf]  ;;  %v13798_v53 = vor.u32 %v18849_v51, %v13795_v62  ;;  %3897 = vmatpush.bf16.msrb.mxu0 %v13542_v7 }
 0x256   :  { %v14051_v4 = vld [vmem:[#allocation5 + $0xd70] sm:$0xf0] }
 0x257   :  { %v18977_v5 = vld [vmem:[#allocation5 + $0xf54] sm:$0xf]  ;;  %v14054_v13 = vor.u32 %v18913_v63, %v14051_v4  ;;  %3911 = vmatpush.bf16.msrb.mxu1 %v13798_v53 }
 0x258   :  { %v14307_v6 = vld [vmem:[#allocation5 + $0xf70] sm:$0xf0] }
 0x259   :  { %v18777_v20 = vld [vmem:[#allocation5 + $0x914] sm:$0xf]  ;;  %v14310_v21 = vor.u32 %v18977_v5, %v14307_v6  ;;  %3925 = vmatpush.bf16.msrb.mxu2 %v14054_v13 }
 0x25a   :  { %v13507_v15 = vld [vmem:[#allocation5 + $0x930] sm:$0xf0] }
 0x25b   :  { %v18841_v16 = vld [vmem:[#allocation5 + $0xb14] sm:$0xf]  ;;  %v13510_v26 = vor.u32 %v18777_v20, %v13507_v15  ;;  %3939 = vmatpush.bf16.msrb.mxu3 %v14310_v21 }
 0x25c   :  { %v13763_v23 = vld [vmem:[#allocation5 + $0xb30] sm:$0xf0] }
 0x25d   :  { %v18905_v24 = vld [vmem:[#allocation5 + $0xd14] sm:$0xf]  ;;  %v13766_v32 = vor.u32 %v18841_v16, %v13763_v23  ;;  %3898 = vmatpush.bf16.msrb.mxu0 %v13510_v26 }
 0x25e   :  { %v14019_v25 = vld [vmem:[#allocation5 + $0xd30] sm:$0xf0] }
 0x25f   :  { %v18969_v30 = vld [vmem:[#allocation5 + $0xf14] sm:$0xf]  ;;  %v14022_v33 = vor.u32 %v18905_v24, %v14019_v25  ;;  %3912 = vmatpush.bf16.msrb.mxu1 %v13766_v32 }
 0x260   :  { %v14275_v31 = vld [vmem:[#allocation5 + $0xf30] sm:$0xf0] }
 0x261   :  { %v18769_v34 = vld [vmem:[#allocation5 + $0x8d4] sm:$0xf]  ;;  %v14278_v37 = vor.u32 %v18969_v30, %v14275_v31  ;;  %3926 = vmatpush.bf16.msrb.mxu2 %v14022_v33 }
 0x262   :  { %v13475_v35 = vld [vmem:[#allocation5 + $0x8f0] sm:$0xf0] }
 0x263   :  { %v18833_v59 = vld [vmem:[#allocation5 + $0xad4] sm:$0xf]  ;;  %v13478_v51 = vor.u32 %v18769_v34, %v13475_v35  ;;  %3940 = vmatpush.bf16.msrb.mxu3 %v14278_v37 }
 0x264   :  { %v13731_v41 = vld [vmem:[#allocation5 + $0xaf0] sm:$0xf0] }
 0x265   :  { %v18897_v46 = vld [vmem:[#allocation5 + $0xcd4] sm:$0xf]  ;;  %v13734_v55 = vor.u32 %v18833_v59, %v13731_v41  ;;  %3899 = vmatpush.bf16.msrb.mxu0 %v13478_v51 }
 0x266   :  { %v13987_v12 = vld [vmem:[#allocation5 + $0xcf0] sm:$0xf0] }
 0x267   :  { %v18961_v50 = vld [vmem:[#allocation5 + $0xed4] sm:$0xf]  ;;  %v13990_v62 = vor.u32 %v18897_v46, %v13987_v12  ;;  %3913 = vmatpush.bf16.msrb.mxu1 %v13734_v55 }
 0x268   :  { %v14243_v48 = vld [vmem:[#allocation5 + $0xef0] sm:$0xf0] }
 0x269   :  { %v18761_v63 = vld [vmem:[#allocation5 + $0x894] sm:$0xf]  ;;  %v14246_v6 = vor.u32 %v18961_v50, %v14243_v48  ;;  %3927 = vmatpush.bf16.msrb.mxu2 %v13990_v62 }
 0x26a   :  { %v13443_v4 = vld [vmem:[#allocation5 + $0x8b0] sm:$0xf0] }
 0x26b   :  { %v18825_v5 = vld [vmem:[#allocation5 + $0xa94] sm:$0xf]  ;;  %v13446_v16 = vor.u32 %v18761_v63, %v13443_v4  ;;  %3941 = vmatpush.bf16.msrb.mxu3 %v14246_v6  ;;  %v18550_v6 = vld [vmem:[#allocation5 + $0x1f4] sm:$0xf0] }
 0x26c   :  { %v13699_v7 = vld [vmem:[#allocation5 + $0xab0] sm:$0xf0] }
 0x26d   :  { %v18889_v53 = vld [vmem:[#allocation5 + $0xc94] sm:$0xf]  ;;  %v13702_v21 = vor.u32 %v18825_v5, %v13699_v7  ;;  %3900 = vmatpush.bf16.msrb.mxu0 %v13446_v16  ;;  %v12585_v5 = vld [vmem:[#allocation5 + $0x1d8] sm:$0xf] }
 0x26e   :  { %v13955_v13 = vld [vmem:[#allocation5 + $0xcb0] sm:$0xf0]  ;;  %v12841_v7 = vld [vmem:[#allocation5 + $0x3d8] sm:$0xf] }
 0x26f   :  { %v18953_v20 = vld [vmem:[#allocation5 + $0xe94] sm:$0xf]  ;;  %v13958_v23 = vor.u32 %v18889_v53, %v13955_v13  ;;  %3914 = vmatpush.bf16.msrb.mxu1 %v13702_v21  ;;  %v18614_v13 = vld [vmem:[#allocation5 + $0x3f4] sm:$0xf0] }
 0x270   :  { %v14211_v15 = vld [vmem:[#allocation5 + $0xeb0] sm:$0xf0] }
 0x271   :  { %v18753_v24 = vld [vmem:[#allocation5 + $0x854] sm:$0xf]  ;;  %v14214_v31 = vor.u32 %v18953_v20, %v14211_v15  ;;  %3928 = vmatpush.bf16.msrb.mxu2 %v13958_v23  ;;  %v13097_v20 = vld [vmem:[#allocation5 + $0x5d8] sm:$0xf] }
 0x272   :  { %v13411_v25 = vld [vmem:[#allocation5 + $0x870] sm:$0xf0]  ;;  %v18678_v15 = vld [vmem:[#allocation5 + $0x5f4] sm:$0xf0] }
 0x273   :  { %v18817_v30 = vld [vmem:[#allocation5 + $0xa54] sm:$0xf]  ;;  %v13414_v59 = vor.u32 %v18753_v24, %v13411_v25  ;;  %3942 = vmatpush.bf16.msrb.mxu3 %v14214_v31  ;;  %v13353_v23 = vld [vmem:[#allocation5 + $0x7d8] sm:$0xf]  ;;  %v12842_v31 = vor.u32 %v18614_v13, %v12841_v7 }
 0x274   :  { %v13667_v26 = vld [vmem:[#allocation5 + $0xa70] sm:$0xf0]  ;;  %v18742_v24 = vld [vmem:[#allocation5 + $0x7f4] sm:$0xf0] }
 0x275   :  { %v18881_v32 = vld [vmem:[#allocation5 + $0xc54] sm:$0xf]  ;;  %v13670_v46 = vor.u32 %v18817_v30, %v13667_v26  ;;  %3901 = vmatpush.bf16.msrb.mxu0 %v13414_v59  ;;  %v12586_v30 = vor.u32 %v18550_v6, %v12585_v5  ;;  %v13098_v26 = vor.u32 %v18678_v15, %v13097_v20  ;;  %v18606_v59 = vld [vmem:[#allocation5 + $0x3b4] sm:$0xf0] }
 0x276   :  { %v13923_v33 = vld [vmem:[#allocation5 + $0xc70] sm:$0xf0]  ;;  %v18598_v5 = vld [vmem:[#allocation5 + $0x374] sm:$0xf0] }
 0x277   :  { %v18945_v34 = vld [vmem:[#allocation5 + $0xe54] sm:$0xf]  ;;  %v13926_v12 = vor.u32 %v18881_v32, %v13923_v33  ;;  %3915 = vmatpush.bf16.msrb.mxu1 %v13670_v46  ;;  %v12553_v32 = vld [vmem:[#allocation5 + $0x198] sm:$0xf] }
 0x278   :  { %v14179_v35 = vld [vmem:[#allocation5 + $0xe70] sm:$0xf0]  ;;  %v18542_v33 = vld [vmem:[#allocation5 + $0x1b4] sm:$0xf0] }
 0x279   :  { %v18745_v37 = vld [vmem:[#allocation5 + $0x814] sm:$0xf]  ;;  %v14182_v55 = vor.u32 %v18945_v34, %v14179_v35  ;;  %3929 = vmatpush.bf16.msrb.mxu2 %v13926_v12  ;;  %v12809_v34 = vld [vmem:[#allocation5 + $0x398] sm:$0xf]  ;;  %v13354_v35 = vor.u32 %v18742_v24, %v13353_v23 }
 0x27a   :  { %v13379_v41 = vld [vmem:[#allocation5 + $0x830] sm:$0xf0]  ;;  %v13321_v46 = vld [vmem:[#allocation5 + $0x798] sm:$0xf] }
 0x27b   :  { %v18809_v50 = vld [vmem:[#allocation5 + $0xa14] sm:$0xf]  ;;  %v13382_v53 = vor.u32 %v18745_v37, %v13379_v41  ;;  %3943 = vmatpush.bf16.msrb.mxu3 %v14182_v55  ;;  %v13065_v37 = vld [vmem:[#allocation5 + $0x598] sm:$0xf] }
 0x27c   :  { %v13635_v48 = vld [vmem:[#allocation5 + $0xa30] sm:$0xf0]  ;;  %v18670_v41 = vld [vmem:[#allocation5 + $0x5b4] sm:$0xf0] }
 0x27d   :  { %v18873_v51 = vld [vmem:[#allocation5 + $0xc14] sm:$0xf]  ;;  %v13638_v16 = vor.u32 %v18809_v50, %v13635_v48  ;;  %3902 = vmatpush.bf16.msrb.mxu0 %v13382_v53  ;;  %v18734_v12 = vld [vmem:[#allocation5 + $0x7b4] sm:$0xf0]  ;;  %v12554_v50 = vor.u32 %v18542_v33, %v12553_v32  ;;  %v12810_v48 = vor.u32 %v18606_v59, %v12809_v34 }
 0x27e   :  { %v13891_v62 = vld [vmem:[#allocation5 + $0xc30] sm:$0xf0]  ;;  %v12521_v55 = vld [vmem:[#allocation5 + $0x158] sm:$0xf] }
 0x27f   :  { %v18937_v63 = vld [vmem:[#allocation5 + $0xe14] sm:$0xf]  ;;  %v13894_v21 = vor.u32 %v18873_v51, %v13891_v62  ;;  %3916 = vmatpush.bf16.msrb.mxu1 %v13638_v16  ;;  %v13066_v51 = vor.u32 %v18670_v41, %v13065_v37  ;;  %v18534_v62 = vld [vmem:[#allocation5 + $0x174] sm:$0xf0] }
 0x280   :  { %v14147_v4 = vld [vmem:[#allocation5 + $0xe30] sm:$0xf0]  ;;  %3903 = vmatmul.bf16.vlgmr.msrb.gmra.mxu0 %v20365_v39  ;;  %v13033_v6 = vld [vmem:[#allocation5 + $0x558] sm:$0xf]  ;;  %v12522_v20 = vor.u32 %v18534_v62, %v12521_v55 }
 0x281   :  { %v14150_v25 = vor.u32 %v18937_v63, %v14147_v4  ;;  %3930 = vmatpush.bf16.msrb.mxu2 %v13894_v21  ;;  %3951 = vmatpush.bf16.msra.mxu0 %v12586_v30  ;;  %v12777_v63 = vld [vmem:[#allocation5 + $0x358] sm:$0xf]  ;;  %v13322_v4 = vor.u32 %v18734_v12, %v13321_v46 }
 0x282   :  { %v18662_v7 = vld [vmem:[#allocation5 + $0x574] sm:$0xf0]  ;;  %3917 = vmatmul.bf16.vlgmr.msrb.gmra.mxu1 %v20369_v44  ;;  %v12778_v15 = vor.u32 %v18598_v5, %v12777_v63 }
 0x283   :  { %3944 = vmatpush.bf16.msrb.mxu3 %v14150_v25  ;;  %3965 = vmatpush.bf16.msra.mxu1 %v12842_v31  ;;  %v13289_v53 = vld [vmem:[#allocation5 + $0x758] sm:$0xf]  ;;  %v13034_v16 = vor.u32 %v18662_v7, %v13033_v6 }
 0x284   :  { %3931 = vmatmul.bf16.vlgmr.msrb.gmra.mxu2 %v20367_v43  ;;  %v18726_v13 = vld [vmem:[#allocation5 + $0x774] sm:$0xf0] }
 0x285   :  { %3979 = vmatpush.bf16.msra.mxu2 %v13098_v26  ;;  %3952 = vmatpush.bf16.msra.mxu0 %v12554_v50  ;;  %v12489_v21 = vld [vmem:[#allocation5 + $0x118] sm:$0xf]  ;;  %v13290_v25 = vor.u32 %v18726_v13, %v13289_v53 }
 0x286   :  { %3945 = vmatmul.bf16.vlgmr.msrb.gmra.mxu3 %v20371_v47  ;;  %v18526_v23 = vld [vmem:[#allocation5 + $0x134] sm:$0xf0] }
 0x287   :  { %3993 = vmatpush.bf16.msra.mxu3 %v13354_v35  ;;  %3966 = vmatpush.bf16.msra.mxu1 %v12810_v48  ;;  %v12745_v24 = vld [vmem:[#allocation5 + $0x318] sm:$0xf]  ;;  %v12490_v34 = vor.u32 %v18526_v23, %v12489_v21 }
 0x288   :  { %v18590_v30 = vld [vmem:[#allocation5 + $0x334] sm:$0xf0] }
 0x289   :  { %3980 = vmatpush.bf16.msra.mxu2 %v13066_v51  ;;  %v13001_v31 = vld [vmem:[#allocation5 + $0x518] sm:$0xf]  ;;  %3953 = vmatpush.bf16.msra.mxu0 %v12522_v20  ;;  %v12746_v35 = vor.u32 %v18590_v30, %v12745_v24 }
 0x28a   :  { %v18654_v26 = vld [vmem:[#allocation5 + $0x534] sm:$0xf0] }
 0x28b   :  { %3994 = vmatpush.bf16.msra.mxu3 %v13322_v4  ;;  %v13257_v32 = vld [vmem:[#allocation5 + $0x718] sm:$0xf]  ;;  %3967 = vmatpush.bf16.msra.mxu1 %v12778_v15  ;;  %v13002_v59 = vor.u32 %v18654_v26, %v13001_v31 }
 0x28c   :  { %v18718_v33 = vld [vmem:[#allocation5 + $0x734] sm:$0xf0] }
 0x28d   :  { %3981 = vmatpush.bf16.msra.mxu2 %v13034_v16  ;;  %v12457_v37 = vld [vmem:[#allocation5 + $0xd8] sm:$0xf]  ;;  %v13258_v12 = vor.u32 %v18718_v33, %v13257_v32  ;;  %3954 = vmatpush.bf16.msra.mxu0 %v12490_v34 }
 0x28e   :  { %v18518_v41 = vld [vmem:[#allocation5 + $0xf4] sm:$0xf0] }
 0x28f   :  { %v12713_v46 = vld [vmem:[#allocation5 + $0x2d8] sm:$0xf]  ;;  %3995 = vmatpush.bf16.msra.mxu3 %v13290_v25  ;;  %v12458_v63 = vor.u32 %v18518_v41, %v12457_v37  ;;  %3968 = vmatpush.bf16.msra.mxu1 %v12746_v35 }
 0x290   :  { %v18582_v50 = vld [vmem:[#allocation5 + $0x2f4] sm:$0xf0] }
 0x291   :  { %v12969_v48 = vld [vmem:[#allocation5 + $0x4d8] sm:$0xf]  ;;  %3982 = vmatpush.bf16.msra.mxu2 %v13002_v59  ;;  %v12714_v4 = vor.u32 %v18582_v50, %v12713_v46  ;;  %3955 = vmatpush.bf16.msra.mxu0 %v12458_v63 }
 0x292   :  { %v18646_v51 = vld [vmem:[#allocation5 + $0x4f4] sm:$0xf0] }
 0x293   :  { %v13225_v55 = vld [vmem:[#allocation5 + $0x6d8] sm:$0xf]  ;;  %v12970_v5 = vor.u32 %v18646_v51, %v12969_v48  ;;  %3996 = vmatpush.bf16.msra.mxu3 %v13258_v12  ;;  %3969 = vmatpush.bf16.msra.mxu1 %v12714_v4 }
 0x294   :  { %v18710_v62 = vld [vmem:[#allocation5 + $0x6f4] sm:$0xf0] }
 0x295   :  { %v12425_v6 = vld [vmem:[#allocation5 + $0x98] sm:$0xf]  ;;  %v13226_v13 = vor.u32 %v18710_v62, %v13225_v55  ;;  %3983 = vmatpush.bf16.msra.mxu2 %v12970_v5 }
 0x296   :  { %v18510_v7 = vld [vmem:[#allocation5 + $0xb4] sm:$0xf0] }
 0x297   :  { %v12681_v53 = vld [vmem:[#allocation5 + $0x298] sm:$0xf]  ;;  %v12426_v24 = vor.u32 %v18510_v7, %v12425_v6  ;;  %3997 = vmatpush.bf16.msra.mxu3 %v13226_v13 }
 0x298   :  { %v18574_v20 = vld [vmem:[#allocation5 + $0x2b4] sm:$0xf0] }
 0x299   :  { %v12937_v15 = vld [vmem:[#allocation5 + $0x498] sm:$0xf]  ;;  %v12682_v25 = vor.u32 %v18574_v20, %v12681_v53  ;;  %3956 = vmatpush.bf16.msra.mxu0 %v12426_v24 }
 0x29a   :  { %v18638_v16 = vld [vmem:[#allocation5 + $0x4b4] sm:$0xf0] }
 0x29b   :  { %v13193_v21 = vld [vmem:[#allocation5 + $0x698] sm:$0xf]  ;;  %v12938_v30 = vor.u32 %v18638_v16, %v12937_v15  ;;  %3970 = vmatpush.bf16.msra.mxu1 %v12682_v25 }
 0x29c   :  { %v18702_v23 = vld [vmem:[#allocation5 + $0x6b4] sm:$0xf0] }
 0x29d   :  { %v12393_v31 = vld [vmem:[#allocation5 + $0x58] sm:$0xf]  ;;  %v13194_v33 = vor.u32 %v18702_v23, %v13193_v21  ;;  %3984 = vmatpush.bf16.msra.mxu2 %v12938_v30 }
 0x29e   :  { %v18502_v26 = vld [vmem:[#allocation5 + $0x74] sm:$0xf0] }
 0x29f   :  { %v12649_v32 = vld [vmem:[#allocation5 + $0x258] sm:$0xf]  ;;  %v12394_v46 = vor.u32 %v18502_v26, %v12393_v31  ;;  %3998 = vmatpush.bf16.msra.mxu3 %v13194_v33 }
 0x2a0   :  { %v18566_v34 = vld [vmem:[#allocation5 + $0x274] sm:$0xf0] }
 0x2a1   :  { %v12905_v35 = vld [vmem:[#allocation5 + $0x458] sm:$0xf]  ;;  %v12650_v48 = vor.u32 %v18566_v34, %v12649_v32  ;;  %3957 = vmatpush.bf16.msra.mxu0 %v12394_v46 }
 0x2a2   :  { %v18630_v59 = vld [vmem:[#allocation5 + $0x474] sm:$0xf0] }
 0x2a3   :  { %v13161_v37 = vld [vmem:[#allocation5 + $0x658] sm:$0xf]  ;;  %v12906_v51 = vor.u32 %v18630_v59, %v12905_v35  ;;  %3971 = vmatpush.bf16.msra.mxu1 %v12650_v48 }
 0x2a4   :  { %v18694_v41 = vld [vmem:[#allocation5 + $0x674] sm:$0xf0] }
 0x2a5   :  { %v12361_v12 = vld [vmem:[#allocation5 + $0x18] sm:$0xf]  ;;  %v13162_v4 = vor.u32 %v18694_v41, %v13161_v37  ;;  %3985 = vmatpush.bf16.msra.mxu2 %v12906_v51 }
 0x2a6   :  { %v18494_v50 = vld [vmem:[#allocation5 + $0x34] sm:$0xf0] }
 0x2a7   :  { %v12617_v55 = vld [vmem:[#allocation5 + $0x218] sm:$0xf]  ;;  %v12362_v15 = vor.u32 %v18494_v50, %v12361_v12  ;;  %3999 = vmatpush.bf16.msra.mxu3 %v13162_v4 }
 0x2a8   :  { %v18558_v62 = vld [vmem:[#allocation5 + $0x234] sm:$0xf0] }
 0x2a9   :  { %v12873_v63 = vld [vmem:[#allocation5 + $0x418] sm:$0xf]  ;;  %v12618_v24 = vor.u32 %v18558_v62, %v12617_v55  ;;  %3958 = vmatpush.bf16.msra.mxu0 %v12362_v15  ;;  %v20486_v62 = vpop.f32.mrf.mxu0 }
 0x2aa   :  { %v18622_v5 = vld [vmem:[#allocation5 + $0x434] sm:$0xf0]  ;;  %21267 = vst [vmem:[#allocation32_spill] sm:$0xff] %v20486_v62  ;;  %v18538_v62 = vld [vmem:[#allocation5 + $0x19c] sm:$0xf] }
 0x2ab   :  { %v13129_v6 = vld [vmem:[#allocation5 + $0x618] sm:$0xf]  ;;  %v12874_v25 = vor.u32 %v18622_v5, %v12873_v63  ;;  %3972 = vmatpush.bf16.msra.mxu1 %v12618_v24  ;;  %v20492_v24 = vpop.f32.mrf.mxu1 }
 0x2ac   :  { %v18686_v7 = vld [vmem:[#allocation5 + $0x634] sm:$0xf0]  ;;  %3959 = vmatmul.bf16.vlgmr.msra.gmra.mxu0 %v20353_v58  ;;  %21268 = vst [vmem:[#allocation33_spill] sm:$0xff] %v20492_v24  ;;  %v12587_v24 = vld [vmem:[#allocation5 + $0x1f8] sm:$0xf0] }
 0x2ad   :  { %v13609_v53 = vld [vmem:[#allocation5 + $0x9d8] sm:$0xf]  ;;  %v13130_v26 = vor.u32 %v18686_v7, %v13129_v6  ;;  %3986 = vmatpush.bf16.msra.mxu2 %v12874_v25 }
 0x2ae   :  { %v18806_v13 = vld [vmem:[#allocation5 + $0x9f4] sm:$0xf0]  ;;  %3973 = vmatmul.bf16.vlgmr.msra.gmra.mxu1 %v20359_v10 }
 0x2af   :  { %v13865_v20 = vld [vmem:[#allocation5 + $0xbd8] sm:$0xf]  ;;  %v13610_v32 = vor.u32 %v18806_v13, %v13609_v53  ;;  %4000 = vmatpush.bf16.msra.mxu3 %v13130_v26 }
 0x2b0   :  { %v18870_v16 = vld [vmem:[#allocation5 + $0xbf4] sm:$0xf0]  ;;  %3987 = vmatmul.bf16.vlgmr.msra.gmra.mxu2 %v20355_v1 }
 0x2b1   :  { %v14121_v21 = vld [vmem:[#allocation5 + $0xdd8] sm:$0xf]  ;;  %v13866_v33 = vor.u32 %v18870_v16, %v13865_v20  ;;  %4007 = vmatpush.bf16.msrb.mxu0 %v13610_v32 }
 0x2b2   :  { %v18934_v23 = vld [vmem:[#allocation5 + $0xdf4] sm:$0xf0]  ;;  %4001 = vmatmul.bf16.vlgmr.msra.gmra.mxu3 %v20361_v17 }
 0x2b3   :  { %v14377_v30 = vld [vmem:[#allocation5 + $0xfd8] sm:$0xf]  ;;  %v14122_v34 = vor.u32 %v18934_v23, %v14121_v21  ;;  %4021 = vmatpush.bf16.msrb.mxu1 %v13866_v33 }
 0x2b4   :  { %v18998_v31 = vld [vmem:[#allocation5 + $0xff4] sm:$0xf0] }
 0x2b5   :  { %v13577_v35 = vld [vmem:[#allocation5 + $0x998] sm:$0xf]  ;;  %v14378_v41 = vor.u32 %v18998_v31, %v14377_v30  ;;  %4035 = vmatpush.bf16.msrb.mxu2 %v14122_v34 }
 0x2b6   :  { %v18798_v59 = vld [vmem:[#allocation5 + $0x9b4] sm:$0xf0] }
 0x2b7   :  { %v13833_v37 = vld [vmem:[#allocation5 + $0xb98] sm:$0xf]  ;;  %v13578_v55 = vor.u32 %v18798_v59, %v13577_v35  ;;  %4049 = vmatpush.bf16.msrb.mxu3 %v14378_v41 }
 0x2b8   :  { %v18862_v46 = vld [vmem:[#allocation5 + $0xbb4] sm:$0xf0] }
 0x2b9   :  { %v14089_v12 = vld [vmem:[#allocation5 + $0xd98] sm:$0xf]  ;;  %v13834_v63 = vor.u32 %v18862_v46, %v13833_v37  ;;  %4008 = vmatpush.bf16.msrb.mxu0 %v13578_v55  ;;  %v20494_v37 = vpop.f32.mrf.mxu2 }
 0x2ba   :  { %v18926_v50 = vld [vmem:[#allocation5 + $0xdb4] sm:$0xf0]  ;;  %21269 = vst [vmem:[#allocation34_spill] sm:$0xff] %v20494_v37 }
 0x2bb   :  { %v14345_v48 = vld [vmem:[#allocation5 + $0xf98] sm:$0xf]  ;;  %v14090_v4 = vor.u32 %v18926_v50, %v14089_v12  ;;  %4022 = vmatpush.bf16.msrb.mxu1 %v13834_v63  ;;  %v20496_v50 = vpop.f32.mrf.mxu0 }
 0x2bc   :  { %v18990_v51 = vld [vmem:[#allocation5 + $0xfb4] sm:$0xf0] }
 0x2bd   :  { %v13545_v5 = vld [vmem:[#allocation5 + $0x958] sm:$0xf]  ;;  %v14346_v53 = vor.u32 %v18990_v51, %v14345_v48  ;;  %4036 = vmatpush.bf16.msrb.mxu2 %v14090_v4 }
 0x2be   :  { %v18790_v6 = vld [vmem:[#allocation5 + $0x974] sm:$0xf0] }
 0x2bf   :  { %v13801_v7 = vld [vmem:[#allocation5 + $0xb58] sm:$0xf]  ;;  %v13546_v23 = vor.u32 %v18790_v6, %v13545_v5  ;;  %4050 = vmatpush.bf16.msrb.mxu3 %v14346_v53 }
 0x2c0   :  { %v18854_v13 = vld [vmem:[#allocation5 + $0xb74] sm:$0xf0] }
 0x2c1   :  { %v14057_v20 = vld [vmem:[#allocation5 + $0xd58] sm:$0xf]  ;;  %v13802_v25 = vor.u32 %v18854_v13, %v13801_v7  ;;  %4009 = vmatpush.bf16.msrb.mxu0 %v13546_v23  ;;  %v20498_v13 = vpop.f32.mrf.mxu3 }
 0x2c2   :  { %v18918_v15 = vld [vmem:[#allocation5 + $0xd74] sm:$0xf0]  ;;  %21270 = vst [vmem:[#allocation35_spill] sm:$0xff] %v20498_v13 }
 0x2c3   :  { %v14313_v16 = vld [vmem:[#allocation5 + $0xf58] sm:$0xf]  ;;  %v14058_v30 = vor.u32 %v18918_v15, %v14057_v20  ;;  %4023 = vmatpush.bf16.msrb.mxu1 %v13802_v25 }
 0x2c4   :  { %v18982_v21 = vld [vmem:[#allocation5 + $0xf74] sm:$0xf0] }
 0x2c5   :  { %v13513_v31 = vld [vmem:[#allocation5 + $0x918] sm:$0xf]  ;;  %v14314_v33 = vor.u32 %v18982_v21, %v14313_v16  ;;  %4037 = vmatpush.bf16.msrb.mxu2 %v14058_v30  ;;  %v20500_v21 = vpop.f32.mrf.mxu1 }
 0x2c6   :  { %v18782_v26 = vld [vmem:[#allocation5 + $0x934] sm:$0xf0] }
 0x2c7   :  { %v13769_v32 = vld [vmem:[#allocation5 + $0xb18] sm:$0xf]  ;;  %v13514_v12 = vor.u32 %v18782_v26, %v13513_v31  ;;  %4051 = vmatpush.bf16.msrb.mxu3 %v14314_v33 }
 0x2c8   :  { %v18846_v34 = vld [vmem:[#allocation5 + $0xb34] sm:$0xf0] }
 0x2c9   :  { %v14025_v35 = vld [vmem:[#allocation5 + $0xd18] sm:$0xf]  ;;  %v13770_v48 = vor.u32 %v18846_v34, %v13769_v32  ;;  %4010 = vmatpush.bf16.msrb.mxu0 %v13514_v12 }
 0x2ca   :  { %v18910_v59 = vld [vmem:[#allocation5 + $0xd34] sm:$0xf0] }
 0x2cb   :  { %v14281_v41 = vld [vmem:[#allocation5 + $0xf18] sm:$0xf]  ;;  %v14026_v51 = vor.u32 %v18910_v59, %v14025_v35  ;;  %4024 = vmatpush.bf16.msrb.mxu1 %v13770_v48  ;;  %v20502_v59 = vpop.f32.mrf.mxu2 }
 0x2cc   :  { %v18974_v46 = vld [vmem:[#allocation5 + $0xf34] sm:$0xf0] }
 0x2cd   :  { %v13481_v55 = vld [vmem:[#allocation5 + $0x8d8] sm:$0xf]  ;;  %v14282_v5 = vor.u32 %v18974_v46, %v14281_v41  ;;  %4038 = vmatpush.bf16.msrb.mxu2 %v14026_v51  ;;  %v20508_v37 = vpop.f32.mrf.mxu1 }
 0x2ce   :  { %v18774_v63 = vld [vmem:[#allocation5 + $0x8f4] sm:$0xf0] }
 0x2cf   :  { %v13737_v4 = vld [vmem:[#allocation5 + $0xad8] sm:$0xf]  ;;  %v13482_v16 = vor.u32 %v18774_v63, %v13481_v55  ;;  %4052 = vmatpush.bf16.msrb.mxu3 %v14282_v5 }
 0x2d0   :  { %v18838_v6 = vld [vmem:[#allocation5 + $0xaf4] sm:$0xf0] }
 0x2d1   :  { %v13993_v7 = vld [vmem:[#allocation5 + $0xcd8] sm:$0xf]  ;;  %v13738_v23 = vor.u32 %v18838_v6, %v13737_v4  ;;  %4011 = vmatpush.bf16.msrb.mxu0 %v13482_v16 }
 0x2d2   :  { %v18902_v53 = vld [vmem:[#allocation5 + $0xcf4] sm:$0xf0] }
 0x2d3   :  { %v14249_v20 = vld [vmem:[#allocation5 + $0xed8] sm:$0xf]  ;;  %v13994_v25 = vor.u32 %v18902_v53, %v13993_v7  ;;  %4025 = vmatpush.bf16.msrb.mxu1 %v13738_v23 }
 0x2d4   :  { %v18966_v15 = vld [vmem:[#allocation5 + $0xef4] sm:$0xf0] }
 0x2d5   :  { %v13449_v30 = vld [vmem:[#allocation5 + $0x898] sm:$0xf]  ;;  %v14250_v32 = vor.u32 %v18966_v15, %v14249_v20  ;;  %4039 = vmatpush.bf16.msrb.mxu2 %v13994_v25  ;;  %v20504_v20 = vpop.f32.mrf.mxu0  ;;  %v20506_v15 = vpop.f32.mrf.mxu3 }
 0x2d6   :  { %v18766_v31 = vld [vmem:[#allocation5 + $0x8b4] sm:$0xf0]  ;;  %21271 = vst [vmem:[#allocation36_spill] sm:$0xff] %v20506_v15  ;;  %v18666_v15 = vld [vmem:[#allocation5 + $0x59c] sm:$0xf] }
 0x2d7   :  { %v13705_v26 = vld [vmem:[#allocation5 + $0xa98] sm:$0xf]  ;;  %v13450_v12 = vor.u32 %v18766_v31, %v13449_v30  ;;  %4053 = vmatpush.bf16.msrb.mxu3 %v14250_v32 }
 0x2d8   :  { %v18830_v33 = vld [vmem:[#allocation5 + $0xab4] sm:$0xf0] }
 0x2d9   :  { %v13961_v34 = vld [vmem:[#allocation5 + $0xc98] sm:$0xf]  ;;  %v13706_v48 = vor.u32 %v18830_v33, %v13705_v26  ;;  %4012 = vmatpush.bf16.msrb.mxu0 %v13450_v12  ;;  %v18610_v12 = vld [vmem:[#allocation5 + $0x3dc] sm:$0xf] }
 0x2da   :  { %v18894_v35 = vld [vmem:[#allocation5 + $0xcb4] sm:$0xf0] }
 0x2db   :  { %v14217_v41 = vld [vmem:[#allocation5 + $0xe98] sm:$0xf]  ;;  %v13962_v51 = vor.u32 %v18894_v35, %v13961_v34  ;;  %4026 = vmatpush.bf16.msrb.mxu1 %v13706_v48  ;;  %v18674_v48 = vld [vmem:[#allocation5 + $0x5dc] sm:$0xf] }
 0x2dc   :  { %v18958_v46 = vld [vmem:[#allocation5 + $0xeb4] sm:$0xf0] }
 0x2dd   :  { %v13417_v55 = vld [vmem:[#allocation5 + $0x858] sm:$0xf]  ;;  %v14218_v6 = vor.u32 %v18958_v46, %v14217_v41  ;;  %4040 = vmatpush.bf16.msrb.mxu2 %v13962_v51  ;;  %v13099_v51 = vld [vmem:[#allocation5 + $0x5f8] sm:$0xf0]  ;;  %v20512_v54 = vpop.f32.mrf.mxu3 }
 0x2de   :  { %v18758_v63 = vld [vmem:[#allocation5 + $0x874] sm:$0xf0]  ;;  %v13102_v38 = vor.u32 %v18674_v48, %v13099_v51  ;;  %v18522_v48 = vld [vmem:[#allocation5 + $0x11c] sm:$0xf] }
 0x2df   :  { %v13673_v4 = vld [vmem:[#allocation5 + $0xa58] sm:$0xf]  ;;  %v13418_v16 = vor.u32 %v18758_v63, %v13417_v55  ;;  %4054 = vmatpush.bf16.msrb.mxu3 %v14218_v6  ;;  %v12843_v63 = vld [vmem:[#allocation5 + $0x3f8] sm:$0xf0] }
 0x2e0   :  { %v18822_v5 = vld [vmem:[#allocation5 + $0xa74] sm:$0xf0]  ;;  %v12846_v36 = vor.u32 %v18610_v12, %v12843_v63  ;;  %v18658_v12 = vld [vmem:[#allocation5 + $0x55c] sm:$0xf]  ;;  %v20517_v63 = vpop.f32.mrf.mxu1 }
 0x2e1   :  { %v13929_v7 = vld [vmem:[#allocation5 + $0xc58] sm:$0xf]  ;;  %v13674_v30 = vor.u32 %v18822_v5, %v13673_v4  ;;  %4013 = vmatpush.bf16.msrb.mxu0 %v13418_v16  ;;  %v20510_v4 = vpop.f32.mrf.mxu2  ;;  %v18602_v16 = vld [vmem:[#allocation5 + $0x39c] sm:$0xf] }
 0x2e2   :  { %v18886_v53 = vld [vmem:[#allocation5 + $0xc74] sm:$0xf0]  ;;  %v12491_v51 = vld [vmem:[#allocation5 + $0x138] sm:$0xf0] }
 0x2e3   :  { %v14185_v13 = vld [vmem:[#allocation5 + $0xe58] sm:$0xf]  ;;  %v13930_v31 = vor.u32 %v18886_v53, %v13929_v7  ;;  %4027 = vmatpush.bf16.msrb.mxu1 %v13674_v30  ;;  %v12590_v53 = vor.u32 %v18546_v52, %v12587_v24  ;;  %v20514_v30 = vpop.f32.mrf.mxu0  ;;  %v12558_v52 = vor.u32 %v18538_v62, %v12555_v9  ;;  %v13291_v9 = vld [vmem:[#allocation5 + $0x778] sm:$0xf0] }
 0x2e4   :  { %v13385_v23 = vld [vmem:[#allocation5 + $0x818] sm:$0xf]  ;;  %v14186_v34 = vor.u32 %v18950_v0, %v14185_v13  ;;  %v18738_v0 = vld [vmem:[#allocation5 + $0x7dc] sm:$0xf] }
 0x2e5   :  { %v18750_v25 = vld [vmem:[#allocation5 + $0x834] sm:$0xf0]  ;;  %4041 = vmatpush.bf16.msrb.mxu2 %v13930_v31  ;;  %v13355_v13 = vld [vmem:[#allocation5 + $0x7f8] sm:$0xf0] }
 0x2e6   :  { %v13641_v26 = vld [vmem:[#allocation5 + $0xa18] sm:$0xf]  ;;  %v13386_v55 = vor.u32 %v18750_v25, %v13385_v23  ;;  %4055 = vmatpush.bf16.msrb.mxu3 %v14186_v34  ;;  %v13358_v23 = vor.u32 %v18738_v0, %v13355_v13  ;;  %v12811_v25 = vld [vmem:[#allocation5 + $0x3b8] sm:$0xf0] }
 0x2e7   :  { %v18814_v32 = vld [vmem:[#allocation5 + $0xa34] sm:$0xf0]  ;;  %v18730_v31 = vld [vmem:[#allocation5 + $0x79c] sm:$0xf]  ;;  %v12814_v24 = vor.u32 %v18602_v16, %v12811_v25 }
 0x2e8   :  { %v13897_v33 = vld [vmem:[#allocation5 + $0xc18] sm:$0xf]  ;;  %v13642_v5 = vor.u32 %v18814_v32, %v13641_v26  ;;  %4014 = vmatpush.bf16.msrb.mxu0 %v13386_v55  ;;  %v13323_v26 = vld [vmem:[#allocation5 + $0x7b8] sm:$0xf0]  ;;  %v13070_v32 = vor.u32 %v18666_v15, %v13067_v28 }
 0x2e9   :  { %v18878_v35 = vld [vmem:[#allocation5 + $0xc34] sm:$0xf0]  ;;  %v12523_v34 = vld [vmem:[#allocation5 + $0x178] sm:$0xf0] }
 0x2ea   :  { %v14153_v41 = vld [vmem:[#allocation5 + $0xe18] sm:$0xf]  ;;  %v13898_v6 = vor.u32 %v18878_v35, %v13897_v33  ;;  %4028 = vmatpush.bf16.msrb.mxu1 %v13642_v5  ;;  %v18530_v33 = vld [vmem:[#allocation5 + $0x15c] sm:$0xf] }
 0x2eb   :  { %v18942_v46 = vld [vmem:[#allocation5 + $0xe34] sm:$0xf0]  ;;  %v18594_v35 = vld [vmem:[#allocation5 + $0x35c] sm:$0xf]  ;;  %4015 = vmatmul.bf16.vlgmr.msrb.gmra.mxu0 %v20365_v39  ;;  %v12526_v28 = vor.u32 %v18530_v33, %v12523_v34  ;;  %v20524_v25 = vpop.f32.mrf.mxu0 }
 0x2ec   :  { %v14154_v7 = vor.u32 %v18942_v46, %v14153_v41  ;;  %4042 = vmatpush.bf16.msrb.mxu2 %v13898_v6  ;;  %4063 = vmatpush.bf16.msra.mxu0 %v12590_v53  ;;  %v13326_v41 = vor.u32 %v18730_v31, %v13323_v26  ;;  %v12779_v46 = vld [vmem:[#allocation5 + $0x378] sm:$0xf0]  ;;  %v20526_v31 = vpop.f32.mrf.mxu3 }
 0x2ed   :  { %v13035_v55 = vld [vmem:[#allocation5 + $0x578] sm:$0xf0]  ;;  %4029 = vmatmul.bf16.vlgmr.msrb.gmra.mxu1 %v20369_v44  ;;  %v12782_v62 = vor.u32 %v18594_v35, %v12779_v46  ;;  %21273 = vst [vmem:[#allocation38_spill] sm:$0xff] %v20526_v31 }
 0x2ee   :  { %4056 = vmatpush.bf16.msrb.mxu3 %v14154_v7  ;;  %4077 = vmatpush.bf16.msra.mxu1 %v12846_v36  ;;  %v18722_v36 = vld [vmem:[#allocation5 + $0x75c] sm:$0xf]  ;;  %v13038_v15 = vor.u32 %v18658_v12, %v13035_v55 }
 0x2ef   :  { %4043 = vmatmul.bf16.vlgmr.msrb.gmra.mxu2 %v20367_v43  ;;  %v18586_v5 = vld [vmem:[#allocation5 + $0x31c] sm:$0xf]  ;;  %v13294_v6 = vor.u32 %v18722_v36, %v13291_v9  ;;  %v20528_v9 = vpop.f32.mrf.mxu1 }
 0x2f0   :  { %4091 = vmatpush.bf16.msra.mxu2 %v13102_v38  ;;  %4064 = vmatpush.bf16.msra.mxu0 %v12558_v52  ;;  %v20522_v38 = vpop.f32.mrf.mxu2  ;;  %v12747_v0 = vld [vmem:[#allocation5 + $0x338] sm:$0xf0] }
 0x2f1   :  { %4057 = vmatmul.bf16.vlgmr.msrb.gmra.mxu3 %v20371_v47  ;;  %21272 = vst [vmem:[#allocation37_spill] sm:$0xff] %v20522_v38  ;;  %v18650_v13 = vld [vmem:[#allocation5 + $0x51c] sm:$0xf]  ;;  %v12750_v26 = vor.u32 %v18586_v5, %v12747_v0 }
 0x2f2   :  { %4105 = vmatpush.bf16.msra.mxu3 %v13358_v23  ;;  %4078 = vmatpush.bf16.msra.mxu1 %v12814_v24  ;;  %v13003_v7 = vld [vmem:[#allocation5 + $0x538] sm:$0xf0]  ;;  %v12494_v23 = vor.u32 %v18522_v48, %v12491_v51 }
 0x2f3   :  { %v18714_v53 = vld [vmem:[#allocation5 + $0x71c] sm:$0xf]  ;;  %v13006_v52 = vor.u32 %v18650_v13, %v13003_v7 }
 0x2f4   :  { %4092 = vmatpush.bf16.msra.mxu2 %v13070_v32  ;;  %v13259_v16 = vld [vmem:[#allocation5 + $0x738] sm:$0xf0]  ;;  %4065 = vmatpush.bf16.msra.mxu0 %v12526_v28 }
 0x2f5   :  { %v18514_v24 = vld [vmem:[#allocation5 + $0xdc] sm:$0xf]  ;;  %v13262_v34 = vor.u32 %v18714_v53, %v13259_v16 }
 0x2f6   :  { %4106 = vmatpush.bf16.msra.mxu3 %v13326_v41  ;;  %4079 = vmatpush.bf16.msra.mxu1 %v12782_v62  ;;  %v12459_v32 = vld [vmem:[#allocation5 + $0xf8] sm:$0xf0] }
 0x2f7   :  { %v18578_v33 = vld [vmem:[#allocation5 + $0x2dc] sm:$0xf]  ;;  %v12462_v36 = vor.u32 %v18514_v24, %v12459_v32  ;;  %v20532_v24 = vpop.f32.mrf.mxu0 }
 0x2f8   :  { %4093 = vmatpush.bf16.msra.mxu2 %v13038_v15  ;;  %v12715_v35 = vld [vmem:[#allocation5 + $0x2f8] sm:$0xf0]  ;;  %4066 = vmatpush.bf16.msra.mxu0 %v12494_v23  ;;  %v20530_v7 = vpop.f32.mrf.mxu2  ;;  %21275 = vst [vmem:[#allocation40_spill] sm:$0xff] %v20532_v24 }
 0x2f9   :  { %v18642_v41 = vld [vmem:[#allocation5 + $0x4dc] sm:$0xf]  ;;  %v12718_v28 = vor.u32 %v18578_v33, %v12715_v35  ;;  %21274 = vst [vmem:[#allocation39_spill] sm:$0xff] %v20530_v7 }
 0x2fa   :  { %4107 = vmatpush.bf16.msra.mxu3 %v13294_v6  ;;  %v12971_v46 = vld [vmem:[#allocation5 + $0x4f8] sm:$0xf0]  ;;  %4080 = vmatpush.bf16.msra.mxu1 %v12750_v26 }
 0x2fb   :  { %v18706_v12 = vld [vmem:[#allocation5 + $0x6dc] sm:$0xf]  ;;  %v12974_v62 = vor.u32 %v18642_v41, %v12971_v46 }
 0x2fc   :  { %v13227_v55 = vld [vmem:[#allocation5 + $0x6f8] sm:$0xf0]  ;;  %4094 = vmatpush.bf16.msra.mxu2 %v13006_v52  ;;  %4067 = vmatpush.bf16.msra.mxu0 %v12462_v36 }
 0x2fd   :  { %v18506_v15 = vld [vmem:[#allocation5 + $0x9c] sm:$0xf]  ;;  %v13230_v5 = vor.u32 %v18706_v12, %v13227_v55  ;;  %v20534_v55 = vpop.f32.mrf.mxu3 }
 0x2fe   :  { %v12427_v48 = vld [vmem:[#allocation5 + $0xb8] sm:$0xf0]  ;;  %4108 = vmatpush.bf16.msra.mxu3 %v13262_v34  ;;  %4081 = vmatpush.bf16.msra.mxu1 %v12718_v28  ;;  %21276 = vst [vmem:[#allocation41_spill] sm:$0xff] %v20534_v55  ;;  %v20536_v28 = vpop.f32.mrf.mxu1 }
 0x2ff   :  { %v18570_v51 = vld [vmem:[#allocation5 + $0x29c] sm:$0xf]  ;;  %v12430_v23 = vor.u32 %v18506_v15, %v12427_v48  ;;  %21277 = vst [vmem:[#allocation42_spill] sm:$0xff] %v20536_v28 }
 0x300   :  { %v12683_v6 = vld [vmem:[#allocation5 + $0x2b8] sm:$0xf0]  ;;  %4095 = vmatpush.bf16.msra.mxu2 %v12974_v62  ;;  %v20538_v55 = vpop.f32.mrf.mxu2 }
 0x301   :  { %v18634_v0 = vld [vmem:[#allocation5 + $0x49c] sm:$0xf]  ;;  %v12686_v26 = vor.u32 %v18570_v51, %v12683_v6  ;;  %4068 = vmatpush.bf16.msra.mxu0 %v12430_v23  ;;  %21278 = vst [vmem:[#allocation43_spill] sm:$0xff] %v20538_v55 }
 0x302   :  { %v12939_v13 = vld [vmem:[#allocation5 + $0x4b8] sm:$0xf0]  ;;  %4109 = vmatpush.bf16.msra.mxu3 %v13230_v5 }
 0x303   :  { %v18698_v53 = vld [vmem:[#allocation5 + $0x69c] sm:$0xf]  ;;  %v12942_v52 = vor.u32 %v18634_v0, %v12939_v13  ;;  %4082 = vmatpush.bf16.msra.mxu1 %v12686_v26 }
 0x304   :  { %v13195_v16 = vld [vmem:[#allocation5 + $0x6b8] sm:$0xf0] }
 0x305   :  { %v18498_v32 = vld [vmem:[#allocation5 + $0x5c] sm:$0xf]  ;;  %v13198_v34 = vor.u32 %v18698_v53, %v13195_v16  ;;  %4096 = vmatpush.bf16.msra.mxu2 %v12942_v52  ;;  %v20542_v55 = vpop.f32.mrf.mxu3 }
 0x306   :  { %v12395_v33 = vld [vmem:[#allocation5 + $0x78] sm:$0xf0] }
 0x307   :  { %v18562_v35 = vld [vmem:[#allocation5 + $0x25c] sm:$0xf]  ;;  %v12398_v36 = vor.u32 %v18498_v32, %v12395_v33  ;;  %4110 = vmatpush.bf16.msra.mxu3 %v13198_v34 }
 0x308   :  { %v12651_v41 = vld [vmem:[#allocation5 + $0x278] sm:$0xf0] }
 0x309   :  { %v18626_v46 = vld [vmem:[#allocation5 + $0x45c] sm:$0xf]  ;;  %v12654_v62 = vor.u32 %v18562_v35, %v12651_v41  ;;  %4069 = vmatpush.bf16.msra.mxu0 %v12398_v36 }
 0x30a   :  { %v12907_v12 = vld [vmem:[#allocation5 + $0x478] sm:$0xf0] }
 0x30b   :  { %v18690_v31 = vld [vmem:[#allocation5 + $0x65c] sm:$0xf]  ;;  %v12910_v51 = vor.u32 %v18626_v46, %v12907_v12  ;;  %4083 = vmatpush.bf16.msra.mxu1 %v12654_v62  ;;  %v20540_v12 = vpop.f32.mrf.mxu0 }
 0x30c   :  { %v13163_v38 = vld [vmem:[#allocation5 + $0x678] sm:$0xf0] }
 0x30d   :  { %v18490_v15 = vld [vmem:[#allocation5 + $0x1c] sm:$0xf]  ;;  %v13166_v13 = vor.u32 %v18690_v31, %v13163_v38  ;;  %4097 = vmatpush.bf16.msra.mxu2 %v12910_v51 }
 0x30e   :  { %v12363_v48 = vld [vmem:[#allocation5 + $0x38] sm:$0xf0] }
 0x30f   :  { %v18554_v6 = vld [vmem:[#allocation5 + $0x21c] sm:$0xf]  ;;  %v12366_v7 = vor.u32 %v18490_v15, %v12363_v48  ;;  %4111 = vmatpush.bf16.msra.mxu3 %v13166_v13  ;;  %v20544_v13 = vpop.f32.mrf.mxu1 }
 0x310   :  { %v12619_v5 = vld [vmem:[#allocation5 + $0x238] sm:$0xf0] }
 0x311   :  { %v18618_v0 = vld [vmem:[#allocation5 + $0x41c] sm:$0xf]  ;;  %v12622_v35 = vor.u32 %v18554_v6, %v12619_v5  ;;  %4070 = vmatpush.bf16.msra.mxu0 %v12366_v7 }
 0x312   :  { %v12875_v53 = vld [vmem:[#allocation5 + $0x438] sm:$0xf0] }
 0x313   :  { %v18682_v16 = vld [vmem:[#allocation5 + $0x61c] sm:$0xf]  ;;  %v12878_v41 = vor.u32 %v18618_v0, %v12875_v53  ;;  %4084 = vmatpush.bf16.msra.mxu1 %v12622_v35 }
 0x314   :  { %v13131_v24 = vld [vmem:[#allocation5 + $0x638] sm:$0xf0]  ;;  %4071 = vmatmul.bf16.vlgmr.msra.gmra.mxu0 %v20353_v58  ;;  %v3403_v58 = vadd.f32 %v20430_v14, %v20421_v22 }
 0x315   :  { %v18802_v23 = vld [vmem:[#allocation5 + $0x9dc] sm:$0xf]  ;;  %v13134_v38 = vor.u32 %v18682_v16, %v13131_v24  ;;  %4098 = vmatpush.bf16.msra.mxu2 %v12878_v41  ;;  %v20549_v41 = vpop.f32.mrf.mxu2 }
 0x316   :  { %v13611_v32 = vld [vmem:[#allocation5 + $0x9f8] sm:$0xf0]  ;;  %4085 = vmatmul.bf16.vlgmr.msra.gmra.mxu1 %v20359_v10  ;;  %v20560_v10 = vpop.f32.mrf.mxu0 }
 0x317   :  { %v18866_v33 = vld [vmem:[#allocation5 + $0xbdc] sm:$0xf]  ;;  %v13614_v31 = vor.u32 %v18802_v23, %v13611_v32  ;;  %4112 = vmatpush.bf16.msra.mxu3 %v13134_v38  ;;  %v3291_v32 = vadd.f32 %v20397_v42, %v20392_v11 }
 0x318   :  { %v13867_v28 = vld [vmem:[#allocation5 + $0xbf8] sm:$0xf0]  ;;  %4099 = vmatmul.bf16.vlgmr.msra.gmra.mxu2 %v20355_v1 }
 0x319   :  { %v18930_v26 = vld [vmem:[#allocation5 + $0xddc] sm:$0xf]  ;;  %v13870_v47 = vor.u32 %v18866_v33, %v13867_v28  ;;  %4119 = vmatpush.bf16.msrb.mxu0 %v13614_v31  ;;  %v3305_v31 = vadd.f32 %v20399_v56, %v3291_v32 }
 0x31a   :  { %v14123_v52 = vld [vmem:[#allocation5 + $0xdf8] sm:$0xf0]  ;;  %4113 = vmatmul.bf16.vlgmr.msra.gmra.mxu3 %v20361_v17 }
 0x31b   :  { %v18994_v46 = vld [vmem:[#allocation5 + $0xfdc] sm:$0xf]  ;;  %v14126_v43 = vor.u32 %v18930_v26, %v14123_v52  ;;  %4133 = vmatpush.bf16.msrb.mxu1 %v13870_v47 }
 0x31c   :  { %v14379_v34 = vld [vmem:[#allocation5 + $0xff8] sm:$0xf0] }
 0x31d   :  { %v18794_v36 = vld [vmem:[#allocation5 + $0x99c] sm:$0xf]  ;;  %v14382_v44 = vor.u32 %v18994_v46, %v14379_v34  ;;  %4147 = vmatpush.bf16.msrb.mxu2 %v14126_v43  ;;  %v658_v43 = vperm.slane %v20385_v45, 6 }
 0x31e   :  { %v13579_v15 = vld [vmem:[#allocation5 + $0x9b8] sm:$0xf0] }
 0x31f   :  { %v18858_v48 = vld [vmem:[#allocation5 + $0xb9c] sm:$0xf]  ;;  %v13582_v24 = vor.u32 %v18794_v36, %v13579_v15  ;;  %4161 = vmatpush.bf16.msrb.mxu3 %v14382_v44 }
 0x320   :  { %v13835_v62 = vld [vmem:[#allocation5 + $0xbb8] sm:$0xf0] }
 0x321   :  { %v18922_v51 = vld [vmem:[#allocation5 + $0xd9c] sm:$0xf]  ;;  %v13838_v28 = vor.u32 %v18858_v48, %v13835_v62  ;;  %4120 = vmatpush.bf16.msrb.mxu0 %v13582_v24  ;;  %v20558_v48 = vpop.f32.mrf.mxu3 }
 0x322   :  { %v14091_v6 = vld [vmem:[#allocation5 + $0xdb8] sm:$0xf0] }
 0x323   :  { %v18986_v5 = vld [vmem:[#allocation5 + $0xf9c] sm:$0xf]  ;;  %v14094_v53 = vor.u32 %v18922_v51, %v14091_v6  ;;  %4134 = vmatpush.bf16.msrb.mxu1 %v13838_v28  ;;  %v674_v6 = vperm.slane %v658_v43, 0  ;;  %v3319_v28 = vadd.f32 %v20405_v8, %v3305_v31  ;;  %v20570_v43 = vpop.f32.mrf.mxu2 }
 0x324   :  { %v14347_v0 = vld [vmem:[#allocation5 + $0xfb8] sm:$0xf0] }
 0x325   :  { %v18786_v16 = vld [vmem:[#allocation5 + $0x95c] sm:$0xf]  ;;  %v14350_v33 = vor.u32 %v18986_v5, %v14347_v0  ;;  %4148 = vmatpush.bf16.msrb.mxu2 %v14094_v53  ;;  %v3417_v53 = vadd.f32 %v20432_v29, %v3403_v58  ;;  %v3627_v8 = vadd.f32 %v20504_v20, %v674_v6 }
 0x326   :  { %v13547_v23 = vld [vmem:[#allocation5 + $0x978] sm:$0xf0] }
 0x327   :  { %v18850_v7 = vld [vmem:[#allocation5 + $0xb5c] sm:$0xf]  ;;  %v13550_v34 = vor.u32 %v18786_v16, %v13547_v23  ;;  %4162 = vmatpush.bf16.msrb.mxu3 %v14350_v33  ;;  %v3515_v33 = vadd.f32 %v20463_v61, %v20454_v27  ;;  %v3333_v27 = vadd.f32 %v20407_v19, %v3319_v28  ;;  %v3431_v61 = vadd.f32 %v20438_v49, %v3417_v53 }
 0x328   :  { %v13803_v26 = vld [vmem:[#allocation5 + $0xb78] sm:$0xf0] }
 0x329   :  { %v18914_v52 = vld [vmem:[#allocation5 + $0xd5c] sm:$0xf]  ;;  %v13806_v1 = vor.u32 %v18850_v7, %v13803_v26  ;;  %4121 = vmatpush.bf16.msrb.mxu0 %v13550_v34  ;;  %v20566_v26 = vpop.f32.mrf.mxu1  ;;  %v3529_v20 = vadd.f32 %v20465_v18, %v3515_v33  ;;  %v20579_v19 = vpop.f32.mrf.mxu3  ;;  %v3347_v18 = vadd.f32 %v20412_v60, %v3333_v27  ;;  %v14609_v27 = vld [vmem:[#allocation8 + $0x1c0] sm:$0xf] }
 0x32a   :  { %v14059_v35 = vld [vmem:[#allocation5 + $0xd78] sm:$0xf0] }
 0x32b   :  { %v18978_v46 = vld [vmem:[#allocation5 + $0xf5c] sm:$0xf]  ;;  %v14062_v44 = vor.u32 %v18914_v52, %v14059_v35  ;;  %4135 = vmatpush.bf16.msrb.mxu1 %v13806_v1 }
 0x32c   :  { %v14315_v47 = vld [vmem:[#allocation5 + $0xf78] sm:$0xf0] }
 0x32d   :  { %v18778_v11 = vld [vmem:[#allocation5 + $0x91c] sm:$0xf]  ;;  %v14318_v17 = vor.u32 %v18978_v46, %v14315_v47  ;;  %4149 = vmatpush.bf16.msrb.mxu2 %v14062_v44  ;;  %v3625_v46 = vadd.f32 %v20496_v50, %v674_v6 }
 0x32e   :  { %v13515_v42 = vld [vmem:[#allocation5 + $0x938] sm:$0xf0] }
 0x32f   :  { %v18842_v38 = vld [vmem:[#allocation5 + $0xb1c] sm:$0xf]  ;;  %v13518_v5 = vor.u32 %v18778_v11, %v13515_v42  ;;  %4163 = vmatpush.bf16.msrb.mxu3 %v14318_v17 }
 0x330   :  { %v13771_v36 = vld [vmem:[#allocation5 + $0xb38] sm:$0xf0] }
 0x331   :  { %v18906_v45 = vld [vmem:[#allocation5 + $0xd1c] sm:$0xf]  ;;  %v13774_v56 = vor.u32 %v18842_v38, %v13771_v36  ;;  %4122 = vmatpush.bf16.msrb.mxu0 %v13518_v5  ;;  %v3639_v36 = vadd.f32 %v20500_v21, %v3625_v46  ;;  %v20586_v60 = vpop.f32.mrf.mxu1 }
 0x332   :  { %v14027_v15 = vld [vmem:[#allocation5 + $0xd38] sm:$0xf0] }
 0x333   :  { %v18970_v62 = vld [vmem:[#allocation5 + $0xf1c] sm:$0xf]  ;;  %v14030_v0 = vor.u32 %v18906_v45, %v14027_v15  ;;  %4136 = vmatpush.bf16.msrb.mxu1 %v13774_v56  ;;  %v3641_v15 = vadd.f32 %v20508_v37, %v3627_v8 }
 0x334   :  { %v14283_v51 = vld [vmem:[#allocation5 + $0xf38] sm:$0xf0] }
 0x335   :  { %v18770_v24 = vld [vmem:[#allocation5 + $0x8dc] sm:$0xf]  ;;  %v14286_v16 = vor.u32 %v18970_v62, %v14283_v51  ;;  %4150 = vmatpush.bf16.msrb.mxu2 %v14030_v0  ;;  %v20577_v62 = vpop.f32.mrf.mxu0  ;;  %v3445_v0 = vadd.f32 %v20440_v57, %v3431_v61  ;;  %v3655_v33 = vadd.f32 %v20510_v4, %v3641_v15  ;;  %v19059_v61 = vld [vmem:[#allocation8 + $0x1dc] sm:$0xf0] }
 0x336   :  { %v13483_v22 = vld [vmem:[#allocation5 + $0x8f8] sm:$0xf0] }
 0x337   :  { %v18834_v14 = vld [vmem:[#allocation5 + $0xadc] sm:$0xf]  ;;  %v13486_v47 = vor.u32 %v18770_v24, %v13483_v22  ;;  %4164 = vmatpush.bf16.msrb.mxu3 %v14286_v16  ;;  %v3653_v16 = vadd.f32 %v20502_v59, %v3639_v36  ;;  %v3459_v8 = vadd.f32 %v20445_v2, %v3445_v0  ;;  %v15121_v2 = vld [vmem:[#allocation8 + $0x5c0] sm:$0xf]  ;;  %v3669_v36 = vadd.f32 %v20512_v54, %v3655_v33 }
 0x338   :  { %v13739_v23 = vld [vmem:[#allocation5 + $0xaf8] sm:$0xf0] }
 0x339   :  { %v18898_v7 = vld [vmem:[#allocation5 + $0xcdc] sm:$0xf]  ;;  %v13742_v29 = vor.u32 %v18834_v14, %v13739_v23  ;;  %4123 = vmatpush.bf16.msrb.mxu0 %v13486_v47  ;;  %v3543_v14 = vadd.f32 %v20471_v40, %v3529_v20  ;;  %v3361_v40 = vadd.f32 %v20415_v3, %v3347_v18  ;;  %v20065_v18 = vld [vmem:[#allocation7] sm:$0xff] }
 0x33a   :  { %v13995_v32 = vld [vmem:[#allocation5 + $0xcf8] sm:$0xf0]  ;;  %v20599_v0 = vunpack.c.h.bf16 %v20065_v18  ;;  %v19235_v18 = vld [vmem:[#allocation8 + $0x75c] sm:$0xf0] }
 0x33b   :  { %v18962_v52 = vld [vmem:[#allocation5 + $0xedc] sm:$0xf]  ;;  %v13998_v34 = vor.u32 %v18898_v7, %v13995_v32  ;;  %4137 = vmatpush.bf16.msrb.mxu1 %v13742_v29 }
 0x33c   :  { %v14251_v35 = vld [vmem:[#allocation5 + $0xef8] sm:$0xf0] }
 0x33d   :  { %v18762_v1 = vld [vmem:[#allocation5 + $0x89c] sm:$0xf]  ;;  %v14254_v42 = vor.u32 %v18962_v52, %v14251_v35  ;;  %4151 = vmatpush.bf16.msrb.mxu2 %v13998_v34 }
 0x33e   :  { %v13451_v44 = vld [vmem:[#allocation5 + $0x8b8] sm:$0xf0] }
 0x33f   :  { %v18826_v11 = vld [vmem:[#allocation5 + $0xa9c] sm:$0xf]  ;;  %v13454_v45 = vor.u32 %v18762_v1, %v13451_v44  ;;  %4165 = vmatpush.bf16.msrb.mxu3 %v14254_v42  ;;  %v21279_v44 = vld [vmem:[#allocation30_spill] sm:$0xff] }
 0x340   :  { %v13707_v50 = vld [vmem:[#allocation5 + $0xab8] sm:$0xf0]  ;;  %v3557_v4 = vadd.f32 %v21279_v44, %v3543_v14  ;;  %v14865_v42 = vld [vmem:[#allocation8 + $0x3c0] sm:$0xf]  ;;  %v20602_v14 = vpop.f32.mrf.mxu3 }
 0x341   :  { %v18890_v38 = vld [vmem:[#allocation5 + $0xc9c] sm:$0xf]  ;;  %v13710_v49 = vor.u32 %v18826_v11, %v13707_v50  ;;  %4124 = vmatpush.bf16.msrb.mxu0 %v13454_v45  ;;  %v20591_v11 = vpop.f32.mrf.mxu2  ;;  %v20596_v45 = vpop.f32.mrf.mxu0 }
 0x342   :  { %v13963_v31 = vld [vmem:[#allocation5 + $0xcb8] sm:$0xf0] }
 0x343   :  { %v18954_v58 = vld [vmem:[#allocation5 + $0xe9c] sm:$0xf]  ;;  %v13966_v51 = vor.u32 %v18890_v38, %v13963_v31  ;;  %4138 = vmatpush.bf16.msrb.mxu1 %v13710_v49 }
 0x344   :  { %v14219_v17 = vld [vmem:[#allocation5 + $0xeb8] sm:$0xf0] }
 0x345   :  { %v18754_v6 = vld [vmem:[#allocation5 + $0x85c] sm:$0xf]  ;;  %v14222_v21 = vor.u32 %v18954_v58, %v14219_v17  ;;  %4152 = vmatpush.bf16.msrb.mxu2 %v13966_v51  ;;  %v19123_v58 = vld [vmem:[#allocation8 + $0x3dc] sm:$0xf0] }
 0x346   :  { %v13419_v5 = vld [vmem:[#allocation5 + $0x878] sm:$0xf0]  ;;  %v19187_v17 = vld [vmem:[#allocation8 + $0x5dc] sm:$0xf0]  ;;  %v14866_v54 = vor.u32 %v19123_v58, %v14865_v42 }
 0x347   :  { %v18818_v56 = vld [vmem:[#allocation5 + $0xa5c] sm:$0xf]  ;;  %v13422_v23 = vor.u32 %v18754_v6, %v13419_v5  ;;  %4166 = vmatpush.bf16.msrb.mxu3 %v14222_v21  ;;  %v15377_v51 = vld [vmem:[#allocation8 + $0x7c0] sm:$0xf]  ;;  %v21282_v5 = vld [vmem:[#allocation27_spill] sm:$0xff] }
 0x348   :  { %v13675_v24 = vld [vmem:[#allocation5 + $0xa78] sm:$0xf0]  ;;  %v19251_v6 = vld [vmem:[#allocation8 + $0x7dc] sm:$0xf0] }
 0x349   :  { %v18882_v22 = vld [vmem:[#allocation5 + $0xc5c] sm:$0xf]  ;;  %v13678_v57 = vor.u32 %v18818_v56, %v13675_v24  ;;  %4125 = vmatpush.bf16.msrb.mxu0 %v13422_v23  ;;  %v3473_v56 = vadd.f32 %v21282_v5, %v3459_v8  ;;  %v14610_v24 = vor.u32 %v19059_v61, %v14609_v27  ;;  %v14833_v23 = vld [vmem:[#allocation8 + $0x380] sm:$0xf]  ;;  %v15378_v33 = vor.u32 %v19251_v6, %v15377_v51  ;;  %v21289_v6 = vld [vmem:[#allocation21_spill] sm:$0xff] }
 0x34a   :  { %v13931_v37 = vld [vmem:[#allocation5 + $0xc78] sm:$0xf0]  ;;  %v15345_v8 = vld [vmem:[#allocation8 + $0x780] sm:$0xf] }
 0x34b   :  { %v18946_v28 = vld [vmem:[#allocation5 + $0xe5c] sm:$0xf]  ;;  %v13934_v52 = vor.u32 %v18882_v22, %v13931_v37  ;;  %4139 = vmatpush.bf16.msrb.mxu1 %v13678_v57  ;;  %v19115_v57 = vld [vmem:[#allocation8 + $0x39c] sm:$0xf0] }
 0x34c   :  { %v14187_v53 = vld [vmem:[#allocation5 + $0xe78] sm:$0xf0]  ;;  %v14545_v42 = vld [vmem:[#allocation8 + $0x140] sm:$0xf] }
 0x34d   :  { %v18746_v7 = vld [vmem:[#allocation5 + $0x81c] sm:$0xf]  ;;  %v14190_v59 = vor.u32 %v18946_v28, %v14187_v53  ;;  %4153 = vmatpush.bf16.msrb.mxu2 %v13934_v52  ;;  %v15122_v28 = vor.u32 %v19187_v17, %v15121_v2  ;;  %v14577_v53 = vld [vmem:[#allocation8 + $0x180] sm:$0xf] }
 0x34e   :  { %v13387_v32 = vld [vmem:[#allocation5 + $0x838] sm:$0xf0]  ;;  %v15089_v52 = vld [vmem:[#allocation8 + $0x580] sm:$0xf] }
 0x34f   :  { %v18810_v35 = vld [vmem:[#allocation5 + $0xa1c] sm:$0xf]  ;;  %v13390_v3 = vor.u32 %v18746_v7, %v13387_v32  ;;  %4167 = vmatpush.bf16.msrb.mxu3 %v14190_v59  ;;  %v19243_v59 = vld [vmem:[#allocation8 + $0x79c] sm:$0xf0] }
 0x350   :  { %v13643_v46 = vld [vmem:[#allocation5 + $0xa38] sm:$0xf0]  ;;  %v19107_v58 = vld [vmem:[#allocation8 + $0x35c] sm:$0xf0] }
 0x351   :  { %v18874_v47 = vld [vmem:[#allocation5 + $0xc1c] sm:$0xf]  ;;  %v13646_v15 = vor.u32 %v18810_v35, %v13643_v46  ;;  %4126 = vmatpush.bf16.msrb.mxu0 %v13390_v3  ;;  %v19179_v35 = vld [vmem:[#allocation8 + $0x59c] sm:$0xf0] }
 0x352   :  { %v13899_v29 = vld [vmem:[#allocation5 + $0xc38] sm:$0xf0]  ;;  %v15090_v61 = vor.u32 %v19179_v35, %v15089_v52  ;;  %v15057_v2 = vld [vmem:[#allocation8 + $0x540] sm:$0xf] }
 0x353   :  { %v18938_v34 = vld [vmem:[#allocation5 + $0xe1c] sm:$0xf]  ;;  %v13902_v49 = vor.u32 %v18874_v47, %v13899_v29  ;;  %v3683_v47 = vadd.f32 %v20524_v25, %v3669_v36  ;;  %4140 = vmatpush.bf16.msrb.mxu1 %v13646_v15  ;;  %v21285_v29 = vld [vmem:[#allocation25_spill] sm:$0xff]  ;;  %v14834_v25 = vor.u32 %v19115_v57, %v14833_v23  ;;  %v19171_v17 = vld [vmem:[#allocation8 + $0x55c] sm:$0xf0] }
 0x354   :  { %v14155_v1 = vld [vmem:[#allocation5 + $0xe38] sm:$0xf0]  ;;  %4127 = vmatmul.bf16.vlgmr.msrb.gmra.mxu0 %v20365_v39  ;;  %v21288_v36 = vld [vmem:[#allocation34_spill] sm:$0xff]  ;;  %v15058_v23 = vor.u32 %v19171_v17, %v15057_v2 }
 0x355   :  { %v21280_v50 = vld [vmem:[#allocation24_spill] sm:$0xff]  ;;  %v14158_v21 = vor.u32 %v18938_v34, %v14155_v1  ;;  %4154 = vmatpush.bf16.msrb.mxu2 %v13902_v49  ;;  %v659_v1 = vperm.slane %v20599_v0, 0  ;;  %7324 = vmatpush.bf16.msra.mxu0 %v14610_v24  ;;  %v3697_v51 = vadd.f32 %v20528_v9, %v3683_v47  ;;  %v20627_v9 = vpop.f32.mrf.mxu3  ;;  %v19099_v52 = vld [vmem:[#allocation8 + $0x31c] sm:$0xf0] }
 0x356   :  { %v3375_v38 = vadd.f32 %v21280_v50, %v3361_v40  ;;  %v21281_v31 = vld [vmem:[#allocation36_spill] sm:$0xff]  ;;  %v20607_v40 = vpop.f32.mrf.mxu1  ;;  %v19043_v50 = vld [vmem:[#allocation8 + $0x15c] sm:$0xf0]  ;;  %4141 = vmatmul.bf16.vlgmr.msrb.gmra.mxu1 %v21289_v6 }
 0x357   :  { %v3667_v20 = vadd.f32 %v21281_v31, %v3653_v16  ;;  %v21283_v22 = vld [vmem:[#allocation32_spill] sm:$0xff]  ;;  %v19051_v16 = vld [vmem:[#allocation8 + $0x19c] sm:$0xf0]  ;;  %4168 = vmatpush.bf16.msrb.mxu3 %v14158_v21  ;;  %7338 = vmatpush.bf16.msra.mxu1 %v14866_v54  ;;  %v21291_v21 = vld [vmem:[#allocation23_spill] sm:$0xff]  ;;  %v675_v39 = vperm.slane %v659_v1, 0  ;;  %v14546_v54 = vor.u32 %v19043_v50, %v14545_v42 }
 0x358   :  { %v3571_v37 = vadd.f32 %v21283_v22, %v3557_v4  ;;  %v21284_v7 = vld [vmem:[#allocation28_spill] sm:$0xff]  ;;  %v3389_v34 = vadd.f32 %v21285_v29, %v3375_v38  ;;  %v14578_v44 = vor.u32 %v19051_v16, %v14577_v53  ;;  %v21286_v4 = vld [vmem:[#allocation33_spill] sm:$0xff]  ;;  %v14801_v31 = vld [vmem:[#allocation8 + $0x340] sm:$0xf]  ;;  %v15346_v38 = vor.u32 %v19243_v59, %v15345_v8  ;;  %v3850_v53 = vpop.f32.mrf.mxu0 }
 0x359   :  { %v3487_v32 = vadd.f32 %v21284_v7, %v3473_v56  ;;  %v3681_v46 = vadd.f32 %v20514_v30, %v3667_v20  ;;  %7352 = vmatpush.bf16.msra.mxu2 %v15122_v28  ;;  %v20612_v30 = vpop.f32.mrf.mxu2  ;;  %v21287_v20 = vld [vmem:[#allocation29_spill] sm:$0xff]  ;;  %v21290_v5 = vld [vmem:[#allocation20_spill] sm:$0xff]  ;;  %v15313_v56 = vld [vmem:[#allocation8 + $0x740] sm:$0xf]  ;;  %v660_v22 = vperm.slane %v20599_v0, 2  ;;  %v14802_v16 = vor.u32 %v19107_v58, %v14801_v31 }
 0x35a   :  { %v3585_v27 = vadd.f32 %v21286_v4, %v3571_v37  ;;  %4155 = vmatmul.bf16.vlgmr.msrb.gmra.mxu2 %v21290_v5  ;;  %v20622_v24 = vpack.c.bf16 %v3389_v34, %v21291_v21  ;;  %v21292_v37 = vld [vmem:[#allocation22_spill] sm:$0xff]  ;;  %7325 = vmatpush.bf16.msra.mxu0 %v14578_v44  ;;  %v21293_v28 = vld [vmem:[#allocation39_spill] sm:$0xff]  ;;  %v15314_v57 = vor.u32 %v19235_v18, %v15313_v56  ;;  %v21296_v34 = vld [vmem:[#allocation37_spill] sm:$0xff] }
 0x35b   :  { %v3501_v3 = vadd.f32 %v21287_v20, %v3487_v32  ;;  %7366 = vmatpush.bf16.msra.mxu3 %v15378_v33  ;;  %v3695_v49 = vadd.f32 %v20517_v63, %v3681_v46  ;;  %v3711_v63 = vadd.f32 %v21293_v28, %v3697_v51  ;;  %7339 = vmatpush.bf16.msra.mxu1 %v14834_v25  ;;  %v14513_v7 = vld [vmem:[#allocation8 + $0x100] sm:$0xf]  ;;  %v21295_v59 = vld [vmem:[#allocation35_spill] sm:$0xff]  ;;  %v676_v25 = vperm.slane %v660_v22, 0  ;;  %v21297_v42 = vld [vmem:[#allocation41_spill] sm:$0xff] }
 0x35c   :  { %v3599_v15 = vadd.f32 %v21288_v36, %v3585_v27  ;;  %4169 = vmatmul.bf16.vlgmr.msrb.gmra.mxu3 %v21292_v37  ;;  %v19035_v32 = vld [vmem:[#allocation8 + $0x11c] sm:$0xf0]  ;;  %v4183_v27 = vunpack.c.l.bf16 %v20622_v24  ;;  %v4191_v17 = vunpack.c.h.bf16 %v20622_v24  ;;  %v21298_v36 = vld [vmem:[#allocation40_spill] sm:$0xff]  ;;  %v21299_v21 = vld [vmem:[#allocation31_spill] sm:$0xff] }
 0x35d   :  { %7353 = vmatpush.bf16.msra.mxu2 %v15090_v61  ;;  %v14769_v33 = vld [vmem:[#allocation8 + $0x300] sm:$0xf]  ;;  %v3709_v1 = vadd.f32 %v21296_v34, %v3695_v49  ;;  %v14514_v61 = vor.u32 %v19035_v32, %v14513_v7  ;;  %v3725_v50 = vadd.f32 %v21297_v42, %v3711_v63  ;;  %v3739_v49 = vadd.f32 %v20540_v12, %v675_v39 }
 0x35e   :  { %v15025_v35 = vld [vmem:[#allocation8 + $0x500] sm:$0xf]  ;;  %v3613_v29 = vadd.f32 %v21295_v59, %v3599_v15  ;;  %7326 = vmatpush.bf16.msra.mxu0 %v14546_v54  ;;  %v3864_v31 = vpop.f32.mrf.mxu1  ;;  %v14770_v20 = vor.u32 %v19099_v52, %v14769_v33  ;;  %v3737_v15 = vadd.f32 %v21298_v36, %v675_v39  ;;  %20033 = vtanh.f32 %v4183_v27 }
 0x35f   :  { %7367 = vmatpush.bf16.msra.mxu3 %v15346_v38  ;;  %v19163_v46 = vld [vmem:[#allocation8 + $0x51c] sm:$0xf0]  ;;  %7340 = vmatpush.bf16.msra.mxu1 %v14802_v16  ;;  %v3849_v24 = vadd.f32 %v20596_v45, %v676_v25  ;;  %20035 = vtanh.f32 %v4191_v17  ;;  %v3753_v59 = vadd.f32 %v20544_v13, %v3739_v49 }
 0x360   :  { %v21294_v47 = vld [vmem:[#allocation26_spill] sm:$0xff]  ;;  %v15026_v38 = vor.u32 %v19163_v46, %v15025_v35  ;;  %v4177_v22 = vpack.c.bf16 %v3613_v29, %v21299_v21 }
 0x361   :  { %v20630_v8 = vpack.c.bf16 %v3501_v3, %v21294_v47  ;;  %v15281_v44 = vld [vmem:[#allocation8 + $0x700] sm:$0xf]  ;;  %7354 = vmatpush.bf16.msra.mxu2 %v15058_v23  ;;  %v3878_v28 = vpop.f32.mrf.mxu2  ;;  %v3851_v23 = vadd.f32 %v3850_v53, %v676_v25 }
 0x362   :  { %v19227_v4 = vld [vmem:[#allocation8 + $0x71c] sm:$0xf0]  ;;  %7327 = vmatpush.bf16.msra.mxu0 %v14514_v61  ;;  %v4193_v25 = vunpack.c.h.bf16 %v4177_v22  ;;  %v3863_v61 = vadd.f32 %v20607_v40, %v3849_v24  ;;  %v3767_v40 = vadd.f32 %v20549_v41, %v3753_v59 }
 0x363   :  { %v14481_v3 = vld [vmem:[#allocation8 + $0xc0] sm:$0xf]  ;;  %7368 = vmatpush.bf16.msra.mxu3 %v15314_v57  ;;  %v15282_v51 = vor.u32 %v19227_v4, %v15281_v44  ;;  %v4184_v18 = vunpack.c.l.bf16 %v20630_v8  ;;  %v4192_v39 = vunpack.c.h.bf16 %v20630_v8  ;;  %7341 = vmatpush.bf16.msra.mxu1 %v14770_v20  ;;  %v4185_v8 = vunpack.c.l.bf16 %v4177_v22  ;;  %v20648_v44 = vpop.f32.mrf.mxu0 }
 0x364   :  { %v19027_v58 = vld [vmem:[#allocation8 + $0xdc] sm:$0xf0]  ;;  %v3865_v42 = vadd.f32 %v3864_v31, %v3851_v23  ;;  %v20652_v17 = vpop.eup %20033 }
 0x365   :  { %v14737_v2 = vld [vmem:[#allocation8 + $0x2c0] sm:$0xf]  ;;  %v14482_v12 = vor.u32 %v19027_v58, %v14481_v3  ;;  %7355 = vmatpush.bf16.msra.mxu2 %v15026_v38  ;;  %20037 = vtanh.f32 %v4184_v18  ;;  %v20036_v22 = vpop.eup %20035 }
 0x366   :  { %v19091_v6 = vld [vmem:[#allocation8 + $0x2dc] sm:$0xf0]  ;;  %20039 = vtanh.f32 %v4192_v39 }
 0x367   :  { %v14993_v5 = vld [vmem:[#allocation8 + $0x4c0] sm:$0xf]  ;;  %v14738_v32 = vor.u32 %v19091_v6, %v14737_v2  ;;  %7369 = vmatpush.bf16.msra.mxu3 %v15282_v51  ;;  %7328 = vmatpush.bf16.msra.mxu0 %v14482_v12  ;;  %20041 = vtanh.f32 %v4185_v8 }
 0x368   :  { %v19155_v56 = vld [vmem:[#allocation8 + $0x4dc] sm:$0xf0]  ;;  %20043 = vtanh.f32 %v4193_v25 }
 0x369   :  { %v21300_v37 = vld [vmem:[#allocation38_spill] sm:$0xff]  ;;  %v14994_v33 = vor.u32 %v19155_v56, %v14993_v5  ;;  %7342 = vmatpush.bf16.msra.mxu1 %v14738_v32  ;;  %v20657_v56 = vpop.f32.mrf.mxu1  ;;  %v20660_v41 = vpop.f32.mrf.mxu2 }
 0x36a   :  { %v3723_v54 = vadd.f32 %v21300_v37, %v3709_v1  ;;  %v15249_v63 = vld [vmem:[#allocation8 + $0x6c0] sm:$0xf]  ;;  %v3892_v1 = vpop.f32.mrf.mxu3  ;;  %v3877_v37 = vadd.f32 %v20612_v30, %v3863_v61  ;;  %v3781_v30 = vadd.f32 %v20558_v48, %v3767_v40 }
 0x36b   :  { %v19219_v16 = vld [vmem:[#allocation8 + $0x6dc] sm:$0xf0]  ;;  %7356 = vmatpush.bf16.msra.mxu2 %v14994_v33  ;;  %v20038_v24 = vpop.eup %20037 }
 0x36c   :  { %v20644_v7 = vpack.c.bf16 %v3725_v50, %v3723_v54  ;;  %v14449_v57 = vld [vmem:[#allocation8 + $0x80] sm:$0xf]  ;;  %v15250_v45 = vor.u32 %v19219_v16, %v15249_v63  ;;  %v3879_v54 = vadd.f32 %v3878_v28, %v3865_v42 }
 0x36d   :  { %v19019_v52 = vld [vmem:[#allocation8 + $0x9c] sm:$0xf0] }
 0x36e   :  { %v14705_v35 = vld [vmem:[#allocation8 + $0x280] sm:$0xf]  ;;  %v14450_v50 = vor.u32 %v19019_v52, %v14449_v57  ;;  %v4186_v13 = vunpack.c.l.bf16 %v20644_v7  ;;  %v4194_v36 = vunpack.c.h.bf16 %v20644_v7  ;;  %7370 = vmatpush.bf16.msra.mxu3 %v15250_v45 }
 0x36f   :  { %v21301_v46 = vld [vmem:[#allocation42_spill] sm:$0xff] }
 0x370   :  { %v3751_v47 = vadd.f32 %v21301_v46, %v3737_v15  ;;  %v19083_v53 = vld [vmem:[#allocation8 + $0x29c] sm:$0xf0]  ;;  %v21302_v15 = vld [vmem:[#allocation43_spill] sm:$0xff]  ;;  %7329 = vmatpush.bf16.msra.mxu0 %v14450_v50  ;;  %20045 = vtanh.f32 %v4186_v13  ;;  %v20040_v46 = vpop.eup %20039  ;;  %v3795_v13 = vadd.f32 %v20577_v62, %v3781_v30 }
 0x371   :  { %v14961_v29 = vld [vmem:[#allocation8 + $0x480] sm:$0xf]  ;;  %v14706_v20 = vor.u32 %v19083_v53, %v14705_v35  ;;  %20047 = vtanh.f32 %v4194_v36  ;;  %v3891_v53 = vadd.f32 %v20627_v9, %v3877_v37  ;;  %v20673_v62 = vpack.c.bf16 %v20040_v46, %v20038_v24 }
 0x372   :  { %v19147_v34 = vld [vmem:[#allocation8 + $0x49c] sm:$0xf0]  ;;  %v3765_v49 = vadd.f32 %v21302_v15, %v3751_v47  ;;  %v20665_v25 = vpop.f32.mrf.mxu3  ;;  %v3809_v37 = vadd.f32 %v20586_v60, %v3795_v13 }
 0x373   :  { %v15217_v4 = vld [vmem:[#allocation8 + $0x680] sm:$0xf]  ;;  %v14962_v38 = vor.u32 %v19147_v34, %v14961_v29  ;;  %7343 = vmatpush.bf16.msra.mxu1 %v14706_v20  ;;  %v3893_v29 = vadd.f32 %v3892_v1, %v3879_v54  ;;  %v3905_v40 = vadd.f32 %v20648_v44, %v3891_v53 }
 0x374   :  { %v19211_v27 = vld [vmem:[#allocation8 + $0x69c] sm:$0xf0]  ;;  %v3779_v33 = vadd.f32 %v20542_v55, %v3765_v49  ;;  %v3906_v55 = vpop.f32.mrf.mxu0  ;;  %v20670_v49 = vpack.c.bf16 %v20036_v22, %v20652_v17 }
 0x375   :  { %v14417_v3 = vld [vmem:[#allocation8 + $0x40] sm:$0xf]  ;;  %v15218_v31 = vor.u32 %v19211_v27, %v15217_v4  ;;  %7357 = vmatpush.bf16.msra.mxu2 %v14962_v38  ;;  %v20042_v27 = vpop.eup %20041 }
 0x376   :  { %v19011_v58 = vld [vmem:[#allocation8 + $0x5c] sm:$0xf0]  ;;  %v20044_v42 = vpop.eup %20043  ;;  %v3793_v50 = vadd.f32 %v20560_v10, %v3779_v33 }
 0x377   :  { %v14673_v2 = vld [vmem:[#allocation8 + $0x240] sm:$0xf]  ;;  %v14418_v63 = vor.u32 %v19011_v58, %v14417_v3  ;;  %7371 = vmatpush.bf16.msra.mxu3 %v15218_v31  ;;  %v20046_v3 = vpop.eup %20045  ;;  %v3907_v31 = vadd.f32 %v3906_v55, %v3893_v29 }
 0x378   :  { %v19075_v51 = vld [vmem:[#allocation8 + $0x25c] sm:$0xf0]  ;;  %v20048_v15 = vpop.eup %20047 }
 0x379   :  { %v14929_v6 = vld [vmem:[#allocation8 + $0x440] sm:$0xf]  ;;  %v14674_v23 = vor.u32 %v19075_v51, %v14673_v2  ;;  %7330 = vmatpush.bf16.msra.mxu0 %v14418_v63  ;;  %v20679_v54 = vpack.c.bf16 %v20048_v15, %v20046_v3  ;;  %v3934_v63 = vpop.f32.mrf.mxu2 }
 0x37a   :  { %v19139_v5 = vld [vmem:[#allocation8 + $0x45c] sm:$0xf0] }
 0x37b   :  { %v15185_v18 = vld [vmem:[#allocation8 + $0x640] sm:$0xf]  ;;  %v14930_v12 = vor.u32 %v19139_v5, %v14929_v6  ;;  %7344 = vmatpush.bf16.msra.mxu1 %v14674_v23  ;;  %v20675_v6 = vpack.c.bf16 %v20044_v42, %v20042_v27  ;;  %v3920_v5 = vpop.f32.mrf.mxu1 }
 0x37c   :  { %v19203_v21 = vld [vmem:[#allocation8 + $0x65c] sm:$0xf0] }
 0x37d   :  { %v14385_v16 = vld [vmem:[#allocation8] sm:$0xf]  ;;  %v15186_v28 = vor.u32 %v19203_v21, %v15185_v18  ;;  %7358 = vmatpush.bf16.msra.mxu2 %v14930_v12  ;;  %v3807_v21 = vadd.f32 %v20566_v26, %v3793_v50  ;;  %v3823_v12 = vadd.f32 %v20591_v11, %v3809_v37  ;;  %v3919_v26 = vadd.f32 %v20657_v56, %v3905_v40  ;;  %v3960_v37 = vpop.f32.mrf.mxu0 }
 0x37e   :  { %v19003_v39 = vld [vmem:[#allocation8 + $0x1c] sm:$0xf0] }
 0x37f   :  { %v14641_v7 = vld [vmem:[#allocation8 + $0x200] sm:$0xf]  ;;  %v14386_v34 = vor.u32 %v19003_v39, %v14385_v16  ;;  %7372 = vmatpush.bf16.msra.mxu3 %v15186_v28  ;;  %v3921_v39 = vadd.f32 %v3920_v5, %v3907_v31  ;;  %v3821_v33 = vadd.f32 %v20570_v43, %v3807_v21 }
 0x380   :  { %v19067_v32 = vld [vmem:[#allocation8 + $0x21c] sm:$0xf0] }
 0x381   :  { %v14897_v57 = vld [vmem:[#allocation8 + $0x400] sm:$0xf]  ;;  %v14642_v48 = vor.u32 %v19067_v32, %v14641_v7  ;;  %7331 = vmatpush.bf16.msra.mxu0 %v14386_v34  ;;  %v3935_v30 = vadd.f32 %v3934_v63, %v3921_v39  ;;  %v3835_v43 = vadd.f32 %v20579_v19, %v3821_v33 }
 0x382   :  { %v19131_v52 = vld [vmem:[#allocation8 + $0x41c] sm:$0xf0] }
 0x383   :  { %v15153_v35 = vld [vmem:[#allocation8 + $0x600] sm:$0xf]  ;;  %v14898_v61 = vor.u32 %v19131_v52, %v14897_v57  ;;  %7345 = vmatpush.bf16.msra.mxu1 %v14642_v48  ;;  %v3948_v52 = vpop.f32.mrf.mxu3 }
 0x384   :  { %v19195_v47 = vld [vmem:[#allocation8 + $0x61c] sm:$0xf0]  ;;  %7332 = vmatmul.bf16.vlgmr.msra.gmra.mxu0 %v20670_v49  ;;  %v3949_v34 = vadd.f32 %v3948_v52, %v3935_v30  ;;  %v19119_v52 = vld [vmem:[#allocation8 + $0x3c4] sm:$0xf] }
 0x385   :  { %v15633_v59 = vld [vmem:[#allocation8 + $0x9c0] sm:$0xf]  ;;  %v15154_v9 = vor.u32 %v19195_v47, %v15153_v35  ;;  %7359 = vmatpush.bf16.msra.mxu2 %v14898_v61  ;;  %v3837_v47 = vadd.f32 %v20602_v14, %v3823_v12 }
 0x386   :  { %v19315_v45 = vld [vmem:[#allocation8 + $0x9dc] sm:$0xf0]  ;;  %7346 = vmatmul.bf16.vlgmr.msra.gmra.mxu1 %v20673_v62 }
 0x387   :  { %v15889_v8 = vld [vmem:[#allocation8 + $0xbc0] sm:$0xf]  ;;  %v15634_v1 = vor.u32 %v19315_v45, %v15633_v59  ;;  %7373 = vmatpush.bf16.msra.mxu3 %v15154_v9  ;;  %v3933_v59 = vadd.f32 %v20660_v41, %v3919_v26  ;;  %v4179_v42 = vpack.c.bf16 %v3837_v47, %v3835_v43 }
 0x388   :  { %v19379_v4 = vld [vmem:[#allocation8 + $0xbdc] sm:$0xf0]  ;;  %7360 = vmatmul.bf16.vlgmr.msra.gmra.mxu2 %v20675_v6 }
 0x389   :  { %v16145_v20 = vld [vmem:[#allocation8 + $0xdc0] sm:$0xf]  ;;  %v15890_v58 = vor.u32 %v19379_v4, %v15889_v8  ;;  %7380 = vmatpush.bf16.msrb.mxu0 %v15634_v1  ;;  %v3947_v14 = vadd.f32 %v20665_v25, %v3933_v59  ;;  %v4195_v40 = vunpack.c.h.bf16 %v4179_v42  ;;  %v3988_v59 = vpop.f32.mrf.mxu2 }
 0x38a   :  { %v19443_v38 = vld [vmem:[#allocation8 + $0xddc] sm:$0xf0]  ;;  %7374 = vmatmul.bf16.vlgmr.msra.gmra.mxu3 %v20679_v54 }
 0x38b   :  { %v15601_v2 = vld [vmem:[#allocation8 + $0x980] sm:$0xf]  ;;  %v16146_v18 = vor.u32 %v19443_v38, %v16145_v20  ;;  %7394 = vmatpush.bf16.msrb.mxu1 %v15890_v58  ;;  %v4180_v9 = vpack.c.bf16 %v3949_v34, %v3947_v14 }
 0x38c   :  { %v19307_v36 = vld [vmem:[#allocation8 + $0x99c] sm:$0xf0] }
 0x38d   :  { %v15857_v10 = vld [vmem:[#allocation8 + $0xb80] sm:$0xf]  ;;  %v15602_v17 = vor.u32 %v19307_v36, %v15601_v2  ;;  %7408 = vmatpush.bf16.msrb.mxu2 %v16146_v18  ;;  %v4187_v2 = vunpack.c.l.bf16 %v4179_v42  ;;  %v4188_v25 = vunpack.c.l.bf16 %v4180_v9  ;;  %v4196_v18 = vunpack.c.h.bf16 %v4180_v9  ;;  %v14579_v42 = vld [vmem:[#allocation8 + $0x1a0] sm:$0xf0] }
 0x38e   :  { %v19371_v51 = vld [vmem:[#allocation8 + $0xb9c] sm:$0xf0]  ;;  %v14835_v9 = vld [vmem:[#allocation8 + $0x3a0] sm:$0xf0] }
 0x38f   :  { %v16113_v44 = vld [vmem:[#allocation8 + $0xd80] sm:$0xf]  ;;  %v15858_v16 = vor.u32 %v19371_v51, %v15857_v10  ;;  %7381 = vmatpush.bf16.msrb.mxu0 %v15602_v17  ;;  %20049 = vtanh.f32 %v4187_v2  ;;  %v15091_v2 = vld [vmem:[#allocation8 + $0x5a0] sm:$0xf0] }
 0x390   :  { %v19435_v22 = vld [vmem:[#allocation8 + $0xd9c] sm:$0xf0]  ;;  %20051 = vtanh.f32 %v4195_v40  ;;  %v19039_v40 = vld [vmem:[#allocation8 + $0x144] sm:$0xf] }
 0x391   :  { %v15569_v24 = vld [vmem:[#allocation8 + $0x940] sm:$0xf]  ;;  %v16114_v32 = vor.u32 %v19435_v22, %v16113_v44  ;;  %7395 = vmatpush.bf16.msrb.mxu1 %v15858_v16  ;;  %v3974_v16 = vpop.f32.mrf.mxu1  ;;  %20053 = vtanh.f32 %v4188_v25 }
 0x392   :  { %v19299_v23 = vld [vmem:[#allocation8 + $0x95c] sm:$0xf0]  ;;  %20055 = vtanh.f32 %v4196_v18 }
 0x393   :  { %v15825_v60 = vld [vmem:[#allocation8 + $0xb40] sm:$0xf]  ;;  %v15570_v28 = vor.u32 %v19299_v23, %v15569_v24  ;;  %7409 = vmatpush.bf16.msrb.mxu2 %v16114_v32  ;;  %v661_v24 = vperm.slane %v20599_v0, 4 }
 0x394   :  { %v19363_v7 = vld [vmem:[#allocation8 + $0xb5c] sm:$0xf0] }
 0x395   :  { %v16081_v57 = vld [vmem:[#allocation8 + $0xd40] sm:$0xf]  ;;  %v15826_v56 = vor.u32 %v19363_v7, %v15825_v60  ;;  %7382 = vmatpush.bf16.msrb.mxu0 %v15570_v28  ;;  %v19055_v28 = vld [vmem:[#allocation8 + $0x1c4] sm:$0xf] }
 0x396   :  { %v19427_v11 = vld [vmem:[#allocation8 + $0xd5c] sm:$0xf0] }
 0x397   :  { %v15537_v35 = vld [vmem:[#allocation8 + $0x900] sm:$0xf]  ;;  %v16082_v29 = vor.u32 %v19427_v11, %v16081_v57  ;;  %7396 = vmatpush.bf16.msrb.mxu1 %v15826_v56  ;;  %v14611_v57 = vld [vmem:[#allocation8 + $0x1e0] sm:$0xf0]  ;;  %v677_v11 = vperm.slane %v661_v24, 0 }
 0x398   :  { %v19291_v46 = vld [vmem:[#allocation8 + $0x91c] sm:$0xf0]  ;;  %v14867_v56 = vld [vmem:[#allocation8 + $0x3e0] sm:$0xf0]  ;;  %v14614_v34 = vor.u32 %v19055_v28, %v14611_v57 }
 0x399   :  { %v15793_v45 = vld [vmem:[#allocation8 + $0xb00] sm:$0xf]  ;;  %v15538_v8 = vor.u32 %v19291_v46, %v15537_v35  ;;  %7410 = vmatpush.bf16.msrb.mxu2 %v16082_v29  ;;  %v20050_v46 = vpop.eup %20049  ;;  %v14515_v24 = vld [vmem:[#allocation8 + $0x120] sm:$0xf0] }
 0x39a   :  { %v19355_v53 = vld [vmem:[#allocation8 + $0xb1c] sm:$0xf0]  ;;  %v20052_v29 = vpop.eup %20051  ;;  %v15027_v28 = vld [vmem:[#allocation8 + $0x520] sm:$0xf0] }
 0x39b   :  { %v16049_v4 = vld [vmem:[#allocation8 + $0xd00] sm:$0xf]  ;;  %v15794_v55 = vor.u32 %v19355_v53, %v15793_v45  ;;  %7383 = vmatpush.bf16.msrb.mxu0 %v15538_v8  ;;  %v20693_v8 = vpop.f32.mrf.mxu3 }
 0x39c   :  { %v19419_v27 = vld [vmem:[#allocation8 + $0xd1c] sm:$0xf0] }
 0x39d   :  { %v15505_v48 = vld [vmem:[#allocation8 + $0x8c0] sm:$0xf]  ;;  %v16050_v13 = vor.u32 %v19419_v27, %v16049_v4  ;;  %7397 = vmatpush.bf16.msrb.mxu1 %v15794_v55  ;;  %v19183_v4 = vld [vmem:[#allocation8 + $0x5c4] sm:$0xf]  ;;  %v20054_v55 = vpop.eup %20053 }
 0x39e   :  { %v19283_v61 = vld [vmem:[#allocation8 + $0x8dc] sm:$0xf0]  ;;  %v15123_v27 = vld [vmem:[#allocation8 + $0x5e0] sm:$0xf0]  ;;  %v20056_v14 = vpop.eup %20055 }
 0x39f   :  { %v15761_v50 = vld [vmem:[#allocation8 + $0xac0] sm:$0xf]  ;;  %v15506_v1 = vor.u32 %v19283_v61, %v15505_v48  ;;  %7411 = vmatpush.bf16.msrb.mxu2 %v16050_v13  ;;  %v14870_v48 = vor.u32 %v19119_v52, %v14867_v56  ;;  %v19047_v61 = vld [vmem:[#allocation8 + $0x184] sm:$0xf] }
 0x3a0   :  { %v19347_v41 = vld [vmem:[#allocation8 + $0xadc] sm:$0xf0]  ;;  %v19111_v13 = vld [vmem:[#allocation8 + $0x384] sm:$0xf] }
 0x3a1   :  { %v16017_v19 = vld [vmem:[#allocation8 + $0xcc0] sm:$0xf]  ;;  %v15762_v38 = vor.u32 %v19347_v41, %v15761_v50  ;;  %7384 = vmatpush.bf16.msrb.mxu0 %v15506_v1  ;;  %v3961_v50 = vadd.f32 %v3960_v37, %v677_v11  ;;  %v3962_v41 = vpop.f32.mrf.mxu0  ;;  %v19167_v37 = vld [vmem:[#allocation8 + $0x544] sm:$0xf] }
 0x3a2   :  { %v19411_v20 = vld [vmem:[#allocation8 + $0xcdc] sm:$0xf0]  ;;  %v14483_v52 = vld [vmem:[#allocation8 + $0xe0] sm:$0xf0] }
 0x3a3   :  { %v15473_v3 = vld [vmem:[#allocation8 + $0x880] sm:$0xf]  ;;  %v16018_v31 = vor.u32 %v19411_v20, %v16017_v19  ;;  %7398 = vmatpush.bf16.msrb.mxu1 %v15762_v38  ;;  %v3976_v19 = vpop.f32.mrf.mxu1  ;;  %v15126_v20 = vor.u32 %v19183_v4, %v15123_v27  ;;  %v20695_v38 = vpack.c.bf16 %v20052_v29, %v20050_v46  ;;  %v3975_v25 = vadd.f32 %v3974_v16, %v3961_v50  ;;  %v19151_v4 = vld [vmem:[#allocation8 + $0x4c4] sm:$0xf] }
 0x3a4   :  { %v19275_v58 = vld [vmem:[#allocation8 + $0x89c] sm:$0xf0]  ;;  %v14995_v27 = vld [vmem:[#allocation8 + $0x4e0] sm:$0xf0] }
 0x3a5   :  { %v15729_v36 = vld [vmem:[#allocation8 + $0xa80] sm:$0xf]  ;;  %v15474_v10 = vor.u32 %v19275_v58, %v15473_v3  ;;  %7412 = vmatpush.bf16.msrb.mxu2 %v16018_v31  ;;  %v14582_v3 = vor.u32 %v19047_v61, %v14579_v42  ;;  %v19175_v58 = vld [vmem:[#allocation8 + $0x584] sm:$0xf]  ;;  %v3989_v16 = vadd.f32 %v3988_v59, %v3975_v25 }
 0x3a6   :  { %v19339_v15 = vld [vmem:[#allocation8 + $0xa9c] sm:$0xf0]  ;;  %v14547_v31 = vld [vmem:[#allocation8 + $0x160] sm:$0xf0]  ;;  %v15094_v18 = vor.u32 %v19175_v58, %v15091_v2 }
 0x3a7   :  { %v15985_v51 = vld [vmem:[#allocation8 + $0xc80] sm:$0xf]  ;;  %v15730_v21 = vor.u32 %v19339_v15, %v15729_v36  ;;  %7385 = vmatpush.bf16.msrb.mxu0 %v15474_v10  ;;  %v20697_v36 = vpack.c.bf16 %v20056_v14, %v20054_v55  ;;  %v14838_v15 = vor.u32 %v19111_v13, %v14835_v9  ;;  %v3963_v10 = vadd.f32 %v3962_v41, %v677_v11  ;;  %v19087_v59 = vld [vmem:[#allocation8 + $0x2c4] sm:$0xf] }
 0x3a8   :  { %v19403_v5 = vld [vmem:[#allocation8 + $0xc9c] sm:$0xf0]  ;;  %v4003_v46 = vadd.f32 %v20693_v8, %v3989_v16  ;;  %v19079_v8 = vld [vmem:[#allocation8 + $0x284] sm:$0xf] }
 0x3a9   :  { %v15441_v17 = vld [vmem:[#allocation8 + $0x840] sm:$0xf]  ;;  %v15986_v23 = vor.u32 %v19403_v5, %v15985_v51  ;;  %7399 = vmatpush.bf16.msrb.mxu1 %v15730_v21  ;;  %v19103_v51 = vld [vmem:[#allocation8 + $0x344] sm:$0xf]  ;;  %v14550_v21 = vor.u32 %v19039_v40, %v14547_v31 }
 0x3aa   :  { %v19267_v44 = vld [vmem:[#allocation8 + $0x85c] sm:$0xf0]  ;;  %v14803_v5 = vld [vmem:[#allocation8 + $0x360] sm:$0xf0] }
 0x3ab   :  { %v15697_v22 = vld [vmem:[#allocation8 + $0xa40] sm:$0xf]  ;;  %v15442_v12 = vor.u32 %v19267_v44, %v15441_v17  ;;  %7413 = vmatpush.bf16.msrb.mxu2 %v15986_v23  ;;  %v15059_v17 = vld [vmem:[#allocation8 + $0x560] sm:$0xf0]  ;;  %v14806_v44 = vor.u32 %v19103_v51, %v14803_v5  ;;  %v3977_v23 = vadd.f32 %v3976_v19, %v3963_v10  ;;  %v4030_v11 = vpop.f32.mrf.mxu1 }
 0x3ac   :  { %v19331_v63 = vld [vmem:[#allocation8 + $0xa5c] sm:$0xf0]  ;;  %v14707_v41 = vld [vmem:[#allocation8 + $0x2a0] sm:$0xf0] }
 0x3ad   :  { %v15953_v26 = vld [vmem:[#allocation8 + $0xc40] sm:$0xf]  ;;  %v15698_v60 = vor.u32 %v19331_v63, %v15697_v22  ;;  %7386 = vmatpush.bf16.msrb.mxu0 %v15442_v12  ;;  %v3990_v22 = vpop.f32.mrf.mxu2  ;;  %v19031_v63 = vld [vmem:[#allocation8 + $0x104] sm:$0xf]  ;;  %v4004_v12 = vpop.f32.mrf.mxu3  ;;  %v14710_v40 = vor.u32 %v19079_v8, %v14707_v41 }
 0x3ae   :  { %v19395_v39 = vld [vmem:[#allocation8 + $0xc5c] sm:$0xf0]  ;;  %v19007_v58 = vld [vmem:[#allocation8 + $0x44] sm:$0xf] }
 0x3af   :  { %v15409_v7 = vld [vmem:[#allocation8 + $0x800] sm:$0xf]  ;;  %v15954_v35 = vor.u32 %v19395_v39, %v15953_v26  ;;  %7400 = vmatpush.bf16.msrb.mxu1 %v15698_v60  ;;  %v19095_v26 = vld [vmem:[#allocation8 + $0x304] sm:$0xf]  ;;  %v15062_v60 = vor.u32 %v19167_v37, %v15059_v17 }
 0x3b0   :  { %v19259_v32 = vld [vmem:[#allocation8 + $0x81c] sm:$0xf0]  ;;  %v14771_v39 = vld [vmem:[#allocation8 + $0x320] sm:$0xf0] }
 0x3b1   :  { %v15665_v33 = vld [vmem:[#allocation8 + $0xa00] sm:$0xf]  ;;  %v15410_v47 = vor.u32 %v19259_v32, %v15409_v7  ;;  %7414 = vmatpush.bf16.msrb.mxu2 %v15954_v35  ;;  %v4016_v7 = vpop.f32.mrf.mxu0  ;;  %v14518_v32 = vor.u32 %v19031_v63, %v14515_v24  ;;  %v14774_v57 = vor.u32 %v19095_v26, %v14771_v39  ;;  %v19143_v2 = vld [vmem:[#allocation8 + $0x484] sm:$0xf] }
 0x3b2   :  { %v19323_v30 = vld [vmem:[#allocation8 + $0xa1c] sm:$0xf0]  ;;  %v4017_v50 = vadd.f32 %v4016_v7, %v4003_v46  ;;  %v14419_v31 = vld [vmem:[#allocation8 + $0x60] sm:$0xf0] }
 0x3b3   :  { %v15921_v45 = vld [vmem:[#allocation8 + $0xc00] sm:$0xf]  ;;  %v15666_v43 = vor.u32 %v19323_v30, %v15665_v33  ;;  %7387 = vmatpush.bf16.msrb.mxu0 %v15410_v47  ;;  %v19023_v33 = vld [vmem:[#allocation8 + $0xc4] sm:$0xf]  ;;  %v3991_v47 = vadd.f32 %v3990_v22, %v3977_v23  ;;  %v4032_v17 = vpop.f32.mrf.mxu1  ;;  %v14422_v63 = vor.u32 %v19007_v58, %v14419_v31 }
 0x3b4   :  { %v19387_v53 = vld [vmem:[#allocation8 + $0xc1c] sm:$0xf0]  ;;  %v19159_v30 = vld [vmem:[#allocation8 + $0x504] sm:$0xf]  ;;  %v4031_v51 = vadd.f32 %v4030_v11, %v4017_v50 }
 0x3b5   :  { %v15922_v1 = vor.u32 %v19387_v53, %v15921_v45  ;;  %7401 = vmatpush.bf16.msrb.mxu1 %v15666_v43  ;;  %v16401_v56 = vld [vmem:[#allocation8 + $0xfc0] sm:$0xf]  ;;  %v14739_v45 = vld [vmem:[#allocation8 + $0x2e0] sm:$0xf0]  ;;  %v15030_v29 = vor.u32 %v19159_v30, %v15027_v28  ;;  %v14486_v43 = vor.u32 %v19023_v33, %v14483_v52  ;;  %v4005_v14 = vadd.f32 %v4004_v12, %v3991_v47  ;;  %v4044_v9 = vpop.f32.mrf.mxu2 }
 0x3b6   :  { %7388 = vmatmul.bf16.vlgmr.msrb.gmra.mxu0 %v20695_v38  ;;  %v19507_v35 = vld [vmem:[#allocation8 + $0xfdc] sm:$0xf0]  ;;  %v14742_v55 = vor.u32 %v19087_v59, %v14739_v45  ;;  %v14387_v24 = vld [vmem:[#allocation8 + $0x20] sm:$0xf0]  ;;  %v4045_v7 = vadd.f32 %v4044_v9, %v4031_v51 }
 0x3b7   :  { %7436 = vmatpush.bf16.msra.mxu0 %v14614_v34  ;;  %7415 = vmatpush.bf16.msrb.mxu2 %v15922_v1  ;;  %v16402_v53 = vor.u32 %v19507_v35, %v16401_v56  ;;  %v19015_v34 = vld [vmem:[#allocation8 + $0x84] sm:$0xf]  ;;  %v16369_v61 = vld [vmem:[#allocation8 + $0xf80] sm:$0xf]  ;;  %v14998_v1 = vor.u32 %v19151_v4, %v14995_v27 }
 0x3b8   :  { %7402 = vmatmul.bf16.vlgmr.msrb.gmra.mxu1 %v20697_v36  ;;  %v19499_v42 = vld [vmem:[#allocation8 + $0xf9c] sm:$0xf0]  ;;  %v19135_v16 = vld [vmem:[#allocation8 + $0x444] sm:$0xf] }
 0x3b9   :  { %7450 = vmatpush.bf16.msra.mxu1 %v14870_v48  ;;  %7422 = vmatpush.bf16.msrb.mxu3 %v16402_v53  ;;  %v14451_v48 = vld [vmem:[#allocation8 + $0xa0] sm:$0xf0]  ;;  %v16370_v13 = vor.u32 %v19499_v42, %v16369_v61  ;;  %v4018_v19 = vpop.f32.mrf.mxu0  ;;  %v16337_v25 = vld [vmem:[#allocation8 + $0xf40] sm:$0xf] }
 0x3ba   :  { %v19491_v10 = vld [vmem:[#allocation8 + $0xf5c] sm:$0xf0]  ;;  %v4019_v5 = vadd.f32 %v4018_v19, %v4005_v14  ;;  %v14931_v23 = vld [vmem:[#allocation8 + $0x460] sm:$0xf0] }
 0x3bb   :  { %7464 = vmatpush.bf16.msra.mxu2 %v15126_v20  ;;  %7437 = vmatpush.bf16.msra.mxu0 %v14582_v3  ;;  %v4058_v20 = vpop.f32.mrf.mxu3  ;;  %v14454_v3 = vor.u32 %v19015_v34, %v14451_v48  ;;  %v16338_v37 = vor.u32 %v19491_v10, %v16337_v25  ;;  %v19063_v26 = vld [vmem:[#allocation8 + $0x204] sm:$0xf]  ;;  %v16305_v39 = vld [vmem:[#allocation8 + $0xf00] sm:$0xf]  ;;  %v14934_v35 = vor.u32 %v19135_v16, %v14931_v23 }
 0x3bc   :  { %v14643_v33 = vld [vmem:[#allocation8 + $0x220] sm:$0xf0]  ;;  %v16273_v34 = vld [vmem:[#allocation8 + $0xec0] sm:$0xf]  ;;  %v4059_v4 = vadd.f32 %v4058_v20, %v4045_v7 }
 0x3bd   :  { %7451 = vmatpush.bf16.msra.mxu1 %v14838_v15  ;;  %v14963_v15 = vld [vmem:[#allocation8 + $0x4a0] sm:$0xf0]  ;;  %7423 = vmatpush.bf16.msrb.mxu3 %v16370_v13  ;;  %v4046_v11 = vpop.f32.mrf.mxu2  ;;  %v19475_v42 = vld [vmem:[#allocation8 + $0xedc] sm:$0xf0] }
 0x3be   :  { %v14966_v22 = vor.u32 %v19143_v2, %v14963_v15  ;;  %v19311_v30 = vld [vmem:[#allocation8 + $0x9c4] sm:$0xf]  ;;  %v16274_v41 = vor.u32 %v19475_v42, %v16273_v34  ;;  %v19467_v19 = vld [vmem:[#allocation8 + $0xe9c] sm:$0xf0] }
 0x3bf   :  { %7465 = vmatpush.bf16.msra.mxu2 %v15094_v18  ;;  %7438 = vmatpush.bf16.msra.mxu0 %v14550_v21  ;;  %v19071_v18 = vld [vmem:[#allocation8 + $0x244] sm:$0xf]  ;;  %v16209_v51 = vld [vmem:[#allocation8 + $0xe40] sm:$0xf] }
 0x3c0   :  { %v14675_v21 = vld [vmem:[#allocation8 + $0x260] sm:$0xf0]  ;;  %v16177_v23 = vld [vmem:[#allocation8 + $0xe00] sm:$0xf] }
 0x3c1   :  { %7452 = vmatpush.bf16.msra.mxu1 %v14806_v44  ;;  %v18999_v44 = vld [vmem:[#allocation8 + $0x4] sm:$0xf]  ;;  %7424 = vmatpush.bf16.msrb.mxu3 %v16338_v37  ;;  %v14678_v12 = vor.u32 %v19071_v18, %v14675_v21 }
 0x3c2   :  { %v15635_v28 = vld [vmem:[#allocation8 + $0x9e0] sm:$0xf0]  ;;  %v14390_v59 = vor.u32 %v18999_v44, %v14387_v24 }
 0x3c3   :  { %7466 = vmatpush.bf16.msra.mxu2 %v15062_v60  ;;  %7439 = vmatpush.bf16.msra.mxu0 %v14518_v32  ;;  %v19483_v60 = vld [vmem:[#allocation8 + $0xf1c] sm:$0xf0]  ;;  %v4033_v32 = vadd.f32 %v4032_v17, %v4019_v5  ;;  %v19375_v52 = vld [vmem:[#allocation8 + $0xbc4] sm:$0xf]  ;;  %v4060_v47 = vpop.f32.mrf.mxu3 }
 0x3c4   :  { %v15891_v56 = vld [vmem:[#allocation8 + $0xbe0] sm:$0xf0]  ;;  %v19459_v5 = vld [vmem:[#allocation8 + $0xe5c] sm:$0xf0] }
 0x3c5   :  { %7453 = vmatpush.bf16.msra.mxu1 %v14774_v57  ;;  %v16306_v57 = vor.u32 %v19483_v60, %v16305_v39  ;;  %v4047_v46 = vadd.f32 %v4046_v11, %v4033_v32  ;;  %v19127_v45 = vld [vmem:[#allocation8 + $0x404] sm:$0xf]  ;;  %v16210_v17 = vor.u32 %v19459_v5, %v16209_v51 }
 0x3c6   :  { %v14899_v53 = vld [vmem:[#allocation8 + $0x420] sm:$0xf0] }
 0x3c7   :  { %7467 = vmatpush.bf16.msra.mxu2 %v15030_v29  ;;  %7440 = vmatpush.bf16.msra.mxu0 %v14486_v43  ;;  %v14646_v29 = vor.u32 %v19063_v26, %v14643_v33  ;;  %v15638_v43 = vor.u32 %v19311_v30, %v15635_v28  ;;  %v4061_v27 = vadd.f32 %v4060_v47, %v4047_v46  ;;  %v19303_v48 = vld [vmem:[#allocation8 + $0x984] sm:$0xf] }
 0x3c8   :  { %7425 = vmatpush.bf16.msrb.mxu3 %v16306_v57  ;;  %v15603_v61 = vld [vmem:[#allocation8 + $0x9a0] sm:$0xf0]  ;;  %v14902_v8 = vor.u32 %v19127_v45, %v14899_v53 }
 0x3c9   :  { %7454 = vmatpush.bf16.msra.mxu1 %v14742_v55  ;;  %v15894_v55 = vor.u32 %v19375_v52, %v15891_v56  ;;  %v19367_v14 = vld [vmem:[#allocation8 + $0xb84] sm:$0xf]  ;;  %v4181_v13 = vpack.c.bf16 %v4061_v27, %v4059_v4  ;;  %v15606_v9 = vor.u32 %v19303_v48, %v15603_v61 }
 0x3ca   :  { %v15859_v50 = vld [vmem:[#allocation8 + $0xba0] sm:$0xf0] }
 0x3cb   :  { %7468 = vmatpush.bf16.msra.mxu2 %v14998_v1  ;;  %7441 = vmatpush.bf16.msra.mxu0 %v14454_v3  ;;  %v16241_v1 = vld [vmem:[#allocation8 + $0xe80] sm:$0xf]  ;;  %v4189_v3 = vunpack.c.l.bf16 %v4181_v13  ;;  %v4197_v58 = vunpack.c.h.bf16 %v4181_v13  ;;  %v15862_v20 = vor.u32 %v19367_v14, %v15859_v50  ;;  %v19295_v2 = vld [vmem:[#allocation8 + $0x944] sm:$0xf] }
 0x3cc   :  { %v15571_v15 = vld [vmem:[#allocation8 + $0x960] sm:$0xf0]  ;;  %7426 = vmatpush.bf16.msrb.mxu3 %v16274_v41 }
 0x3cd   :  { %7455 = vmatpush.bf16.msra.mxu1 %v14710_v40  ;;  %v16242_v40 = vor.u32 %v19467_v19, %v16241_v1  ;;  %v19359_v31 = vld [vmem:[#allocation8 + $0xb44] sm:$0xf]  ;;  %20057 = vtanh.f32 %v4189_v3  ;;  %v15574_v10 = vor.u32 %v19295_v2, %v15571_v15 }
 0x3ce   :  { %v15827_v25 = vld [vmem:[#allocation8 + $0xb60] sm:$0xf0]  ;;  %20059 = vtanh.f32 %v4197_v58 }
 0x3cf   :  { %7469 = vmatpush.bf16.msra.mxu2 %v14966_v22  ;;  %7442 = vmatpush.bf16.msra.mxu0 %v14422_v63  ;;  %v15830_v18 = vor.u32 %v19359_v31, %v15827_v25  ;;  %v19287_v21 = vld [vmem:[#allocation8 + $0x904] sm:$0xf]  ;;  %v4072_v25 = vpop.f32.mrf.mxu0 }
 0x3d0   :  { %v15539_v37 = vld [vmem:[#allocation8 + $0x920] sm:$0xf0]  ;;  %7427 = vmatpush.bf16.msrb.mxu3 %v16242_v40 }
 0x3d1   :  { %7456 = vmatpush.bf16.msra.mxu1 %v14678_v12  ;;  %v19351_v44 = vld [vmem:[#allocation8 + $0xb04] sm:$0xf]  ;;  %v15542_v16 = vor.u32 %v19287_v21, %v15539_v37  ;;  %v19451_v12 = vld [vmem:[#allocation8 + $0xe1c] sm:$0xf0] }
 0x3d2   :  { %v15795_v22 = vld [vmem:[#allocation8 + $0xb20] sm:$0xf0]  ;;  %v16178_v11 = vor.u32 %v19451_v12, %v16177_v23 }
 0x3d3   :  { %7470 = vmatpush.bf16.msra.mxu2 %v14934_v35  ;;  %7443 = vmatpush.bf16.msra.mxu0 %v14390_v59  ;;  %v19439_v63 = vld [vmem:[#allocation8 + $0xdc4] sm:$0xf]  ;;  %v20058_v26 = vpop.eup %20057  ;;  %v15798_v39 = vor.u32 %v19351_v44, %v15795_v22  ;;  %v19060_v44 = vld [vmem:[#allocation8 + $0x1e4] sm:$0xf0] }
 0x3d4   :  { %v16147_v24 = vld [vmem:[#allocation8 + $0xde0] sm:$0xf0]  ;;  %7428 = vmatpush.bf16.msrb.mxu3 %v16210_v17  ;;  %v20060_v33 = vpop.eup %20059  ;;  %v14617_v17 = vld [vmem:[#allocation8 + $0x1c8] sm:$0xf] }
 0x3d5   :  { %7457 = vmatpush.bf16.msra.mxu1 %v14646_v29  ;;  %v19279_v60 = vld [vmem:[#allocation8 + $0x8c4] sm:$0xf]  ;;  %v16150_v30 = vor.u32 %v19439_v63, %v16147_v24  ;;  %v20704_v56 = vpack.c.bf16 %v20060_v33, %v20058_v26  ;;  %v14873_v22 = vld [vmem:[#allocation8 + $0x3c8] sm:$0xf] }
 0x3d6   :  { %7444 = vmatmul.bf16.vlgmr.msra.gmra.mxu0 %v20670_v49  ;;  %v15507_v7 = vld [vmem:[#allocation8 + $0x8e0] sm:$0xf0]  ;;  %v19124_v63 = vld [vmem:[#allocation8 + $0x3e4] sm:$0xf0] }
 0x3d7   :  { %7492 = vmatpush.bf16.msrb.mxu0 %v15638_v43  ;;  %7471 = vmatpush.bf16.msra.mxu2 %v14902_v8  ;;  %v19247_v32 = vld [vmem:[#allocation8 + $0x7c4] sm:$0xf]  ;;  %v15510_v59 = vor.u32 %v19279_v60, %v15507_v7  ;;  %v14618_v7 = vor.u32 %v19060_v44, %v14617_v17  ;;  %v14874_v33 = vor.u32 %v19124_v63, %v14873_v22  ;;  %v19188_v17 = vld [vmem:[#allocation8 + $0x5e4] sm:$0xf0] }
 0x3d8   :  { %7458 = vmatmul.bf16.vlgmr.msra.gmra.mxu1 %v20673_v62  ;;  %v19343_v28 = vld [vmem:[#allocation8 + $0xac4] sm:$0xf]  ;;  %7416 = vmatmul.bf16.vlgmr.msrb.gmra.mxu2 %v20704_v56 }
 0x3d9   :  { %7506 = vmatpush.bf16.msrb.mxu1 %v15894_v55  ;;  %v15763_v57 = vld [vmem:[#allocation8 + $0xae0] sm:$0xf0]  ;;  %7429 = vmatpush.bf16.msrb.mxu3 %v16178_v11 }
 0x3da   :  { %v15379_v52 = vld [vmem:[#allocation8 + $0x7e0] sm:$0xf0]  ;;  %v15766_v53 = vor.u32 %v19343_v28, %v15763_v57  ;;  %v19052_v28 = vld [vmem:[#allocation8 + $0x1a4] sm:$0xf0] }
 0x3db   :  { %7493 = vmatpush.bf16.msrb.mxu0 %v15606_v9  ;;  %v19431_v35 = vld [vmem:[#allocation8 + $0xd84] sm:$0xf]  ;;  %v15382_v47 = vor.u32 %v19247_v32, %v15379_v52  ;;  %7520 = vmatpush.bf16.msrb.mxu2 %v16150_v30  ;;  %v14585_v30 = vld [vmem:[#allocation8 + $0x188] sm:$0xf] }
 0x3dc   :  { %v16115_v46 = vld [vmem:[#allocation8 + $0xda0] sm:$0xf0]  ;;  %v14841_v52 = vld [vmem:[#allocation8 + $0x388] sm:$0xf] }
 0x3dd   :  { %7507 = vmatpush.bf16.msrb.mxu1 %v15862_v20  ;;  %v19271_v45 = vld [vmem:[#allocation8 + $0x884] sm:$0xf]  ;;  %v16118_v4 = vor.u32 %v19431_v35, %v16115_v46  ;;  %7478 = vmatpush.bf16.msra.mxu3 %v15382_v47  ;;  %v19116_v35 = vld [vmem:[#allocation8 + $0x3a4] sm:$0xf0]  ;;  %v20710_v46 = vpop.f32.mrf.mxu2 }
 0x3de   :  { %v15475_v29 = vld [vmem:[#allocation8 + $0x8a0] sm:$0xf0] }
 0x3df   :  { %7494 = vmatpush.bf16.msrb.mxu0 %v15574_v10  ;;  %v19239_v43 = vld [vmem:[#allocation8 + $0x784] sm:$0xf]  ;;  %v15478_v14 = vor.u32 %v19271_v45, %v15475_v29  ;;  %7521 = vmatpush.bf16.msrb.mxu2 %v16118_v4  ;;  %v14586_v29 = vor.u32 %v19052_v28, %v14585_v30  ;;  %v14842_v4 = vor.u32 %v19116_v35, %v14841_v52  ;;  %v19180_v52 = vld [vmem:[#allocation8 + $0x5a4] sm:$0xf0] }
 0x3e0   :  { %v15347_v34 = vld [vmem:[#allocation8 + $0x7a0] sm:$0xf0] }
 0x3e1   :  { %7508 = vmatpush.bf16.msrb.mxu1 %v15830_v18  ;;  %v19335_v27 = vld [vmem:[#allocation8 + $0xa84] sm:$0xf]  ;;  %v15350_v42 = vor.u32 %v19239_v43, %v15347_v34 }
 0x3e2   :  { %v15731_v55 = vld [vmem:[#allocation8 + $0xaa0] sm:$0xf0] }
 0x3e3   :  { %7495 = vmatpush.bf16.msrb.mxu0 %v15542_v16  ;;  %v19423_v48 = vld [vmem:[#allocation8 + $0xd44] sm:$0xf]  ;;  %v15734_v8 = vor.u32 %v19335_v27, %v15731_v55  ;;  %7479 = vmatpush.bf16.msra.mxu3 %v15350_v42  ;;  %v20707_v16 = vpop.f32.mrf.mxu1  ;;  %v14553_v27 = vld [vmem:[#allocation8 + $0x148] sm:$0xf] }
 0x3e4   :  { %v16083_v61 = vld [vmem:[#allocation8 + $0xd60] sm:$0xf0]  ;;  %v19044_v55 = vld [vmem:[#allocation8 + $0x164] sm:$0xf0] }
 0x3e5   :  { %7509 = vmatpush.bf16.msrb.mxu1 %v15798_v39  ;;  %v19263_v50 = vld [vmem:[#allocation8 + $0x844] sm:$0xf]  ;;  %v16086_v1 = vor.u32 %v19423_v48, %v16083_v61  ;;  %v662_v39 = vperm.slane %v20599_v0, 6  ;;  %v4074_v48 = vpop.f32.mrf.mxu0  ;;  %v14809_v42 = vld [vmem:[#allocation8 + $0x348] sm:$0xf]  ;;  %v4102_v22 = vpop.f32.mrf.mxu2 }
 0x3e6   :  { %v15443_v41 = vld [vmem:[#allocation8 + $0x860] sm:$0xf0] }
 0x3e7   :  { %7496 = vmatpush.bf16.msrb.mxu0 %v15510_v59  ;;  %v19231_v13 = vld [vmem:[#allocation8 + $0x744] sm:$0xf]  ;;  %v15446_v15 = vor.u32 %v19263_v50, %v15443_v41  ;;  %7522 = vmatpush.bf16.msrb.mxu2 %v16086_v1  ;;  %v678_v0 = vperm.slane %v662_v39, 0 }
 0x3e8   :  { %v15315_v9 = vld [vmem:[#allocation8 + $0x760] sm:$0xf0]  ;;  %7472 = vmatmul.bf16.vlgmr.msra.gmra.mxu2 %v20675_v6 }
 0x3e9   :  { %7510 = vmatpush.bf16.msrb.mxu1 %v15766_v53  ;;  %v19327_v19 = vld [vmem:[#allocation8 + $0xa44] sm:$0xf]  ;;  %v15318_v2 = vor.u32 %v19231_v13, %v15315_v9  ;;  %v20712_v53 = vpop.f32.mrf.mxu3  ;;  %v4073_v13 = vadd.f32 %v4072_v25, %v678_v0  ;;  %v14554_v9 = vor.u32 %v19044_v55, %v14553_v27  ;;  %v15065_v27 = vld [vmem:[#allocation8 + $0x548] sm:$0xf] }
 0x3ea   :  { %v15699_v3 = vld [vmem:[#allocation8 + $0xa60] sm:$0xf0]  ;;  %v19172_v55 = vld [vmem:[#allocation8 + $0x564] sm:$0xf0] }
 0x3eb   :  { %v19415_v58 = vld [vmem:[#allocation8 + $0xd04] sm:$0xf]  ;;  %7497 = vmatpush.bf16.msrb.mxu0 %v15478_v14  ;;  %v15702_v10 = vor.u32 %v19327_v19, %v15699_v3  ;;  %7480 = vmatpush.bf16.msra.mxu3 %v15318_v2  ;;  %v19108_v14 = vld [vmem:[#allocation8 + $0x364] sm:$0xf0]  ;;  %v4088_v3 = vpop.f32.mrf.mxu1  ;;  %v4087_v25 = vadd.f32 %v20707_v16, %v4073_v13 }
 0x3ec   :  { %v16051_v20 = vld [vmem:[#allocation8 + $0xd20] sm:$0xf0]  ;;  %v19036_v2 = vld [vmem:[#allocation8 + $0x124] sm:$0xf0] }
 0x3ed   :  { %v19255_v40 = vld [vmem:[#allocation8 + $0x804] sm:$0xf]  ;;  %7511 = vmatpush.bf16.msrb.mxu1 %v15734_v8  ;;  %v16054_v21 = vor.u32 %v19415_v58, %v16051_v20  ;;  %v14810_v58 = vor.u32 %v19108_v14, %v14809_v42  ;;  %v14521_v20 = vld [vmem:[#allocation8 + $0x108] sm:$0xf]  ;;  %v4101_v28 = vadd.f32 %v20710_v46, %v4087_v25 }
 0x3ee   :  { %v15411_v31 = vld [vmem:[#allocation8 + $0x820] sm:$0xf0]  ;;  %v14425_v42 = vld [vmem:[#allocation8 + $0x48] sm:$0xf] }
 0x3ef   :  { %v19319_v51 = vld [vmem:[#allocation8 + $0xa04] sm:$0xf]  ;;  %7498 = vmatpush.bf16.msrb.mxu0 %v15446_v15  ;;  %v15414_v23 = vor.u32 %v19255_v40, %v15411_v31  ;;  %7523 = vmatpush.bf16.msrb.mxu2 %v16054_v21  ;;  %v4075_v15 = vadd.f32 %v4074_v48, %v678_v0  ;;  %v14777_v31 = vld [vmem:[#allocation8 + $0x308] sm:$0xf]  ;;  %v14522_v21 = vor.u32 %v19036_v2, %v14521_v20  ;;  %v4156_v48 = vpop.f32.mrf.mxu2 }
 0x3f0   :  { %v19223_v5 = vld [vmem:[#allocation8 + $0x704] sm:$0xf]  ;;  %v19012_v14 = vld [vmem:[#allocation8 + $0x64] sm:$0xf0] }
 0x3f1   :  { %v15283_v18 = vld [vmem:[#allocation8 + $0x720] sm:$0xf0]  ;;  %7512 = vmatpush.bf16.msrb.mxu1 %v15702_v10  ;;  %v19100_v10 = vld [vmem:[#allocation8 + $0x324] sm:$0xf0]  ;;  %v4116_v39 = vpop.f32.mrf.mxu3 }
 0x3f2   :  { %v15667_v37 = vld [vmem:[#allocation8 + $0xa20] sm:$0xf0]  ;;  %v15286_v24 = vor.u32 %v19223_v5, %v15283_v18  ;;  %v14778_v63 = vor.u32 %v19100_v10, %v14777_v31  ;;  %v19164_v20 = vld [vmem:[#allocation8 + $0x524] sm:$0xf0] }
 0x3f3   :  { %v19407_v12 = vld [vmem:[#allocation8 + $0xcc4] sm:$0xf]  ;;  %v15670_v60 = vor.u32 %v19319_v51, %v15667_v37  ;;  %7499 = vmatpush.bf16.msrb.mxu0 %v15414_v23  ;;  %v15129_v37 = vld [vmem:[#allocation8 + $0x5c8] sm:$0xf]  ;;  %v4142_v35 = vpop.f32.mrf.mxu1 }
 0x3f4   :  { %v16019_v26 = vld [vmem:[#allocation8 + $0xce0] sm:$0xf0]  ;;  %7481 = vmatpush.bf16.msra.mxu3 %v15286_v24  ;;  %v14489_v24 = vld [vmem:[#allocation8 + $0xc8] sm:$0xf]  ;;  %v15130_v30 = vor.u32 %v19188_v17, %v15129_v37 }
 0x3f5   :  { %v19215_v32 = vld [vmem:[#allocation8 + $0x6c4] sm:$0xf]  ;;  %v16022_v11 = vor.u32 %v19407_v12, %v16019_v26  ;;  %7513 = vmatpush.bf16.msrb.mxu1 %v15670_v60  ;;  %v19028_v23 = vld [vmem:[#allocation8 + $0xe4] sm:$0xf0]  ;;  %v4089_v26 = vadd.f32 %v4088_v3, %v4075_v15  ;;  %v4128_v60 = vpop.f32.mrf.mxu0  ;;  %v14426_v3 = vor.u32 %v19012_v14, %v14425_v42 }
 0x3f6   :  { %v15251_v57 = vld [vmem:[#allocation8 + $0x6e0] sm:$0xf0]  ;;  %7500 = vmatmul.bf16.vlgmr.msrb.gmra.mxu0 %v20695_v38  ;;  %v14393_v15 = vld [vmem:[#allocation8 + $0x8] sm:$0xf] }
 0x3f7   :  { %v19399_v47 = vld [vmem:[#allocation8 + $0xc84] sm:$0xf]  ;;  %v15254_v45 = vor.u32 %v19215_v32, %v15251_v57  ;;  %7548 = vmatpush.bf16.msra.mxu0 %v14618_v7  ;;  %7524 = vmatpush.bf16.msrb.mxu2 %v16022_v11  ;;  %v14745_v32 = vld [vmem:[#allocation8 + $0x2c8] sm:$0xf]  ;;  %v14490_v57 = vor.u32 %v19028_v23, %v14489_v24  ;;  %v4103_v0 = vadd.f32 %v4102_v22, %v4089_v26 }
 0x3f8   :  { %v15987_v59 = vld [vmem:[#allocation8 + $0xca0] sm:$0xf0]  ;;  %7514 = vmatmul.bf16.vlgmr.msrb.gmra.mxu1 %v20697_v36  ;;  %v15097_v11 = vld [vmem:[#allocation8 + $0x588] sm:$0xf] }
 0x3f9   :  { %v19207_v43 = vld [vmem:[#allocation8 + $0x684] sm:$0xf]  ;;  %7562 = vmatpush.bf16.msra.mxu1 %v14874_v33  ;;  %v15990_v61 = vor.u32 %v19399_v47, %v15987_v59  ;;  %7482 = vmatpush.bf16.msra.mxu3 %v15254_v45  ;;  %v19092_v33 = vld [vmem:[#allocation8 + $0x2e4] sm:$0xf0] }
 0x3fa   :  { %v15219_v34 = vld [vmem:[#allocation8 + $0x6a0] sm:$0xf0]  ;;  %v14746_v47 = vor.u32 %v19092_v33, %v14745_v32  ;;  %v14457_v59 = vld [vmem:[#allocation8 + $0x88] sm:$0xf] }
 0x3fb   :  { %v19391_v50 = vld [vmem:[#allocation8 + $0xc44] sm:$0xf]  ;;  %v15222_v41 = vor.u32 %v19207_v43, %v15219_v34  ;;  %7549 = vmatpush.bf16.msra.mxu0 %v14586_v29  ;;  %7525 = vmatpush.bf16.msrb.mxu2 %v15990_v61  ;;  %v19020_v45 = vld [vmem:[#allocation8 + $0xa4] sm:$0xf0]  ;;  %v15098_v34 = vor.u32 %v19180_v52, %v15097_v11  ;;  %v4144_v25 = vpop.f32.mrf.mxu1 }
 0x3fc   :  { %v15955_v8 = vld [vmem:[#allocation8 + $0xc60] sm:$0xf0]  ;;  %v14713_v29 = vld [vmem:[#allocation8 + $0x288] sm:$0xf]  ;;  %v14458_v46 = vor.u32 %v19020_v45, %v14457_v59 }
 0x3fd   :  { %v19199_v1 = vld [vmem:[#allocation8 + $0x644] sm:$0xf]  ;;  %7563 = vmatpush.bf16.msra.mxu1 %v14842_v4  ;;  %v15958_v40 = vor.u32 %v19391_v50, %v15955_v8  ;;  %7483 = vmatpush.bf16.msra.mxu3 %v15222_v41  ;;  %v19084_v43 = vld [vmem:[#allocation8 + $0x2a4] sm:$0xf0]  ;;  %v4115_v4 = vadd.f32 %v20712_v53, %v4101_v28  ;;  %v4117_v50 = vadd.f32 %v4116_v39, %v4103_v0  ;;  %v4170_v41 = vpop.f32.mrf.mxu3  ;;  %v4130_v13 = vpop.f32.mrf.mxu0 }
 0x3fe   :  { %v15187_v19 = vld [vmem:[#allocation8 + $0x660] sm:$0xf0]  ;;  %v14714_v61 = vor.u32 %v19084_v43, %v14713_v29  ;;  %v14649_v31 = vld [vmem:[#allocation8 + $0x208] sm:$0xf] }
 0x3ff   :  { %v19383_v51 = vld [vmem:[#allocation8 + $0xc04] sm:$0xf]  ;;  %v15190_v18 = vor.u32 %v19199_v1, %v15187_v19  ;;  %7550 = vmatpush.bf16.msra.mxu0 %v14554_v9  ;;  %7526 = vmatpush.bf16.msrb.mxu2 %v15958_v40  ;;  %v4129_v8 = vadd.f32 %v4128_v60, %v4115_v4  ;;  %v14681_v9 = vld [vmem:[#allocation8 + $0x248] sm:$0xf]  ;;  %v15066_v19 = vor.u32 %v19172_v55, %v15065_v27 }
 0x400   :  { %v15923_v5 = vld [vmem:[#allocation8 + $0xc20] sm:$0xf0]  ;;  %v19076_v1 = vld [vmem:[#allocation8 + $0x264] sm:$0xf0]  ;;  %v4131_v53 = vadd.f32 %v4130_v13, %v4117_v50 }
 0x401   :  { %v19191_v44 = vld [vmem:[#allocation8 + $0x604] sm:$0xf]  ;;  %7564 = vmatpush.bf16.msra.mxu1 %v14810_v58  ;;  %v15926_v7 = vor.u32 %v19383_v51, %v15923_v5  ;;  %7484 = vmatpush.bf16.msra.mxu3 %v15190_v18  ;;  %v15033_v58 = vld [vmem:[#allocation8 + $0x508] sm:$0xf]  ;;  %v14682_v2 = vor.u32 %v19076_v1, %v14681_v9  ;;  %v4143_v10 = vadd.f32 %v4142_v35, %v4129_v8 }
 0x402   :  { %v15155_v12 = vld [vmem:[#allocation8 + $0x620] sm:$0xf0]  ;;  %v19004_v40 = vld [vmem:[#allocation8 + $0x24] sm:$0xf0]  ;;  %v4145_v22 = vadd.f32 %v4144_v25, %v4131_v53 }
 0x403   :  { %v15158_v16 = vor.u32 %v19191_v44, %v15155_v12  ;;  %7551 = vmatpush.bf16.msra.mxu0 %v14522_v21  ;;  %7527 = vmatpush.bf16.msrb.mxu2 %v15926_v7  ;;  %v19068_v51 = vld [vmem:[#allocation8 + $0x224] sm:$0xf0]  ;;  %v15034_v21 = vor.u32 %v19164_v20, %v15033_v58  ;;  %v4157_v44 = vadd.f32 %v4156_v48, %v4143_v10  ;;  %v4158_v12 = vpop.f32.mrf.mxu2  ;;  %v4735_v60 = vld [vmem:[#allocation10] sm:$0xff] }
 0x404   :  { %v15641_v5 = vld [vmem:[#allocation8 + $0x9c8] sm:$0xf]  ;;  %v14650_v26 = vor.u32 %v19068_v51, %v14649_v31  ;;  %v4159_v7 = vadd.f32 %v4158_v12, %v4145_v22  ;;  %v20721_v45 = vunpack.c.l.bf16 %v4735_v60  ;;  %v16403_v51 = vld [vmem:[#allocation8 + $0xfe0] sm:$0xf0] }
 0x405   :  { %7565 = vmatpush.bf16.msra.mxu1 %v14778_v63  ;;  %7485 = vmatpush.bf16.msra.mxu3 %v15158_v16  ;;  %v19316_v18 = vld [vmem:[#allocation8 + $0x9e4] sm:$0xf0]  ;;  %v14394_v63 = vor.u32 %v19004_v40, %v14393_v15  ;;  %v4172_v16 = vpop.f32.mrf.mxu3  ;;  %v4171_v52 = vadd.f32 %v4170_v41, %v4157_v44  ;;  %v19503_v15 = vld [vmem:[#allocation8 + $0xfc4] sm:$0xf]  ;;  %v7333_v25 = vpop.f32.mrf.mxu0 }
 0x406   :  { %7528 = vmatmul.bf16.vlgmr.msrb.gmra.mxu2 %v20704_v56  ;;  %v15897_v37 = vld [vmem:[#allocation8 + $0xbc8] sm:$0xf]  ;;  %v15642_v39 = vor.u32 %v19316_v18, %v15641_v5  ;;  %v4173_v35 = vadd.f32 %v4172_v16, %v4159_v7  ;;  %v4740_v50 = vperm.slane %v20721_v45, 0  ;;  %v16406_v12 = vor.u32 %v19503_v15, %v16403_v51  ;;  %v16371_v16 = vld [vmem:[#allocation8 + $0xfa0] sm:$0xf0] }
 0x407   :  { %7576 = vmatpush.bf16.msra.mxu2 %v15130_v30  ;;  %7552 = vmatpush.bf16.msra.mxu0 %v14490_v57  ;;  %v19380_v17 = vld [vmem:[#allocation8 + $0xbe4] sm:$0xf0] }
 0x408   :  { %v15001_v24 = vld [vmem:[#allocation8 + $0x4c8] sm:$0xf]  ;;  %v15898_v32 = vor.u32 %v19380_v17, %v15897_v37  ;;  %v4182_v29 = vpack.c.bf16 %v4173_v35, %v4171_v52 }
 0x409   :  { %7566 = vmatpush.bf16.msra.mxu1 %v14746_v47  ;;  %v19156_v23 = vld [vmem:[#allocation8 + $0x4e4] sm:$0xf0] }
 0x40a   :  { %v15609_v33 = vld [vmem:[#allocation8 + $0x988] sm:$0xf]  ;;  %v15002_v28 = vor.u32 %v19156_v23, %v15001_v24  ;;  %v4190_v48 = vunpack.c.l.bf16 %v4182_v29  ;;  %v7347_v23 = vpop.f32.mrf.mxu1 }
 0x40b   :  { %7577 = vmatpush.bf16.msra.mxu2 %v15098_v34  ;;  %7553 = vmatpush.bf16.msra.mxu0 %v14458_v46  ;;  %v19308_v30 = vld [vmem:[#allocation8 + $0x9a4] sm:$0xf0] }
 0x40c   :  { %v15865_v57 = vld [vmem:[#allocation8 + $0xb88] sm:$0xf]  ;;  %v15610_v0 = vor.u32 %v19308_v30, %v15609_v33  ;;  %20061 = vtanh.f32 %v4190_v48 }
 0x40d   :  { %7567 = vmatpush.bf16.msra.mxu1 %v14714_v61  ;;  %v19372_v11 = vld [vmem:[#allocation8 + $0xba4] sm:$0xf0]  ;;  %v4198_v61 = vunpack.c.h.bf16 %v4182_v29 }
 0x40e   :  { %v14969_v47 = vld [vmem:[#allocation8 + $0x488] sm:$0xf]  ;;  %v15866_v43 = vor.u32 %v19372_v11, %v15865_v57 }
 0x40f   :  { %7578 = vmatpush.bf16.msra.mxu2 %v15066_v19  ;;  %7554 = vmatpush.bf16.msra.mxu0 %v14426_v3  ;;  %v19148_v59 = vld [vmem:[#allocation8 + $0x4a4] sm:$0xf0]  ;;  %20063 = vtanh.f32 %v4198_v61  ;;  %v20726_v3 = vperm.slane %v4740_v50, 0 }
 0x410   :  { %v15577_v34 = vld [vmem:[#allocation8 + $0x948] sm:$0xf]  ;;  %v14970_v46 = vor.u32 %v19148_v59, %v14969_v47 }
 0x411   :  { %7568 = vmatpush.bf16.msra.mxu1 %v14682_v2  ;;  %v19300_v4 = vld [vmem:[#allocation8 + $0x964] sm:$0xf0]  ;;  %v7334_v22 = vadd.f32 %v7333_v25, %v20726_v3 }
 0x412   :  { %v15833_v27 = vld [vmem:[#allocation8 + $0xb48] sm:$0xf]  ;;  %v15578_v8 = vor.u32 %v19300_v4, %v15577_v34  ;;  %v20062_v44 = vpop.eup %20061  ;;  %v7361_v34 = vpop.f32.mrf.mxu2 }
 0x413   :  { %7579 = vmatpush.bf16.msra.mxu2 %v15034_v21  ;;  %7555 = vmatpush.bf16.msra.mxu0 %v14394_v63  ;;  %v19364_v55 = vld [vmem:[#allocation8 + $0xb64] sm:$0xf0]  ;;  %v7348_v33 = vadd.f32 %v7347_v23, %v7334_v22 }
 0x414   :  { %v14937_v42 = vld [vmem:[#allocation8 + $0x448] sm:$0xf]  ;;  %v15834_v41 = vor.u32 %v19364_v55, %v15833_v27 }
 0x415   :  { %7569 = vmatpush.bf16.msra.mxu1 %v14650_v26  ;;  %v19140_v14 = vld [vmem:[#allocation8 + $0x464] sm:$0xf0]  ;;  %v20064_v24 = vpop.eup %20063  ;;  %v7362_v48 = vadd.f32 %v7361_v34, %v7348_v33 }
 0x416   :  { %7556 = vmatmul.bf16.vlgmr.msra.gmra.mxu0 %v20670_v49  ;;  %v15545_v13 = vld [vmem:[#allocation8 + $0x908] sm:$0xf]  ;;  %v14938_v1 = vor.u32 %v19140_v14, %v14937_v42  ;;  %v7375_v14 = vpop.f32.mrf.mxu3 }
 0x417   :  { %7604 = vmatpush.bf16.msrb.mxu0 %v15642_v39  ;;  %7580 = vmatpush.bf16.msra.mxu2 %v15002_v28  ;;  %v19292_v9 = vld [vmem:[#allocation8 + $0x924] sm:$0xf0]  ;;  %v19495_v39 = vld [vmem:[#allocation8 + $0xf84] sm:$0xf] }
 0x418   :  { %7570 = vmatmul.bf16.vlgmr.msra.gmra.mxu1 %v20673_v62  ;;  %v15801_v19 = vld [vmem:[#allocation8 + $0xb08] sm:$0xf]  ;;  %v15546_v2 = vor.u32 %v19292_v9, %v15545_v13  ;;  %v16374_v47 = vor.u32 %v19495_v39, %v16371_v16 }
 0x419   :  { %7618 = vmatpush.bf16.msrb.mxu1 %v15898_v32  ;;  %v19356_v53 = vld [vmem:[#allocation8 + $0xb24] sm:$0xf0]  ;;  %v20729_v32 = vpack.c.bf16 %v20064_v24, %v20062_v44  ;;  %v16275_v24 = vld [vmem:[#allocation8 + $0xee0] sm:$0xf0] }
 0x41a   :  { %v14905_v58 = vld [vmem:[#allocation8 + $0x408] sm:$0xf]  ;;  %v15802_v10 = vor.u32 %v19356_v53, %v15801_v19 }
 0x41b   :  { %7605 = vmatpush.bf16.msrb.mxu0 %v15610_v0  ;;  %7581 = vmatpush.bf16.msra.mxu2 %v14970_v46  ;;  %v19132_v20 = vld [vmem:[#allocation8 + $0x424] sm:$0xf0]  ;;  %v19487_v0 = vld [vmem:[#allocation8 + $0xf44] sm:$0xf] }
 0x41c   :  { %v16153_v40 = vld [vmem:[#allocation8 + $0xdc8] sm:$0xf]  ;;  %v14906_v21 = vor.u32 %v19132_v20, %v14905_v58  ;;  %7430 = vmatmul.bf16.vlgmr.msrb.gmra.mxu3 %v20729_v32  ;;  %v16339_v46 = vld [vmem:[#allocation8 + $0xf60] sm:$0xf0] }
 0x41d   :  { %7619 = vmatpush.bf16.msrb.mxu1 %v15866_v43  ;;  %v19444_v31 = vld [vmem:[#allocation8 + $0xde4] sm:$0xf0]  ;;  %7534 = vmatpush.bf16.msrb.mxu3 %v16406_v12  ;;  %v16342_v13 = vor.u32 %v19487_v0, %v16339_v46  ;;  %v19048_v12 = vld [vmem:[#allocation8 + $0x18c] sm:$0xf] }
 0x41e   :  { %v15513_v5 = vld [vmem:[#allocation8 + $0x8c8] sm:$0xf]  ;;  %v16154_v63 = vor.u32 %v19444_v31, %v16153_v40  ;;  %v19056_v31 = vld [vmem:[#allocation8 + $0x1cc] sm:$0xf] }
 0x41f   :  { %7606 = vmatpush.bf16.msrb.mxu0 %v15578_v8  ;;  %v19284_v18 = vld [vmem:[#allocation8 + $0x8e4] sm:$0xf0]  ;;  %7582 = vmatpush.bf16.msra.mxu2 %v14938_v1  ;;  %v19479_v8 = vld [vmem:[#allocation8 + $0xf04] sm:$0xf]  ;;  %v19104_v0 = vld [vmem:[#allocation8 + $0x34c] sm:$0xf] }
 0x420   :  { %v15769_v37 = vld [vmem:[#allocation8 + $0xac8] sm:$0xf]  ;;  %v15514_v26 = vor.u32 %v19284_v18, %v15513_v5  ;;  %v16307_v1 = vld [vmem:[#allocation8 + $0xf20] sm:$0xf0]  ;;  %v19120_v5 = vld [vmem:[#allocation8 + $0x3cc] sm:$0xf] }
 0x421   :  { %7620 = vmatpush.bf16.msrb.mxu1 %v15834_v41  ;;  %v19348_v17 = vld [vmem:[#allocation8 + $0xae4] sm:$0xf0]  ;;  %v20733_v41 = vadd.f32 %v7375_v14, %v7362_v48  ;;  %7535 = vmatpush.bf16.msrb.mxu3 %v16374_v47  ;;  %v14875_v18 = vld [vmem:[#allocation8 + $0x3e8] sm:$0xf0]  ;;  %v16310_v25 = vor.u32 %v19479_v8, %v16307_v1  ;;  %v16211_v48 = vld [vmem:[#allocation8 + $0xe60] sm:$0xf0] }
 0x422   :  { %v16121_v60 = vld [vmem:[#allocation8 + $0xd88] sm:$0xf]  ;;  %v15770_v30 = vor.u32 %v19348_v17, %v15769_v37  ;;  %v14878_v23 = vor.u32 %v19120_v5, %v14875_v18  ;;  %v14555_v47 = vld [vmem:[#allocation8 + $0x168] sm:$0xf0]  ;;  %v19447_v1 = vld [vmem:[#allocation8 + $0xe04] sm:$0xf] }
 0x423   :  { %7607 = vmatpush.bf16.msrb.mxu0 %v15546_v2  ;;  %v19436_v7 = vld [vmem:[#allocation8 + $0xda4] sm:$0xf0]  ;;  %7583 = vmatpush.bf16.msra.mxu2 %v14906_v21  ;;  %v19032_v14 = vld [vmem:[#allocation8 + $0x10c] sm:$0xf] }
 0x424   :  { %v15481_v28 = vld [vmem:[#allocation8 + $0x888] sm:$0xf]  ;;  %v16122_v35 = vor.u32 %v19436_v7, %v16121_v60  ;;  %v19112_v60 = vld [vmem:[#allocation8 + $0x38c] sm:$0xf] }
 0x425   :  { %7621 = vmatpush.bf16.msrb.mxu1 %v15802_v10  ;;  %v19276_v57 = vld [vmem:[#allocation8 + $0x8a4] sm:$0xf0]  ;;  %v14619_v10 = vld [vmem:[#allocation8 + $0x1e8] sm:$0xf0]  ;;  %7536 = vmatpush.bf16.msrb.mxu3 %v16342_v13 }
 0x426   :  { %v15737_v11 = vld [vmem:[#allocation8 + $0xa88] sm:$0xf]  ;;  %v15482_v59 = vor.u32 %v19276_v57, %v15481_v28  ;;  %7584 = vmatmul.bf16.vlgmr.msra.gmra.mxu2 %v20675_v6  ;;  %v14622_v22 = vor.u32 %v19056_v31, %v14619_v10  ;;  %v14843_v7 = vld [vmem:[#allocation8 + $0x3a8] sm:$0xf0]  ;;  %v19463_v57 = vld [vmem:[#allocation8 + $0xe84] sm:$0xf] }
 0x427   :  { %v19340_v52 = vld [vmem:[#allocation8 + $0xaa4] sm:$0xf0]  ;;  %7632 = vmatpush.bf16.msrb.mxu2 %v16154_v63  ;;  %7608 = vmatpush.bf16.msrb.mxu0 %v15514_v26  ;;  %v19471_v63 = vld [vmem:[#allocation8 + $0xec4] sm:$0xf]  ;;  %v14587_v26 = vld [vmem:[#allocation8 + $0x1a8] sm:$0xf0] }
 0x428   :  { %v16089_v29 = vld [vmem:[#allocation8 + $0xd48] sm:$0xf]  ;;  %v15738_v4 = vor.u32 %v19340_v52, %v15737_v11  ;;  %v16278_v33 = vor.u32 %v19471_v63, %v16275_v24  ;;  %v14590_v28 = vor.u32 %v19048_v12, %v14587_v26  ;;  %v16243_v11 = vld [vmem:[#allocation8 + $0xea0] sm:$0xf0]  ;;  %v14846_v52 = vor.u32 %v19112_v60, %v14843_v7  ;;  %v19096_v13 = vld [vmem:[#allocation8 + $0x30c] sm:$0xf] }
 0x429   :  { %v19428_v43 = vld [vmem:[#allocation8 + $0xd64] sm:$0xf0]  ;;  %7622 = vmatpush.bf16.msrb.mxu1 %v15770_v30  ;;  %7537 = vmatpush.bf16.msrb.mxu3 %v16310_v25  ;;  %v16246_v34 = vor.u32 %v19463_v57, %v16243_v11  ;;  %v15131_v31 = vld [vmem:[#allocation8 + $0x5e8] sm:$0xf0] }
 0x42a   :  { %v15449_v27 = vld [vmem:[#allocation8 + $0x848] sm:$0xf]  ;;  %v16090_v50 = vor.u32 %v19428_v43, %v16089_v29  ;;  %v14811_v29 = vld [vmem:[#allocation8 + $0x368] sm:$0xf0]  ;;  %v20736_v43 = vpop.f32.mrf.mxu0 }
 0x42b   :  { %v19268_v55 = vld [vmem:[#allocation8 + $0x864] sm:$0xf0]  ;;  %7633 = vmatpush.bf16.msrb.mxu2 %v16122_v35  ;;  %7609 = vmatpush.bf16.msrb.mxu0 %v15482_v59  ;;  %v19040_v35 = vld [vmem:[#allocation8 + $0x14c] sm:$0xf] }
 0x42c   :  { %v15705_v61 = vld [vmem:[#allocation8 + $0xa48] sm:$0xf]  ;;  %v15450_v9 = vor.u32 %v19268_v55, %v15449_v27  ;;  %7486 = vmatmul.bf16.vlgmr.msra.gmra.mxu3 %v20679_v54  ;;  %v14558_v27 = vor.u32 %v19040_v35, %v14555_v47  ;;  %v19455_v55 = vld [vmem:[#allocation8 + $0xe44] sm:$0xf]  ;;  %v19024_v5 = vld [vmem:[#allocation8 + $0xcc] sm:$0xf] }
 0x42d   :  { %v19332_v42 = vld [vmem:[#allocation8 + $0xa64] sm:$0xf0]  ;;  %7623 = vmatpush.bf16.msrb.mxu1 %v15738_v4  ;;  %7538 = vmatpush.bf16.msrb.mxu3 %v16278_v33  ;;  %v14491_v18 = vld [vmem:[#allocation8 + $0xe8] sm:$0xf0] }
 0x42e   :  { %v16057_v19 = vld [vmem:[#allocation8 + $0xd08] sm:$0xf]  ;;  %v15706_v58 = vor.u32 %v19332_v42, %v15705_v61  ;;  %v20740_v61 = vpop.f32.mrf.mxu1  ;;  %v14814_v42 = vor.u32 %v19104_v0, %v14811_v29  ;;  %v19176_v26 = vld [vmem:[#allocation8 + $0x58c] sm:$0xf] }
 0x42f   :  { %v19420_v53 = vld [vmem:[#allocation8 + $0xd24] sm:$0xf0]  ;;  %7634 = vmatpush.bf16.msrb.mxu2 %v16090_v50  ;;  %7610 = vmatpush.bf16.msrb.mxu0 %v15450_v9  ;;  %v14523_v50 = vld [vmem:[#allocation8 + $0x128] sm:$0xf0] }
 0x430   :  { %v15417_v20 = vld [vmem:[#allocation8 + $0x808] sm:$0xf]  ;;  %v16058_v51 = vor.u32 %v19420_v53, %v16057_v19  ;;  %v14779_v9 = vld [vmem:[#allocation8 + $0x328] sm:$0xf0]  ;;  %v16214_v19 = vor.u32 %v19455_v55, %v16211_v48  ;;  %v16179_v53 = vld [vmem:[#allocation8 + $0xe20] sm:$0xf0] }
 0x431   :  { %v19260_v2 = vld [vmem:[#allocation8 + $0x824] sm:$0xf0]  ;;  %7624 = vmatpush.bf16.msrb.mxu1 %v15706_v58  ;;  %7539 = vmatpush.bf16.msrb.mxu3 %v16246_v34  ;;  %v14782_v10 = vor.u32 %v19096_v13, %v14779_v9  ;;  %v19080_v57 = vld [vmem:[#allocation8 + $0x28c] sm:$0xf] }
 0x432   :  { %v15673_v15 = vld [vmem:[#allocation8 + $0xa08] sm:$0xf]  ;;  %v15418_v21 = vor.u32 %v19260_v2, %v15417_v20  ;;  %v14526_v2 = vor.u32 %v19032_v14, %v14523_v50  ;;  %v14715_v11 = vld [vmem:[#allocation8 + $0x2a8] sm:$0xf0] }
 0x433   :  { %v19324_v40 = vld [vmem:[#allocation8 + $0xa24] sm:$0xf0]  ;;  %7635 = vmatpush.bf16.msrb.mxu2 %v16058_v51  ;;  %v15067_v0 = vld [vmem:[#allocation8 + $0x568] sm:$0xf0]  ;;  %v14718_v29 = vor.u32 %v19080_v57, %v14715_v11 }
 0x434   :  { %v16025_v37 = vld [vmem:[#allocation8 + $0xcc8] sm:$0xf]  ;;  %v15674_v44 = vor.u32 %v19324_v40, %v15673_v15  ;;  %7611 = vmatpush.bf16.msrb.mxu0 %v15418_v21  ;;  %v19184_v40 = vld [vmem:[#allocation8 + $0x5cc] sm:$0xf] }
 0x435   :  { %v19412_v17 = vld [vmem:[#allocation8 + $0xce4] sm:$0xf0]  ;;  %v19088_v21 = vld [vmem:[#allocation8 + $0x2cc] sm:$0xf]  ;;  %7540 = vmatpush.bf16.msrb.mxu3 %v16214_v19 }
 0x436   :  { %v16026_v39 = vor.u32 %v19412_v17, %v16025_v37  ;;  %v15993_v30 = vld [vmem:[#allocation8 + $0xc88] sm:$0xf]  ;;  %7625 = vmatpush.bf16.msrb.mxu1 %v15674_v44  ;;  %v14747_v37 = vld [vmem:[#allocation8 + $0x2e8] sm:$0xf0]  ;;  %v7389_v17 = vpop.f32.mrf.mxu0  ;;  %v16182_v44 = vor.u32 %v19447_v1, %v16179_v53  ;;  %v7403_v60 = vpop.f32.mrf.mxu1 }
 0x437   :  { %v19404_v16 = vld [vmem:[#allocation8 + $0xca4] sm:$0xf0]  ;;  %7612 = vmatmul.bf16.vlgmr.msrb.gmra.mxu0 %v20695_v38  ;;  %v7390_v63 = vadd.f32 %v7389_v17, %v20733_v41  ;;  %v14750_v7 = vor.u32 %v19088_v21, %v14747_v37  ;;  %v14683_v55 = vld [vmem:[#allocation8 + $0x268] sm:$0xf0] }
 0x438   :  { %7660 = vmatpush.bf16.msra.mxu0 %v14622_v22  ;;  %7636 = vmatpush.bf16.msrb.mxu2 %v16026_v39  ;;  %v15994_v59 = vor.u32 %v19404_v16, %v15993_v30  ;;  %v15961_v4 = vld [vmem:[#allocation8 + $0xc48] sm:$0xf]  ;;  %v15134_v22 = vor.u32 %v19184_v40, %v15131_v31  ;;  %v15099_v39 = vld [vmem:[#allocation8 + $0x5a8] sm:$0xf0] }
 0x439   :  { %v19396_v46 = vld [vmem:[#allocation8 + $0xc64] sm:$0xf0]  ;;  %7626 = vmatmul.bf16.vlgmr.msrb.gmra.mxu1 %v20697_v36  ;;  %v19016_v30 = vld [vmem:[#allocation8 + $0x8c] sm:$0xf]  ;;  %7541 = vmatpush.bf16.msrb.mxu3 %v16182_v44  ;;  %v15102_v41 = vor.u32 %v19176_v26, %v15099_v39 }
 0x43a   :  { %7674 = vmatpush.bf16.msra.mxu1 %v14878_v23  ;;  %v15962_v8 = vor.u32 %v19396_v46, %v15961_v4  ;;  %v15929_v58 = vld [vmem:[#allocation8 + $0xc08] sm:$0xf]  ;;  %v14494_v23 = vor.u32 %v19024_v5, %v14491_v18  ;;  %v14459_v16 = vld [vmem:[#allocation8 + $0xa8] sm:$0xf0] }
 0x43b   :  { %v19388_v20 = vld [vmem:[#allocation8 + $0xc24] sm:$0xf0]  ;;  %v14462_v35 = vor.u32 %v19016_v30, %v14459_v16  ;;  %v19008_v4 = vld [vmem:[#allocation8 + $0x4c] sm:$0xf] }
 0x43c   :  { %7661 = vmatpush.bf16.msra.mxu0 %v14590_v28  ;;  %7637 = vmatpush.bf16.msrb.mxu2 %v15994_v59  ;;  %v15385_v15 = vld [vmem:[#allocation8 + $0x7c8] sm:$0xf]  ;;  %v15930_v25 = vor.u32 %v19388_v20, %v15929_v58  ;;  %v20743_v28 = vadd.f32 %v7403_v60, %v7390_v63  ;;  %v19168_v59 = vld [vmem:[#allocation8 + $0x54c] sm:$0xf] }
 0x43d   :  { %v19252_v51 = vld [vmem:[#allocation8 + $0x7e4] sm:$0xf0]  ;;  %v14427_v46 = vld [vmem:[#allocation8 + $0x68] sm:$0xf0]  ;;  %7542 = vmatmul.bf16.vlgmr.msrb.gmra.mxu3 %v20729_v32  ;;  %v15070_v48 = vor.u32 %v19168_v59, %v15067_v0  ;;  %v4741_v59 = vperm.slane %v20721_v45, 2 }
 0x43e   :  { %7675 = vmatpush.bf16.msra.mxu1 %v14846_v52  ;;  %v15386_v24 = vor.u32 %v19252_v51, %v15385_v15  ;;  %v15353_v12 = vld [vmem:[#allocation8 + $0x788] sm:$0xf]  ;;  %v14430_v50 = vor.u32 %v19008_v4, %v14427_v46  ;;  %v19160_v13 = vld [vmem:[#allocation8 + $0x50c] sm:$0xf]  ;;  %v20749_v0 = vpop.f32.mrf.mxu0 }
 0x43f   :  { %v19244_v33 = vld [vmem:[#allocation8 + $0x7a4] sm:$0xf0]  ;;  %v15035_v9 = vld [vmem:[#allocation8 + $0x528] sm:$0xf0] }
 0x440   :  { %7662 = vmatpush.bf16.msra.mxu0 %v14558_v27  ;;  %7638 = vmatpush.bf16.msrb.mxu2 %v15962_v8  ;;  %v15354_v52 = vor.u32 %v19244_v33, %v15353_v12  ;;  %v15321_v47 = vld [vmem:[#allocation8 + $0x748] sm:$0xf]  ;;  %v19072_v27 = vld [vmem:[#allocation8 + $0x24c] sm:$0xf]  ;;  %v15038_v40 = vor.u32 %v19160_v13, %v15035_v9  ;;  %v20754_v9 = vperm.slane %v4741_v59, 0 }
 0x441   :  { %7590 = vmatpush.bf16.msra.mxu3 %v15386_v24  ;;  %v19236_v34 = vld [vmem:[#allocation8 + $0x764] sm:$0xf0]  ;;  %v14686_v1 = vor.u32 %v19072_v27, %v14683_v55  ;;  %v19000_v19 = vld [vmem:[#allocation8 + $0xc] sm:$0xf] }
 0x442   :  { %7676 = vmatpush.bf16.msra.mxu1 %v14814_v42  ;;  %v15289_v42 = vld [vmem:[#allocation8 + $0x708] sm:$0xf]  ;;  %v15322_v14 = vor.u32 %v19236_v34, %v15321_v47  ;;  %v14395_v53 = vld [vmem:[#allocation8 + $0x28] sm:$0xf0] }
 0x443   :  { %v19228_v8 = vld [vmem:[#allocation8 + $0x724] sm:$0xf0]  ;;  %v19064_v58 = vld [vmem:[#allocation8 + $0x20c] sm:$0xf]  ;;  %v14398_v5 = vor.u32 %v19000_v19, %v14395_v53 }
 0x444   :  { %7663 = vmatpush.bf16.msra.mxu0 %v14526_v2  ;;  %7639 = vmatpush.bf16.msrb.mxu2 %v15930_v25  ;;  %v14651_v20 = vld [vmem:[#allocation8 + $0x228] sm:$0xf0]  ;;  %v15290_v51 = vor.u32 %v19228_v8, %v15289_v42  ;;  %v15257_v17 = vld [vmem:[#allocation8 + $0x6c8] sm:$0xf] }
 0x445   :  { %7591 = vmatpush.bf16.msra.mxu3 %v15354_v52  ;;  %v19312_v2 = vld [vmem:[#allocation8 + $0x9cc] sm:$0xf]  ;;  %v14654_v21 = vor.u32 %v19064_v58, %v14651_v20  ;;  %v19220_v44 = vld [vmem:[#allocation8 + $0x6e4] sm:$0xf0] }
 0x446   :  { %7677 = vmatpush.bf16.msra.mxu1 %v14782_v10  ;;  %v15643_v15 = vld [vmem:[#allocation8 + $0x9e8] sm:$0xf0]  ;;  %v15258_v39 = vor.u32 %v19220_v44, %v15257_v17  ;;  %v15225_v30 = vld [vmem:[#allocation8 + $0x688] sm:$0xf] }
 0x447   :  { %7640 = vmatmul.bf16.vlgmr.msrb.gmra.mxu2 %v20704_v56  ;;  %v19376_v31 = vld [vmem:[#allocation8 + $0xbcc] sm:$0xf]  ;;  %v15646_v37 = vor.u32 %v19312_v2, %v15643_v15  ;;  %v19212_v16 = vld [vmem:[#allocation8 + $0x6a4] sm:$0xf0] }
 0x448   :  { %7688 = vmatpush.bf16.msra.mxu2 %v15134_v22  ;;  %7664 = vmatpush.bf16.msra.mxu0 %v14494_v23  ;;  %v15899_v10 = vld [vmem:[#allocation8 + $0xbe8] sm:$0xf0]  ;;  %v15193_v27 = vld [vmem:[#allocation8 + $0x648] sm:$0xf] }
 0x449   :  { %7592 = vmatpush.bf16.msra.mxu3 %v15322_v14  ;;  %v19152_v18 = vld [vmem:[#allocation8 + $0x4cc] sm:$0xf]  ;;  %v15902_v22 = vor.u32 %v19376_v31, %v15899_v10  ;;  %v19204_v55 = vld [vmem:[#allocation8 + $0x664] sm:$0xf0] }
 0x44a   :  { %7678 = vmatpush.bf16.msra.mxu1 %v14750_v7  ;;  %v15003_v25 = vld [vmem:[#allocation8 + $0x4e8] sm:$0xf0]  ;;  %v15161_v19 = vld [vmem:[#allocation8 + $0x608] sm:$0xf]  ;;  %v15194_v53 = vor.u32 %v19204_v55, %v15193_v27 }
 0x44b   :  { %v19304_v63 = vld [vmem:[#allocation8 + $0x98c] sm:$0xf]  ;;  %v15006_v23 = vor.u32 %v19152_v18, %v15003_v25  ;;  %v19196_v58 = vld [vmem:[#allocation8 + $0x624] sm:$0xf0] }
 0x44c   :  { %7689 = vmatpush.bf16.msra.mxu2 %v15102_v41  ;;  %7665 = vmatpush.bf16.msra.mxu0 %v14462_v35  ;;  %v15611_v24 = vld [vmem:[#allocation8 + $0x9a8] sm:$0xf0]  ;;  %v19492_v27 = vld [vmem:[#allocation8 + $0xf64] sm:$0xf0] }
 0x44d   :  { %v19368_v12 = vld [vmem:[#allocation8 + $0xb8c] sm:$0xf]  ;;  %7593 = vmatpush.bf16.msra.mxu3 %v15290_v51  ;;  %v15614_v33 = vor.u32 %v19304_v63, %v15611_v24 }
 0x44e   :  { %7679 = vmatpush.bf16.msra.mxu1 %v14718_v29  ;;  %v15867_v26 = vld [vmem:[#allocation8 + $0xba8] sm:$0xf0]  ;;  %v15226_v29 = vor.u32 %v19212_v16, %v15225_v30  ;;  %v19500_v30 = vld [vmem:[#allocation8 + $0xfa4] sm:$0xf0] }
 0x44f   :  { %v19144_v60 = vld [vmem:[#allocation8 + $0x48c] sm:$0xf]  ;;  %v15870_v57 = vor.u32 %v19368_v12, %v15867_v26  ;;  %v16377_v26 = vld [vmem:[#allocation8 + $0xf88] sm:$0xf] }
 0x450   :  { %7690 = vmatpush.bf16.msra.mxu2 %v15070_v48  ;;  %7666 = vmatpush.bf16.msra.mxu0 %v14430_v50  ;;  %v14971_v7 = vld [vmem:[#allocation8 + $0x4a8] sm:$0xf0]  ;;  %v20752_v48 = vpop.f32.mrf.mxu1 }
 0x451   :  { %v19296_v11 = vld [vmem:[#allocation8 + $0x94c] sm:$0xf]  ;;  %v14974_v52 = vor.u32 %v19144_v60, %v14971_v7  ;;  %7594 = vmatpush.bf16.msra.mxu3 %v15258_v39 }
 0x452   :  { %7680 = vmatpush.bf16.msra.mxu1 %v14686_v1  ;;  %v15579_v41 = vld [vmem:[#allocation8 + $0x968] sm:$0xf0] }
 0x453   :  { %v19360_v35 = vld [vmem:[#allocation8 + $0xb4c] sm:$0xf]  ;;  %v15582_v46 = vor.u32 %v19296_v11, %v15579_v41  ;;  %v7445_v44 = vpop.f32.mrf.mxu0 }
 0x454   :  { %7691 = vmatpush.bf16.msra.mxu2 %v15038_v40  ;;  %7667 = vmatpush.bf16.msra.mxu0 %v14398_v5  ;;  %v15835_v47 = vld [vmem:[#allocation8 + $0xb68] sm:$0xf0]  ;;  %v16409_v40 = vld [vmem:[#allocation8 + $0xfc8] sm:$0xf]  ;;  %v7446_v24 = vadd.f32 %v7445_v44, %v20754_v9 }
 0x455   :  { %v19136_v34 = vld [vmem:[#allocation8 + $0x44c] sm:$0xf]  ;;  %v15838_v42 = vor.u32 %v19360_v35, %v15835_v47  ;;  %7595 = vmatpush.bf16.msra.mxu3 %v15226_v29  ;;  %v19508_v5 = vld [vmem:[#allocation8 + $0xfe4] sm:$0xf0]  ;;  %v16378_v47 = vor.u32 %v19500_v30, %v16377_v26  ;;  %v14849_v30 = vld [vmem:[#allocation8 + $0x390] sm:$0xf] }
 0x456   :  { %7681 = vmatpush.bf16.msra.mxu1 %v14654_v21  ;;  %v14939_v4 = vld [vmem:[#allocation8 + $0x468] sm:$0xf0]  ;;  %v16345_v29 = vld [vmem:[#allocation8 + $0xf48] sm:$0xf] }
 0x457   :  { %7668 = vmatmul.bf16.vlgmr.msra.gmra.mxu0 %v20670_v49  ;;  %v19288_v14 = vld [vmem:[#allocation8 + $0x90c] sm:$0xf]  ;;  %v14942_v13 = vor.u32 %v19136_v34, %v14939_v4  ;;  %v19476_v26 = vld [vmem:[#allocation8 + $0xee4] sm:$0xf0] }
 0x458   :  { %7716 = vmatpush.bf16.msrb.mxu0 %v15646_v37  ;;  %7692 = vmatpush.bf16.msra.mxu2 %v15006_v23  ;;  %v15547_v50 = vld [vmem:[#allocation8 + $0x928] sm:$0xf0]  ;;  %v16410_v23 = vor.u32 %v19508_v5, %v16409_v40  ;;  %v7459_v7 = vpop.f32.mrf.mxu1  ;;  %v14625_v5 = vld [vmem:[#allocation8 + $0x1d0] sm:$0xf] }
 0x459   :  { %7682 = vmatmul.bf16.vlgmr.msra.gmra.mxu1 %v20673_v62  ;;  %v19352_v8 = vld [vmem:[#allocation8 + $0xb0c] sm:$0xf]  ;;  %v15550_v15 = vor.u32 %v19288_v14, %v15547_v50  ;;  %7596 = vmatpush.bf16.msra.mxu3 %v15194_v53  ;;  %v20757_v11 = vadd.f32 %v7459_v7, %v7446_v24  ;;  %v19053_v7 = vld [vmem:[#allocation8 + $0x1ac] sm:$0xf0] }
 0x45a   :  { %7730 = vmatpush.bf16.msrb.mxu1 %v15902_v22  ;;  %v15803_v1 = vld [vmem:[#allocation8 + $0xb28] sm:$0xf0]  ;;  %v15162_v22 = vor.u32 %v19196_v58, %v15161_v19  ;;  %v16346_v19 = vor.u32 %v19492_v27, %v16345_v29  ;;  %v19484_v58 = vld [vmem:[#allocation8 + $0xf24] sm:$0xf0]  ;;  %v19045_v27 = vld [vmem:[#allocation8 + $0x16c] sm:$0xf0] }
 0x45b   :  { %v19128_v20 = vld [vmem:[#allocation8 + $0x40c] sm:$0xf]  ;;  %v15806_v51 = vor.u32 %v19352_v8, %v15803_v1  ;;  %v20761_v1 = vpop.f32.mrf.mxu2  ;;  %v16249_v29 = vld [vmem:[#allocation8 + $0xe88] sm:$0xf] }
 0x45c   :  { %7717 = vmatpush.bf16.msrb.mxu0 %v15614_v33  ;;  %7693 = vmatpush.bf16.msra.mxu2 %v14974_v52  ;;  %v14907_v2 = vld [vmem:[#allocation8 + $0x428] sm:$0xf0] }
 0x45d   :  { %v19440_v31 = vld [vmem:[#allocation8 + $0xdcc] sm:$0xf]  ;;  %v14910_v21 = vor.u32 %v19128_v20, %v14907_v2  ;;  %7597 = vmatpush.bf16.msra.mxu3 %v15162_v22 }
 0x45e   :  { %7731 = vmatpush.bf16.msrb.mxu1 %v15870_v57  ;;  %v16155_v10 = vld [vmem:[#allocation8 + $0xde8] sm:$0xf0] }
 0x45f   :  { %v19280_v18 = vld [vmem:[#allocation8 + $0x8cc] sm:$0xf]  ;;  %v16158_v63 = vor.u32 %v19440_v31, %v16155_v10 }
 0x460   :  { %7718 = vmatpush.bf16.msrb.mxu0 %v15582_v46  ;;  %v15515_v25 = vld [vmem:[#allocation8 + $0x8e8] sm:$0xf0]  ;;  %7694 = vmatpush.bf16.msra.mxu2 %v14942_v13  ;;  %v16313_v13 = vld [vmem:[#allocation8 + $0xf08] sm:$0xf] }
 0x461   :  { %v19344_v37 = vld [vmem:[#allocation8 + $0xacc] sm:$0xf]  ;;  %v15518_v12 = vor.u32 %v19280_v18, %v15515_v25  ;;  %7646 = vmatpush.bf16.msrb.mxu3 %v16410_v23  ;;  %v19061_v18 = vld [vmem:[#allocation8 + $0x1ec] sm:$0xf0] }
 0x462   :  { %7732 = vmatpush.bf16.msrb.mxu1 %v15838_v42  ;;  %v15771_v17 = vld [vmem:[#allocation8 + $0xae8] sm:$0xf0]  ;;  %7598 = vmatmul.bf16.vlgmr.msra.gmra.mxu3 %v20679_v54  ;;  %v14626_v23 = vor.u32 %v19061_v18, %v14625_v5  ;;  %v19452_v18 = vld [vmem:[#allocation8 + $0xe24] sm:$0xf0] }
 0x463   :  { %v19432_v39 = vld [vmem:[#allocation8 + $0xd8c] sm:$0xf]  ;;  %v15774_v33 = vor.u32 %v19344_v37, %v15771_v17  ;;  %v19125_v37 = vld [vmem:[#allocation8 + $0x3ec] sm:$0xf0]  ;;  %v16314_v17 = vor.u32 %v19484_v58, %v16313_v13 }
 0x464   :  { %7719 = vmatpush.bf16.msrb.mxu0 %v15550_v15  ;;  %v16123_v60 = vld [vmem:[#allocation8 + $0xda8] sm:$0xf0]  ;;  %7695 = vmatpush.bf16.msra.mxu2 %v14910_v21  ;;  %v14881_v21 = vld [vmem:[#allocation8 + $0x3d0] sm:$0xf] }
 0x465   :  { %v19272_v16 = vld [vmem:[#allocation8 + $0x88c] sm:$0xf]  ;;  %v16126_v35 = vor.u32 %v19432_v39, %v16123_v60  ;;  %7647 = vmatpush.bf16.msrb.mxu3 %v16378_v47  ;;  %v14882_v39 = vor.u32 %v19125_v37, %v14881_v21  ;;  %v14593_v60 = vld [vmem:[#allocation8 + $0x190] sm:$0xf] }
 0x466   :  { %7733 = vmatpush.bf16.msrb.mxu1 %v15806_v51  ;;  %v15483_v57 = vld [vmem:[#allocation8 + $0x8a8] sm:$0xf0] }
 0x467   :  { %v19336_v41 = vld [vmem:[#allocation8 + $0xa8c] sm:$0xf]  ;;  %v15486_v59 = vor.u32 %v19272_v16, %v15483_v57  ;;  %7696 = vmatmul.bf16.vlgmr.msra.gmra.mxu2 %v20675_v6  ;;  %v19117_v16 = vld [vmem:[#allocation8 + $0x3ac] sm:$0xf0]  ;;  %v7417_v57 = vpop.f32.mrf.mxu2 }
 0x468   :  { %v15739_v52 = vld [vmem:[#allocation8 + $0xaa8] sm:$0xf0]  ;;  %7744 = vmatpush.bf16.msrb.mxu2 %v16158_v63  ;;  %7720 = vmatpush.bf16.msrb.mxu0 %v15518_v12  ;;  %v16281_v12 = vld [vmem:[#allocation8 + $0xec8] sm:$0xf]  ;;  %v20764_v47 = vadd.f32 %v7417_v57, %v20743_v28 }
 0x469   :  { %v19424_v34 = vld [vmem:[#allocation8 + $0xd4c] sm:$0xf]  ;;  %v15742_v46 = vor.u32 %v19336_v41, %v15739_v52  ;;  %7648 = vmatpush.bf16.msrb.mxu3 %v16346_v19  ;;  %v16282_v41 = vor.u32 %v19476_v26, %v16281_v12  ;;  %v16217_v19 = vld [vmem:[#allocation8 + $0xe48] sm:$0xf]  ;;  %v19029_v12 = vld [vmem:[#allocation8 + $0xec] sm:$0xf0] }
 0x46a   :  { %v16091_v4 = vld [vmem:[#allocation8 + $0xd68] sm:$0xf0]  ;;  %7734 = vmatpush.bf16.msrb.mxu1 %v15774_v33 }
 0x46b   :  { %v19264_v55 = vld [vmem:[#allocation8 + $0x84c] sm:$0xf]  ;;  %v16094_v8 = vor.u32 %v19424_v34, %v16091_v4  ;;  %v19468_v34 = vld [vmem:[#allocation8 + $0xea4] sm:$0xf0]  ;;  %v14850_v4 = vor.u32 %v19117_v16, %v14849_v30 }
 0x46c   :  { %v15451_v42 = vld [vmem:[#allocation8 + $0x868] sm:$0xf0]  ;;  %7745 = vmatpush.bf16.msrb.mxu2 %v16126_v35  ;;  %7721 = vmatpush.bf16.msrb.mxu0 %v15486_v59  ;;  %v14594_v59 = vor.u32 %v19053_v7, %v14593_v60  ;;  %v19093_v60 = vld [vmem:[#allocation8 + $0x2ec] sm:$0xf0] }
 0x46d   :  { %v19328_v14 = vld [vmem:[#allocation8 + $0xa4c] sm:$0xf]  ;;  %v15454_v53 = vor.u32 %v19264_v55, %v15451_v42  ;;  %7649 = vmatpush.bf16.msrb.mxu3 %v16314_v17  ;;  %v14817_v42 = vld [vmem:[#allocation8 + $0x350] sm:$0xf] }
 0x46e   :  { %v15707_v50 = vld [vmem:[#allocation8 + $0xa68] sm:$0xf0]  ;;  %7735 = vmatpush.bf16.msrb.mxu1 %v15742_v46  ;;  %v14561_v46 = vld [vmem:[#allocation8 + $0x150] sm:$0xf] }
 0x46f   :  { %v19416_v20 = vld [vmem:[#allocation8 + $0xd0c] sm:$0xf]  ;;  %v15710_v15 = vor.u32 %v19328_v14, %v15707_v50  ;;  %v19109_v14 = vld [vmem:[#allocation8 + $0x36c] sm:$0xf0]  ;;  %v16250_v50 = vor.u32 %v19468_v34, %v16249_v29  ;;  %v14562_v13 = vor.u32 %v19045_v27, %v14561_v46 }
 0x470   :  { %v16059_v2 = vld [vmem:[#allocation8 + $0xd28] sm:$0xf0]  ;;  %7746 = vmatpush.bf16.msrb.mxu2 %v16094_v8  ;;  %7722 = vmatpush.bf16.msrb.mxu0 %v15454_v53  ;;  %v19460_v53 = vld [vmem:[#allocation8 + $0xe64] sm:$0xf0]  ;;  %v14818_v58 = vor.u32 %v19109_v14, %v14817_v42  ;;  %v14465_v29 = vld [vmem:[#allocation8 + $0x90] sm:$0xf]  ;;  %v20772_v42 = vpop.f32.mrf.mxu1 }
 0x471   :  { %v19256_v40 = vld [vmem:[#allocation8 + $0x80c] sm:$0xf]  ;;  %v16062_v25 = vor.u32 %v19416_v20, %v16059_v2  ;;  %7650 = vmatpush.bf16.msrb.mxu3 %v16282_v41  ;;  %v14529_v20 = vld [vmem:[#allocation8 + $0x110] sm:$0xf]  ;;  %v16218_v5 = vor.u32 %v19460_v53, %v16217_v19 }
 0x472   :  { %v15419_v31 = vld [vmem:[#allocation8 + $0x828] sm:$0xf0]  ;;  %7736 = vmatpush.bf16.msrb.mxu1 %v15710_v15  ;;  %v19037_v2 = vld [vmem:[#allocation8 + $0x12c] sm:$0xf0] }
 0x473   :  { %v19320_v10 = vld [vmem:[#allocation8 + $0xa0c] sm:$0xf]  ;;  %v15422_v44 = vor.u32 %v19256_v40, %v15419_v31  ;;  %v14785_v40 = vld [vmem:[#allocation8 + $0x310] sm:$0xf]  ;;  %v14530_v37 = vor.u32 %v19037_v2, %v14529_v20 }
 0x474   :  { %v15675_v51 = vld [vmem:[#allocation8 + $0xa28] sm:$0xf0]  ;;  %7747 = vmatpush.bf16.msrb.mxu2 %v16062_v25  ;;  %v19101_v31 = vld [vmem:[#allocation8 + $0x32c] sm:$0xf0] }
 0x475   :  { %v19408_v22 = vld [vmem:[#allocation8 + $0xccc] sm:$0xf]  ;;  %v15678_v24 = vor.u32 %v19320_v10, %v15675_v51  ;;  %7723 = vmatpush.bf16.msrb.mxu0 %v15422_v44  ;;  %v16185_v10 = vld [vmem:[#allocation8 + $0xe08] sm:$0xf]  ;;  %7651 = vmatpush.bf16.msrb.mxu3 %v16250_v50  ;;  %v20768_v51 = vpop.f32.mrf.mxu2  ;;  %v15137_v44 = vld [vmem:[#allocation8 + $0x5d0] sm:$0xf] }
 0x476   :  { %v16027_v63 = vld [vmem:[#allocation8 + $0xce8] sm:$0xf0]  ;;  %v16186_v7 = vor.u32 %v19452_v18, %v16185_v10  ;;  %v15105_v41 = vld [vmem:[#allocation8 + $0x590] sm:$0xf] }
 0x477   :  { %v16030_v33 = vor.u32 %v19408_v22, %v16027_v63  ;;  %v19400_v52 = vld [vmem:[#allocation8 + $0xc8c] sm:$0xf]  ;;  %7737 = vmatpush.bf16.msrb.mxu1 %v15678_v24  ;;  %v19189_v22 = vld [vmem:[#allocation8 + $0x5ec] sm:$0xf0]  ;;  %v14786_v63 = vor.u32 %v19101_v31, %v14785_v40 }
 0x478   :  { %v15995_v35 = vld [vmem:[#allocation8 + $0xca8] sm:$0xf0]  ;;  %7724 = vmatmul.bf16.vlgmr.msrb.gmra.mxu0 %v20695_v38  ;;  %v19021_v34 = vld [vmem:[#allocation8 + $0xac] sm:$0xf0] }
 0x479   :  { %7772 = vmatpush.bf16.msra.mxu0 %v14626_v23  ;;  %7748 = vmatpush.bf16.msrb.mxu2 %v16030_v33  ;;  %v15998_v55 = vor.u32 %v19400_v52, %v15995_v35  ;;  %v19392_v28 = vld [vmem:[#allocation8 + $0xc4c] sm:$0xf]  ;;  %v14497_v23 = vld [vmem:[#allocation8 + $0xd0] sm:$0xf]  ;;  %v15138_v33 = vor.u32 %v19189_v22, %v15137_v44 }
 0x47a   :  { %7738 = vmatmul.bf16.vlgmr.msrb.gmra.mxu1 %v20697_v36  ;;  %v15963_v8 = vld [vmem:[#allocation8 + $0xc68] sm:$0xf0]  ;;  %7652 = vmatpush.bf16.msrb.mxu3 %v16218_v5  ;;  %v14498_v16 = vor.u32 %v19029_v12, %v14497_v23  ;;  %v19181_v52 = vld [vmem:[#allocation8 + $0x5ac] sm:$0xf0] }
 0x47b   :  { %7786 = vmatpush.bf16.msra.mxu1 %v14882_v39  ;;  %v15966_v15 = vor.u32 %v19392_v28, %v15963_v8  ;;  %v19384_v25 = vld [vmem:[#allocation8 + $0xc0c] sm:$0xf]  ;;  %v14753_v39 = vld [vmem:[#allocation8 + $0x2d0] sm:$0xf]  ;;  %v14466_v28 = vor.u32 %v19021_v34, %v14465_v29 }
 0x47c   :  { %v15931_v21 = vld [vmem:[#allocation8 + $0xc28] sm:$0xf0]  ;;  %v14754_v35 = vor.u32 %v19093_v60, %v14753_v39  ;;  %v14721_v46 = vld [vmem:[#allocation8 + $0x290] sm:$0xf] }
 0x47d   :  { %7773 = vmatpush.bf16.msra.mxu0 %v14594_v59  ;;  %7749 = vmatpush.bf16.msrb.mxu2 %v15998_v55  ;;  %v19248_v17 = vld [vmem:[#allocation8 + $0x7cc] sm:$0xf]  ;;  %v15934_v26 = vor.u32 %v19384_v25, %v15931_v21  ;;  %v19085_v27 = vld [vmem:[#allocation8 + $0x2ac] sm:$0xf0]  ;;  %v15106_v55 = vor.u32 %v19181_v52, %v15105_v41  ;;  %v7473_v14 = vpop.f32.mrf.mxu2 }
 0x47e   :  { %v15387_v24 = vld [vmem:[#allocation8 + $0x7e8] sm:$0xf0]  ;;  %7653 = vmatpush.bf16.msrb.mxu3 %v16186_v7  ;;  %v19173_v19 = vld [vmem:[#allocation8 + $0x56c] sm:$0xf0]  ;;  %v20775_v53 = vadd.f32 %v7473_v14, %v20757_v11 }
 0x47f   :  { %7787 = vmatpush.bf16.msra.mxu1 %v14850_v4  ;;  %v15390_v30 = vor.u32 %v19248_v17, %v15387_v24  ;;  %v19240_v57 = vld [vmem:[#allocation8 + $0x78c] sm:$0xf]  ;;  %v20770_v4 = vpop.f32.mrf.mxu0  ;;  %v14433_v2 = vld [vmem:[#allocation8 + $0x50] sm:$0xf] }
 0x480   :  { %v15355_v59 = vld [vmem:[#allocation8 + $0x7a8] sm:$0xf0]  ;;  %v14689_v40 = vld [vmem:[#allocation8 + $0x250] sm:$0xf] }
 0x481   :  { %7774 = vmatpush.bf16.msra.mxu0 %v14562_v13  ;;  %7750 = vmatpush.bf16.msrb.mxu2 %v15966_v15  ;;  %v15358_v50 = vor.u32 %v19240_v57, %v15355_v59  ;;  %v19232_v8 = vld [vmem:[#allocation8 + $0x74c] sm:$0xf]  ;;  %v15073_v13 = vld [vmem:[#allocation8 + $0x550] sm:$0xf] }
 0x482   :  { %7702 = vmatpush.bf16.msra.mxu3 %v15390_v30  ;;  %v15323_v20 = vld [vmem:[#allocation8 + $0x768] sm:$0xf0]  ;;  %v19013_v15 = vld [vmem:[#allocation8 + $0x6c] sm:$0xf0]  ;;  %v15074_v10 = vor.u32 %v19173_v19, %v15073_v13 }
 0x483   :  { %7788 = vmatpush.bf16.msra.mxu1 %v14818_v58  ;;  %v14722_v58 = vor.u32 %v19085_v27, %v14721_v46  ;;  %7654 = vmatmul.bf16.vlgmr.msrb.gmra.mxu3 %v20729_v32  ;;  %v19077_v31 = vld [vmem:[#allocation8 + $0x26c] sm:$0xf0]  ;;  %v19224_v5 = vld [vmem:[#allocation8 + $0x70c] sm:$0xf]  ;;  %v15326_v18 = vor.u32 %v19232_v8, %v15323_v20  ;;  %v14434_v25 = vor.u32 %v19013_v15, %v14433_v2 }
 0x484   :  { %v15291_v11 = vld [vmem:[#allocation8 + $0x728] sm:$0xf0]  ;;  %v15041_v21 = vld [vmem:[#allocation8 + $0x510] sm:$0xf]  ;;  %v14690_v17 = vor.u32 %v19077_v31, %v14689_v40 }
 0x485   :  { %7775 = vmatpush.bf16.msra.mxu0 %v14530_v37  ;;  %7751 = vmatpush.bf16.msrb.mxu2 %v15934_v26  ;;  %v19165_v37 = vld [vmem:[#allocation8 + $0x52c] sm:$0xf0]  ;;  %v15294_v30 = vor.u32 %v19224_v5, %v15291_v11  ;;  %v19216_v59 = vld [vmem:[#allocation8 + $0x6cc] sm:$0xf] }
 0x486   :  { %7703 = vmatpush.bf16.msra.mxu3 %v15358_v50  ;;  %v14401_v44 = vld [vmem:[#allocation8 + $0x10] sm:$0xf]  ;;  %v15042_v39 = vor.u32 %v19165_v37, %v15041_v21  ;;  %v15259_v29 = vld [vmem:[#allocation8 + $0x6e8] sm:$0xf0] }
 0x487   :  { %7789 = vmatpush.bf16.msra.mxu1 %v14786_v63  ;;  %v19005_v22 = vld [vmem:[#allocation8 + $0x2c] sm:$0xf0]  ;;  %v20779_v24 = vpop.f32.mrf.mxu0  ;;  %v15227_v20 = vld [vmem:[#allocation8 + $0x6a8] sm:$0xf0] }
 0x488   :  { %7752 = vmatmul.bf16.vlgmr.msrb.gmra.mxu2 %v20704_v56  ;;  %v14657_v63 = vld [vmem:[#allocation8 + $0x210] sm:$0xf] }
 0x489   :  { %7800 = vmatpush.bf16.msra.mxu2 %v15138_v33  ;;  %7776 = vmatpush.bf16.msra.mxu0 %v14498_v16  ;;  %v19069_v23 = vld [vmem:[#allocation8 + $0x22c] sm:$0xf0]  ;;  %v20781_v33 = vpop.f32.mrf.mxu1  ;;  %v14402_v16 = vor.u32 %v19005_v22, %v14401_v44  ;;  %v19200_v22 = vld [vmem:[#allocation8 + $0x64c] sm:$0xf] }
 0x48a   :  { %v15649_v12 = vld [vmem:[#allocation8 + $0x9d0] sm:$0xf]  ;;  %7704 = vmatpush.bf16.msra.mxu3 %v15326_v18  ;;  %v14658_v52 = vor.u32 %v19069_v23, %v14657_v63  ;;  %v4742_v18 = vperm.slane %v20721_v45, 4  ;;  %v15195_v63 = vld [vmem:[#allocation8 + $0x668] sm:$0xf0] }
 0x48b   :  { %7790 = vmatpush.bf16.msra.mxu1 %v14754_v35  ;;  %v19317_v26 = vld [vmem:[#allocation8 + $0x9ec] sm:$0xf0] }
 0x48c   :  { %v15905_v60 = vld [vmem:[#allocation8 + $0xbd0] sm:$0xf]  ;;  %v15650_v35 = vor.u32 %v19317_v26, %v15649_v12 }
 0x48d   :  { %7801 = vmatpush.bf16.msra.mxu2 %v15106_v55  ;;  %7777 = vmatpush.bf16.msra.mxu0 %v14466_v28  ;;  %v19381_v7 = vld [vmem:[#allocation8 + $0xbec] sm:$0xf0]  ;;  %v15262_v28 = vor.u32 %v19216_v59, %v15259_v29 }
 0x48e   :  { %v15009_v57 = vld [vmem:[#allocation8 + $0x4d0] sm:$0xf]  ;;  %v15906_v34 = vor.u32 %v19381_v7, %v15905_v60  ;;  %7705 = vmatpush.bf16.msra.mxu3 %v15294_v30  ;;  %v20792_v30 = vperm.slane %v4742_v18, 0 }
 0x48f   :  { %7791 = vmatpush.bf16.msra.mxu1 %v14722_v58  ;;  %v19157_v41 = vld [vmem:[#allocation8 + $0x4ec] sm:$0xf0]  ;;  %v19208_v58 = vld [vmem:[#allocation8 + $0x68c] sm:$0xf] }
 0x490   :  { %v15617_v46 = vld [vmem:[#allocation8 + $0x990] sm:$0xf]  ;;  %v15010_v55 = vor.u32 %v19157_v41, %v15009_v57  ;;  %v15230_v11 = vor.u32 %v19208_v58, %v15227_v20  ;;  %v19192_v57 = vld [vmem:[#allocation8 + $0x60c] sm:$0xf]  ;;  %v15198_v41 = vor.u32 %v19200_v22, %v15195_v63 }
 0x491   :  { %7802 = vmatpush.bf16.msra.mxu2 %v15074_v10  ;;  %7778 = vmatpush.bf16.msra.mxu0 %v14434_v25  ;;  %v19309_v27 = vld [vmem:[#allocation8 + $0x9ac] sm:$0xf0]  ;;  %v20785_v25 = vpop.f32.mrf.mxu0  ;;  %v20790_v23 = vpop.f32.mrf.mxu1 }
 0x492   :  { %v15873_v14 = vld [vmem:[#allocation8 + $0xb90] sm:$0xf]  ;;  %v15618_v19 = vor.u32 %v19309_v27, %v15617_v46  ;;  %7706 = vmatpush.bf16.msra.mxu3 %v15262_v28 }
 0x493   :  { %7792 = vmatpush.bf16.msra.mxu1 %v14690_v17  ;;  %v19373_v50 = vld [vmem:[#allocation8 + $0xbac] sm:$0xf0]  ;;  %v20788_v17 = vpop.f32.mrf.mxu2 }
 0x494   :  { %v14977_v8 = vld [vmem:[#allocation8 + $0x490] sm:$0xf]  ;;  %v15874_v2 = vor.u32 %v19373_v50, %v15873_v14  ;;  %v16411_v14 = vld [vmem:[#allocation8 + $0xfe8] sm:$0xf0] }
 0x495   :  { %7803 = vmatpush.bf16.msra.mxu2 %v15042_v39  ;;  %7779 = vmatpush.bf16.msra.mxu0 %v14402_v16  ;;  %v19149_v13 = vld [vmem:[#allocation8 + $0x4ac] sm:$0xf0] }
 0x496   :  { %v15585_v15 = vld [vmem:[#allocation8 + $0x950] sm:$0xf]  ;;  %v14978_v31 = vor.u32 %v19149_v13, %v14977_v8  ;;  %7707 = vmatpush.bf16.msra.mxu3 %v15230_v11 }
 0x497   :  { %7793 = vmatpush.bf16.msra.mxu1 %v14658_v52  ;;  %v19301_v40 = vld [vmem:[#allocation8 + $0x96c] sm:$0xf0]  ;;  %v15163_v52 = vld [vmem:[#allocation8 + $0x628] sm:$0xf0] }
 0x498   :  { %7780 = vmatmul.bf16.vlgmr.msra.gmra.mxu0 %v20670_v49  ;;  %v15841_v10 = vld [vmem:[#allocation8 + $0xb50] sm:$0xf]  ;;  %v15586_v44 = vor.u32 %v19301_v40, %v15585_v15  ;;  %v15166_v20 = vor.u32 %v19192_v57, %v15163_v52  ;;  %v19488_v57 = vld [vmem:[#allocation8 + $0xf4c] sm:$0xf] }
 0x499   :  { %7828 = vmatpush.bf16.msrb.mxu0 %v15650_v35  ;;  %7804 = vmatpush.bf16.msra.mxu2 %v15010_v55  ;;  %v19365_v5 = vld [vmem:[#allocation8 + $0xb6c] sm:$0xf0]  ;;  %v7557_v58 = vpop.f32.mrf.mxu0  ;;  %v7571_v11 = vpop.f32.mrf.mxu1 }
 0x49a   :  { %7794 = vmatmul.bf16.vlgmr.msra.gmra.mxu1 %v20673_v62  ;;  %v14945_v21 = vld [vmem:[#allocation8 + $0x450] sm:$0xf]  ;;  %v15842_v12 = vor.u32 %v19365_v5, %v15841_v10  ;;  %7708 = vmatpush.bf16.msra.mxu3 %v15198_v41  ;;  %v7558_v15 = vadd.f32 %v7557_v58, %v20792_v30  ;;  %v19496_v10 = vld [vmem:[#allocation8 + $0xf8c] sm:$0xf] }
 0x49b   :  { %7842 = vmatpush.bf16.msrb.mxu1 %v15906_v34  ;;  %v19141_v37 = vld [vmem:[#allocation8 + $0x46c] sm:$0xf0]  ;;  %v19504_v34 = vld [vmem:[#allocation8 + $0xfcc] sm:$0xf]  ;;  %v20795_v63 = vpop.f32.mrf.mxu2 }
 0x49c   :  { %v15553_v26 = vld [vmem:[#allocation8 + $0x910] sm:$0xf]  ;;  %v14946_v7 = vor.u32 %v19141_v37, %v14945_v21  ;;  %v16414_v40 = vor.u32 %v19504_v34, %v16411_v14  ;;  %v16379_v37 = vld [vmem:[#allocation8 + $0xfa8] sm:$0xf0] }
 0x49d   :  { %7829 = vmatpush.bf16.msrb.mxu0 %v15618_v19  ;;  %v19293_v39 = vld [vmem:[#allocation8 + $0x92c] sm:$0xf0]  ;;  %7805 = vmatpush.bf16.msra.mxu2 %v14978_v31  ;;  %v19480_v14 = vld [vmem:[#allocation8 + $0xf0c] sm:$0xf] }
 0x49e   :  { %v15809_v60 = vld [vmem:[#allocation8 + $0xb10] sm:$0xf]  ;;  %v15554_v29 = vor.u32 %v19293_v39, %v15553_v26  ;;  %7709 = vmatpush.bf16.msra.mxu3 %v15166_v20 }
 0x49f   :  { %7843 = vmatpush.bf16.msrb.mxu1 %v15874_v2  ;;  %v19357_v16 = vld [vmem:[#allocation8 + $0xb2c] sm:$0xf0] }
 0x4a0   :  { %v14913_v35 = vld [vmem:[#allocation8 + $0x410] sm:$0xf]  ;;  %v15810_v55 = vor.u32 %v19357_v16, %v15809_v60 }
 0x4a1   :  { %v19133_v59 = vld [vmem:[#allocation8 + $0x42c] sm:$0xf0]  ;;  %7830 = vmatpush.bf16.msrb.mxu0 %v15586_v44  ;;  %7806 = vmatpush.bf16.msra.mxu2 %v14946_v7  ;;  %v16382_v7 = vor.u32 %v19496_v10, %v16379_v37  ;;  %v19057_v10 = vld [vmem:[#allocation8 + $0x1d4] sm:$0xf] }
 0x4a2   :  { %v16161_v46 = vld [vmem:[#allocation8 + $0xdd0] sm:$0xf]  ;;  %v14914_v8 = vor.u32 %v19133_v59, %v14913_v35  ;;  %7758 = vmatpush.bf16.msrb.mxu3 %v16414_v40  ;;  %v16347_v59 = vld [vmem:[#allocation8 + $0xf68] sm:$0xf0]  ;;  %v20801_v40 = vpop.f32.mrf.mxu3 }
 0x4a3   :  { %v19445_v27 = vld [vmem:[#allocation8 + $0xdec] sm:$0xf0]  ;;  %7844 = vmatpush.bf16.msrb.mxu1 %v15842_v12  ;;  %v20797_v12 = vadd.f32 %v7571_v11, %v7558_v15  ;;  %7710 = vmatmul.bf16.vlgmr.msra.gmra.mxu3 %v20679_v54  ;;  %v19121_v11 = vld [vmem:[#allocation8 + $0x3d4] sm:$0xf]  ;;  %v20803_v37 = vpop.f32.mrf.mxu2 }
 0x4a4   :  { %v15521_v50 = vld [vmem:[#allocation8 + $0x8d0] sm:$0xf]  ;;  %v16162_v2 = vor.u32 %v19445_v27, %v16161_v46 }
 0x4a5   :  { %v19285_v28 = vld [vmem:[#allocation8 + $0x8ec] sm:$0xf0]  ;;  %7831 = vmatpush.bf16.msrb.mxu0 %v15554_v29  ;;  %7807 = vmatpush.bf16.msra.mxu2 %v14914_v8  ;;  %v16315_v8 = vld [vmem:[#allocation8 + $0xf28] sm:$0xf0] }
 0x4a6   :  { %v15777_v13 = vld [vmem:[#allocation8 + $0xad0] sm:$0xf]  ;;  %v15522_v31 = vor.u32 %v19285_v28, %v15521_v50  ;;  %7759 = vmatpush.bf16.msrb.mxu3 %v16382_v7  ;;  %v16350_v50 = vor.u32 %v19488_v57, %v16347_v59  ;;  %v16283_v57 = vld [vmem:[#allocation8 + $0xee8] sm:$0xf0] }
 0x4a7   :  { %v19349_v19 = vld [vmem:[#allocation8 + $0xaec] sm:$0xf0]  ;;  %7845 = vmatpush.bf16.msrb.mxu1 %v15810_v55 }
 0x4a8   :  { %v16129_v5 = vld [vmem:[#allocation8 + $0xd90] sm:$0xf]  ;;  %v15778_v21 = vor.u32 %v19349_v19, %v15777_v13  ;;  %7808 = vmatmul.bf16.vlgmr.msra.gmra.mxu2 %v20675_v6 }
 0x4a9   :  { %v19437_v18 = vld [vmem:[#allocation8 + $0xdac] sm:$0xf0]  ;;  %7856 = vmatpush.bf16.msrb.mxu2 %v16162_v2  ;;  %7832 = vmatpush.bf16.msrb.mxu0 %v15522_v31 }
 0x4aa   :  { %v15489_v44 = vld [vmem:[#allocation8 + $0x890] sm:$0xf]  ;;  %v16130_v60 = vor.u32 %v19437_v18, %v16129_v5  ;;  %v14627_v5 = vld [vmem:[#allocation8 + $0x1f0] sm:$0xf0]  ;;  %7760 = vmatpush.bf16.msrb.mxu3 %v16350_v50  ;;  %v19464_v50 = vld [vmem:[#allocation8 + $0xe8c] sm:$0xf] }
 0x4ab   :  { %v19277_v22 = vld [vmem:[#allocation8 + $0x8ac] sm:$0xf0]  ;;  %7846 = vmatpush.bf16.msrb.mxu1 %v15778_v21  ;;  %v14883_v21 = vld [vmem:[#allocation8 + $0x3f0] sm:$0xf0]  ;;  %v14630_v7 = vor.u32 %v19057_v10, %v14627_v5  ;;  %v7585_v10 = vpop.f32.mrf.mxu2 }
 0x4ac   :  { %v15745_v26 = vld [vmem:[#allocation8 + $0xa90] sm:$0xf]  ;;  %v15490_v16 = vor.u32 %v19277_v22, %v15489_v44  ;;  %v16318_v44 = vor.u32 %v19480_v14, %v16315_v8  ;;  %v7431_v8 = vpop.f32.mrf.mxu3 }
 0x4ad   :  { %v19341_v39 = vld [vmem:[#allocation8 + $0xaac] sm:$0xf0]  ;;  %7857 = vmatpush.bf16.msrb.mxu2 %v16130_v60 }
 0x4ae   :  { %v16097_v41 = vld [vmem:[#allocation8 + $0xd50] sm:$0xf]  ;;  %v15746_v35 = vor.u32 %v19341_v39, %v15745_v26  ;;  %7833 = vmatpush.bf16.msrb.mxu0 %v15490_v16  ;;  %v19472_v16 = vld [vmem:[#allocation8 + $0xecc] sm:$0xf]  ;;  %7761 = vmatpush.bf16.msrb.mxu3 %v16318_v44 }
 0x4af   :  { %v19429_v52 = vld [vmem:[#allocation8 + $0xd6c] sm:$0xf0] }
 0x4b0   :  { %v15457_v29 = vld [vmem:[#allocation8 + $0x850] sm:$0xf]  ;;  %v16098_v55 = vor.u32 %v19429_v52, %v16097_v41  ;;  %7847 = vmatpush.bf16.msrb.mxu1 %v15746_v35  ;;  %v14886_v41 = vor.u32 %v19121_v11, %v14883_v21  ;;  %v19049_v52 = vld [vmem:[#allocation8 + $0x194] sm:$0xf]  ;;  %v20811_v21 = vadd.f32 %v7585_v10, %v20797_v12 }
 0x4b1   :  { %v19269_v34 = vld [vmem:[#allocation8 + $0x86c] sm:$0xf0]  ;;  %v14595_v35 = vld [vmem:[#allocation8 + $0x1b0] sm:$0xf0] }
 0x4b2   :  { %v15713_v46 = vld [vmem:[#allocation8 + $0xa50] sm:$0xf]  ;;  %v15458_v28 = vor.u32 %v19269_v34, %v15457_v29  ;;  %7858 = vmatpush.bf16.msrb.mxu2 %v16098_v55  ;;  %v19113_v29 = vld [vmem:[#allocation8 + $0x394] sm:$0xf]  ;;  %v14598_v14 = vor.u32 %v19049_v52, %v14595_v35  ;;  %v16187_v35 = vld [vmem:[#allocation8 + $0xe28] sm:$0xf0] }
 0x4b3   :  { %v19333_v27 = vld [vmem:[#allocation8 + $0xa6c] sm:$0xf0]  ;;  %v14851_v34 = vld [vmem:[#allocation8 + $0x3b0] sm:$0xf0] }
 0x4b4   :  { %v16065_v13 = vld [vmem:[#allocation8 + $0xd10] sm:$0xf]  ;;  %v15714_v58 = vor.u32 %v19333_v27, %v15713_v46  ;;  %7834 = vmatpush.bf16.msrb.mxu0 %v15458_v28  ;;  %v16286_v46 = vor.u32 %v19472_v16, %v16283_v57  ;;  %v16251_v28 = vld [vmem:[#allocation8 + $0xea8] sm:$0xf0]  ;;  %v19097_v16 = vld [vmem:[#allocation8 + $0x314] sm:$0xf] }
 0x4b5   :  { %v19421_v19 = vld [vmem:[#allocation8 + $0xd2c] sm:$0xf0]  ;;  %v16254_v5 = vor.u32 %v19464_v50, %v16251_v28  ;;  %v14787_v57 = vld [vmem:[#allocation8 + $0x330] sm:$0xf0] }
 0x4b6   :  { %v15425_v20 = vld [vmem:[#allocation8 + $0x810] sm:$0xf]  ;;  %v16066_v18 = vor.u32 %v19421_v19, %v16065_v13  ;;  %7848 = vmatpush.bf16.msrb.mxu1 %v15714_v58  ;;  %v14854_v13 = vor.u32 %v19113_v29, %v14851_v34  ;;  %v19041_v19 = vld [vmem:[#allocation8 + $0x154] sm:$0xf]  ;;  %7762 = vmatpush.bf16.msrb.mxu3 %v16286_v46 }
 0x4b7   :  { %v19261_v2 = vld [vmem:[#allocation8 + $0x82c] sm:$0xf0]  ;;  %v14563_v58 = vld [vmem:[#allocation8 + $0x170] sm:$0xf0] }
 0x4b8   :  { %v15681_v15 = vld [vmem:[#allocation8 + $0xa10] sm:$0xf]  ;;  %v15426_v22 = vor.u32 %v19261_v2, %v15425_v20  ;;  %7859 = vmatpush.bf16.msrb.mxu2 %v16066_v18  ;;  %v20806_v20 = vadd.f32 %v7431_v8, %v20764_v47  ;;  %v14566_v44 = vor.u32 %v19041_v19, %v14563_v58  ;;  %v19456_v47 = vld [vmem:[#allocation8 + $0xe4c] sm:$0xf]  ;;  %v19185_v46 = vld [vmem:[#allocation8 + $0x5d4] sm:$0xf] }
 0x4b9   :  { %v19325_v31 = vld [vmem:[#allocation8 + $0xa2c] sm:$0xf0]  ;;  %v19025_v28 = vld [vmem:[#allocation8 + $0xd4] sm:$0xf] }
 0x4ba   :  { %v16033_v26 = vld [vmem:[#allocation8 + $0xcd0] sm:$0xf]  ;;  %v15682_v60 = vor.u32 %v19325_v31, %v15681_v15  ;;  %7835 = vmatpush.bf16.msrb.mxu0 %v15426_v22  ;;  %v19105_v15 = vld [vmem:[#allocation8 + $0x354] sm:$0xf]  ;;  %v16219_v22 = vld [vmem:[#allocation8 + $0xe68] sm:$0xf0]  ;;  %7763 = vmatpush.bf16.msrb.mxu3 %v16254_v5 }
 0x4bb   :  { %v19413_v39 = vld [vmem:[#allocation8 + $0xcec] sm:$0xf0]  ;;  %v14819_v31 = vld [vmem:[#allocation8 + $0x370] sm:$0xf0]  ;;  %v16222_v52 = vor.u32 %v19456_v47, %v16219_v22 }
 0x4bc   :  { %v16034_v59 = vor.u32 %v19413_v39, %v16033_v26  ;;  %v16001_v27 = vld [vmem:[#allocation8 + $0xc90] sm:$0xf]  ;;  %7849 = vmatpush.bf16.msrb.mxu1 %v15682_v60  ;;  %v14822_v26 = vor.u32 %v19105_v15, %v14819_v31  ;;  %v19033_v39 = vld [vmem:[#allocation8 + $0x114] sm:$0xf] }
 0x4bd   :  { %v19405_v55 = vld [vmem:[#allocation8 + $0xcac] sm:$0xf0]  ;;  %7836 = vmatmul.bf16.vlgmr.msrb.gmra.mxu0 %v20695_v38  ;;  %v14531_v60 = vld [vmem:[#allocation8 + $0x130] sm:$0xf0] }
 0x4be   :  { %7884 = vmatpush.bf16.msra.mxu0 %v14630_v7  ;;  %7860 = vmatpush.bf16.msrb.mxu2 %v16034_v59  ;;  %v16002_v2 = vor.u32 %v19405_v55, %v16001_v27  ;;  %v15969_v18 = vld [vmem:[#allocation8 + $0xc50] sm:$0xf]  ;;  %v14534_v12 = vor.u32 %v19033_v39, %v14531_v60  ;;  %v15139_v27 = vld [vmem:[#allocation8 + $0x5f0] sm:$0xf0]  ;;  %v20813_v55 = vpop.f32.mrf.mxu3  ;;  %v20815_v39 = vpop.f32.mrf.mxu0 }
 0x4bf   :  { %7850 = vmatmul.bf16.vlgmr.msrb.gmra.mxu1 %v20697_v36  ;;  %v19397_v11 = vld [vmem:[#allocation8 + $0xc6c] sm:$0xf0]  ;;  %v14499_v8 = vld [vmem:[#allocation8 + $0xf0] sm:$0xf0]  ;;  %7764 = vmatpush.bf16.msrb.mxu3 %v16222_v52  ;;  %v15142_v15 = vor.u32 %v19185_v46, %v15139_v27 }
 0x4c0   :  { %7898 = vmatpush.bf16.msra.mxu1 %v14886_v41  ;;  %v15970_v7 = vor.u32 %v19397_v11, %v15969_v18  ;;  %v19448_v41 = vld [vmem:[#allocation8 + $0xe0c] sm:$0xf]  ;;  %v15937_v59 = vld [vmem:[#allocation8 + $0xc10] sm:$0xf]  ;;  %v19089_v19 = vld [vmem:[#allocation8 + $0x2d4] sm:$0xf]  ;;  %v14502_v10 = vor.u32 %v19025_v28, %v14499_v8 }
 0x4c1   :  { %v19389_v29 = vld [vmem:[#allocation8 + $0xc2c] sm:$0xf0]  ;;  %v14755_v58 = vld [vmem:[#allocation8 + $0x2f0] sm:$0xf0] }
 0x4c2   :  { %7885 = vmatpush.bf16.msra.mxu0 %v14598_v14  ;;  %7861 = vmatpush.bf16.msrb.mxu2 %v16002_v2  ;;  %v15393_v34 = vld [vmem:[#allocation8 + $0x7d0] sm:$0xf]  ;;  %v14790_v14 = vor.u32 %v19097_v16, %v14787_v57  ;;  %v16190_v2 = vor.u32 %v19448_v41, %v16187_v35  ;;  %v19177_v18 = vld [vmem:[#allocation8 + $0x594] sm:$0xf]  ;;  %v20817_v57 = vpop.f32.mrf.mxu1 }
 0x4c3   :  { %v19253_v50 = vld [vmem:[#allocation8 + $0x7ec] sm:$0xf0]  ;;  %v15107_v11 = vld [vmem:[#allocation8 + $0x5b0] sm:$0xf0] }
 0x4c4   :  { %7899 = vmatpush.bf16.msra.mxu1 %v14854_v13  ;;  %v15938_v13 = vor.u32 %v19389_v29, %v15937_v59  ;;  %v15394_v31 = vor.u32 %v19253_v50, %v15393_v34  ;;  %v15361_v5 = vld [vmem:[#allocation8 + $0x790] sm:$0xf]  ;;  %v19017_v22 = vld [vmem:[#allocation8 + $0x94] sm:$0xf]  ;;  %7765 = vmatpush.bf16.msrb.mxu3 %v16190_v2  ;;  %v15110_v16 = vor.u32 %v19177_v18, %v15107_v11 }
 0x4c5   :  { %v19245_v47 = vld [vmem:[#allocation8 + $0x7ac] sm:$0xf0]  ;;  %v19081_v60 = vld [vmem:[#allocation8 + $0x294] sm:$0xf] }
 0x4c6   :  { %7886 = vmatpush.bf16.msra.mxu0 %v14566_v44  ;;  %7862 = vmatpush.bf16.msrb.mxu2 %v15970_v7  ;;  %v14758_v44 = vor.u32 %v19089_v19, %v14755_v58  ;;  %v14723_v7 = vld [vmem:[#allocation8 + $0x2b0] sm:$0xf0]  ;;  %v15362_v41 = vor.u32 %v19245_v47, %v15361_v5  ;;  %v15329_v35 = vld [vmem:[#allocation8 + $0x750] sm:$0xf]  ;;  %v7487_v34 = vpop.f32.mrf.mxu3  ;;  %v20826_v47 = vpop.f32.mrf.mxu0 }
 0x4c7   :  { %v19169_v59 = vld [vmem:[#allocation8 + $0x554] sm:$0xf]  ;;  %v14726_v46 = vor.u32 %v19081_v60, %v14723_v7  ;;  %v19237_v27 = vld [vmem:[#allocation8 + $0x76c] sm:$0xf0]  ;;  %v7488_v28 = vadd.f32 %v7487_v34, %v20775_v53  ;;  %7766 = vmatmul.bf16.vlgmr.msrb.gmra.mxu3 %v20729_v32 }
 0x4c8   :  { %7900 = vmatpush.bf16.msra.mxu1 %v14822_v26  ;;  %v14467_v26 = vld [vmem:[#allocation8 + $0xb0] sm:$0xf0]  ;;  %7814 = vmatpush.bf16.msra.mxu3 %v15394_v31  ;;  %v15297_v58 = vld [vmem:[#allocation8 + $0x710] sm:$0xf] }
 0x4c9   :  { %v14470_v52 = vor.u32 %v19017_v22, %v14467_v26  ;;  %v15075_v29 = vld [vmem:[#allocation8 + $0x570] sm:$0xf0]  ;;  %v7502_v2 = vadd.f32 %v20779_v24, %v7488_v28 }
 0x4ca   :  { %7887 = vmatpush.bf16.msra.mxu0 %v14534_v12  ;;  %7863 = vmatpush.bf16.msrb.mxu2 %v15938_v13  ;;  %v7448_v12 = vadd.f32 %v20770_v4, %v20754_v9  ;;  %v14435_v50 = vld [vmem:[#allocation8 + $0x70] sm:$0xf0]  ;;  %v15078_v19 = vor.u32 %v19169_v59, %v15075_v29  ;;  %v15330_v9 = vor.u32 %v19237_v27, %v15329_v35  ;;  %v20830_v35 = vpop.f32.mrf.mxu1 }
 0x4cb   :  { %v19073_v8 = vld [vmem:[#allocation8 + $0x254] sm:$0xf]  ;;  %v7516_v24 = vadd.f32 %v20781_v33, %v7502_v2 }
 0x4cc   :  { %7901 = vmatpush.bf16.msra.mxu1 %v14790_v14  ;;  %v19009_v14 = vld [vmem:[#allocation8 + $0x54] sm:$0xf]  ;;  %7815 = vmatpush.bf16.msra.mxu3 %v15362_v41  ;;  %v7462_v5 = vadd.f32 %v20772_v42, %v7448_v12 }
 0x4cd   :  { %7864 = vmatmul.bf16.vlgmr.msrb.gmra.mxu2 %v20704_v56  ;;  %v14691_v13 = vld [vmem:[#allocation8 + $0x270] sm:$0xf0]  ;;  %v14438_v4 = vor.u32 %v19009_v14, %v14435_v50  ;;  %v7530_v34 = vadd.f32 %v20795_v63, %v7516_v24  ;;  %v15265_v14 = vld [vmem:[#allocation8 + $0x6d0] sm:$0xf] }
 0x4ce   :  { %7912 = vmatpush.bf16.msra.mxu2 %v15142_v15  ;;  %7888 = vmatpush.bf16.msra.mxu0 %v14502_v10  ;;  %v19229_v15 = vld [vmem:[#allocation8 + $0x72c] sm:$0xf0]  ;;  %v19161_v31 = vld [vmem:[#allocation8 + $0x514] sm:$0xf]  ;;  %v14694_v53 = vor.u32 %v19073_v8, %v14691_v13  ;;  %v7476_v7 = vadd.f32 %v20788_v17, %v7462_v5  ;;  %v20837_v24 = vpop.f32.mrf.mxu0 }
 0x4cf   :  { %v15043_v10 = vld [vmem:[#allocation8 + $0x530] sm:$0xf0]  ;;  %v15298_v42 = vor.u32 %v19229_v15, %v15297_v58  ;;  %v19221_v17 = vld [vmem:[#allocation8 + $0x6ec] sm:$0xf0] }
 0x4d0   :  { %7902 = vmatpush.bf16.msra.mxu1 %v14758_v44  ;;  %v19001_v18 = vld [vmem:[#allocation8 + $0x14] sm:$0xf]  ;;  %7816 = vmatpush.bf16.msra.mxu3 %v15330_v9  ;;  %v19213_v5 = vld [vmem:[#allocation8 + $0x6ac] sm:$0xf0] }
 0x4d1   :  { %v14403_v11 = vld [vmem:[#allocation8 + $0x30] sm:$0xf0] }
 0x4d2   :  { %7913 = vmatpush.bf16.msra.mxu2 %v15110_v16  ;;  %7889 = vmatpush.bf16.msra.mxu0 %v14470_v52  ;;  %v19065_v44 = vld [vmem:[#allocation8 + $0x214] sm:$0xf]  ;;  %v15046_v16 = vor.u32 %v19161_v31, %v15043_v10  ;;  %v14406_v59 = vor.u32 %v19001_v18, %v14403_v11  ;;  %v15233_v10 = vld [vmem:[#allocation8 + $0x690] sm:$0xf] }
 0x4d3   :  { %v14659_v22 = vld [vmem:[#allocation8 + $0x230] sm:$0xf0] }
 0x4d4   :  { %7903 = vmatpush.bf16.msra.mxu1 %v14726_v46  ;;  %v19313_v26 = vld [vmem:[#allocation8 + $0x9d4] sm:$0xf]  ;;  %v7489_v46 = vpop.f32.mrf.mxu3  ;;  %v14662_v27 = vor.u32 %v19065_v44, %v14659_v22  ;;  %7817 = vmatpush.bf16.msra.mxu3 %v15298_v42 }
 0x4d5   :  { %v15651_v60 = vld [vmem:[#allocation8 + $0x9f0] sm:$0xf0]  ;;  %v7490_v50 = vadd.f32 %v7489_v46, %v7476_v7  ;;  %v15234_v7 = vor.u32 %v19213_v5, %v15233_v10 }
 0x4d6   :  { %7914 = vmatpush.bf16.msra.mxu2 %v15078_v19  ;;  %v19377_v41 = vld [vmem:[#allocation8 + $0xbd4] sm:$0xf]  ;;  %7890 = vmatpush.bf16.msra.mxu0 %v14438_v4  ;;  %v15654_v33 = vor.u32 %v19313_v26, %v15651_v60  ;;  %v15266_v4 = vor.u32 %v19221_v17, %v15265_v14  ;;  %v4743_v60 = vperm.slane %v20721_v45, 6  ;;  %v20845_v17 = vpop.f32.mrf.mxu2 }
 0x4d7   :  { %v15907_v52 = vld [vmem:[#allocation8 + $0xbf0] sm:$0xf0]  ;;  %v7504_v58 = vadd.f32 %v20785_v25, %v7490_v50 }
 0x4d8   :  { %v19153_v29 = vld [vmem:[#allocation8 + $0x4d4] sm:$0xf]  ;;  %7904 = vmatpush.bf16.msra.mxu1 %v14694_v53  ;;  %v15910_v28 = vor.u32 %v19377_v41, %v15907_v52  ;;  %7818 = vmatpush.bf16.msra.mxu3 %v15266_v4 }
 0x4d9   :  { %v15011_v12 = vld [vmem:[#allocation8 + $0x4f0] sm:$0xf0]  ;;  %v7518_v44 = vadd.f32 %v20790_v23, %v7504_v58  ;;  %v16417_v58 = vld [vmem:[#allocation8 + $0xfd0] sm:$0xf] }
 0x4da   :  { %v19305_v8 = vld [vmem:[#allocation8 + $0x994] sm:$0xf]  ;;  %7915 = vmatpush.bf16.msra.mxu2 %v15046_v16  ;;  %v15014_v19 = vor.u32 %v19153_v29, %v15011_v12  ;;  %7891 = vmatpush.bf16.msra.mxu0 %v14406_v59  ;;  %v15201_v59 = vld [vmem:[#allocation8 + $0x650] sm:$0xf]  ;;  %v20841_v12 = vpop.f32.mrf.mxu1 }
 0x4db   :  { %v15619_v13 = vld [vmem:[#allocation8 + $0x9b0] sm:$0xf0]  ;;  %v7532_v52 = vadd.f32 %v20803_v37, %v7518_v44  ;;  %v19205_v29 = vld [vmem:[#allocation8 + $0x66c] sm:$0xf0]  ;;  %v7669_v44 = vpop.f32.mrf.mxu0 }
 0x4dc   :  { %v19369_v2 = vld [vmem:[#allocation8 + $0xb94] sm:$0xf]  ;;  %7905 = vmatpush.bf16.msra.mxu1 %v14662_v27  ;;  %v15622_v31 = vor.u32 %v19305_v8, %v15619_v13  ;;  %v7543_v42 = vpop.f32.mrf.mxu3  ;;  %v15169_v8 = vld [vmem:[#allocation8 + $0x610] sm:$0xf]  ;;  %7819 = vmatpush.bf16.msra.mxu3 %v15234_v7  ;;  %v15202_v13 = vor.u32 %v19205_v29, %v15201_v59 }
 0x4dd   :  { %v15875_v9 = vld [vmem:[#allocation8 + $0xbb0] sm:$0xf0]  ;;  %7892 = vmatmul.bf16.vlgmr.msra.gmra.mxu0 %v20670_v49  ;;  %v20843_v46 = vadd.f32 %v7543_v42, %v7530_v34 }
 0x4de   :  { %v19145_v63 = vld [vmem:[#allocation8 + $0x494] sm:$0xf]  ;;  %7940 = vmatpush.bf16.msrb.mxu0 %v15654_v33  ;;  %v15878_v53 = vor.u32 %v19369_v2, %v15875_v9  ;;  %7916 = vmatpush.bf16.msra.mxu2 %v15014_v19  ;;  %v19197_v19 = vld [vmem:[#allocation8 + $0x62c] sm:$0xf0] }
 0x4df   :  { %v14979_v15 = vld [vmem:[#allocation8 + $0x4b0] sm:$0xf0]  ;;  %7906 = vmatmul.bf16.vlgmr.msra.gmra.mxu1 %v20673_v62 }
 0x4e0   :  { %7954 = vmatpush.bf16.msrb.mxu1 %v15910_v28  ;;  %v19297_v18 = vld [vmem:[#allocation8 + $0x954] sm:$0xf]  ;;  %v14982_v25 = vor.u32 %v19145_v63, %v14979_v15  ;;  %v20847_v28 = vperm.slane %v4743_v60, 0  ;;  %7820 = vmatpush.bf16.msra.mxu3 %v15202_v13 }
 0x4e1   :  { %v15587_v11 = vld [vmem:[#allocation8 + $0x970] sm:$0xf0] }
 0x4e2   :  { %v19361_v22 = vld [vmem:[#allocation8 + $0xb54] sm:$0xf]  ;;  %7941 = vmatpush.bf16.msrb.mxu0 %v15622_v31  ;;  %v15590_v23 = vor.u32 %v19297_v18, %v15587_v11  ;;  %7917 = vmatpush.bf16.msra.mxu2 %v14982_v25  ;;  %21303 = vst [vmem:[#allocation30_spill] sm:$0xff] %v20847_v28  ;;  %v19509_v31 = vld [vmem:[#allocation8 + $0xfec] sm:$0xf0]  ;;  %v15170_v25 = vor.u32 %v19197_v19, %v15169_v8  ;;  %v7683_v29 = vpop.f32.mrf.mxu1  ;;  %v8245_v19 = vmax.f32 %v20843_v46, 0.0 }
 0x4e3   :  { %v15843_v26 = vld [vmem:[#allocation8 + $0xb70] sm:$0xf0]  ;;  %v7670_v60 = vadd.f32 %v7669_v44, %v20847_v28  ;;  %v16418_v7 = vor.u32 %v19509_v31, %v16417_v58  ;;  %v16353_v58 = vld [vmem:[#allocation8 + $0xf50] sm:$0xf]  ;;  %v19246_v28 = vld [vmem:[#allocation8 + $0x7b4] sm:$0xf0] }
 0x4e4   :  { %v19137_v16 = vld [vmem:[#allocation8 + $0x454] sm:$0xf]  ;;  %7955 = vmatpush.bf16.msrb.mxu1 %v15878_v53  ;;  %v15846_v45 = vor.u32 %v19361_v22, %v15843_v26  ;;  %v7545_v26 = vpop.f32.mrf.mxu3  ;;  %7821 = vmatpush.bf16.msra.mxu3 %v15170_v25  ;;  %v16321_v44 = vld [vmem:[#allocation8 + $0xf10] sm:$0xf] }
 0x4e5   :  { %v14947_v41 = vld [vmem:[#allocation8 + $0x470] sm:$0xf0]  ;;  %v7546_v59 = vadd.f32 %v7545_v26, %v7532_v52  ;;  %v19485_v26 = vld [vmem:[#allocation8 + $0xf2c] sm:$0xf0] }
 0x4e6   :  { %v19289_v27 = vld [vmem:[#allocation8 + $0x914] sm:$0xf]  ;;  %v14950_v50 = vor.u32 %v19137_v16, %v14947_v41  ;;  %7942 = vmatpush.bf16.msrb.mxu0 %v15590_v23  ;;  %v16385_v41 = vld [vmem:[#allocation8 + $0xf90] sm:$0xf] }
 0x4e7   :  { %v15555_v33 = vld [vmem:[#allocation8 + $0x930] sm:$0xf0]  ;;  %7822 = vmatmul.bf16.vlgmr.msra.gmra.mxu3 %v20679_v54 }
 0x4e8   :  { %v19353_v14 = vld [vmem:[#allocation8 + $0xb14] sm:$0xf]  ;;  %v15558_v34 = vor.u32 %v19289_v27, %v15555_v33  ;;  %7956 = vmatpush.bf16.msrb.mxu1 %v15846_v45  ;;  %7918 = vmatpush.bf16.msra.mxu2 %v14950_v50  ;;  %v19501_v27 = vld [vmem:[#allocation8 + $0xfac] sm:$0xf0]  ;;  %v20850_v50 = vpop.f32.mrf.mxu2 }
 0x4e9   :  { %v15811_v37 = vld [vmem:[#allocation8 + $0xb30] sm:$0xf0]  ;;  %7870 = vmatpush.bf16.msrb.mxu3 %v16418_v7  ;;  %v16386_v52 = vor.u32 %v19501_v27, %v16385_v41 }
 0x4ea   :  { %v19129_v2 = vld [vmem:[#allocation8 + $0x414] sm:$0xf]  ;;  %v15814_v15 = vor.u32 %v19353_v14, %v15811_v37  ;;  %7943 = vmatpush.bf16.msrb.mxu0 %v15558_v34  ;;  %v20852_v37 = vadd.f32 %v7683_v29, %v7670_v60  ;;  %v14633_v29 = vld [vmem:[#allocation8 + $0x1d8] sm:$0xf] }
 0x4eb   :  { %v14915_v9 = vld [vmem:[#allocation8 + $0x430] sm:$0xf0] }
 0x4ec   :  { %v19441_v4 = vld [vmem:[#allocation8 + $0xdd4] sm:$0xf]  ;;  %v14918_v53 = vor.u32 %v19129_v2, %v14915_v9  ;;  %7957 = vmatpush.bf16.msrb.mxu1 %v15814_v15  ;;  %v8253_v2 = vmax.f32 %v7546_v59, 0.0 }
 0x4ed   :  { %v16163_v63 = vld [vmem:[#allocation8 + $0xdf0] sm:$0xf0]  ;;  %7871 = vmatpush.bf16.msrb.mxu3 %v16386_v52 }
 0x4ee   :  { %v19281_v10 = vld [vmem:[#allocation8 + $0x8d4] sm:$0xf]  ;;  %v16166_v22 = vor.u32 %v19441_v4, %v16163_v63  ;;  %7919 = vmatpush.bf16.msra.mxu2 %v14918_v53  ;;  %v20855_v15 = vpack.c.bf16 %v8253_v2, %v8245_v19 }
 0x4ef   :  { %v15523_v5 = vld [vmem:[#allocation8 + $0x8f0] sm:$0xf0] }
 0x4f0   :  { %v19345_v18 = vld [vmem:[#allocation8 + $0xad4] sm:$0xf]  ;;  %v15526_v16 = vor.u32 %v19281_v10, %v15523_v5  ;;  %v19493_v10 = vld [vmem:[#allocation8 + $0xf6c] sm:$0xf0] }
 0x4f1   :  { %v15779_v11 = vld [vmem:[#allocation8 + $0xaf0] sm:$0xf0]  ;;  %7920 = vmatmul.bf16.vlgmr.msra.gmra.mxu2 %v20675_v6  ;;  %v16354_v25 = vor.u32 %v19493_v10, %v16353_v58  ;;  %v16289_v58 = vld [vmem:[#allocation8 + $0xed0] sm:$0xf]  ;;  %v19054_v10 = vld [vmem:[#allocation8 + $0x1b4] sm:$0xf0] }
 0x4f2   :  { %v19433_v42 = vld [vmem:[#allocation8 + $0xd94] sm:$0xf]  ;;  %v15782_v45 = vor.u32 %v19345_v18, %v15779_v11  ;;  %7968 = vmatpush.bf16.msrb.mxu2 %v16166_v22  ;;  %7944 = vmatpush.bf16.msrb.mxu0 %v15526_v16 }
 0x4f3   :  { %v16131_v23 = vld [vmem:[#allocation8 + $0xdb0] sm:$0xf0]  ;;  %7872 = vmatpush.bf16.msrb.mxu3 %v16354_v25 }
 0x4f4   :  { %v19273_v33 = vld [vmem:[#allocation8 + $0x894] sm:$0xf]  ;;  %v16134_v9 = vor.u32 %v19433_v42, %v16131_v23  ;;  %7958 = vmatpush.bf16.msrb.mxu1 %v15782_v45  ;;  %v19062_v45 = vld [vmem:[#allocation8 + $0x1f4] sm:$0xf0] }
 0x4f5   :  { %v15491_v14 = vld [vmem:[#allocation8 + $0x8b0] sm:$0xf0] }
 0x4f6   :  { %v19337_v8 = vld [vmem:[#allocation8 + $0xa94] sm:$0xf]  ;;  %v15494_v34 = vor.u32 %v19273_v33, %v15491_v14  ;;  %7969 = vmatpush.bf16.msrb.mxu2 %v16134_v9  ;;  %v14889_v33 = vld [vmem:[#allocation8 + $0x3d8] sm:$0xf] }
 0x4f7   :  { %v15747_v13 = vld [vmem:[#allocation8 + $0xab0] sm:$0xf0]  ;;  %v19126_v14 = vld [vmem:[#allocation8 + $0x3f4] sm:$0xf0] }
 0x4f8   :  { %v19425_v4 = vld [vmem:[#allocation8 + $0xd54] sm:$0xf]  ;;  %v15750_v31 = vor.u32 %v19337_v8, %v15747_v13  ;;  %7945 = vmatpush.bf16.msrb.mxu0 %v15494_v34  ;;  %v20859_v8 = vpop.f32.mrf.mxu2  ;;  %v16322_v13 = vor.u32 %v19485_v26, %v16321_v44  ;;  %v14634_v34 = vor.u32 %v19062_v45, %v14633_v29  ;;  %v19469_v26 = vld [vmem:[#allocation8 + $0xeac] sm:$0xf0] }
 0x4f9   :  { %v16099_v63 = vld [vmem:[#allocation8 + $0xd70] sm:$0xf0] }
 0x4fa   :  { %v19265_v5 = vld [vmem:[#allocation8 + $0x854] sm:$0xf]  ;;  %v16102_v11 = vor.u32 %v19425_v4, %v16099_v63  ;;  %7959 = vmatpush.bf16.msrb.mxu1 %v15750_v31  ;;  %v19477_v4 = vld [vmem:[#allocation8 + $0xeec] sm:$0xf0]  ;;  %v14890_v63 = vor.u32 %v19126_v14, %v14889_v33  ;;  %v14601_v31 = vld [vmem:[#allocation8 + $0x198] sm:$0xf]  ;;  %7873 = vmatpush.bf16.msrb.mxu3 %v16322_v13  ;;  %v7599_v33 = vpop.f32.mrf.mxu3 }
 0x4fb   :  { %v15459_v46 = vld [vmem:[#allocation8 + $0x870] sm:$0xf0]  ;;  %v14602_v25 = vor.u32 %v19054_v10, %v14601_v31  ;;  %v19102_v31 = vld [vmem:[#allocation8 + $0x334] sm:$0xf0]  ;;  %v16193_v10 = vld [vmem:[#allocation8 + $0xe10] sm:$0xf] }
 0x4fc   :  { %v19329_v53 = vld [vmem:[#allocation8 + $0xa54] sm:$0xf]  ;;  %v15462_v22 = vor.u32 %v19265_v5, %v15459_v46  ;;  %7970 = vmatpush.bf16.msrb.mxu2 %v16102_v11  ;;  %v14857_v46 = vld [vmem:[#allocation8 + $0x398] sm:$0xf] }
 0x4fd   :  { %v15715_v18 = vld [vmem:[#allocation8 + $0xa70] sm:$0xf0] }
 0x4fe   :  { %v19417_v60 = vld [vmem:[#allocation8 + $0xd14] sm:$0xf]  ;;  %v15718_v16 = vor.u32 %v19329_v53, %v15715_v18  ;;  %7946 = vmatpush.bf16.msrb.mxu0 %v15462_v22  ;;  %v19118_v53 = vld [vmem:[#allocation8 + $0x3b4] sm:$0xf0]  ;;  %v16290_v18 = vor.u32 %v19477_v4, %v16289_v58  ;;  %v16257_v22 = vld [vmem:[#allocation8 + $0xe90] sm:$0xf] }
 0x4ff   :  { %v16067_v7 = vld [vmem:[#allocation8 + $0xd30] sm:$0xf0]  ;;  %v16258_v29 = vor.u32 %v19469_v26, %v16257_v22  ;;  %v19038_v58 = vld [vmem:[#allocation8 + $0x134] sm:$0xf0] }
 0x500   :  { %v19257_v41 = vld [vmem:[#allocation8 + $0x814] sm:$0xf]  ;;  %v16070_v27 = vor.u32 %v19417_v60, %v16067_v7  ;;  %7960 = vmatpush.bf16.msrb.mxu1 %v15718_v16  ;;  %v14858_v60 = vor.u32 %v19118_v53, %v14857_v46  ;;  %v14569_v7 = vld [vmem:[#allocation8 + $0x158] sm:$0xf]  ;;  %7874 = vmatpush.bf16.msrb.mxu3 %v16290_v18 }
 0x501   :  { %v15427_v42 = vld [vmem:[#allocation8 + $0x830] sm:$0xf0]  ;;  %v19046_v16 = vld [vmem:[#allocation8 + $0x174] sm:$0xf0] }
 0x502   :  { %v19321_v23 = vld [vmem:[#allocation8 + $0xa14] sm:$0xf]  ;;  %v15430_v19 = vor.u32 %v19257_v41, %v15427_v42  ;;  %7971 = vmatpush.bf16.msrb.mxu2 %v16070_v27  ;;  %v14825_v42 = vld [vmem:[#allocation8 + $0x358] sm:$0xf]  ;;  %v14570_v13 = vor.u32 %v19046_v16, %v14569_v7 }
 0x503   :  { %v15683_v59 = vld [vmem:[#allocation8 + $0xa30] sm:$0xf0]  ;;  %v14505_v26 = vld [vmem:[#allocation8 + $0xd8] sm:$0xf] }
 0x504   :  { %v19409_v2 = vld [vmem:[#allocation8 + $0xcd4] sm:$0xf]  ;;  %v15686_v52 = vor.u32 %v19321_v23, %v15683_v59  ;;  %7947 = vmatpush.bf16.msrb.mxu0 %v15430_v19  ;;  %v19110_v23 = vld [vmem:[#allocation8 + $0x374] sm:$0xf0]  ;;  %v7697_v59 = vpop.f32.mrf.mxu2  ;;  %v16225_v19 = vld [vmem:[#allocation8 + $0xe50] sm:$0xf]  ;;  %7875 = vmatpush.bf16.msrb.mxu3 %v16258_v29 }
 0x505   :  { %v16035_v9 = vld [vmem:[#allocation8 + $0xcf0] sm:$0xf0]  ;;  %v20864_v14 = vadd.f32 %v7697_v59, %v20852_v37  ;;  %v19453_v37 = vld [vmem:[#allocation8 + $0xe2c] sm:$0xf0]  ;;  %v14761_v16 = vld [vmem:[#allocation8 + $0x2d8] sm:$0xf] }
 0x506   :  { %v16038_v5 = vor.u32 %v19409_v2, %v16035_v9  ;;  %v19401_v11 = vld [vmem:[#allocation8 + $0xc94] sm:$0xf]  ;;  %7961 = vmatpush.bf16.msrb.mxu1 %v15686_v52  ;;  %v19461_v2 = vld [vmem:[#allocation8 + $0xe6c] sm:$0xf0]  ;;  %v20867_v9 = vadd.f32 %v7599_v33, %v20811_v21  ;;  %v14826_v52 = vor.u32 %v19110_v23, %v14825_v42  ;;  %v19190_v21 = vld [vmem:[#allocation8 + $0x5f4] sm:$0xf0]  ;;  %v16194_v42 = vor.u32 %v19453_v37, %v16193_v10 }
 0x507   :  { %v16003_v44 = vld [vmem:[#allocation8 + $0xcb0] sm:$0xf0]  ;;  %7948 = vmatmul.bf16.vlgmr.msrb.gmra.mxu0 %v20695_v38  ;;  %v19182_v33 = vld [vmem:[#allocation8 + $0x5b4] sm:$0xf0] }
 0x508   :  { %7996 = vmatpush.bf16.msra.mxu0 %v14634_v34  ;;  %7972 = vmatpush.bf16.msrb.mxu2 %v16038_v5  ;;  %v16006_v41 = vor.u32 %v19401_v11, %v16003_v44  ;;  %v19393_v45 = vld [vmem:[#allocation8 + $0xc54] sm:$0xf]  ;;  %v14537_v34 = vld [vmem:[#allocation8 + $0x118] sm:$0xf]  ;;  %v16226_v5 = vor.u32 %v19461_v2, %v16225_v19 }
 0x509   :  { %7962 = vmatmul.bf16.vlgmr.msrb.gmra.mxu1 %v20697_v36  ;;  %v15971_v27 = vld [vmem:[#allocation8 + $0xc70] sm:$0xf0]  ;;  %v14538_v18 = vor.u32 %v19038_v58, %v14537_v34  ;;  %v15145_v44 = vld [vmem:[#allocation8 + $0x5d8] sm:$0xf] }
 0x50a   :  { %8010 = vmatpush.bf16.msra.mxu1 %v14890_v63  ;;  %v15974_v4 = vor.u32 %v19393_v45, %v15971_v27  ;;  %v14793_v63 = vld [vmem:[#allocation8 + $0x318] sm:$0xf]  ;;  %v19385_v46 = vld [vmem:[#allocation8 + $0xc14] sm:$0xf]  ;;  %7876 = vmatpush.bf16.msrb.mxu3 %v16226_v5  ;;  %v15146_v23 = vor.u32 %v19190_v21, %v15145_v44 }
 0x50b   :  { %v15939_v53 = vld [vmem:[#allocation8 + $0xc30] sm:$0xf0]  ;;  %v15113_v27 = vld [vmem:[#allocation8 + $0x598] sm:$0xf] }
 0x50c   :  { %7997 = vmatpush.bf16.msra.mxu0 %v14602_v25  ;;  %7973 = vmatpush.bf16.msrb.mxu2 %v16006_v41  ;;  %v19249_v11 = vld [vmem:[#allocation8 + $0x7d4] sm:$0xf]  ;;  %v14794_v25 = vor.u32 %v19102_v31, %v14793_v63  ;;  %v15942_v7 = vor.u32 %v19385_v46, %v15939_v53  ;;  %v19094_v41 = vld [vmem:[#allocation8 + $0x2f4] sm:$0xf0] }
 0x50d   :  { %v15395_v22 = vld [vmem:[#allocation8 + $0x7f0] sm:$0xf0]  ;;  %v14473_v2 = vld [vmem:[#allocation8 + $0x98] sm:$0xf] }
 0x50e   :  { %8011 = vmatpush.bf16.msra.mxu1 %v14858_v60  ;;  %v19030_v60 = vld [vmem:[#allocation8 + $0xf4] sm:$0xf0]  ;;  %v15398_v59 = vor.u32 %v19249_v11, %v15395_v22  ;;  %v19241_v45 = vld [vmem:[#allocation8 + $0x794] sm:$0xf]  ;;  %7877 = vmatpush.bf16.msrb.mxu3 %v16194_v42 }
 0x50f   :  { %v14506_v29 = vor.u32 %v19030_v60, %v14505_v26  ;;  %v15363_v19 = vld [vmem:[#allocation8 + $0x7b0] sm:$0xf0]  ;;  %v14729_v34 = vld [vmem:[#allocation8 + $0x298] sm:$0xf] }
 0x510   :  { %7998 = vmatpush.bf16.msra.mxu0 %v14570_v13  ;;  %7974 = vmatpush.bf16.msrb.mxu2 %v15974_v4  ;;  %v14762_v13 = vor.u32 %v19094_v41, %v14761_v16  ;;  %v19086_v58 = vld [vmem:[#allocation8 + $0x2b4] sm:$0xf0]  ;;  %v15114_v4 = vor.u32 %v19182_v33, %v15113_v27  ;;  %v15366_v63 = vor.u32 %v19241_v45, %v15363_v19  ;;  %v19233_v10 = vld [vmem:[#allocation8 + $0x754] sm:$0xf] }
 0x511   :  { %v15081_v5 = vld [vmem:[#allocation8 + $0x558] sm:$0xf]  ;;  %v14730_v46 = vor.u32 %v19086_v58, %v14729_v34  ;;  %v15331_v53 = vld [vmem:[#allocation8 + $0x770] sm:$0xf0]  ;;  %7878 = vmatmul.bf16.vlgmr.msrb.gmra.mxu3 %v20729_v32 }
 0x512   :  { %8012 = vmatpush.bf16.msra.mxu1 %v14826_v52  ;;  %v19022_v52 = vld [vmem:[#allocation8 + $0xb4] sm:$0xf0]  ;;  %7926 = vmatpush.bf16.msra.mxu3 %v15398_v59  ;;  %v19225_v22 = vld [vmem:[#allocation8 + $0x714] sm:$0xf]  ;;  %v15334_v26 = vor.u32 %v19233_v10, %v15331_v53 }
 0x513   :  { %v14474_v31 = vor.u32 %v19022_v52, %v14473_v2  ;;  %v19174_v37 = vld [vmem:[#allocation8 + $0x574] sm:$0xf0]  ;;  %v19217_v10 = vld [vmem:[#allocation8 + $0x6d4] sm:$0xf] }
 0x514   :  { %7999 = vmatpush.bf16.msra.mxu0 %v14538_v18  ;;  %7975 = vmatpush.bf16.msrb.mxu2 %v15942_v7  ;;  %v14441_v18 = vld [vmem:[#allocation8 + $0x58] sm:$0xf]  ;;  %v15299_v7 = vld [vmem:[#allocation8 + $0x730] sm:$0xf0] }
 0x515   :  { %v19014_v11 = vld [vmem:[#allocation8 + $0x74] sm:$0xf0]  ;;  %v15302_v52 = vor.u32 %v19225_v22, %v15299_v7  ;;  %v15235_v7 = vld [vmem:[#allocation8 + $0x6b0] sm:$0xf0] }
 0x516   :  { %8013 = vmatpush.bf16.msra.mxu1 %v14794_v25  ;;  %v14697_v44 = vld [vmem:[#allocation8 + $0x258] sm:$0xf]  ;;  %v15082_v25 = vor.u32 %v19174_v37, %v15081_v5  ;;  %7927 = vmatpush.bf16.msra.mxu3 %v15366_v63  ;;  %v14442_v60 = vor.u32 %v19014_v11, %v14441_v18  ;;  %v15267_v5 = vld [vmem:[#allocation8 + $0x6f0] sm:$0xf0] }
 0x517   :  { %7976 = vmatmul.bf16.vlgmr.msrb.gmra.mxu2 %v20704_v56  ;;  %v19078_v21 = vld [vmem:[#allocation8 + $0x274] sm:$0xf0] }
 0x518   :  { %8024 = vmatpush.bf16.msra.mxu2 %v15146_v23  ;;  %8000 = vmatpush.bf16.msra.mxu0 %v14506_v29  ;;  %v15049_v16 = vld [vmem:[#allocation8 + $0x518] sm:$0xf]  ;;  %v14698_v42 = vor.u32 %v19078_v21, %v14697_v44  ;;  %v15270_v21 = vor.u32 %v19217_v10, %v15267_v5  ;;  %v19193_v10 = vld [vmem:[#allocation8 + $0x614] sm:$0xf]  ;;  %v20873_v5 = vpop.f32.mrf.mxu3 }
 0x519   :  { %v19166_v41 = vld [vmem:[#allocation8 + $0x534] sm:$0xf0] }
 0x51a   :  { %8014 = vmatpush.bf16.msra.mxu1 %v14762_v13  ;;  %v14409_v23 = vld [vmem:[#allocation8 + $0x18] sm:$0xf]  ;;  %v15050_v13 = vor.u32 %v19166_v41, %v15049_v16  ;;  %7928 = vmatpush.bf16.msra.mxu3 %v15334_v26 }
 0x51b   :  { %v19006_v59 = vld [vmem:[#allocation8 + $0x34] sm:$0xf0] }
 0x51c   :  { %8025 = vmatpush.bf16.msra.mxu2 %v15114_v4  ;;  %8001 = vmatpush.bf16.msra.mxu0 %v14474_v31  ;;  %v14665_v29 = vld [vmem:[#allocation8 + $0x218] sm:$0xf]  ;;  %v14410_v34 = vor.u32 %v19006_v59, %v14409_v23 }
 0x51d   :  { %v19070_v45 = vld [vmem:[#allocation8 + $0x234] sm:$0xf0] }
 0x51e   :  { %8015 = vmatpush.bf16.msra.mxu1 %v14730_v46  ;;  %v15657_v27 = vld [vmem:[#allocation8 + $0x9d8] sm:$0xf]  ;;  %v14666_v63 = vor.u32 %v19070_v45, %v14665_v29  ;;  %7929 = vmatpush.bf16.msra.mxu3 %v15302_v52 }
 0x51f   :  { %v19318_v33 = vld [vmem:[#allocation8 + $0x9f4] sm:$0xf0] }
 0x520   :  { %8026 = vmatpush.bf16.msra.mxu2 %v15082_v25  ;;  %v15913_v19 = vld [vmem:[#allocation8 + $0xbd8] sm:$0xf]  ;;  %8002 = vmatpush.bf16.msra.mxu0 %v14442_v60  ;;  %v15658_v31 = vor.u32 %v19318_v33, %v15657_v27  ;;  %v19209_v60 = vld [vmem:[#allocation8 + $0x694] sm:$0xf] }
 0x521   :  { %v19382_v2 = vld [vmem:[#allocation8 + $0xbf4] sm:$0xf0]  ;;  %v15238_v45 = vor.u32 %v19209_v60, %v15235_v7 }
 0x522   :  { %v15017_v58 = vld [vmem:[#allocation8 + $0x4d8] sm:$0xf]  ;;  %8016 = vmatpush.bf16.msra.mxu1 %v14698_v42  ;;  %v15914_v37 = vor.u32 %v19382_v2, %v15913_v19  ;;  %7930 = vmatpush.bf16.msra.mxu3 %v15270_v21  ;;  %v19201_v19 = vld [vmem:[#allocation8 + $0x654] sm:$0xf] }
 0x523   :  { %v19158_v4 = vld [vmem:[#allocation8 + $0x4f4] sm:$0xf0]  ;;  %v15203_v2 = vld [vmem:[#allocation8 + $0x670] sm:$0xf0] }
 0x524   :  { %v15625_v46 = vld [vmem:[#allocation8 + $0x998] sm:$0xf]  ;;  %8027 = vmatpush.bf16.msra.mxu2 %v15050_v13  ;;  %v15018_v18 = vor.u32 %v19158_v4, %v15017_v58  ;;  %8003 = vmatpush.bf16.msra.mxu0 %v14410_v34 }
 0x525   :  { %v19310_v53 = vld [vmem:[#allocation8 + $0x9b4] sm:$0xf0] }
 0x526   :  { %v15881_v11 = vld [vmem:[#allocation8 + $0xb98] sm:$0xf]  ;;  %8017 = vmatpush.bf16.msra.mxu1 %v14666_v63  ;;  %v15626_v26 = vor.u32 %v19310_v53, %v15625_v46  ;;  %7931 = vmatpush.bf16.msra.mxu3 %v15238_v45  ;;  %v15171_v46 = vld [vmem:[#allocation8 + $0x630] sm:$0xf0] }
 0x527   :  { %v19374_v44 = vld [vmem:[#allocation8 + $0xbb4] sm:$0xf0]  ;;  %8004 = vmatmul.bf16.vlgmr.msra.gmra.mxu0 %v20670_v49 }
 0x528   :  { %v14985_v25 = vld [vmem:[#allocation8 + $0x498] sm:$0xf]  ;;  %8052 = vmatpush.bf16.msrb.mxu0 %v15658_v31  ;;  %v15882_v16 = vor.u32 %v19374_v44, %v15881_v11  ;;  %8028 = vmatpush.bf16.msra.mxu2 %v15018_v18  ;;  %v19505_v44 = vld [vmem:[#allocation8 + $0xfd4] sm:$0xf] }
 0x529   :  { %v19150_v22 = vld [vmem:[#allocation8 + $0x4b4] sm:$0xf0]  ;;  %8018 = vmatmul.bf16.vlgmr.msra.gmra.mxu1 %v20673_v62 }
 0x52a   :  { %8066 = vmatpush.bf16.msrb.mxu1 %v15914_v37  ;;  %v15593_v41 = vld [vmem:[#allocation8 + $0x958] sm:$0xf]  ;;  %v14986_v23 = vor.u32 %v19150_v22, %v14985_v25  ;;  %v15206_v37 = vor.u32 %v19201_v19, %v15203_v2  ;;  %v16387_v2 = vld [vmem:[#allocation8 + $0xfb0] sm:$0xf0] }
 0x52b   :  { %v19302_v42 = vld [vmem:[#allocation8 + $0x974] sm:$0xf0] }
 0x52c   :  { %v15849_v59 = vld [vmem:[#allocation8 + $0xb58] sm:$0xf]  ;;  %8053 = vmatpush.bf16.msrb.mxu0 %v15626_v26  ;;  %v15594_v13 = vor.u32 %v19302_v42, %v15593_v41  ;;  %8029 = vmatpush.bf16.msra.mxu2 %v14986_v23  ;;  %v16419_v26 = vld [vmem:[#allocation8 + $0xff0] sm:$0xf0]  ;;  %v15174_v23 = vor.u32 %v19193_v10, %v15171_v46 }
 0x52d   :  { %v19366_v29 = vld [vmem:[#allocation8 + $0xb74] sm:$0xf0]  ;;  %7932 = vmatpush.bf16.msra.mxu3 %v15206_v37  ;;  %v19489_v46 = vld [vmem:[#allocation8 + $0xf54] sm:$0xf] }
 0x52e   :  { %v14953_v27 = vld [vmem:[#allocation8 + $0x458] sm:$0xf]  ;;  %8067 = vmatpush.bf16.msrb.mxu1 %v15882_v16  ;;  %v15850_v52 = vor.u32 %v19366_v29, %v15849_v59  ;;  %v16422_v29 = vor.u32 %v19505_v44, %v16419_v26  ;;  %v16355_v44 = vld [vmem:[#allocation8 + $0xf70] sm:$0xf0] }
 0x52f   :  { %v19142_v33 = vld [vmem:[#allocation8 + $0x474] sm:$0xf0] }
 0x530   :  { %v15561_v34 = vld [vmem:[#allocation8 + $0x918] sm:$0xf]  ;;  %v14954_v4 = vor.u32 %v19142_v33, %v14953_v27  ;;  %8054 = vmatpush.bf16.msrb.mxu0 %v15594_v13  ;;  %v19497_v27 = vld [vmem:[#allocation8 + $0xf94] sm:$0xf] }
 0x531   :  { %v19294_v58 = vld [vmem:[#allocation8 + $0x934] sm:$0xf0]  ;;  %7933 = vmatpush.bf16.msra.mxu3 %v15174_v23  ;;  %v16390_v10 = vor.u32 %v19497_v27, %v16387_v2  ;;  %v14635_v2 = vld [vmem:[#allocation8 + $0x1f8] sm:$0xf0] }
 0x532   :  { %v15817_v63 = vld [vmem:[#allocation8 + $0xb18] sm:$0xf]  ;;  %v15562_v11 = vor.u32 %v19294_v58, %v15561_v34  ;;  %8068 = vmatpush.bf16.msrb.mxu1 %v15850_v52  ;;  %8030 = vmatpush.bf16.msra.mxu2 %v14954_v4 }
 0x533   :  { %v19358_v31 = vld [vmem:[#allocation8 + $0xb34] sm:$0xf0] }
 0x534   :  { %v14921_v53 = vld [vmem:[#allocation8 + $0x418] sm:$0xf]  ;;  %v15818_v22 = vor.u32 %v19358_v31, %v15817_v63  ;;  %8055 = vmatpush.bf16.msrb.mxu0 %v15562_v11  ;;  %v20875_v63 = vpop.f32.mrf.mxu3  ;;  %7934 = vmatmul.bf16.vlgmr.msra.gmra.mxu3 %v20679_v54 }
 0x535   :  { %v19134_v18 = vld [vmem:[#allocation8 + $0x434] sm:$0xf0]  ;;  %7982 = vmatpush.bf16.msrb.mxu3 %v16422_v29 }
 0x536   :  { %v16169_v21 = vld [vmem:[#allocation8 + $0xdd8] sm:$0xf]  ;;  %v14922_v16 = vor.u32 %v19134_v18, %v14921_v53  ;;  %8069 = vmatpush.bf16.msrb.mxu1 %v15818_v22 }
 0x537   :  { %v19446_v25 = vld [vmem:[#allocation8 + $0xdf4] sm:$0xf0] }
 0x538   :  { %v15529_v60 = vld [vmem:[#allocation8 + $0x8d8] sm:$0xf]  ;;  %v16170_v59 = vor.u32 %v19446_v25, %v16169_v21  ;;  %8031 = vmatpush.bf16.msra.mxu2 %v14922_v16  ;;  %v16358_v16 = vor.u32 %v19489_v46, %v16355_v44  ;;  %v16291_v44 = vld [vmem:[#allocation8 + $0xef0] sm:$0xf0] }
 0x539   :  { %v19286_v7 = vld [vmem:[#allocation8 + $0x8f4] sm:$0xf0]  ;;  %7983 = vmatpush.bf16.msrb.mxu3 %v16390_v10 }
 0x53a   :  { %v15785_v41 = vld [vmem:[#allocation8 + $0xad8] sm:$0xf]  ;;  %v15530_v45 = vor.u32 %v19286_v7, %v15529_v60  ;;  %v19481_v7 = vld [vmem:[#allocation8 + $0xf14] sm:$0xf] }
 0x53b   :  { %v19350_v42 = vld [vmem:[#allocation8 + $0xaf4] sm:$0xf0]  ;;  %8032 = vmatmul.bf16.vlgmr.msra.gmra.mxu2 %v20675_v6 }
 0x53c   :  { %v16137_v33 = vld [vmem:[#allocation8 + $0xd98] sm:$0xf]  ;;  %v15786_v19 = vor.u32 %v19350_v42, %v15785_v41  ;;  %8080 = vmatpush.bf16.msrb.mxu2 %v16170_v59  ;;  %8056 = vmatpush.bf16.msrb.mxu0 %v15530_v45  ;;  %v16323_v42 = vld [vmem:[#allocation8 + $0xf30] sm:$0xf0]  ;;  %v20879_v46 = vpop.f32.mrf.mxu3 }
 0x53d   :  { %v19438_v13 = vld [vmem:[#allocation8 + $0xdb4] sm:$0xf0]  ;;  %7984 = vmatpush.bf16.msrb.mxu3 %v16358_v16  ;;  %v19114_v16 = vld [vmem:[#allocation8 + $0x39c] sm:$0xf] }
 0x53e   :  { %v15497_v52 = vld [vmem:[#allocation8 + $0x898] sm:$0xf]  ;;  %v16138_v31 = vor.u32 %v19438_v13, %v16137_v33  ;;  %8070 = vmatpush.bf16.msrb.mxu1 %v15786_v19  ;;  %v19058_v19 = vld [vmem:[#allocation8 + $0x1dc] sm:$0xf] }
 0x53f   :  { %v19278_v34 = vld [vmem:[#allocation8 + $0x8b4] sm:$0xf0] }
 0x540   :  { %v15753_v58 = vld [vmem:[#allocation8 + $0xa98] sm:$0xf]  ;;  %v15498_v37 = vor.u32 %v19278_v34, %v15497_v52  ;;  %8081 = vmatpush.bf16.msrb.mxu2 %v16138_v31  ;;  %v19122_v34 = vld [vmem:[#allocation8 + $0x3dc] sm:$0xf] }
 0x541   :  { %v19342_v4 = vld [vmem:[#allocation8 + $0xab4] sm:$0xf0] }
 0x542   :  { %v16105_v53 = vld [vmem:[#allocation8 + $0xd58] sm:$0xf]  ;;  %v15754_v11 = vor.u32 %v19342_v4, %v15753_v58  ;;  %8057 = vmatpush.bf16.msrb.mxu0 %v15498_v37  ;;  %v14891_v58 = vld [vmem:[#allocation8 + $0x3f8] sm:$0xf0]  ;;  %v16326_v4 = vor.u32 %v19481_v7, %v16323_v42 }
 0x543   :  { %v19430_v18 = vld [vmem:[#allocation8 + $0xd74] sm:$0xf0] }
 0x544   :  { %v15465_v21 = vld [vmem:[#allocation8 + $0x858] sm:$0xf]  ;;  %v16106_v60 = vor.u32 %v19430_v18, %v16105_v53  ;;  %8071 = vmatpush.bf16.msrb.mxu1 %v15754_v11  ;;  %v14638_v18 = vor.u32 %v19058_v19, %v14635_v2  ;;  %v19473_v11 = vld [vmem:[#allocation8 + $0xed4] sm:$0xf]  ;;  %7985 = vmatpush.bf16.msrb.mxu3 %v16326_v4  ;;  %v14571_v19 = vld [vmem:[#allocation8 + $0x178] sm:$0xf0]  ;;  %v20885_v2 = vpop.f32.mrf.mxu2 }
 0x545   :  { %v19270_v25 = vld [vmem:[#allocation8 + $0x874] sm:$0xf0]  ;;  %v16294_v7 = vor.u32 %v19473_v11, %v16291_v44  ;;  %21306 = vst [vmem:[#allocation27_spill] sm:$0xff] %v20885_v2  ;;  %v16227_v11 = vld [vmem:[#allocation8 + $0xe70] sm:$0xf0] }
 0x546   :  { %v15721_v22 = vld [vmem:[#allocation8 + $0xa58] sm:$0xf]  ;;  %v15466_v41 = vor.u32 %v19270_v25, %v15465_v21  ;;  %8082 = vmatpush.bf16.msrb.mxu2 %v16106_v60  ;;  %v14894_v21 = vor.u32 %v19122_v34, %v14891_v58  ;;  %v19050_v25 = vld [vmem:[#allocation8 + $0x19c] sm:$0xf] }
 0x547   :  { %v19334_v26 = vld [vmem:[#allocation8 + $0xa74] sm:$0xf0]  ;;  %v19106_v34 = vld [vmem:[#allocation8 + $0x35c] sm:$0xf] }
 0x548   :  { %v16073_v23 = vld [vmem:[#allocation8 + $0xd18] sm:$0xf]  ;;  %v15722_v29 = vor.u32 %v19334_v26, %v15721_v22  ;;  %8058 = vmatpush.bf16.msrb.mxu0 %v15466_v41  ;;  %v14603_v22 = vld [vmem:[#allocation8 + $0x1b8] sm:$0xf0]  ;;  %v20881_v26 = vpop.f32.mrf.mxu0  ;;  %7986 = vmatpush.bf16.msrb.mxu3 %v16294_v7 }
 0x549   :  { %v19422_v59 = vld [vmem:[#allocation8 + $0xd34] sm:$0xf0]  ;;  %21304 = vst [vmem:[#allocation24_spill] sm:$0xff] %v20881_v26  ;;  %v14859_v41 = vld [vmem:[#allocation8 + $0x3b8] sm:$0xf0] }
 0x54a   :  { %v15433_v45 = vld [vmem:[#allocation8 + $0x818] sm:$0xf]  ;;  %v16074_v52 = vor.u32 %v19422_v59, %v16073_v23  ;;  %8072 = vmatpush.bf16.msrb.mxu1 %v15722_v29  ;;  %v20883_v59 = vpop.f32.mrf.mxu1  ;;  %v14606_v29 = vor.u32 %v19050_v25, %v14603_v22  ;;  %v14827_v58 = vld [vmem:[#allocation8 + $0x378] sm:$0xf0] }
 0x54b   :  { %v19262_v27 = vld [vmem:[#allocation8 + $0x834] sm:$0xf0]  ;;  %21305 = vst [vmem:[#allocation36_spill] sm:$0xff] %v20883_v59  ;;  %v19034_v25 = vld [vmem:[#allocation8 + $0x11c] sm:$0xf] }
 0x54c   :  { %v15689_v33 = vld [vmem:[#allocation8 + $0xa18] sm:$0xf]  ;;  %v15434_v31 = vor.u32 %v19262_v27, %v15433_v45  ;;  %8083 = vmatpush.bf16.msrb.mxu2 %v16074_v52  ;;  %v19465_v45 = vld [vmem:[#allocation8 + $0xe94] sm:$0xf]  ;;  %v14539_v22 = vld [vmem:[#allocation8 + $0x138] sm:$0xf0]  ;;  %v7753_v59 = vpop.f32.mrf.mxu2 }
 0x54d   :  { %v19326_v13 = vld [vmem:[#allocation8 + $0xa34] sm:$0xf0]  ;;  %v16259_v27 = vld [vmem:[#allocation8 + $0xeb0] sm:$0xf0]  ;;  %v14795_v7 = vld [vmem:[#allocation8 + $0x338] sm:$0xf0]  ;;  %v14542_v2 = vor.u32 %v19034_v25, %v14539_v22 }
 0x54e   :  { %v16041_v10 = vld [vmem:[#allocation8 + $0xcd8] sm:$0xf]  ;;  %v15690_v53 = vor.u32 %v19326_v13, %v15689_v33  ;;  %8059 = vmatpush.bf16.msrb.mxu0 %v15434_v31  ;;  %v14862_v33 = vor.u32 %v19114_v16, %v14859_v41  ;;  %v19042_v13 = vld [vmem:[#allocation8 + $0x15c] sm:$0xf]  ;;  %v16262_v4 = vor.u32 %v19465_v45, %v16259_v27  ;;  %v16195_v27 = vld [vmem:[#allocation8 + $0xe30] sm:$0xf0] }
 0x54f   :  { %v19414_v37 = vld [vmem:[#allocation8 + $0xcf4] sm:$0xf0]  ;;  %v19098_v41 = vld [vmem:[#allocation8 + $0x31c] sm:$0xf] }
 0x550   :  { %v16042_v60 = vor.u32 %v19414_v37, %v16041_v10  ;;  %v16009_v42 = vld [vmem:[#allocation8 + $0xc98] sm:$0xf]  ;;  %8073 = vmatpush.bf16.msrb.mxu1 %v15690_v53  ;;  %v7711_v37 = vpop.f32.mrf.mxu3  ;;  %v14574_v53 = vor.u32 %v19042_v13, %v14571_v19  ;;  %7987 = vmatpush.bf16.msrb.mxu3 %v16262_v4  ;;  %v19090_v4 = vld [vmem:[#allocation8 + $0x2dc] sm:$0xf] }
 0x551   :  { %v19406_v23 = vld [vmem:[#allocation8 + $0xcb4] sm:$0xf0]  ;;  %8060 = vmatmul.bf16.vlgmr.msrb.gmra.mxu0 %v20695_v38  ;;  %v7712_v44 = vadd.f32 %v7711_v37, %v20864_v14 }
 0x552   :  { %8108 = vmatpush.bf16.msra.mxu0 %v14638_v18  ;;  %8084 = vmatpush.bf16.msrb.mxu2 %v16042_v60  ;;  %v16010_v52 = vor.u32 %v19406_v23, %v16009_v42  ;;  %v15977_v31 = vld [vmem:[#allocation8 + $0xc58] sm:$0xf]  ;;  %v19457_v18 = vld [vmem:[#allocation8 + $0xe54] sm:$0xf]  ;;  %v7725_v60 = vpop.f32.mrf.mxu0  ;;  %v7739_v19 = vpop.f32.mrf.mxu1 }
 0x553   :  { %8074 = vmatmul.bf16.vlgmr.msrb.gmra.mxu1 %v20697_v36  ;;  %v19398_v10 = vld [vmem:[#allocation8 + $0xc74] sm:$0xf0]  ;;  %v19449_v42 = vld [vmem:[#allocation8 + $0xe14] sm:$0xf]  ;;  %v7726_v23 = vadd.f32 %v7725_v60, %v7712_v44  ;;  %v16230_v45 = vor.u32 %v19457_v18, %v16227_v11  ;;  %v14763_v18 = vld [vmem:[#allocation8 + $0x2f8] sm:$0xf0] }
 0x554   :  { %8122 = vmatpush.bf16.msra.mxu1 %v14894_v21  ;;  %v14830_v21 = vor.u32 %v19106_v34, %v14827_v58  ;;  %v15978_v16 = vor.u32 %v19398_v10, %v15977_v31  ;;  %v19390_v13 = vld [vmem:[#allocation8 + $0xc34] sm:$0xf0]  ;;  %v15147_v34 = vld [vmem:[#allocation8 + $0x5f8] sm:$0xf0]  ;;  %v14798_v58 = vor.u32 %v19098_v41, %v14795_v7  ;;  %v16198_v11 = vor.u32 %v19449_v42, %v16195_v27 }
 0x555   :  { %v15401_v14 = vld [vmem:[#allocation8 + $0x7d8] sm:$0xf]  ;;  %v14507_v31 = vld [vmem:[#allocation8 + $0xf8] sm:$0xf0]  ;;  %v7740_v10 = vadd.f32 %v7739_v19, %v7726_v23  ;;  %7988 = vmatpush.bf16.msrb.mxu3 %v16230_v45  ;;  %v14766_v7 = vor.u32 %v19090_v4, %v14763_v18 }
 0x556   :  { %8109 = vmatpush.bf16.msra.mxu0 %v14606_v29  ;;  %8085 = vmatpush.bf16.msrb.mxu2 %v16010_v52  ;;  %v15945_v29 = vld [vmem:[#allocation8 + $0xc18] sm:$0xf]  ;;  %v19026_v52 = vld [vmem:[#allocation8 + $0xdc] sm:$0xf] }
 0x557   :  { %v19254_v37 = vld [vmem:[#allocation8 + $0x7f4] sm:$0xf0]  ;;  %v15946_v44 = vor.u32 %v19390_v13, %v15945_v29  ;;  %v20890_v26 = vadd.f32 %v7753_v59, %v7740_v10  ;;  %v14510_v25 = vor.u32 %v19026_v52, %v14507_v31  ;;  %v15115_v41 = vld [vmem:[#allocation8 + $0x5b8] sm:$0xf0] }
 0x558   :  { %8123 = vmatpush.bf16.msra.mxu1 %v14862_v33  ;;  %v19186_v33 = vld [vmem:[#allocation8 + $0x5dc] sm:$0xf]  ;;  %v15369_v22 = vld [vmem:[#allocation8 + $0x798] sm:$0xf] }
 0x559   :  { %v15150_v60 = vor.u32 %v19186_v33, %v15147_v34  ;;  %v19018_v23 = vld [vmem:[#allocation8 + $0x9c] sm:$0xf]  ;;  %7989 = vmatpush.bf16.msrb.mxu3 %v16198_v11  ;;  %v15370_v59 = vor.u32 %v19246_v28, %v15369_v22  ;;  %v15337_v45 = vld [vmem:[#allocation8 + $0x758] sm:$0xf] }
 0x55a   :  { %8110 = vmatpush.bf16.msra.mxu0 %v14574_v53  ;;  %8086 = vmatpush.bf16.msrb.mxu2 %v15978_v16  ;;  %v15402_v53 = vor.u32 %v19254_v37, %v15401_v14  ;;  %v14475_v19 = vld [vmem:[#allocation8 + $0xb8] sm:$0xf0]  ;;  %v19238_v33 = vld [vmem:[#allocation8 + $0x774] sm:$0xf0] }
 0x55b   :  { %v19082_v16 = vld [vmem:[#allocation8 + $0x29c] sm:$0xf]  ;;  %v15305_v10 = vld [vmem:[#allocation8 + $0x718] sm:$0xf]  ;;  %v15338_v28 = vor.u32 %v19238_v33, %v15337_v45  ;;  %v20894_v45 = vpop.f32.mrf.mxu3 }
 0x55c   :  { %8124 = vmatpush.bf16.msra.mxu1 %v14830_v21  ;;  %v19178_v21 = vld [vmem:[#allocation8 + $0x59c] sm:$0xf]  ;;  %7990 = vmatmul.bf16.vlgmr.msrb.gmra.mxu3 %v20729_v32  ;;  %v19230_v4 = vld [vmem:[#allocation8 + $0x734] sm:$0xf0] }
 0x55d   :  { %v14731_v29 = vld [vmem:[#allocation8 + $0x2b8] sm:$0xf0]  ;;  %v15118_v42 = vor.u32 %v19178_v21, %v15115_v41  ;;  %8038 = vmatpush.bf16.msra.mxu3 %v15402_v53  ;;  %v19222_v33 = vld [vmem:[#allocation8 + $0x6f4] sm:$0xf0] }
 0x55e   :  { %8111 = vmatpush.bf16.msra.mxu0 %v14542_v2  ;;  %8087 = vmatpush.bf16.msrb.mxu2 %v15946_v44  ;;  %v14478_v2 = vor.u32 %v19018_v23, %v14475_v19  ;;  %v19170_v27 = vld [vmem:[#allocation8 + $0x55c] sm:$0xf]  ;;  %v14734_v14 = vor.u32 %v19082_v16, %v14731_v29  ;;  %v15306_v29 = vor.u32 %v19230_v4, %v15305_v10 }
 0x55f   :  { %v15083_v13 = vld [vmem:[#allocation8 + $0x578] sm:$0xf0] }
 0x560   :  { %8125 = vmatpush.bf16.msra.mxu1 %v14798_v58  ;;  %v19010_v34 = vld [vmem:[#allocation8 + $0x5c] sm:$0xf]  ;;  %v15086_v31 = vor.u32 %v19170_v27, %v15083_v13 }
 0x561   :  { %8088 = vmatmul.bf16.vlgmr.msrb.gmra.mxu2 %v20704_v56  ;;  %v14443_v58 = vld [vmem:[#allocation8 + $0x78] sm:$0xf0]  ;;  %8039 = vmatpush.bf16.msra.mxu3 %v15370_v59 }
 0x562   :  { %8136 = vmatpush.bf16.msra.mxu2 %v15150_v60  ;;  %8112 = vmatpush.bf16.msra.mxu0 %v14510_v25  ;;  %v19074_v37 = vld [vmem:[#allocation8 + $0x25c] sm:$0xf]  ;;  %v14446_v44 = vor.u32 %v19010_v34, %v14443_v58 }
 0x563   :  { %v14699_v52 = vld [vmem:[#allocation8 + $0x278] sm:$0xf0] }
 0x564   :  { %8126 = vmatpush.bf16.msra.mxu1 %v14766_v7  ;;  %v19162_v18 = vld [vmem:[#allocation8 + $0x51c] sm:$0xf]  ;;  %v14702_v60 = vor.u32 %v19074_v37, %v14699_v52 }
 0x565   :  { %v15051_v11 = vld [vmem:[#allocation8 + $0x538] sm:$0xf0]  ;;  %8040 = vmatpush.bf16.msra.mxu3 %v15338_v28 }
 0x566   :  { %8137 = vmatpush.bf16.msra.mxu2 %v15118_v42  ;;  %8113 = vmatpush.bf16.msra.mxu0 %v14478_v2  ;;  %v19002_v53 = vld [vmem:[#allocation8 + $0x1c] sm:$0xf]  ;;  %v15054_v23 = vor.u32 %v19162_v18, %v15051_v11  ;;  %v15241_v11 = vld [vmem:[#allocation8 + $0x698] sm:$0xf] }
 0x567   :  { %v14411_v25 = vld [vmem:[#allocation8 + $0x38] sm:$0xf0] }
 0x568   :  { %8127 = vmatpush.bf16.msra.mxu1 %v14734_v14  ;;  %v19066_v22 = vld [vmem:[#allocation8 + $0x21c] sm:$0xf]  ;;  %v14414_v42 = vor.u32 %v19002_v53, %v14411_v25  ;;  %v15273_v14 = vld [vmem:[#allocation8 + $0x6d8] sm:$0xf] }
 0x569   :  { %v14667_v21 = vld [vmem:[#allocation8 + $0x238] sm:$0xf0]  ;;  %8041 = vmatpush.bf16.msra.mxu3 %v15306_v29  ;;  %v15274_v10 = vor.u32 %v19222_v33, %v15273_v14  ;;  %v7767_v29 = vpop.f32.mrf.mxu3 }
 0x56a   :  { %v19314_v41 = vld [vmem:[#allocation8 + $0x9dc] sm:$0xf]  ;;  %8138 = vmatpush.bf16.msra.mxu2 %v15086_v31  ;;  %8114 = vmatpush.bf16.msra.mxu0 %v14446_v44  ;;  %v14670_v27 = vor.u32 %v19066_v22, %v14667_v21 }
 0x56b   :  { %v15659_v7 = vld [vmem:[#allocation8 + $0x9f8] sm:$0xf0] }
 0x56c   :  { %v19378_v19 = vld [vmem:[#allocation8 + $0xbdc] sm:$0xf]  ;;  %8128 = vmatpush.bf16.msra.mxu1 %v14702_v60  ;;  %v15662_v13 = vor.u32 %v19314_v41, %v15659_v7  ;;  %v19214_v60 = vld [vmem:[#allocation8 + $0x6b4] sm:$0xf0] }
 0x56d   :  { %v15915_v16 = vld [vmem:[#allocation8 + $0xbf8] sm:$0xf0]  ;;  %8042 = vmatpush.bf16.msra.mxu3 %v15274_v10 }
 0x56e   :  { %v19154_v59 = vld [vmem:[#allocation8 + $0x4dc] sm:$0xf]  ;;  %v15918_v34 = vor.u32 %v19378_v19, %v15915_v16  ;;  %8139 = vmatpush.bf16.msra.mxu2 %v15054_v23  ;;  %8115 = vmatpush.bf16.msra.mxu0 %v14414_v42  ;;  %v15242_v23 = vor.u32 %v19214_v60, %v15241_v11  ;;  %v19510_v11 = vld [vmem:[#allocation8 + $0xff4] sm:$0xf0] }
 0x56f   :  { %v15019_v2 = vld [vmem:[#allocation8 + $0x4f8] sm:$0xf0] }
 0x570   :  { %v19306_v58 = vld [vmem:[#allocation8 + $0x99c] sm:$0xf]  ;;  %v15022_v52 = vor.u32 %v19154_v59, %v15019_v2  ;;  %8129 = vmatpush.bf16.msra.mxu1 %v14670_v27  ;;  %v15209_v59 = vld [vmem:[#allocation8 + $0x658] sm:$0xf]  ;;  %v20899_v27 = vadd.f32 %v7767_v29, %v20890_v26 }
 0x571   :  { %v15627_v37 = vld [vmem:[#allocation8 + $0x9b8] sm:$0xf0]  ;;  %8116 = vmatmul.bf16.vlgmr.msra.gmra.mxu0 %v20670_v49  ;;  %v19206_v2 = vld [vmem:[#allocation8 + $0x674] sm:$0xf0]  ;;  %8043 = vmatpush.bf16.msra.mxu3 %v15242_v23 }
 0x572   :  { %v19370_v31 = vld [vmem:[#allocation8 + $0xb9c] sm:$0xf]  ;;  %8164 = vmatpush.bf16.msrb.mxu0 %v15662_v13  ;;  %v15630_v4 = vor.u32 %v19306_v58, %v15627_v37  ;;  %8140 = vmatpush.bf16.msra.mxu2 %v15022_v52  ;;  %v15210_v37 = vor.u32 %v19206_v2, %v15209_v59  ;;  %v19198_v52 = vld [vmem:[#allocation8 + $0x634] sm:$0xf0] }
 0x573   :  { %v15883_v18 = vld [vmem:[#allocation8 + $0xbb8] sm:$0xf0]  ;;  %8130 = vmatmul.bf16.vlgmr.msra.gmra.mxu1 %v20673_v62  ;;  %v15177_v62 = vld [vmem:[#allocation8 + $0x618] sm:$0xf] }
 0x574   :  { %v19146_v28 = vld [vmem:[#allocation8 + $0x49c] sm:$0xf]  ;;  %8178 = vmatpush.bf16.msrb.mxu1 %v15918_v34  ;;  %v15886_v53 = vor.u32 %v19370_v31, %v15883_v18  ;;  %v19502_v2 = vld [vmem:[#allocation8 + $0xfb4] sm:$0xf0] }
 0x575   :  { %v14987_v44 = vld [vmem:[#allocation8 + $0x4b8] sm:$0xf0]  ;;  %8044 = vmatpush.bf16.msra.mxu3 %v15210_v37  ;;  %v16361_v37 = vld [vmem:[#allocation8 + $0xf58] sm:$0xf] }
 0x576   :  { %v19298_v25 = vld [vmem:[#allocation8 + $0x95c] sm:$0xf]  ;;  %v14990_v21 = vor.u32 %v19146_v28, %v14987_v44  ;;  %8165 = vmatpush.bf16.msrb.mxu0 %v15630_v4  ;;  %v16425_v28 = vld [vmem:[#allocation8 + $0xfd8] sm:$0xf] }
 0x577   :  { %v15595_v22 = vld [vmem:[#allocation8 + $0x978] sm:$0xf0]  ;;  %v16426_v23 = vor.u32 %v19510_v11, %v16425_v28 }
 0x578   :  { %v19362_v41 = vld [vmem:[#allocation8 + $0xb5c] sm:$0xf]  ;;  %v15598_v42 = vor.u32 %v19298_v25, %v15595_v22  ;;  %8179 = vmatpush.bf16.msrb.mxu1 %v15886_v53  ;;  %8141 = vmatpush.bf16.msra.mxu2 %v14990_v21 }
 0x579   :  { %v15851_v7 = vld [vmem:[#allocation8 + $0xb78] sm:$0xf0] }
 0x57a   :  { %v19138_v19 = vld [vmem:[#allocation8 + $0x45c] sm:$0xf]  ;;  %v15854_v13 = vor.u32 %v19362_v41, %v15851_v7  ;;  %8166 = vmatpush.bf16.msrb.mxu0 %v15598_v42  ;;  %v15178_v41 = vor.u32 %v19198_v52, %v15177_v62 }
 0x57b   :  { %v14955_v16 = vld [vmem:[#allocation8 + $0x478] sm:$0xf0] }
 0x57c   :  { %v19290_v49 = vld [vmem:[#allocation8 + $0x91c] sm:$0xf]  ;;  %v14958_v33 = vor.u32 %v19138_v19, %v14955_v16  ;;  %8180 = vmatpush.bf16.msrb.mxu1 %v15854_v13  ;;  %v16393_v16 = vld [vmem:[#allocation8 + $0xf98] sm:$0xf]  ;;  %8045 = vmatpush.bf16.msra.mxu3 %v15178_v41 }
 0x57d   :  { %v15563_v14 = vld [vmem:[#allocation8 + $0x938] sm:$0xf0] }
 0x57e   :  { %v19354_v34 = vld [vmem:[#allocation8 + $0xb1c] sm:$0xf]  ;;  %v15566_v10 = vor.u32 %v19290_v49, %v15563_v14  ;;  %8142 = vmatpush.bf16.msra.mxu2 %v14958_v33 }
 0x57f   :  { %v15819_v58 = vld [vmem:[#allocation8 + $0xb38] sm:$0xf0]  ;;  %8046 = vmatmul.bf16.vlgmr.msra.gmra.mxu3 %v20679_v54 }
 0x580   :  { %v19130_v31 = vld [vmem:[#allocation8 + $0x41c] sm:$0xf]  ;;  %v15822_v4 = vor.u32 %v19354_v34, %v15819_v58  ;;  %8167 = vmatpush.bf16.msrb.mxu0 %v15566_v10  ;;  %8094 = vmatpush.bf16.msrb.mxu3 %v16426_v23  ;;  %v16394_v58 = vor.u32 %v19502_v2, %v16393_v16  ;;  %v19494_v10 = vld [vmem:[#allocation8 + $0xf74] sm:$0xf0]  ;;  %v16913_v2 = vld [vmem:[#allocation11 + $0x3c0] sm:$0xf] }
 0x581   :  { %v14923_v18 = vld [vmem:[#allocation8 + $0x438] sm:$0xf0] }
 0x582   :  { %v19442_v44 = vld [vmem:[#allocation8 + $0xddc] sm:$0xf]  ;;  %v14926_v25 = vor.u32 %v19130_v31, %v14923_v18  ;;  %8181 = vmatpush.bf16.msrb.mxu1 %v15822_v4 }
 0x583   :  { %v16171_v26 = vld [vmem:[#allocation8 + $0xdf8] sm:$0xf0] }
 0x584   :  { %v19282_v60 = vld [vmem:[#allocation8 + $0x8dc] sm:$0xf]  ;;  %v16174_v7 = vor.u32 %v19442_v44, %v16171_v26  ;;  %8143 = vmatpush.bf16.msra.mxu2 %v14926_v25  ;;  %8095 = vmatpush.bf16.msrb.mxu3 %v16394_v58 }
 0x585   :  { %v15531_v53 = vld [vmem:[#allocation8 + $0x8f8] sm:$0xf0] }
 0x586   :  { %v19346_v22 = vld [vmem:[#allocation8 + $0xadc] sm:$0xf]  ;;  %v15534_v19 = vor.u32 %v19282_v60, %v15531_v53  ;;  %v16329_v60 = vld [vmem:[#allocation8 + $0xf18] sm:$0xf]  ;;  %v16362_v53 = vor.u32 %v19494_v10, %v16361_v37  ;;  %v19563_v10 = vld [vmem:[#allocation11 + $0x19c] sm:$0xf0] }
 0x587   :  { %v15787_v21 = vld [vmem:[#allocation8 + $0xaf8] sm:$0xf0]  ;;  %8144 = vmatmul.bf16.vlgmr.msra.gmra.mxu2 %v20675_v6  ;;  %v16297_v37 = vld [vmem:[#allocation8 + $0xed8] sm:$0xf] }
 0x588   :  { %v19434_v29 = vld [vmem:[#allocation8 + $0xd9c] sm:$0xf]  ;;  %v15790_v59 = vor.u32 %v19346_v22, %v15787_v21  ;;  %8192 = vmatpush.bf16.msrb.mxu2 %v16174_v7  ;;  %8168 = vmatpush.bf16.msrb.mxu0 %v15534_v19  ;;  %v19486_v22 = vld [vmem:[#allocation8 + $0xf34] sm:$0xf0] }
 0x589   :  { %v16139_v42 = vld [vmem:[#allocation8 + $0xdb8] sm:$0xf0]  ;;  %8096 = vmatpush.bf16.msrb.mxu3 %v16362_v53 }
 0x58a   :  { %v19274_v13 = vld [vmem:[#allocation8 + $0x89c] sm:$0xf]  ;;  %v16142_v34 = vor.u32 %v19434_v29, %v16139_v42  ;;  %8182 = vmatpush.bf16.msrb.mxu1 %v15790_v59  ;;  %v16657_v29 = vld [vmem:[#allocation11 + $0x1c0] sm:$0xf] }
 0x58b   :  { %v15499_v49 = vld [vmem:[#allocation8 + $0x8b8] sm:$0xf0]  ;;  %v19571_v42 = vld [vmem:[#allocation11 + $0x1dc] sm:$0xf0] }
 0x58c   :  { %v19338_v14 = vld [vmem:[#allocation8 + $0xa9c] sm:$0xf]  ;;  %v15502_v62 = vor.u32 %v19274_v13, %v15499_v49  ;;  %8193 = vmatpush.bf16.msrb.mxu2 %v16142_v34  ;;  %v19635_v13 = vld [vmem:[#allocation11 + $0x3dc] sm:$0xf0]  ;;  %v16330_v49 = vor.u32 %v19486_v22, %v16329_v60  ;;  %v19470_v22 = vld [vmem:[#allocation8 + $0xeb4] sm:$0xf0] }
 0x58d   :  { %v15755_v33 = vld [vmem:[#allocation8 + $0xab8] sm:$0xf0] }
 0x58e   :  { %v19426_v52 = vld [vmem:[#allocation8 + $0xd5c] sm:$0xf]  ;;  %v15758_v18 = vor.u32 %v19338_v14, %v15755_v33  ;;  %8169 = vmatpush.bf16.msrb.mxu0 %v15502_v62  ;;  %v16658_v62 = vor.u32 %v19571_v42, %v16657_v29  ;;  %8097 = vmatpush.bf16.msrb.mxu3 %v16330_v49  ;;  %v20906_v29 = vpop.f32.mrf.mxu0 }
 0x58f   :  { %v16107_v31 = vld [vmem:[#allocation8 + $0xd78] sm:$0xf0] }
 0x590   :  { %v19266_v28 = vld [vmem:[#allocation8 + $0x85c] sm:$0xf]  ;;  %v16110_v11 = vor.u32 %v19426_v52, %v16107_v31  ;;  %8183 = vmatpush.bf16.msrb.mxu1 %v15758_v18  ;;  %v19478_v52 = vld [vmem:[#allocation8 + $0xef4] sm:$0xf0]  ;;  %v16914_v31 = vor.u32 %v19635_v13, %v16913_v2  ;;  %v16625_v18 = vld [vmem:[#allocation11 + $0x180] sm:$0xf] }
 0x591   :  { %v15467_v44 = vld [vmem:[#allocation8 + $0x878] sm:$0xf0]  ;;  %v16626_v53 = vor.u32 %v19563_v10, %v16625_v18  ;;  %v19462_v13 = vld [vmem:[#allocation8 + $0xe74] sm:$0xf0] }
 0x592   :  { %v19330_v26 = vld [vmem:[#allocation8 + $0xa5c] sm:$0xf]  ;;  %v15470_v25 = vor.u32 %v19266_v28, %v15467_v44  ;;  %8194 = vmatpush.bf16.msrb.mxu2 %v16110_v11  ;;  %v16881_v44 = vld [vmem:[#allocation11 + $0x380] sm:$0xf]  ;;  %v19454_v18 = vld [vmem:[#allocation8 + $0xe34] sm:$0xf0] }
 0x593   :  { %v15723_v4 = vld [vmem:[#allocation8 + $0xa78] sm:$0xf0] }
 0x594   :  { %v19418_v21 = vld [vmem:[#allocation8 + $0xd1c] sm:$0xf]  ;;  %v15726_v6 = vor.u32 %v19330_v26, %v15723_v4  ;;  %8170 = vmatpush.bf16.msrb.mxu0 %v15470_v25  ;;  %v19627_v26 = vld [vmem:[#allocation11 + $0x39c] sm:$0xf0]  ;;  %v16298_v4 = vor.u32 %v19478_v52, %v16297_v37  ;;  %v16265_v25 = vld [vmem:[#allocation8 + $0xe98] sm:$0xf]  ;;  %v20911_v52 = vpop.f32.mrf.mxu1 }
 0x595   :  { %v16075_v41 = vld [vmem:[#allocation8 + $0xd38] sm:$0xf0]  ;;  %v16266_v42 = vor.u32 %v19470_v22, %v16265_v25  ;;  %v16201_v37 = vld [vmem:[#allocation8 + $0xe18] sm:$0xf]  ;;  %v19539_v25 = vld [vmem:[#allocation11 + $0xdc] sm:$0xf0]  ;;  %v20913_v22 = vpop.f32.mrf.mxu2 }
 0x596   :  { %v19258_v7 = vld [vmem:[#allocation8 + $0x81c] sm:$0xf]  ;;  %v16078_v59 = vor.u32 %v19418_v21, %v16075_v41  ;;  %8184 = vmatpush.bf16.msrb.mxu1 %v15726_v6  ;;  %v7336_v21 = vadd.f32 %v20736_v43, %v20726_v3  ;;  %v16882_v41 = vor.u32 %v19627_v26, %v16881_v44  ;;  %v16593_v6 = vld [vmem:[#allocation11 + $0x140] sm:$0xf]  ;;  %8098 = vmatpush.bf16.msrb.mxu3 %v16298_v4  ;;  %v16233_v43 = vld [vmem:[#allocation8 + $0xe58] sm:$0xf] }
 0x597   :  { %v15435_v23 = vld [vmem:[#allocation8 + $0x838] sm:$0xf0]  ;;  %v17169_v26 = vld [vmem:[#allocation11 + $0x5c0] sm:$0xf] }
 0x598   :  { %v19322_v19 = vld [vmem:[#allocation8 + $0xa1c] sm:$0xf]  ;;  %v15438_v14 = vor.u32 %v19258_v7, %v15435_v23  ;;  %8195 = vmatpush.bf16.msrb.mxu2 %v16078_v59  ;;  %v19555_v7 = vld [vmem:[#allocation11 + $0x15c] sm:$0xf0]  ;;  %v7350_v49 = vadd.f32 %v20740_v61, %v7336_v21 }
 0x599   :  { %v15691_v16 = vld [vmem:[#allocation8 + $0xa38] sm:$0xf0]  ;;  %v16594_v3 = vor.u32 %v19555_v7, %v16593_v6  ;;  %v19699_v4 = vld [vmem:[#allocation11 + $0x5dc] sm:$0xf0]  ;;  %v20916_v7 = vpop.f32.mrf.mxu0 }
 0x59a   :  { %v19410_v33 = vld [vmem:[#allocation8 + $0xcdc] sm:$0xf]  ;;  %v15694_v58 = vor.u32 %v19322_v19, %v15691_v16  ;;  %8171 = vmatpush.bf16.msrb.mxu0 %v15438_v14  ;;  %v16849_v19 = vld [vmem:[#allocation11 + $0x340] sm:$0xf]  ;;  %8099 = vmatpush.bf16.msrb.mxu3 %v16266_v42 }
 0x59b   :  { %v16043_v34 = vld [vmem:[#allocation8 + $0xcf8] sm:$0xf0]  ;;  %v19619_v16 = vld [vmem:[#allocation11 + $0x35c] sm:$0xf0] }
 0x59c   :  { %v16046_v28 = vor.u32 %v19410_v33, %v16043_v34  ;;  %v19402_v11 = vld [vmem:[#allocation8 + $0xc9c] sm:$0xf]  ;;  %8185 = vmatpush.bf16.msrb.mxu1 %v15694_v58  ;;  %v16850_v14 = vor.u32 %v19619_v16, %v16849_v19  ;;  %v19547_v33 = vld [vmem:[#allocation11 + $0x11c] sm:$0xf0]  ;;  %v16202_v19 = vor.u32 %v19454_v18, %v16201_v37  ;;  %v17170_v16 = vor.u32 %v19699_v4, %v17169_v26 }
 0x59d   :  { %v16011_v60 = vld [vmem:[#allocation8 + $0xcb8] sm:$0xf0]  ;;  %8172 = vmatmul.bf16.vlgmr.msrb.gmra.mxu0 %v20695_v38  ;;  %v16561_v38 = vld [vmem:[#allocation11 + $0x100] sm:$0xf] }
 0x59e   :  { %11369 = vmatpush.bf16.msra.mxu0 %v16658_v62  ;;  %8196 = vmatpush.bf16.msrb.mxu2 %v16046_v28  ;;  %v16014_v23 = vor.u32 %v19402_v11, %v16011_v60  ;;  %v19394_v59 = vld [vmem:[#allocation8 + $0xc5c] sm:$0xf]  ;;  %v16817_v58 = vld [vmem:[#allocation11 + $0x300] sm:$0xf]  ;;  %v16562_v61 = vor.u32 %v19547_v33, %v16561_v38  ;;  %v7560_v33 = vadd.f32 %v20815_v39, %v20792_v30 }
 0x59f   :  { %8186 = vmatmul.bf16.vlgmr.msrb.gmra.mxu1 %v20697_v36  ;;  %v15979_v2 = vld [vmem:[#allocation8 + $0xc78] sm:$0xf0]  ;;  %v19611_v62 = vld [vmem:[#allocation11 + $0x31c] sm:$0xf0]  ;;  %v7364_v36 = vadd.f32 %v20761_v1, %v7350_v49 }
 0x5a0   :  { %11383 = vmatpush.bf16.msra.mxu1 %v16914_v31  ;;  %v15982_v34 = vor.u32 %v19394_v59, %v15979_v2  ;;  %v16234_v31 = vor.u32 %v19462_v13, %v16233_v43  ;;  %v19386_v10 = vld [vmem:[#allocation8 + $0xc1c] sm:$0xf]  ;;  %v16818_v11 = vor.u32 %v19611_v62, %v16817_v58  ;;  %v16785_v21 = vld [vmem:[#allocation11 + $0x2c0] sm:$0xf]  ;;  %v20066_v62 = vld [vmem:[#allocation10] sm:$0xff] }
 0x5a1   :  { %v15947_v28 = vld [vmem:[#allocation8 + $0xc38] sm:$0xf0]  ;;  %v7378_v6 = vadd.f32 %v20801_v40, %v7364_v36  ;;  %v19691_v43 = vld [vmem:[#allocation11 + $0x59c] sm:$0xf0]  ;;  %v20923_v37 = vunpack.c.h.bf16 %v20066_v62  ;;  %v20925_v36 = vpop.f32.mrf.mxu1 }
 0x5a2   :  { %11370 = vmatpush.bf16.msra.mxu0 %v16626_v53  ;;  %8197 = vmatpush.bf16.msrb.mxu2 %v16014_v23  ;;  %v19250_v44 = vld [vmem:[#allocation8 + $0x7dc] sm:$0xf]  ;;  %v16529_v53 = vld [vmem:[#allocation11 + $0xc0] sm:$0xf]  ;;  %v15950_v1 = vor.u32 %v19386_v10, %v15947_v28  ;;  %v20918_v23 = vpop.f32.mrf.mxu3 }
 0x5a3   :  { %v15403_v60 = vld [vmem:[#allocation8 + $0x7f8] sm:$0xf0]  ;;  %8100 = vmatpush.bf16.msrb.mxu3 %v16234_v31  ;;  %v16530_v59 = vor.u32 %v19539_v25, %v16529_v53  ;;  %v7392_v13 = vadd.f32 %v20749_v0, %v7378_v6  ;;  %v16497_v38 = vld [vmem:[#allocation11 + $0x80] sm:$0xf] }
 0x5a4   :  { %11384 = vmatpush.bf16.msra.mxu1 %v16882_v41  ;;  %v19603_v41 = vld [vmem:[#allocation11 + $0x2dc] sm:$0xf0]  ;;  %v15406_v42 = vor.u32 %v19250_v44, %v15403_v60  ;;  %v19242_v2 = vld [vmem:[#allocation8 + $0x79c] sm:$0xf]  ;;  %v20930_v60 = vpop.f32.mrf.mxu2 }
 0x5a5   :  { %v16786_v49 = vor.u32 %v19603_v41, %v16785_v21  ;;  %v19531_v40 = vld [vmem:[#allocation11 + $0x9c] sm:$0xf0]  ;;  %v19234_v10 = vld [vmem:[#allocation8 + $0x75c] sm:$0xf]  ;;  %v7406_v30 = vadd.f32 %v20752_v48, %v7392_v13  ;;  %v4744_v21 = vperm.slane %v20923_v37, 0 }
 0x5a6   :  { %11371 = vmatpush.bf16.msra.mxu0 %v16594_v3  ;;  %8198 = vmatpush.bf16.msrb.mxu2 %v15982_v34  ;;  %v17137_v3 = vld [vmem:[#allocation11 + $0x580] sm:$0xf]  ;;  %v16498_v18 = vor.u32 %v19531_v40, %v16497_v38  ;;  %v15339_v44 = vld [vmem:[#allocation8 + $0x778] sm:$0xf0] }
 0x5a7   :  { %v16753_v34 = vld [vmem:[#allocation11 + $0x280] sm:$0xf]  ;;  %8101 = vmatpush.bf16.msrb.mxu3 %v16202_v19  ;;  %v17138_v31 = vor.u32 %v19691_v43, %v17137_v3  ;;  %v19226_v41 = vld [vmem:[#allocation8 + $0x71c] sm:$0xf]  ;;  %v7783_v3 = vpop.f32.mrf.mxu0 }
 0x5a8   :  { %11385 = vmatpush.bf16.msra.mxu1 %v16850_v14  ;;  %v15371_v14 = vld [vmem:[#allocation8 + $0x7b8] sm:$0xf0]  ;;  %v19595_v58 = vld [vmem:[#allocation11 + $0x29c] sm:$0xf0] }
 0x5a9   :  { %v15374_v0 = vor.u32 %v19242_v2, %v15371_v14  ;;  %v17105_v28 = vld [vmem:[#allocation11 + $0x540] sm:$0xf]  ;;  %v16754_v39 = vor.u32 %v19595_v58, %v16753_v34 }
 0x5aa   :  { %11372 = vmatpush.bf16.msra.mxu0 %v16562_v61  ;;  %8199 = vmatpush.bf16.msrb.mxu2 %v15950_v1  ;;  %v19683_v61 = vld [vmem:[#allocation11 + $0x55c] sm:$0xf0]  ;;  %v7420_v1 = vadd.f32 %v20768_v51, %v7406_v30  ;;  %v20935_v48 = vpop.f32.mrf.mxu3  ;;  %v19218_v30 = vld [vmem:[#allocation8 + $0x6dc] sm:$0xf] }
 0x5ab   :  { %8150 = vmatpush.bf16.msra.mxu3 %v15406_v42  ;;  %v16465_v26 = vld [vmem:[#allocation11 + $0x40] sm:$0xf] }
 0x5ac   :  { %11386 = vmatpush.bf16.msra.mxu1 %v16818_v11  ;;  %v19523_v4 = vld [vmem:[#allocation11 + $0x5c] sm:$0xf0]  ;;  %v7574_v11 = vadd.f32 %v20817_v57, %v7560_v33  ;;  %8102 = vmatmul.bf16.vlgmr.msrb.gmra.mxu3 %v20729_v32  ;;  %v15342_v57 = vor.u32 %v19234_v10, %v15339_v44  ;;  %v7434_v2 = vadd.f32 %v20813_v55, %v7420_v1  ;;  %v7797_v10 = vpop.f32.mrf.mxu1  ;;  %v4760_v44 = vperm.slane %v4744_v21, 0 }
 0x5ad   :  { %8200 = vmatmul.bf16.vlgmr.msrb.gmra.mxu2 %v20704_v56  ;;  %v16721_v53 = vld [vmem:[#allocation11 + $0x240] sm:$0xf]  ;;  %v17106_v56 = vor.u32 %v19683_v61, %v17105_v28  ;;  %v16466_v19 = vor.u32 %v19523_v4, %v16465_v26 }
 0x5ae   :  { %11397 = vmatpush.bf16.msra.mxu2 %v17170_v16  ;;  %11373 = vmatpush.bf16.msra.mxu0 %v16530_v59  ;;  %v19587_v25 = vld [vmem:[#allocation11 + $0x25c] sm:$0xf0]  ;;  %v7588_v6 = vadd.f32 %v20845_v17, %v7574_v11  ;;  %v15307_v16 = vld [vmem:[#allocation8 + $0x738] sm:$0xf0] }
 0x5af   :  { %8151 = vmatpush.bf16.msra.mxu3 %v15374_v0  ;;  %v17073_v42 = vld [vmem:[#allocation11 + $0x500] sm:$0xf]  ;;  %v16722_v51 = vor.u32 %v19587_v25, %v16721_v53  ;;  %v15310_v62 = vor.u32 %v19226_v41, %v15307_v16  ;;  %v8244_v53 = vmax.f32 %v20806_v20, 0.0  ;;  %v7614_v25 = vadd.f32 %v20826_v47, %v20867_v9  ;;  %v19210_v47 = vld [vmem:[#allocation8 + $0x69c] sm:$0xf] }
 0x5b0   :  { %11387 = vmatpush.bf16.msra.mxu1 %v16786_v49  ;;  %v19675_v59 = vld [vmem:[#allocation11 + $0x51c] sm:$0xf0]  ;;  %v7602_v14 = vadd.f32 %v20873_v5, %v7588_v6  ;;  %v15275_v5 = vld [vmem:[#allocation8 + $0x6f8] sm:$0xf0]  ;;  %v7784_v6 = vadd.f32 %v7783_v3, %v4760_v44  ;;  %v7782_v3 = vadd.f32 %v20916_v7, %v4760_v44 }
 0x5b1   :  { %v16433_v43 = vld [vmem:[#allocation11] sm:$0xf]  ;;  %v17074_v33 = vor.u32 %v19675_v59, %v17073_v42  ;;  %v20946_v42 = vpop.f32.mrf.mxu0  ;;  %v15243_v9 = vld [vmem:[#allocation8 + $0x6b8] sm:$0xf0] }
 0x5b2   :  { %11398 = vmatpush.bf16.msra.mxu2 %v17138_v31  ;;  %11374 = vmatpush.bf16.msra.mxu0 %v16498_v18  ;;  %v19515_v13 = vld [vmem:[#allocation11 + $0x1c] sm:$0xf0]  ;;  %v8252_v18 = vmax.f32 %v7434_v2, 0.0  ;;  %v7825_v59 = vpop.f32.mrf.mxu3 }
 0x5b3   :  { %v16689_v49 = vld [vmem:[#allocation11 + $0x200] sm:$0xf]  ;;  %8152 = vmatpush.bf16.msra.mxu3 %v15342_v57  ;;  %v16434_v31 = vor.u32 %v19515_v13, %v16433_v43  ;;  %v7811_v57 = vpop.f32.mrf.mxu2 }
 0x5b4   :  { %11388 = vmatpush.bf16.msra.mxu1 %v16754_v39  ;;  %v19579_v38 = vld [vmem:[#allocation11 + $0x21c] sm:$0xf0]  ;;  %v7616_v39 = vadd.f32 %v20837_v24, %v7602_v14  ;;  %v20944_v21 = vpack.c.bf16 %v8252_v18, %v8244_v53  ;;  %v20953_v7 = vpop.f32.mrf.mxu1 }
 0x5b5   :  { %v17681_v40 = vld [vmem:[#allocation11 + $0x9c0] sm:$0xf]  ;;  %v16690_v28 = vor.u32 %v19579_v38, %v16689_v49  ;;  %v7628_v49 = vadd.f32 %v20830_v35, %v7614_v25 }
 0x5b6   :  { %v19827_v17 = vld [vmem:[#allocation11 + $0x9dc] sm:$0xf0]  ;;  %11399 = vmatpush.bf16.msra.mxu2 %v17106_v56  ;;  %11375 = vmatpush.bf16.msra.mxu0 %v16466_v19  ;;  %v15278_v19 = vor.u32 %v19218_v30, %v15275_v5  ;;  %v7630_v2 = vadd.f32 %v20841_v12, %v7616_v39 }
 0x5b7   :  { %v17937_v34 = vld [vmem:[#allocation11 + $0xbc0] sm:$0xf]  ;;  %v17682_v61 = vor.u32 %v19827_v17, %v17681_v40  ;;  %8153 = vmatpush.bf16.msra.mxu3 %v15310_v62  ;;  %v7798_v17 = vadd.f32 %v7797_v10, %v7784_v6  ;;  %v19202_v62 = vld [vmem:[#allocation8 + $0x65c] sm:$0xf] }
 0x5b8   :  { %v19891_v58 = vld [vmem:[#allocation11 + $0xbdc] sm:$0xf0]  ;;  %11389 = vmatpush.bf16.msra.mxu1 %v16722_v51  ;;  %v7644_v35 = vadd.f32 %v20859_v8, %v7630_v2  ;;  %v19506_v6 = vld [vmem:[#allocation8 + $0xfdc] sm:$0xf] }
 0x5b9   :  { %v17041_v55 = vld [vmem:[#allocation11 + $0x4c0] sm:$0xf]  ;;  %v17938_v11 = vor.u32 %v19891_v58, %v17937_v34 }
 0x5ba   :  { %v19667_v0 = vld [vmem:[#allocation11 + $0x4dc] sm:$0xf0]  ;;  %11400 = vmatpush.bf16.msra.mxu2 %v17074_v33  ;;  %11376 = vmatpush.bf16.msra.mxu0 %v16434_v31  ;;  %v15246_v33 = vor.u32 %v19210_v47, %v15243_v9  ;;  %v15211_v31 = vld [vmem:[#allocation8 + $0x678] sm:$0xf0]  ;;  %v7658_v44 = vadd.f32 %v20879_v46, %v7644_v35 }
 0x5bb   :  { %v17649_v26 = vld [vmem:[#allocation11 + $0x980] sm:$0xf]  ;;  %v17042_v1 = vor.u32 %v19667_v0, %v17041_v55  ;;  %8154 = vmatpush.bf16.msra.mxu3 %v15278_v19  ;;  %v7796_v55 = vadd.f32 %v20925_v36, %v7782_v3  ;;  %v7812_v0 = vadd.f32 %v7811_v57, %v7798_v17  ;;  %v15214_v8 = vor.u32 %v19202_v62, %v15211_v31  ;;  %v20961_v25 = vpop.f32.mrf.mxu2  ;;  %v16427_v57 = vld [vmem:[#allocation8 + $0xff8] sm:$0xf0] }
 0x5bc   :  { %v19819_v4 = vld [vmem:[#allocation11 + $0x99c] sm:$0xf0]  ;;  %11390 = vmatpush.bf16.msra.mxu1 %v16690_v28  ;;  %v8254_v47 = vmax.f32 %v7658_v44, 0.0  ;;  %v7853_v17 = vpop.f32.mrf.mxu1  ;;  %v19490_v35 = vld [vmem:[#allocation8 + $0xf5c] sm:$0xf] }
 0x5bd   :  { %v17905_v56 = vld [vmem:[#allocation11 + $0xb80] sm:$0xf]  ;;  %v17650_v20 = vor.u32 %v19819_v4, %v17649_v26  ;;  %11377 = vmatmul.bf16.vlgmr.msra.gmra.mxu0 %v20944_v21  ;;  %v7810_v26 = vadd.f32 %v20930_v60, %v7796_v55  ;;  %v7826_v4 = vadd.f32 %v7825_v59, %v7812_v0  ;;  %v16363_v55 = vld [vmem:[#allocation8 + $0xf78] sm:$0xf0] }
 0x5be   :  { %v19883_v41 = vld [vmem:[#allocation11 + $0xb9c] sm:$0xf0]  ;;  %11425 = vmatpush.bf16.msrb.mxu0 %v17682_v61  ;;  %11401 = vmatpush.bf16.msra.mxu2 %v17042_v1  ;;  %v7642_v61 = vadd.f32 %v20850_v50, %v7628_v49  ;;  %v20963_v1 = vpop.f32.mrf.mxu3  ;;  %v16395_v49 = vld [vmem:[#allocation8 + $0xfb8] sm:$0xf0]  ;;  %v16366_v44 = vor.u32 %v19490_v35, %v16363_v55  ;;  %v19543_v55 = vld [vmem:[#allocation11 + $0x104] sm:$0xf] }
 0x5bf   :  { %v17009_v16 = vld [vmem:[#allocation11 + $0x480] sm:$0xf]  ;;  %v17906_v13 = vor.u32 %v19883_v41, %v17905_v56  ;;  %11391 = vmatmul.bf16.vlgmr.msra.gmra.mxu1 %v20855_v15  ;;  %8155 = vmatpush.bf16.msra.mxu3 %v15246_v33  ;;  %v19194_v56 = vld [vmem:[#allocation8 + $0x61c] sm:$0xf]  ;;  %v7824_v46 = vadd.f32 %v20935_v48, %v7810_v26 }
 0x5c0   :  { %v19659_v24 = vld [vmem:[#allocation11 + $0x49c] sm:$0xf0]  ;;  %11439 = vmatpush.bf16.msrb.mxu1 %v17938_v11  ;;  %v7656_v53 = vadd.f32 %v20875_v63, %v7642_v61  ;;  %v15179_v41 = vld [vmem:[#allocation8 + $0x638] sm:$0xf0] }
 0x5c1   :  { %v17617_v51 = vld [vmem:[#allocation11 + $0x940] sm:$0xf]  ;;  %v17010_v14 = vor.u32 %v19659_v24, %v17009_v16  ;;  %v7839_v24 = vpop.f32.mrf.mxu0  ;;  %v15182_v2 = vor.u32 %v19194_v56, %v15179_v41  ;;  %v7838_v48 = vadd.f32 %v20946_v42, %v7824_v46  ;;  %v16659_v41 = vld [vmem:[#allocation11 + $0x1e0] sm:$0xf0]  ;;  %v19458_v35 = vld [vmem:[#allocation8 + $0xe5c] sm:$0xf] }
 0x5c2   :  { %v19811_v43 = vld [vmem:[#allocation11 + $0x95c] sm:$0xf0]  ;;  %11426 = vmatpush.bf16.msrb.mxu0 %v17650_v20  ;;  %v7840_v9 = vadd.f32 %v7839_v24, %v7826_v4  ;;  %v8246_v3 = vmax.f32 %v7656_v53, 0.0  ;;  %v19482_v4 = vld [vmem:[#allocation8 + $0xf1c] sm:$0xf] }
 0x5c3   :  { %v17873_v38 = vld [vmem:[#allocation11 + $0xb40] sm:$0xf]  ;;  %v17618_v58 = vor.u32 %v19811_v43, %v17617_v51  ;;  %11402 = vmatpush.bf16.msra.mxu2 %v17010_v14  ;;  %8156 = vmatpush.bf16.msra.mxu3 %v15214_v8  ;;  %v16430_v51 = vor.u32 %v19506_v6, %v16427_v57  ;;  %v7852_v42 = vadd.f32 %v20953_v7, %v7838_v48  ;;  %v16331_v7 = vld [vmem:[#allocation8 + $0xf38] sm:$0xf0]  ;;  %v19631_v57 = vld [vmem:[#allocation11 + $0x3c4] sm:$0xf] }
 0x5c4   :  { %v19875_v40 = vld [vmem:[#allocation11 + $0xb5c] sm:$0xf0]  ;;  %11440 = vmatpush.bf16.msrb.mxu1 %v17906_v13  ;;  %v19498_v13 = vld [vmem:[#allocation8 + $0xf9c] sm:$0xf] }
 0x5c5   :  { %v16977_v12 = vld [vmem:[#allocation11 + $0x440] sm:$0xf]  ;;  %v17874_v10 = vor.u32 %v19875_v40, %v17873_v38  ;;  %v16398_v62 = vor.u32 %v19498_v13, %v16395_v49  ;;  %v7866_v8 = vadd.f32 %v20961_v25, %v7852_v42  ;;  %v19474_v25 = vld [vmem:[#allocation8 + $0xedc] sm:$0xf] }
 0x5c6   :  { %v19651_v34 = vld [vmem:[#allocation11 + $0x45c] sm:$0xf0]  ;;  %11427 = vmatpush.bf16.msrb.mxu0 %v17618_v58  ;;  %v7854_v58 = vadd.f32 %v7853_v17, %v7840_v9  ;;  %v7881_v61 = vpop.f32.mrf.mxu3  ;;  %v16627_v9 = vld [vmem:[#allocation11 + $0x1a0] sm:$0xf0]  ;;  %v19466_v49 = vld [vmem:[#allocation8 + $0xe9c] sm:$0xf] }
 0x5c7   :  { %v17585_v18 = vld [vmem:[#allocation11 + $0x900] sm:$0xf]  ;;  %v16978_v30 = vor.u32 %v19651_v34, %v16977_v12  ;;  %v20967_v34 = vpack.c.bf16 %v8254_v47, %v8246_v3  ;;  %8157 = vmatpush.bf16.msra.mxu3 %v15182_v2  ;;  %v7880_v46 = vadd.f32 %v20963_v1, %v7866_v8  ;;  %v19559_v47 = vld [vmem:[#allocation11 + $0x184] sm:$0xf]  ;;  %v16235_v42 = vld [vmem:[#allocation8 + $0xe78] sm:$0xf0] }
 0x5c8   :  { %v19803_v28 = vld [vmem:[#allocation11 + $0x91c] sm:$0xf0]  ;;  %11441 = vmatpush.bf16.msrb.mxu1 %v17874_v10  ;;  %v7867_v10 = vpop.f32.mrf.mxu2  ;;  %v16630_v48 = vor.u32 %v19559_v47, %v16627_v9  ;;  %v16531_v8 = vld [vmem:[#allocation11 + $0xe0] sm:$0xf0] }
 0x5c9   :  { %v17841_v5 = vld [vmem:[#allocation11 + $0xb00] sm:$0xf]  ;;  %v17586_v50 = vor.u32 %v19803_v28, %v17585_v18  ;;  %11403 = vmatpush.bf16.msra.mxu2 %v16978_v30  ;;  %v8248_v3 = vmax.f32 %v7880_v46, 0.0 }
 0x5ca   :  { %v19867_v39 = vld [vmem:[#allocation11 + $0xb1c] sm:$0xf0]  ;;  %8158 = vmatmul.bf16.vlgmr.msra.gmra.mxu3 %v20679_v54 }
 0x5cb   :  { %v16945_v11 = vld [vmem:[#allocation11 + $0x400] sm:$0xf]  ;;  %v17842_v16 = vor.u32 %v19867_v39, %v17841_v5  ;;  %11428 = vmatpush.bf16.msrb.mxu0 %v17586_v50  ;;  %8206 = vmatpush.bf16.msrb.mxu3 %v16430_v51  ;;  %v7868_v39 = vadd.f32 %v7867_v10, %v7854_v58  ;;  %v19567_v50 = vld [vmem:[#allocation11 + $0x1c4] sm:$0xf]  ;;  %v20977_v58 = vpop.f32.mrf.mxu0 }
 0x5cc   :  { %v19643_v36 = vld [vmem:[#allocation11 + $0x41c] sm:$0xf0]  ;;  %v19623_v51 = vld [vmem:[#allocation11 + $0x384] sm:$0xf] }
 0x5cd   :  { %v17553_v60 = vld [vmem:[#allocation11 + $0x8c0] sm:$0xf]  ;;  %v16946_v59 = vor.u32 %v19643_v36, %v16945_v11  ;;  %11442 = vmatpush.bf16.msrb.mxu1 %v17842_v16  ;;  %v7882_v11 = vadd.f32 %v7881_v61, %v7868_v39  ;;  %v16819_v10 = vld [vmem:[#allocation11 + $0x320] sm:$0xf0]  ;;  %v20979_v61 = vpop.f32.mrf.mxu1  ;;  %v19450_v39 = vld [vmem:[#allocation8 + $0xe1c] sm:$0xf] }
 0x5ce   :  { %v19795_v19 = vld [vmem:[#allocation11 + $0x8dc] sm:$0xf0] }
 0x5cf   :  { %v17809_v63 = vld [vmem:[#allocation11 + $0xac0] sm:$0xf]  ;;  %v17554_v43 = vor.u32 %v19795_v19, %v17553_v60  ;;  %11404 = vmatpush.bf16.msra.mxu2 %v16946_v59  ;;  %8207 = vmatpush.bf16.msrb.mxu3 %v16398_v62  ;;  %v16915_v60 = vld [vmem:[#allocation11 + $0x3e0] sm:$0xf0]  ;;  %v16334_v19 = vor.u32 %v19482_v4, %v16331_v7  ;;  %v8256_v24 = vmax.f32 %v7882_v11, 0.0  ;;  %v16662_v59 = vor.u32 %v19567_v50, %v16659_v41 }
 0x5d0   :  { %v19859_v20 = vld [vmem:[#allocation11 + $0xadc] sm:$0xf0]  ;;  %v16918_v2 = vor.u32 %v19631_v57, %v16915_v60  ;;  %v19535_v7 = vld [vmem:[#allocation11 + $0xc4] sm:$0xf] }
 0x5d1   :  { %v17521_v14 = vld [vmem:[#allocation11 + $0x880] sm:$0xf]  ;;  %v17810_v40 = vor.u32 %v19859_v20, %v17809_v63  ;;  %11429 = vmatpush.bf16.msrb.mxu0 %v17554_v43  ;;  %v16299_v63 = vld [vmem:[#allocation8 + $0xef8] sm:$0xf0]  ;;  %v16883_v43 = vld [vmem:[#allocation11 + $0x3a0] sm:$0xf0]  ;;  %v20974_v13 = vpack.c.bf16 %v8256_v24, %v8248_v3 }
 0x5d2   :  { %v19787_v38 = vld [vmem:[#allocation11 + $0x89c] sm:$0xf0]  ;;  %11405 = vmatmul.bf16.vlgmr.msra.gmra.mxu2 %v20967_v34  ;;  %v16302_v1 = vor.u32 %v19474_v25, %v16299_v63  ;;  %v16886_v17 = vor.u32 %v19623_v51, %v16883_v43  ;;  %v16787_v50 = vld [vmem:[#allocation11 + $0x2e0] sm:$0xf0]  ;;  %v21307_v63 = vld [vmem:[#allocation30_spill] sm:$0xff]  ;;  %v20986_v43 = vpop.f32.mrf.mxu3 }
 0x5d3   :  { %v17777_v33 = vld [vmem:[#allocation11 + $0xa80] sm:$0xf]  ;;  %v17522_v31 = vor.u32 %v19787_v38, %v17521_v14  ;;  %11443 = vmatpush.bf16.msrb.mxu1 %v17810_v40  ;;  %8208 = vmatpush.bf16.msrb.mxu3 %v16366_v44  ;;  %v16267_v14 = vld [vmem:[#allocation8 + $0xeb8] sm:$0xf0]  ;;  %v19551_v38 = vld [vmem:[#allocation11 + $0x144] sm:$0xf] }
 0x5d4   :  { %v19851_v12 = vld [vmem:[#allocation11 + $0xa9c] sm:$0xf0]  ;;  %v16595_v40 = vld [vmem:[#allocation11 + $0x160] sm:$0xf0]  ;;  %v16270_v62 = vor.u32 %v19466_v49, %v16267_v14  ;;  %v16203_v44 = vld [vmem:[#allocation8 + $0xe38] sm:$0xf0] }
 0x5d5   :  { %v17489_v0 = vld [vmem:[#allocation11 + $0x840] sm:$0xf]  ;;  %v17778_v28 = vor.u32 %v19851_v12, %v17777_v33  ;;  %11430 = vmatpush.bf16.msrb.mxu0 %v17522_v31  ;;  %v19615_v33 = vld [vmem:[#allocation11 + $0x344] sm:$0xf]  ;;  %v16598_v31 = vor.u32 %v19551_v38, %v16595_v40  ;;  %v16206_v41 = vor.u32 %v19450_v39, %v16203_v44  ;;  %v7909_v38 = vpop.f32.mrf.mxu1 }
 0x5d6   :  { %v19779_v18 = vld [vmem:[#allocation11 + $0x85c] sm:$0xf0]  ;;  %v16851_v12 = vld [vmem:[#allocation11 + $0x360] sm:$0xf0] }
 0x5d7   :  { %v17745_v30 = vld [vmem:[#allocation11 + $0xa40] sm:$0xf]  ;;  %v17490_v26 = vor.u32 %v19779_v18, %v17489_v0  ;;  %11444 = vmatpush.bf16.msrb.mxu1 %v17778_v28  ;;  %8209 = vmatpush.bf16.msrb.mxu3 %v16334_v19  ;;  %v16563_v0 = vld [vmem:[#allocation11 + $0x120] sm:$0xf0]  ;;  %v16854_v18 = vor.u32 %v19615_v33, %v16851_v12  ;;  %v7895_v19 = vpop.f32.mrf.mxu0 }
 0x5d8   :  { %v19843_v5 = vld [vmem:[#allocation11 + $0xa5c] sm:$0xf0]  ;;  %v19607_v28 = vld [vmem:[#allocation11 + $0x304] sm:$0xf] }
 0x5d9   :  { %v17457_v36 = vld [vmem:[#allocation11 + $0x800] sm:$0xf]  ;;  %v17746_v56 = vor.u32 %v19843_v5, %v17745_v30  ;;  %11431 = vmatpush.bf16.msrb.mxu0 %v17490_v26  ;;  %v16238_v30 = vor.u32 %v19458_v35, %v16235_v42  ;;  %v16566_v5 = vor.u32 %v19543_v55, %v16563_v0  ;;  %v16822_v11 = vor.u32 %v19607_v28, %v16819_v10  ;;  %v19527_v60 = vld [vmem:[#allocation11 + $0x84] sm:$0xf] }
 0x5da   :  { %v19771_v53 = vld [vmem:[#allocation11 + $0x81c] sm:$0xf0]  ;;  %v16755_v3 = vld [vmem:[#allocation11 + $0x2a0] sm:$0xf0] }
 0x5db   :  { %v17713_v6 = vld [vmem:[#allocation11 + $0xa00] sm:$0xf]  ;;  %v17458_v16 = vor.u32 %v19771_v53, %v17457_v36  ;;  %11445 = vmatpush.bf16.msrb.mxu1 %v17746_v56  ;;  %8210 = vmatpush.bf16.msrb.mxu3 %v16302_v1  ;;  %v4745_v36 = vperm.slane %v20923_v37, 2  ;;  %v19599_v53 = vld [vmem:[#allocation11 + $0x2c4] sm:$0xf]  ;;  %v20982_v56 = vpop.f32.mrf.mxu2 }
 0x5dc   :  { %v19835_v54 = vld [vmem:[#allocation11 + $0xa1c] sm:$0xf0]  ;;  %v16790_v24 = vor.u32 %v19599_v53, %v16787_v50  ;;  %v19519_v40 = vld [vmem:[#allocation11 + $0x44] sm:$0xf] }
 0x5dd   :  { %v17714_v20 = vor.u32 %v19835_v54, %v17713_v6  ;;  %11432 = vmatpush.bf16.msrb.mxu0 %v17458_v16  ;;  %v17425_v26 = vld [vmem:[#allocation11 + $0x7c0] sm:$0xf]  ;;  %v16534_v54 = vor.u32 %v19535_v7, %v16531_v8  ;;  %v16499_v16 = vld [vmem:[#allocation11 + $0xa0] sm:$0xf0]  ;;  %v4761_v9 = vperm.slane %v4745_v36, 0 }
 0x5de   :  { %v19763_v4 = vld [vmem:[#allocation11 + $0x7dc] sm:$0xf0]  ;;  %v19583_v12 = vld [vmem:[#allocation11 + $0x244] sm:$0xf] }
 0x5df   :  { %11446 = vmatpush.bf16.msrb.mxu1 %v17714_v20  ;;  %8211 = vmatpush.bf16.msrb.mxu3 %v16270_v62  ;;  %v17426_v6 = vor.u32 %v19763_v4, %v17425_v26  ;;  %v17393_v46 = vld [vmem:[#allocation11 + $0x780] sm:$0xf]  ;;  %v21308_v20 = vld [vmem:[#allocation24_spill] sm:$0xff]  ;;  %v7894_v35 = vadd.f32 %v20977_v58, %v4761_v9  ;;  %v16723_v42 = vld [vmem:[#allocation11 + $0x260] sm:$0xf0] }
 0x5e0   :  { %11433 = vmatmul.bf16.vlgmr.msrb.gmra.mxu0 %v20974_v13  ;;  %v19755_v57 = vld [vmem:[#allocation11 + $0x79c] sm:$0xf0]  ;;  %v7672_v47 = vadd.f32 %v21308_v20, %v21307_v63  ;;  %v21309_v62 = vld [vmem:[#allocation36_spill] sm:$0xff]  ;;  %v19511_v4 = vld [vmem:[#allocation11 + $0x4] sm:$0xf] }
 0x5e1   :  { %11481 = vmatpush.bf16.msra.mxu0 %v16662_v59  ;;  %v18193_v59 = vld [vmem:[#allocation11 + $0xdc0] sm:$0xf]  ;;  %v17394_v1 = vor.u32 %v19755_v57, %v17393_v46  ;;  %v16435_v7 = vld [vmem:[#allocation11 + $0x20] sm:$0xf0] }
 0x5e2   :  { %v19955_v25 = vld [vmem:[#allocation11 + $0xddc] sm:$0xf0]  ;;  %v19823_v58 = vld [vmem:[#allocation11 + $0x9c4] sm:$0xf] }
 0x5e3   :  { %11495 = vmatpush.bf16.msra.mxu1 %v16918_v2  ;;  %8212 = vmatpush.bf16.msrb.mxu3 %v16238_v30  ;;  %v19591_v2 = vld [vmem:[#allocation11 + $0x284] sm:$0xf]  ;;  %v18194_v51 = vor.u32 %v19955_v25, %v18193_v59  ;;  %v17361_v49 = vld [vmem:[#allocation11 + $0x740] sm:$0xf]  ;;  %v7923_v8 = vpop.f32.mrf.mxu2  ;;  %v7963_v59 = vpop.f32.mrf.mxu1 }
 0x5e4   :  { %v19747_v14 = vld [vmem:[#allocation11 + $0x75c] sm:$0xf0]  ;;  %v16758_v33 = vor.u32 %v19591_v2, %v16755_v3  ;;  %v17683_v36 = vld [vmem:[#allocation11 + $0x9e0] sm:$0xf0]  ;;  %v7937_v25 = vpop.f32.mrf.mxu3 }
 0x5e5   :  { %11482 = vmatpush.bf16.msra.mxu0 %v16630_v48  ;;  %v16502_v48 = vor.u32 %v19527_v60, %v16499_v16  ;;  %11453 = vmatpush.bf16.msrb.mxu2 %v18194_v51  ;;  %v18161_v55 = vld [vmem:[#allocation11 + $0xd80] sm:$0xf]  ;;  %v17362_v39 = vor.u32 %v19747_v14, %v17361_v49  ;;  %v17686_v63 = vor.u32 %v19823_v58, %v17683_v36  ;;  %v19815_v51 = vld [vmem:[#allocation11 + $0x984] sm:$0xf] }
 0x5e6   :  { %v19947_v0 = vld [vmem:[#allocation11 + $0xd9c] sm:$0xf0] }
 0x5e7   :  { %11496 = vmatpush.bf16.msra.mxu1 %v16886_v17  ;;  %8213 = vmatpush.bf16.msrb.mxu3 %v16206_v41  ;;  %v16467_v17 = vld [vmem:[#allocation11 + $0x60] sm:$0xf0]  ;;  %v17329_v28 = vld [vmem:[#allocation11 + $0x700] sm:$0xf]  ;;  %v18162_v10 = vor.u32 %v19947_v0, %v18161_v55  ;;  %v7908_v41 = vadd.f32 %v20979_v61, %v7894_v35 }
 0x5e8   :  { %v21310_v30 = vld [vmem:[#allocation27_spill] sm:$0xff]  ;;  %v16470_v44 = vor.u32 %v19519_v40, %v16467_v17 }
 0x5e9   :  { %11483 = vmatpush.bf16.msra.mxu0 %v16598_v31  ;;  %v7686_v31 = vadd.f32 %v21309_v62, %v7672_v47  ;;  %v19739_v26 = vld [vmem:[#allocation11 + $0x71c] sm:$0xf0]  ;;  %11454 = vmatpush.bf16.msrb.mxu2 %v18162_v10 }
 0x5ea   :  { %8214 = vmatmul.bf16.vlgmr.msrb.gmra.mxu3 %v20729_v32  ;;  %v16726_v32 = vor.u32 %v19583_v12, %v16723_v42  ;;  %v18129_v53 = vld [vmem:[#allocation11 + $0xd40] sm:$0xf]  ;;  %v17330_v16 = vor.u32 %v19739_v26, %v17329_v28  ;;  %v19807_v12 = vld [vmem:[#allocation11 + $0x944] sm:$0xf] }
 0x5eb   :  { %11497 = vmatpush.bf16.msra.mxu1 %v16854_v18  ;;  %11411 = vmatpush.bf16.msra.mxu3 %v17426_v6  ;;  %v7896_v18 = vadd.f32 %v7895_v19, %v4761_v9  ;;  %v19575_v6 = vld [vmem:[#allocation11 + $0x204] sm:$0xf]  ;;  %v19939_v46 = vld [vmem:[#allocation11 + $0xd5c] sm:$0xf0]  ;;  %v7922_v19 = vadd.f32 %v20982_v56, %v7908_v41 }
 0x5ec   :  { %v18130_v60 = vor.u32 %v19939_v46, %v18129_v53  ;;  %v17297_v20 = vld [vmem:[#allocation11 + $0x6c0] sm:$0xf]  ;;  %v17651_v56 = vld [vmem:[#allocation11 + $0x9a0] sm:$0xf0]  ;;  %v7991_v10 = vpop.f32.mrf.mxu3 }
 0x5ed   :  { %11484 = vmatpush.bf16.msra.mxu0 %v16566_v5  ;;  %v7700_v5 = vadd.f32 %v21310_v30, %v7686_v31  ;;  %v7910_v57 = vadd.f32 %v7909_v38, %v7896_v18  ;;  %v19731_v47 = vld [vmem:[#allocation11 + $0x6dc] sm:$0xf0]  ;;  %v7936_v3 = vadd.f32 %v20986_v43, %v7922_v19  ;;  %v7977_v38 = vpop.f32.mrf.mxu2  ;;  %v17654_v40 = vor.u32 %v19815_v51, %v17651_v56  ;;  %v17619_v31 = vld [vmem:[#allocation11 + $0x960] sm:$0xf0] }
 0x5ee   :  { %11455 = vmatpush.bf16.msrb.mxu2 %v18130_v60  ;;  %v18097_v61 = vld [vmem:[#allocation11 + $0xd00] sm:$0xf]  ;;  %v17298_v14 = vor.u32 %v19731_v47, %v17297_v20  ;;  %v17622_v30 = vor.u32 %v19807_v12, %v17619_v31  ;;  %v17555_v46 = vld [vmem:[#allocation11 + $0x8e0] sm:$0xf0]  ;;  %v8247_v56 = vmax.f32 %v20899_v27, 0.0 }
 0x5ef   :  { %11498 = vmatpush.bf16.msra.mxu1 %v16822_v11  ;;  %11412 = vmatpush.bf16.msra.mxu3 %v17394_v1  ;;  %v7949_v11 = vpop.f32.mrf.mxu0  ;;  %v7714_v50 = vadd.f32 %v20894_v45, %v7700_v5  ;;  %v7924_v2 = vadd.f32 %v7923_v8, %v7910_v57  ;;  %v19931_v1 = vld [vmem:[#allocation11 + $0xd1c] sm:$0xf0]  ;;  %v19887_v20 = vld [vmem:[#allocation11 + $0xbc4] sm:$0xf] }
 0x5f0   :  { %v17265_v17 = vld [vmem:[#allocation11 + $0x680] sm:$0xf]  ;;  %v7950_v62 = vadd.f32 %v7949_v11, %v7936_v3  ;;  %v7965_v11 = vpop.f32.mrf.mxu1  ;;  %v17523_v3 = vld [vmem:[#allocation11 + $0x8a0] sm:$0xf0] }
 0x5f1   :  { %11485 = vmatpush.bf16.msra.mxu0 %v16534_v54  ;;  %v16691_v54 = vld [vmem:[#allocation11 + $0x220] sm:$0xf0]  ;;  %v7728_v9 = vadd.f32 %v20906_v29, %v7714_v50  ;;  %v7938_v49 = vadd.f32 %v7937_v25, %v7924_v2  ;;  %v18065_v43 = vld [vmem:[#allocation11 + $0xcc0] sm:$0xf] }
 0x5f2   :  { %v16694_v45 = vor.u32 %v19575_v6, %v16691_v54  ;;  %v19923_v35 = vld [vmem:[#allocation11 + $0xcdc] sm:$0xf0]  ;;  %v7964_v26 = vadd.f32 %v7963_v59, %v7950_v62  ;;  %v19791_v6 = vld [vmem:[#allocation11 + $0x8c4] sm:$0xf] }
 0x5f3   :  { %11499 = vmatpush.bf16.msra.mxu1 %v16790_v24  ;;  %11413 = vmatpush.bf16.msra.mxu3 %v17362_v39  ;;  %v16438_v24 = vor.u32 %v19511_v4, %v16435_v7  ;;  %v7742_v29 = vadd.f32 %v20911_v52, %v7728_v9  ;;  %v18066_v55 = vor.u32 %v19923_v35, %v18065_v43  ;;  %v17233_v28 = vld [vmem:[#allocation11 + $0x640] sm:$0xf]  ;;  %v19799_v4 = vld [vmem:[#allocation11 + $0x904] sm:$0xf] }
 0x5f4   :  { %v19715_v5 = vld [vmem:[#allocation11 + $0x65c] sm:$0xf0]  ;;  %v17587_v7 = vld [vmem:[#allocation11 + $0x920] sm:$0xf0]  ;;  %v7978_v54 = vadd.f32 %v7977_v38, %v7964_v26  ;;  %v7993_v25 = vpop.f32.mrf.mxu3 }
 0x5f5   :  { %11486 = vmatpush.bf16.msra.mxu0 %v16502_v48  ;;  %v18098_v48 = vor.u32 %v19931_v1, %v18097_v61  ;;  %v18033_v39 = vld [vmem:[#allocation11 + $0xc80] sm:$0xf]  ;;  %v7756_v52 = vadd.f32 %v20913_v22, %v7742_v29  ;;  %v17234_v36 = vor.u32 %v19715_v5, %v17233_v28  ;;  %v17590_v53 = vor.u32 %v19799_v4, %v17587_v7  ;;  %v7979_v60 = vpop.f32.mrf.mxu2  ;;  %v17939_v9 = vld [vmem:[#allocation11 + $0xbe0] sm:$0xf0] }
 0x5f6   :  { %v17201_v50 = vld [vmem:[#allocation11 + $0x600] sm:$0xf]  ;;  %v19783_v2 = vld [vmem:[#allocation11 + $0x884] sm:$0xf] }
 0x5f7   :  { %11500 = vmatpush.bf16.msra.mxu1 %v16758_v33  ;;  %11414 = vmatpush.bf16.msra.mxu3 %v17330_v16  ;;  %v19723_v33 = vld [vmem:[#allocation11 + $0x69c] sm:$0xf0]  ;;  %v7951_v42 = vpop.f32.mrf.mxu0  ;;  %v7770_v58 = vadd.f32 %v20918_v23, %v7756_v52  ;;  %v19695_v1 = vld [vmem:[#allocation11 + $0x5c4] sm:$0xf] }
 0x5f8   :  { %11456 = vmatpush.bf16.msrb.mxu2 %v18098_v48  ;;  %v7952_v0 = vadd.f32 %v7951_v42, %v7938_v49  ;;  %v17266_v18 = vor.u32 %v19723_v33, %v17265_v17  ;;  %v19707_v41 = vld [vmem:[#allocation11 + $0x61c] sm:$0xf0]  ;;  %v17171_v48 = vld [vmem:[#allocation11 + $0x5e0] sm:$0xf0]  ;;  %v17942_v17 = vor.u32 %v19887_v20, %v17939_v9  ;;  %v17526_v33 = vor.u32 %v19783_v2, %v17523_v3  ;;  %v19548_v9 = vld [vmem:[#allocation11 + $0x124] sm:$0xf0]  ;;  %v21010_v3 = vpop.f32.mrf.mxu1 }
 0x5f9   :  { %11487 = vmatpush.bf16.msra.mxu0 %v16470_v44  ;;  %v19915_v44 = vld [vmem:[#allocation11 + $0xc9c] sm:$0xf0]  ;;  %v8255_v16 = vmax.f32 %v7770_v58, 0.0  ;;  %v17202_v23 = vor.u32 %v19707_v41, %v17201_v50  ;;  %v17174_v38 = vor.u32 %v19695_v1, %v17171_v48  ;;  %v19879_v12 = vld [vmem:[#allocation11 + $0xb84] sm:$0xf] }
 0x5fa   :  { %v18034_v8 = vor.u32 %v19915_v44, %v18033_v39  ;;  %v18001_v22 = vld [vmem:[#allocation11 + $0xc40] sm:$0xf]  ;;  %v17907_v62 = vld [vmem:[#allocation11 + $0xba0] sm:$0xf0]  ;;  %v16665_v39 = vld [vmem:[#allocation11 + $0x1c8] sm:$0xf] }
 0x5fb   :  { %11501 = vmatpush.bf16.msra.mxu1 %v16726_v32  ;;  %11415 = vmatpush.bf16.msra.mxu3 %v17298_v14  ;;  %v7966_v32 = vadd.f32 %v7965_v11, %v7952_v0  ;;  %v19907_v57 = vld [vmem:[#allocation11 + $0xc5c] sm:$0xf0]  ;;  %v19775_v31 = vld [vmem:[#allocation11 + $0x844] sm:$0xf]  ;;  %v19572_v44 = vld [vmem:[#allocation11 + $0x1e4] sm:$0xf0] }
 0x5fc   :  { %11457 = vmatpush.bf16.msrb.mxu2 %v18066_v55  ;;  %v18002_v19 = vor.u32 %v19907_v57, %v18001_v22  ;;  %v17969_v47 = vld [vmem:[#allocation11 + $0xc00] sm:$0xf]  ;;  %v17491_v43 = vld [vmem:[#allocation11 + $0x860] sm:$0xf0]  ;;  %v17910_v55 = vor.u32 %v19879_v12, %v17907_v62  ;;  %v16666_v58 = vor.u32 %v19572_v44, %v16665_v39  ;;  %v16601_v57 = vld [vmem:[#allocation11 + $0x148] sm:$0xf] }
 0x5fd   :  { %11488 = vmatpush.bf16.msra.mxu0 %v16438_v24  ;;  %v7992_v24 = vadd.f32 %v7991_v10, %v7978_v54  ;;  %v7980_v59 = vadd.f32 %v7979_v60, %v7966_v32  ;;  %v19687_v27 = vld [vmem:[#allocation11 + $0x584] sm:$0xf]  ;;  %v17494_v0 = vor.u32 %v19775_v31, %v17491_v43  ;;  %v16633_v32 = vld [vmem:[#allocation11 + $0x188] sm:$0xf]  ;;  %v8033_v62 = vpop.f32.mrf.mxu2 }
 0x5fe   :  { %v17139_v35 = vld [vmem:[#allocation11 + $0x5a0] sm:$0xf0]  ;;  %v19556_v60 = vld [vmem:[#allocation11 + $0x164] sm:$0xf0] }
 0x5ff   :  { %11502 = vmatpush.bf16.msra.mxu1 %v16694_v45  ;;  %11416 = vmatpush.bf16.msra.mxu3 %v17266_v18  ;;  %v19899_v45 = vld [vmem:[#allocation11 + $0xc1c] sm:$0xf0]  ;;  %v7994_v61 = vadd.f32 %v7993_v25, %v7980_v59  ;;  %v8249_v49 = vmax.f32 %v7992_v24, 0.0  ;;  %v17142_v42 = vor.u32 %v19687_v27, %v17139_v35  ;;  %v19871_v18 = vld [vmem:[#allocation11 + $0xb44] sm:$0xf]  ;;  %v8005_v59 = vpop.f32.mrf.mxu0  ;;  %v16602_v20 = vor.u32 %v19556_v60, %v16601_v57 }
 0x600   :  { %11489 = vmatmul.bf16.vlgmr.msra.gmra.mxu0 %v20944_v21  ;;  %11458 = vmatpush.bf16.msrb.mxu2 %v18034_v8  ;;  %v17970_v51 = vor.u32 %v19899_v45, %v17969_v47  ;;  %v17875_v28 = vld [vmem:[#allocation11 + $0xb60] sm:$0xf0] }
 0x601   :  { %11537 = vmatpush.bf16.msrb.mxu0 %v17686_v63  ;;  %v17558_v63 = vor.u32 %v19791_v6, %v17555_v46  ;;  %v8257_v14 = vmax.f32 %v7994_v61, 0.0  ;;  %v19767_v10 = vld [vmem:[#allocation11 + $0x804] sm:$0xf]  ;;  %v17878_v4 = vor.u32 %v19871_v18, %v17875_v28  ;;  %v16569_v61 = vld [vmem:[#allocation11 + $0x108] sm:$0xf] }
 0x602   :  { %v19679_v5 = vld [vmem:[#allocation11 + $0x544] sm:$0xf]  ;;  %v16570_v48 = vor.u32 %v19548_v9, %v16569_v61  ;;  %v19532_v28 = vld [vmem:[#allocation11 + $0xa4] sm:$0xf0]  ;;  %v8047_v44 = vpop.f32.mrf.mxu3  ;;  %v20003_v61 = vld [vmem:[#allocation11 + $0xf5c] sm:$0xf0] }
 0x603   :  { %11417 = vmatpush.bf16.msra.mxu3 %v17234_v36  ;;  %v21004_v29 = vpack.c.bf16 %v8257_v14, %v8249_v49  ;;  %v17107_v52 = vld [vmem:[#allocation11 + $0x560] sm:$0xf0]  ;;  %v16537_v49 = vld [vmem:[#allocation11 + $0xc8] sm:$0xf] }
 0x604   :  { %11459 = vmatpush.bf16.msrb.mxu2 %v18002_v19  ;;  %v17110_v26 = vor.u32 %v19679_v5, %v17107_v52  ;;  %v19863_v8 = vld [vmem:[#allocation11 + $0xb04] sm:$0xf]  ;;  %v19540_v14 = vld [vmem:[#allocation11 + $0xe4] sm:$0xf0] }
 0x605   :  { %11538 = vmatpush.bf16.msrb.mxu0 %v17654_v40  ;;  %v21002_v40 = vpack.c.bf16 %v8255_v16, %v8247_v56  ;;  %11447 = vmatmul.bf16.vlgmr.msrb.gmra.mxu1 %v21004_v29  ;;  %v17843_v11 = vld [vmem:[#allocation11 + $0xb20] sm:$0xf0]  ;;  %v16538_v35 = vor.u32 %v19540_v14, %v16537_v49  ;;  %v16825_v14 = vld [vmem:[#allocation11 + $0x308] sm:$0xf] }
 0x606   :  { %11551 = vmatpush.bf16.msrb.mxu1 %v17942_v17  ;;  %v19671_v36 = vld [vmem:[#allocation11 + $0x504] sm:$0xf]  ;;  %v17846_v6 = vor.u32 %v19863_v8, %v17843_v11  ;;  %v16889_v11 = vld [vmem:[#allocation11 + $0x388] sm:$0xf] }
 0x607   :  { %11418 = vmatpush.bf16.msra.mxu3 %v17202_v23  ;;  %v17075_v50 = vld [vmem:[#allocation11 + $0x520] sm:$0xf0]  ;;  %v8007_v18 = vpop.f32.mrf.mxu0 }
 0x608   :  { %11460 = vmatpush.bf16.msrb.mxu2 %v17970_v51  ;;  %v17078_v41 = vor.u32 %v19671_v36, %v17075_v50  ;;  %v19855_v54 = vld [vmem:[#allocation11 + $0xac4] sm:$0xf]  ;;  %v8021_v36 = vpop.f32.mrf.mxu1  ;;  %v19524_v50 = vld [vmem:[#allocation11 + $0x64] sm:$0xf0] }
 0x609   :  { %11539 = vmatpush.bf16.msrb.mxu0 %v17622_v30  ;;  %v17459_v30 = vld [vmem:[#allocation11 + $0x820] sm:$0xf0] }
 0x60a   :  { %11419 = vmatmul.bf16.vlgmr.msra.gmra.mxu3 %v21002_v40  ;;  %11552 = vmatpush.bf16.msrb.mxu1 %v17910_v55  ;;  %v17462_v7 = vor.u32 %v19767_v10, %v17459_v30  ;;  %v17811_v46 = vld [vmem:[#allocation11 + $0xae0] sm:$0xf0]  ;;  %v19636_v55 = vld [vmem:[#allocation11 + $0x3e4] sm:$0xf0]  ;;  %v8049_v49 = vpop.f32.mrf.mxu3 }
 0x60b   :  { %v19663_v19 = vld [vmem:[#allocation11 + $0x4c4] sm:$0xf]  ;;  %v17814_v23 = vor.u32 %v19855_v54, %v17811_v46  ;;  %v20011_v54 = vld [vmem:[#allocation11 + $0xf9c] sm:$0xf0] }
 0x60c   :  { %11509 = vmatpush.bf16.msra.mxu2 %v17174_v38  ;;  %v17043_v16 = vld [vmem:[#allocation11 + $0x4e0] sm:$0xf0] }
 0x60d   :  { %11540 = vmatpush.bf16.msrb.mxu0 %v17590_v53  ;;  %v19564_v53 = vld [vmem:[#allocation11 + $0x1a4] sm:$0xf0]  ;;  %v17046_v24 = vor.u32 %v19663_v19, %v17043_v16  ;;  %v19847_v25 = vld [vmem:[#allocation11 + $0xa84] sm:$0xf] }
 0x60e   :  { %11553 = vmatpush.bf16.msrb.mxu1 %v17878_v4  ;;  %v16634_v22 = vor.u32 %v19564_v53, %v16633_v32  ;;  %v19655_v47 = vld [vmem:[#allocation11 + $0x484] sm:$0xf]  ;;  %v20019_v4 = vld [vmem:[#allocation11 + $0xfdc] sm:$0xf0]  ;;  %v19628_v32 = vld [vmem:[#allocation11 + $0x3a4] sm:$0xf0] }
 0x60f   :  { %v17011_v45 = vld [vmem:[#allocation11 + $0x4a0] sm:$0xf0]  ;;  %v16473_v53 = vld [vmem:[#allocation11 + $0x48] sm:$0xf]  ;;  %v16890_v57 = vor.u32 %v19628_v32, %v16889_v11  ;;  %v18289_v32 = vld [vmem:[#allocation11 + $0xe80] sm:$0xf] }
 0x610   :  { %11510 = vmatpush.bf16.msra.mxu2 %v17142_v42  ;;  %v17014_v2 = vor.u32 %v19655_v47, %v17011_v45  ;;  %v19839_v56 = vld [vmem:[#allocation11 + $0xa44] sm:$0xf]  ;;  %v16921_v42 = vld [vmem:[#allocation11 + $0x3c8] sm:$0xf]  ;;  %v16474_v60 = vor.u32 %v19524_v50, %v16473_v53  ;;  %v18385_v45 = vld [vmem:[#allocation11 + $0xf40] sm:$0xf] }
 0x611   :  { %11541 = vmatpush.bf16.msrb.mxu0 %v17558_v63  ;;  %v17779_v63 = vld [vmem:[#allocation11 + $0xaa0] sm:$0xf0]  ;;  %v16857_v19 = vld [vmem:[#allocation11 + $0x348] sm:$0xf]  ;;  %v19979_v53 = vld [vmem:[#allocation11 + $0xe9c] sm:$0xf0] }
 0x612   :  { %11554 = vmatpush.bf16.msrb.mxu1 %v17846_v6  ;;  %v17782_v51 = vor.u32 %v19847_v25, %v17779_v63  ;;  %v17747_v1 = vld [vmem:[#allocation11 + $0xa60] sm:$0xf0]  ;;  %v18417_v6 = vld [vmem:[#allocation11 + $0xf80] sm:$0xf]  ;;  %v19620_v16 = vld [vmem:[#allocation11 + $0x364] sm:$0xf0] }
 0x613   :  { %v19647_v38 = vld [vmem:[#allocation11 + $0x444] sm:$0xf]  ;;  %v17750_v31 = vor.u32 %v19839_v56, %v17747_v1  ;;  %v16441_v25 = vld [vmem:[#allocation11 + $0x8] sm:$0xf]  ;;  %v16858_v56 = vor.u32 %v19620_v16, %v16857_v19 }
 0x614   :  { %11511 = vmatpush.bf16.msra.mxu2 %v17110_v26  ;;  %v16979_v17 = vld [vmem:[#allocation11 + $0x460] sm:$0xf0]  ;;  %v18449_v26 = vld [vmem:[#allocation11 + $0xfc0] sm:$0xf]  ;;  %v19516_v63 = vld [vmem:[#allocation11 + $0x24] sm:$0xf0] }
 0x615   :  { %11542 = vmatpush.bf16.msrb.mxu0 %v17526_v33  ;;  %11503 = vmatmul.bf16.vlgmr.msra.gmra.mxu1 %v20855_v15  ;;  %v4746_v33 = vperm.slane %v20923_v37, 4  ;;  %v16982_v12 = vor.u32 %v19647_v38, %v16979_v17  ;;  %v19831_v43 = vld [vmem:[#allocation11 + $0xa04] sm:$0xf]  ;;  %v16442_v1 = vor.u32 %v19516_v63, %v16441_v25  ;;  %v19612_v38 = vld [vmem:[#allocation11 + $0x324] sm:$0xf0] }
 0x616   :  { %11555 = vmatpush.bf16.msrb.mxu1 %v17814_v23  ;;  %v17715_v27 = vld [vmem:[#allocation11 + $0xa20] sm:$0xf0]  ;;  %v8061_v23 = vpop.f32.mrf.mxu0  ;;  %v19588_v19 = vld [vmem:[#allocation11 + $0x264] sm:$0xf0]  ;;  %v18257_v63 = vld [vmem:[#allocation11 + $0xe40] sm:$0xf] }
 0x617   :  { %v19639_v10 = vld [vmem:[#allocation11 + $0x404] sm:$0xf]  ;;  %v4762_v5 = vperm.slane %v4746_v33, 0  ;;  %v17718_v52 = vor.u32 %v19831_v43, %v17715_v27  ;;  %v17657_v33 = vld [vmem:[#allocation11 + $0x988] sm:$0xf] }
 0x618   :  { %11512 = vmatpush.bf16.msra.mxu2 %v17078_v41  ;;  %v16947_v30 = vld [vmem:[#allocation11 + $0x420] sm:$0xf0]  ;;  %v18353_v43 = vld [vmem:[#allocation11 + $0xf00] sm:$0xf]  ;;  %v19796_v25 = vld [vmem:[#allocation11 + $0x8e4] sm:$0xf0] }
 0x619   :  { %11543 = vmatpush.bf16.msrb.mxu0 %v17494_v0  ;;  %v16505_v0 = vld [vmem:[#allocation11 + $0x88] sm:$0xf]  ;;  %v16950_v39 = vor.u32 %v19639_v10, %v16947_v30  ;;  %v8006_v41 = vadd.f32 %v8005_v59, %v4762_v5  ;;  %v8008_v46 = vadd.f32 %v8007_v18, %v4762_v5  ;;  %v19995_v27 = vld [vmem:[#allocation11 + $0xf1c] sm:$0xf0] }
 0x61a   :  { %11556 = vmatpush.bf16.msrb.mxu1 %v17782_v51  ;;  %v16506_v8 = vor.u32 %v19532_v28, %v16505_v0  ;;  %v19828_v59 = vld [vmem:[#allocation11 + $0x9e4] sm:$0xf0] }
 0x61b   :  { %v8020_v47 = vadd.f32 %v21010_v3, %v8006_v41  ;;  %v8022_v9 = vadd.f32 %v8021_v36, %v8008_v46  ;;  %v16793_v0 = vld [vmem:[#allocation11 + $0x2c8] sm:$0xf] }
 0x61c   :  { %11513 = vmatpush.bf16.msra.mxu2 %v17046_v24  ;;  %v8035_v24 = vpop.f32.mrf.mxu2  ;;  %v19604_v18 = vld [vmem:[#allocation11 + $0x2e4] sm:$0xf0] }
 0x61d   :  { %11544 = vmatpush.bf16.msrb.mxu0 %v17462_v7  ;;  %v16922_v7 = vor.u32 %v19636_v55, %v16921_v42  ;;  %v8034_v51 = vadd.f32 %v8033_v62, %v8020_v47  ;;  %v8036_v3 = vadd.f32 %v8035_v24, %v8022_v9  ;;  %v16826_v62 = vor.u32 %v19612_v38, %v16825_v14  ;;  %v17625_v10 = vld [vmem:[#allocation11 + $0x948] sm:$0xf]  ;;  %v19963_v14 = vld [vmem:[#allocation11 + $0xe1c] sm:$0xf0] }
 0x61e   :  { %11557 = vmatpush.bf16.msrb.mxu1 %v17750_v31  ;;  %v19820_v31 = vld [vmem:[#allocation11 + $0x9a4] sm:$0xf0] }
 0x61f   :  { %v8050_v42 = vadd.f32 %v8049_v49, %v8036_v3  ;;  %v17658_v28 = vor.u32 %v19820_v31, %v17657_v33  ;;  %v19812_v5 = vld [vmem:[#allocation11 + $0x964] sm:$0xf0]  ;;  %v18225_v49 = vld [vmem:[#allocation11 + $0xe00] sm:$0xf] }
 0x620   :  { %11545 = vmatmul.bf16.vlgmr.msrb.gmra.mxu0 %v20974_v13  ;;  %11514 = vmatpush.bf16.msra.mxu2 %v17014_v2  ;;  %v18386_v2 = vor.u32 %v20003_v61, %v18385_v45  ;;  %v17626_v36 = vor.u32 %v19812_v5, %v17625_v10  ;;  %v17593_v41 = vld [vmem:[#allocation11 + $0x908] sm:$0xf]  ;;  %v18163_v10 = vld [vmem:[#allocation11 + $0xda0] sm:$0xf0] }
 0x621   :  { %11593 = vmatpush.bf16.msra.mxu0 %v16666_v58  ;;  %v18450_v58 = vor.u32 %v20019_v4, %v18449_v26  ;;  %v17561_v24 = vld [vmem:[#allocation11 + $0x8c8] sm:$0xf] }
 0x622   :  { %11558 = vmatpush.bf16.msrb.mxu1 %v17718_v52  ;;  %v8063_v52 = vpop.f32.mrf.mxu0  ;;  %v17945_v33 = vld [vmem:[#allocation11 + $0xbc8] sm:$0xf] }
 0x623   :  { %11467 = vmatpush.bf16.msrb.mxu3 %v18450_v58  ;;  %v8064_v4 = vadd.f32 %v8063_v52, %v8050_v42  ;;  %v19596_v58 = vld [vmem:[#allocation11 + $0x2a4] sm:$0xf0] }
 0x624   :  { %11515 = vmatpush.bf16.msra.mxu2 %v16982_v12  ;;  %v8048_v12 = vadd.f32 %v8047_v44, %v8034_v51  ;;  %v8089_v55 = vpop.f32.mrf.mxu2  ;;  %v19987_v44 = vld [vmem:[#allocation11 + $0xedc] sm:$0xf0]  ;;  %v19580_v51 = vld [vmem:[#allocation11 + $0x224] sm:$0xf0] }
 0x625   :  { %11594 = vmatpush.bf16.msra.mxu0 %v16634_v22  ;;  %v18418_v22 = vor.u32 %v20011_v54, %v18417_v6  ;;  %11559 = vmatmul.bf16.vlgmr.msrb.gmra.mxu1 %v21004_v29  ;;  %v19804_v6 = vld [vmem:[#allocation11 + $0x924] sm:$0xf0]  ;;  %v18290_v54 = vor.u32 %v19979_v53, %v18289_v32  ;;  %v19935_v32 = vld [vmem:[#allocation11 + $0xd44] sm:$0xf] }
 0x626   :  { %11607 = vmatpush.bf16.msra.mxu1 %v16922_v7  ;;  %v8062_v30 = vadd.f32 %v8061_v23, %v8048_v12  ;;  %v16794_v7 = vor.u32 %v19604_v18, %v16793_v0  ;;  %v17594_v16 = vor.u32 %v19804_v6, %v17593_v41  ;;  %v19892_v3 = vld [vmem:[#allocation11 + $0xbe4] sm:$0xf0]  ;;  %v18226_v12 = vor.u32 %v19963_v14, %v18225_v49  ;;  %v18131_v53 = vld [vmem:[#allocation11 + $0xd60] sm:$0xf0] }
 0x627   :  { %11468 = vmatpush.bf16.msrb.mxu3 %v18418_v22  ;;  %v17529_v31 = vld [vmem:[#allocation11 + $0x888] sm:$0xf]  ;;  %v17946_v18 = vor.u32 %v19892_v3, %v17945_v33  ;;  %v19919_v49 = vld [vmem:[#allocation11 + $0xcc4] sm:$0xf] }
 0x628   :  { %11516 = vmatpush.bf16.msra.mxu2 %v16950_v39  ;;  %v18321_v39 = vld [vmem:[#allocation11 + $0xec0] sm:$0xf]  ;;  %v19884_v52 = vld [vmem:[#allocation11 + $0xba4] sm:$0xf0]  ;;  %v18067_v14 = vld [vmem:[#allocation11 + $0xce0] sm:$0xf0] }
 0x629   :  { %11595 = vmatpush.bf16.msra.mxu0 %v16602_v20  ;;  %v17689_v20 = vld [vmem:[#allocation11 + $0x9c8] sm:$0xf]  ;;  %v18322_v26 = vor.u32 %v19987_v44, %v18321_v39  ;;  %v19727_v3 = vld [vmem:[#allocation11 + $0x6c4] sm:$0xf] }
 0x62a   :  { %11608 = vmatpush.bf16.msra.mxu1 %v16890_v57  ;;  %v17690_v17 = vor.u32 %v19828_v59, %v17689_v20  ;;  %v19971_v20 = vld [vmem:[#allocation11 + $0xe5c] sm:$0xf0]  ;;  %v17913_v44 = vld [vmem:[#allocation11 + $0xb88] sm:$0xf] }
 0x62b   :  { %11469 = vmatpush.bf16.msrb.mxu3 %v18386_v2  ;;  %v18258_v59 = vor.u32 %v19971_v20, %v18257_v63  ;;  %v16697_v2 = vld [vmem:[#allocation11 + $0x208] sm:$0xf]  ;;  %v18099_v20 = vld [vmem:[#allocation11 + $0xd20] sm:$0xf0] }
 0x62c   :  { %v8091_v47 = vpop.f32.mrf.mxu2  ;;  %v17881_v41 = vld [vmem:[#allocation11 + $0xb48] sm:$0xf] }
 0x62d   :  { %11596 = vmatpush.bf16.msra.mxu0 %v16570_v48  ;;  %v8075_v48 = vpop.f32.mrf.mxu1  ;;  %v19876_v6 = vld [vmem:[#allocation11 + $0xb64] sm:$0xf0] }
 0x62e   :  { %11609 = vmatpush.bf16.msra.mxu1 %v16858_v56  ;;  %v8076_v50 = vadd.f32 %v8075_v48, %v8062_v30  ;;  %v19951_v48 = vld [vmem:[#allocation11 + $0xdc4] sm:$0xf] }
 0x62f   :  { %v8103_v11 = vpop.f32.mrf.mxu3 }
 0x630   :  { %v8090_v23 = vadd.f32 %v8089_v55, %v8076_v50  ;;  %v17427_v55 = vld [vmem:[#allocation11 + $0x7e0] sm:$0xf0] }
 0x631   :  { %11597 = vmatpush.bf16.msra.mxu0 %v16538_v35  ;;  %v18354_v35 = vor.u32 %v19995_v27, %v18353_v43  ;;  %v19788_v43 = vld [vmem:[#allocation11 + $0x8a4] sm:$0xf0]  ;;  %v19759_v27 = vld [vmem:[#allocation11 + $0x7c4] sm:$0xf] }
 0x632   :  { %11610 = vmatpush.bf16.msra.mxu1 %v16826_v62  ;;  %v8104_v45 = vadd.f32 %v8103_v11, %v8090_v23  ;;  %v16698_v62 = vor.u32 %v19580_v51, %v16697_v2  ;;  %v17430_v30 = vor.u32 %v19759_v27, %v17427_v55  ;;  %v17530_v39 = vor.u32 %v19788_v43, %v17529_v31  ;;  %v19560_v2 = vld [vmem:[#allocation11 + $0x18c] sm:$0xf]  ;;  %v19911_v55 = vld [vmem:[#allocation11 + $0xc84] sm:$0xf] }
 0x633   :  { %11470 = vmatpush.bf16.msrb.mxu3 %v18354_v35  ;;  %v17882_v23 = vor.u32 %v19876_v6, %v17881_v41  ;;  %v16635_v51 = vld [vmem:[#allocation11 + $0x1a8] sm:$0xf0]  ;;  %v19711_v41 = vld [vmem:[#allocation11 + $0x644] sm:$0xf] }
 0x634   :  { %v8250_v35 = vmax.f32 %v8104_v45, 0.0  ;;  %v16638_v33 = vor.u32 %v19560_v2, %v16635_v51  ;;  %v19552_v31 = vld [vmem:[#allocation11 + $0x14c] sm:$0xf]  ;;  %v17235_v6 = vld [vmem:[#allocation11 + $0x660] sm:$0xf0] }
 0x635   :  { %11598 = vmatpush.bf16.msra.mxu0 %v16506_v8  ;;  %v16761_v8 = vld [vmem:[#allocation11 + $0x288] sm:$0xf]  ;;  %v8077_v46 = vpop.f32.mrf.mxu1  ;;  %v16603_v43 = vld [vmem:[#allocation11 + $0x168] sm:$0xf0] }
 0x636   :  { %11611 = vmatpush.bf16.msra.mxu1 %v16794_v7  ;;  %v16762_v22 = vor.u32 %v19596_v58, %v16761_v8  ;;  %v8078_v57 = vadd.f32 %v8077_v46, %v8064_v4  ;;  %v19780_v4 = vld [vmem:[#allocation11 + $0x864] sm:$0xf0]  ;;  %v19751_v7 = vld [vmem:[#allocation11 + $0x784] sm:$0xf]  ;;  %v19528_v51 = vld [vmem:[#allocation11 + $0x8c] sm:$0xf] }
 0x637   :  { %11471 = vmatpush.bf16.msrb.mxu3 %v18322_v26  ;;  %v8105_v56 = vpop.f32.mrf.mxu3  ;;  %v17497_v26 = vld [vmem:[#allocation11 + $0x848] sm:$0xf]  ;;  %v17395_v8 = vld [vmem:[#allocation11 + $0x7a0] sm:$0xf0] }
 0x638   :  { %v8092_v61 = vadd.f32 %v8091_v47, %v8078_v57  ;;  %v17398_v11 = vor.u32 %v19751_v7, %v17395_v8  ;;  %v17498_v50 = vor.u32 %v19780_v4, %v17497_v26  ;;  %v19772_v46 = vld [vmem:[#allocation11 + $0x824] sm:$0xf0]  ;;  %v17363_v57 = vld [vmem:[#allocation11 + $0x760] sm:$0xf0]  ;;  %v16571_v26 = vld [vmem:[#allocation11 + $0x128] sm:$0xf0] }
 0x639   :  { %11599 = vmatpush.bf16.msra.mxu0 %v16474_v60  ;;  %v16729_v60 = vld [vmem:[#allocation11 + $0x248] sm:$0xf] }
 0x63a   :  { %11612 = vmatpush.bf16.msra.mxu1 %v16762_v22  ;;  %v16730_v9 = vor.u32 %v19588_v19, %v16729_v60  ;;  %v8106_v38 = vadd.f32 %v8105_v56, %v8092_v61  ;;  %v19743_v22 = vld [vmem:[#allocation11 + $0x744] sm:$0xf]  ;;  %v19568_v60 = vld [vmem:[#allocation11 + $0x1cc] sm:$0xf]  ;;  %v17849_v47 = vld [vmem:[#allocation11 + $0xb08] sm:$0xf] }
 0x63b   :  { %11472 = vmatpush.bf16.msrb.mxu3 %v18290_v54  ;;  %v17465_v54 = vld [vmem:[#allocation11 + $0x808] sm:$0xf]  ;;  %v16667_v19 = vld [vmem:[#allocation11 + $0x1e8] sm:$0xf0]  ;;  %v19735_v61 = vld [vmem:[#allocation11 + $0x704] sm:$0xf] }
 0x63c   :  { %v8258_v42 = vmax.f32 %v8106_v38, 0.0  ;;  %v17466_v63 = vor.u32 %v19772_v46, %v17465_v54  ;;  %v16670_v45 = vor.u32 %v19568_v60, %v16667_v19  ;;  %v17817_v38 = vld [vmem:[#allocation11 + $0xac8] sm:$0xf]  ;;  %v19895_v54 = vld [vmem:[#allocation11 + $0xc04] sm:$0xf]  ;;  %v21027_v60 = vpop.f32.mrf.mxu2 }
 0x63d   :  { %11600 = vmatpush.bf16.msra.mxu0 %v16442_v1  ;;  %v17562_v1 = vor.u32 %v19796_v25, %v17561_v24  ;;  %v18134_v24 = vor.u32 %v19935_v32, %v18131_v53  ;;  %v19927_v25 = vld [vmem:[#allocation11 + $0xd04] sm:$0xf]  ;;  %v21024_v4 = vpop.f32.mrf.mxu1  ;;  %v19844_v32 = vld [vmem:[#allocation11 + $0xa64] sm:$0xf0]  ;;  %v4747_v53 = vperm.slane %v20923_v37, 6 }
 0x63e   :  { %11613 = vmatpush.bf16.msra.mxu1 %v16730_v9  ;;  %v21016_v5 = vpack.c.bf16 %v8258_v42, %v8250_v35  ;;  %v17331_v9 = vld [vmem:[#allocation11 + $0x720] sm:$0xf0]  ;;  %v21020_v35 = vpop.f32.mrf.mxu0  ;;  %v18070_v42 = vor.u32 %v19919_v49, %v18067_v14  ;;  %v19536_v46 = vld [vmem:[#allocation11 + $0xcc] sm:$0xf]  ;;  %v19700_v37 = vld [vmem:[#allocation11 + $0x5e4] sm:$0xf0] }
 0x63f   :  { %11473 = vmatpush.bf16.msrb.mxu3 %v18258_v59  ;;  %v19868_v59 = vld [vmem:[#allocation11 + $0xb24] sm:$0xf0]  ;;  %v17334_v56 = vor.u32 %v19735_v61, %v17331_v9  ;;  %v19703_v61 = vld [vmem:[#allocation11 + $0x604] sm:$0xf]  ;;  %v4763_v2 = vperm.slane %v4747_v53, 0 }
 0x640   :  { %11601 = vmatmul.bf16.vlgmr.msra.gmra.mxu0 %v20944_v21  ;;  %11461 = vmatmul.bf16.vlgmr.msrb.gmra.mxu2 %v21016_v5  ;;  %v17203_v9 = vld [vmem:[#allocation11 + $0x620] sm:$0xf0] }
 0x641   :  { %11649 = vmatpush.bf16.msrb.mxu0 %v17690_v17  ;;  %v18195_v17 = vld [vmem:[#allocation11 + $0xde0] sm:$0xf0] }
 0x642   :  { %v18198_v0 = vor.u32 %v19951_v48, %v18195_v17  ;;  %11614 = vmatpush.bf16.msra.mxu1 %v16698_v62  ;;  %v17850_v48 = vor.u32 %v19868_v59, %v17849_v47  ;;  %v19860_v17 = vld [vmem:[#allocation11 + $0xae4] sm:$0xf0] }
 0x643   :  { %11474 = vmatpush.bf16.msrb.mxu3 %v18226_v12  ;;  %v17299_v12 = vld [vmem:[#allocation11 + $0x6e0] sm:$0xf0]  ;;  %v17818_v62 = vor.u32 %v19860_v17, %v17817_v38 }
 0x644   :  { %11565 = vmatpush.bf16.msrb.mxu2 %v18198_v0  ;;  %v17302_v27 = vor.u32 %v19727_v3, %v17299_v12  ;;  %v18035_v0 = vld [vmem:[#allocation11 + $0xca0] sm:$0xf0] }
 0x645   :  { %11650 = vmatpush.bf16.msrb.mxu0 %v17658_v28  ;;  %v19943_v28 = vld [vmem:[#allocation11 + $0xd84] sm:$0xf]  ;;  %11615 = vmatmul.bf16.vlgmr.msra.gmra.mxu1 %v20855_v15  ;;  %v18038_v7 = vor.u32 %v19911_v55, %v18035_v0  ;;  %v8133_v3 = vpop.f32.mrf.mxu1  ;;  %v16475_v55 = vld [vmem:[#allocation11 + $0x68] sm:$0xf0] }
 0x646   :  { %11663 = vmatpush.bf16.msrb.mxu1 %v17946_v18  ;;  %v18166_v58 = vor.u32 %v19943_v28, %v18163_v10  ;;  %v17785_v18 = vld [vmem:[#allocation11 + $0xa88] sm:$0xf]  ;;  %v19719_v10 = vld [vmem:[#allocation11 + $0x684] sm:$0xf]  ;;  %v8119_v47 = vpop.f32.mrf.mxu0 }
 0x647   :  { %11523 = vmatpush.bf16.msra.mxu3 %v17430_v30  ;;  %v19852_v28 = vld [vmem:[#allocation11 + $0xaa4] sm:$0xf0]  ;;  %v17267_v30 = vld [vmem:[#allocation11 + $0x6a0] sm:$0xf0]  ;;  %v8120_v0 = vadd.f32 %v8119_v47, %v4763_v2 }
 0x648   :  { %11566 = vmatpush.bf16.msrb.mxu2 %v18166_v58  ;;  %v17786_v8 = vor.u32 %v19852_v28, %v17785_v18  ;;  %v18003_v58 = vld [vmem:[#allocation11 + $0xc60] sm:$0xf0]  ;;  %v17049_v47 = vld [vmem:[#allocation11 + $0x4c8] sm:$0xf] }
 0x649   :  { %11651 = vmatpush.bf16.msrb.mxu0 %v17626_v36  ;;  %v17914_v36 = vor.u32 %v19884_v52, %v17913_v44  ;;  %v17270_v44 = vor.u32 %v19719_v10, %v17267_v30  ;;  %v19544_v52 = vld [vmem:[#allocation11 + $0x10c] sm:$0xf]  ;;  %v17113_v10 = vld [vmem:[#allocation11 + $0x548] sm:$0xf]  ;;  %v8147_v30 = vpop.f32.mrf.mxu2 }
 0x64b   :  { %11524 = vmatpush.bf16.msra.mxu3 %v17398_v11  ;;  %11664 = vmatpush.bf16.msrb.mxu1 %v17914_v36  ;;  %v19903_v11 = vld [vmem:[#allocation11 + $0xc44] sm:$0xf]  ;;  %v17753_v36 = vld [vmem:[#allocation11 + $0xa48] sm:$0xf] }
 0x64c   :  { %11567 = vmatpush.bf16.msrb.mxu2 %v18134_v24  ;;  %v18006_v19 = vor.u32 %v19903_v11, %v18003_v58  ;;  %v17971_v24 = vld [vmem:[#allocation11 + $0xc20] sm:$0xf0]  ;;  %v16443_v11 = vld [vmem:[#allocation11 + $0x28] sm:$0xf0]  ;;  %v8134_v58 = vadd.f32 %v8133_v3, %v8120_v0  ;;  %v19660_v3 = vld [vmem:[#allocation11 + $0x4a4] sm:$0xf0] }
 0x64d   :  { %11652 = vmatpush.bf16.msrb.mxu0 %v17594_v16  ;;  %v17366_v16 = vor.u32 %v19743_v22, %v17363_v57  ;;  %v16539_v22 = vld [vmem:[#allocation11 + $0xe8] sm:$0xf0]  ;;  %v17238_v57 = vor.u32 %v19711_v41, %v17235_v6  ;;  %v17974_v49 = vor.u32 %v19895_v54, %v17971_v24  ;;  %v17081_v6 = vld [vmem:[#allocation11 + $0x508] sm:$0xf]  ;;  %v8187_v54 = vpop.f32.mrf.mxu1 }
 0x64e   :  { %v16542_v59 = vor.u32 %v19536_v46, %v16539_v22  ;;  %v19676_v22 = vld [vmem:[#allocation11 + $0x524] sm:$0xf0] }
 0x64f   :  { %11525 = vmatpush.bf16.msra.mxu3 %v17366_v16  ;;  %11665 = vmatpush.bf16.msrb.mxu1 %v17882_v23  ;;  %v17754_v16 = vor.u32 %v19844_v32, %v17753_v36  ;;  %v17721_v23 = vld [vmem:[#allocation11 + $0xa08] sm:$0xf]  ;;  %v19824_v36 = vld [vmem:[#allocation11 + $0x9cc] sm:$0xf] }
 0x650   :  { %11517 = vmatmul.bf16.vlgmr.msra.gmra.mxu2 %v20967_v34  ;;  %v17691_v32 = vld [vmem:[#allocation11 + $0x9e8] sm:$0xf0] }
 0x651   :  { %11653 = vmatpush.bf16.msrb.mxu0 %v17562_v1  ;;  %v18102_v1 = vor.u32 %v19927_v25, %v18099_v20  ;;  %v19836_v25 = vld [vmem:[#allocation11 + $0xa24] sm:$0xf0]  ;;  %v19632_v20 = vld [vmem:[#allocation11 + $0x3cc] sm:$0xf] }
 0x652   :  { %v17722_v14 = vor.u32 %v19836_v25, %v17721_v23  ;;  %v17694_v23 = vor.u32 %v19824_v36, %v17691_v32  ;;  %v19816_v25 = vld [vmem:[#allocation11 + $0x98c] sm:$0xf] }
 0x653   :  { %11526 = vmatpush.bf16.msra.mxu3 %v17334_v56  ;;  %11568 = vmatpush.bf16.msrb.mxu2 %v18102_v1  ;;  %v16507_v56 = vld [vmem:[#allocation11 + $0xa8] sm:$0xf0]  ;;  %v17206_v1 = vor.u32 %v19703_v61, %v17203_v9 }
 0x654   :  { %11666 = vmatpush.bf16.msrb.mxu1 %v17850_v48  ;;  %v8159_v48 = vpop.f32.mrf.mxu3  ;;  %v16510_v12 = vor.u32 %v19528_v51, %v16507_v56  ;;  %v19600_v61 = vld [vmem:[#allocation11 + $0x2cc] sm:$0xf] }
 0x655   :  { %11654 = vmatpush.bf16.msrb.mxu0 %v17530_v39  ;;  %v16606_v39 = vor.u32 %v19552_v31, %v16603_v43  ;;  %v19692_v31 = vld [vmem:[#allocation11 + $0x5a4] sm:$0xf0]  ;;  %v19624_v43 = vld [vmem:[#allocation11 + $0x38c] sm:$0xf] }
 0x656   :  { %v16795_v9 = vld [vmem:[#allocation11 + $0x2e8] sm:$0xf0] }
 0x657   :  { %11527 = vmatpush.bf16.msra.mxu3 %v17302_v27  ;;  %11569 = vmatpush.bf16.msrb.mxu2 %v18070_v42  ;;  %v16891_v27 = vld [vmem:[#allocation11 + $0x3a8] sm:$0xf0]  ;;  %v8118_v42 = vadd.f32 %v21020_v35, %v4763_v2 }
 0x658   :  { %11667 = vmatpush.bf16.msrb.mxu1 %v17818_v62  ;;  %v19520_v62 = vld [vmem:[#allocation11 + $0x4c] sm:$0xf]  ;;  %v16894_v28 = vor.u32 %v19624_v43, %v16891_v27 }
 0x659   :  { %11655 = vmatpush.bf16.msrb.mxu0 %v17498_v50  ;;  %v16574_v50 = vor.u32 %v19544_v52, %v16571_v26  ;;  %v19684_v52 = vld [vmem:[#allocation11 + $0x564] sm:$0xf0]  ;;  %v19616_v26 = vld [vmem:[#allocation11 + $0x34c] sm:$0xf] }
 0x65a   :  { %v19512_v35 = vld [vmem:[#allocation11 + $0xc] sm:$0xf] }
 0x65b   :  { %11528 = vmatpush.bf16.msra.mxu3 %v17270_v44  ;;  %11570 = vmatpush.bf16.msrb.mxu2 %v18038_v7  ;;  %v16478_v44 = vor.u32 %v19520_v62, %v16475_v55  ;;  %v16859_v7 = vld [vmem:[#allocation11 + $0x368] sm:$0xf0] }
 0x65c   :  { %11668 = vmatpush.bf16.msrb.mxu1 %v17786_v8  ;;  %v8132_v8 = vadd.f32 %v21024_v4, %v8118_v42  ;;  %v16862_v41 = vor.u32 %v19616_v26, %v16859_v7  ;;  %v8161_v46 = vpop.f32.mrf.mxu3  ;;  %v16446_v4 = vor.u32 %v19512_v35, %v16443_v11  ;;  %v8189_v42 = vpop.f32.mrf.mxu1  ;;  %v19800_v62 = vld [vmem:[#allocation11 + $0x90c] sm:$0xf] }
 0x65d   :  { %11656 = vmatpush.bf16.msrb.mxu0 %v17466_v63  ;;  %v17177_v63 = vld [vmem:[#allocation11 + $0x5c8] sm:$0xf]  ;;  %v17595_v55 = vld [vmem:[#allocation11 + $0x928] sm:$0xf0] }
 0x65e   :  { %v17178_v38 = vor.u32 %v19700_v37, %v17177_v63  ;;  %v8146_v53 = vadd.f32 %v21027_v60, %v8132_v8  ;;  %v17659_v63 = vld [vmem:[#allocation11 + $0x9a8] sm:$0xf0]  ;;  %v17082_v60 = vor.u32 %v19676_v22, %v17081_v6  ;;  %v17598_v26 = vor.u32 %v19800_v62, %v17595_v55  ;;  %v20015_v22 = vld [vmem:[#allocation11 + $0xfc4] sm:$0xf] }
 0x65f   :  { %11529 = vmatpush.bf16.msra.mxu3 %v17238_v57  ;;  %11571 = vmatpush.bf16.msrb.mxu2 %v18006_v19  ;;  %v19608_v57 = vld [vmem:[#allocation11 + $0x30c] sm:$0xf]  ;;  %v17662_v51 = vor.u32 %v19816_v25, %v17659_v63 }
 0x660   :  { %11657 = vmatmul.bf16.vlgmr.msrb.gmra.mxu0 %v20974_v13  ;;  %11669 = vmatpush.bf16.msrb.mxu1 %v17754_v16  ;;  %v16827_v19 = vld [vmem:[#allocation11 + $0x328] sm:$0xf0]  ;;  %v8148_v16 = vadd.f32 %v8147_v30, %v8134_v58  ;;  %v8160_v24 = vadd.f32 %v8159_v48, %v8146_v53  ;;  %v19652_v30 = vld [vmem:[#allocation11 + $0x464] sm:$0xf0] }
 0x661   :  { %11705 = vmatpush.bf16.msra.mxu0 %v16670_v45  ;;  %v16923_v45 = vld [vmem:[#allocation11 + $0x3e8] sm:$0xf0]  ;;  %v16953_v53 = vld [vmem:[#allocation11 + $0x408] sm:$0xf] }
 0x662   :  { %v16926_v17 = vor.u32 %v19632_v20, %v16923_v45  ;;  %v8162_v37 = vadd.f32 %v8161_v46, %v8148_v16  ;;  %v16830_v20 = vor.u32 %v19608_v57, %v16827_v19  ;;  %v19668_v45 = vld [vmem:[#allocation11 + $0x4e4] sm:$0xf0]  ;;  %v17627_v48 = vld [vmem:[#allocation11 + $0x968] sm:$0xf0]  ;;  %v18451_v16 = vld [vmem:[#allocation11 + $0xfe0] sm:$0xf0] }
 0x663   :  { %11530 = vmatpush.bf16.msra.mxu3 %v17206_v1  ;;  %11572 = vmatpush.bf16.msrb.mxu2 %v17974_v49  ;;  %v19808_v1 = vld [vmem:[#allocation11 + $0x94c] sm:$0xf]  ;;  %v18201_v57 = vld [vmem:[#allocation11 + $0xdc8] sm:$0xf] }
 0x664   :  { %11670 = vmatpush.bf16.msrb.mxu1 %v17722_v14  ;;  %v17050_v14 = vor.u32 %v19668_v45, %v17049_v47  ;;  %v17630_v27 = vor.u32 %v19808_v1, %v17627_v48  ;;  %v19792_v35 = vld [vmem:[#allocation11 + $0x8cc] sm:$0xf]  ;;  %v19956_v19 = vld [vmem:[#allocation11 + $0xde4] sm:$0xf0]  ;;  %v18419_v1 = vld [vmem:[#allocation11 + $0xfa0] sm:$0xf0] }
 0x665   :  { %11706 = vmatpush.bf16.msra.mxu0 %v16638_v33  ;;  %v17145_v33 = vld [vmem:[#allocation11 + $0x588] sm:$0xf]  ;;  %v17563_v11 = vld [vmem:[#allocation11 + $0x8e8] sm:$0xf0] }
 0x666   :  { %v17146_v18 = vor.u32 %v19692_v31, %v17145_v33  ;;  %11573 = vmatmul.bf16.vlgmr.msrb.gmra.mxu2 %v21016_v5  ;;  %v16763_v31 = vld [vmem:[#allocation11 + $0x2a8] sm:$0xf0] }
 0x667   :  { %11621 = vmatpush.bf16.msra.mxu2 %v17178_v38  ;;  %11671 = vmatmul.bf16.vlgmr.msrb.gmra.mxu1 %v21004_v29  ;;  %v16798_v38 = vor.u32 %v19600_v61, %v16795_v9  ;;  %v19576_v6 = vld [vmem:[#allocation11 + $0x20c] sm:$0xf]  ;;  %v18454_v61 = vor.u32 %v20015_v22, %v18451_v16  ;;  %v19565_v16 = vld [vmem:[#allocation11 + $0x1ac] sm:$0xf0] }
 0x668   :  { %11719 = vmatpush.bf16.msra.mxu1 %v16926_v17  ;;  %v17017_v17 = vld [vmem:[#allocation11 + $0x488] sm:$0xf]  ;;  %v19784_v47 = vld [vmem:[#allocation11 + $0x88c] sm:$0xf] }
 0x669   :  { %11707 = vmatpush.bf16.msra.mxu0 %v16606_v39  ;;  %v8173_v39 = vpop.f32.mrf.mxu0  ;;  %v17018_v0 = vor.u32 %v19660_v3, %v17017_v17  ;;  %v19880_v48 = vld [vmem:[#allocation11 + $0xb8c] sm:$0xf] }
 0x66a   :  { %v8174_v2 = vadd.f32 %v8173_v39, %v8160_v24  ;;  %v19584_v39 = vld [vmem:[#allocation11 + $0x24c] sm:$0xf] }
 0x66b   :  { %11622 = vmatpush.bf16.msra.mxu2 %v17146_v18  ;;  %v19888_v24 = vld [vmem:[#allocation11 + $0xbcc] sm:$0xf] }
 0x66c   :  { %11720 = vmatpush.bf16.msra.mxu1 %v16894_v28  ;;  %v8188_v43 = vadd.f32 %v8187_v54, %v8174_v2  ;;  %v16699_v54 = vld [vmem:[#allocation11 + $0x228] sm:$0xf0]  ;;  %v20007_v2 = vld [vmem:[#allocation11 + $0xf84] sm:$0xf] }
 0x66d   :  { %11708 = vmatpush.bf16.msra.mxu0 %v16574_v50  ;;  %v17114_v50 = vor.u32 %v19684_v52, %v17113_v10  ;;  %v8215_v33 = vpop.f32.mrf.mxu3  ;;  %v16985_v10 = vld [vmem:[#allocation11 + $0x448] sm:$0xf]  ;;  %v19776_v17 = vld [vmem:[#allocation11 + $0x84c] sm:$0xf]  ;;  %v18422_v3 = vor.u32 %v20007_v2, %v18419_v1  ;;  %v19557_v2 = vld [vmem:[#allocation11 + $0x16c] sm:$0xf0] }
 0x66e   :  { %v16986_v8 = vor.u32 %v19652_v30, %v16985_v10  ;;  %v19872_v62 = vld [vmem:[#allocation11 + $0xb4c] sm:$0xf]  ;;  %v19991_v30 = vld [vmem:[#allocation11 + $0xf04] sm:$0xf] }
 0x66f   :  { %11623 = vmatpush.bf16.msra.mxu2 %v17114_v50  ;;  %v17883_v55 = vld [vmem:[#allocation11 + $0xb68] sm:$0xf0] }
 0x670   :  { %11721 = vmatpush.bf16.msra.mxu1 %v16862_v41  ;;  %v19644_v41 = vld [vmem:[#allocation11 + $0x424] sm:$0xf0]  ;;  %v17467_v10 = vld [vmem:[#allocation11 + $0x828] sm:$0xf0] }
 0x671   :  { %11709 = vmatpush.bf16.msra.mxu0 %v16542_v59  ;;  %v8201_v59 = vpop.f32.mrf.mxu2  ;;  %v8175_v56 = vpop.f32.mrf.mxu0  ;;  %v19856_v22 = vld [vmem:[#allocation11 + $0xacc] sm:$0xf] }
 0x672   :  { %v8176_v49 = vadd.f32 %v8175_v56, %v8162_v37  ;;  %v8202_v52 = vadd.f32 %v8201_v59, %v8188_v43  ;;  %v16954_v37 = vor.u32 %v19644_v41, %v16953_v53  ;;  %v17531_v59 = vld [vmem:[#allocation11 + $0x8a8] sm:$0xf0]  ;;  %v19948_v56 = vld [vmem:[#allocation11 + $0xda4] sm:$0xf0] }
 0x673   :  { %11624 = vmatpush.bf16.msra.mxu2 %v17082_v60  ;;  %v16702_v60 = vor.u32 %v19576_v6, %v16699_v54  ;;  %v18137_v43 = vld [vmem:[#allocation11 + $0xd48] sm:$0xf]  ;;  %v19983_v6 = vld [vmem:[#allocation11 + $0xec4] sm:$0xf] }
 0x674   :  { %11722 = vmatpush.bf16.msra.mxu1 %v16830_v20  ;;  %v8190_v28 = vadd.f32 %v8189_v42, %v8176_v49  ;;  %v8216_v58 = vadd.f32 %v8215_v33, %v8202_v52  ;;  %v18202_v20 = vor.u32 %v19956_v19, %v18201_v57  ;;  %v17915_v49 = vld [vmem:[#allocation11 + $0xba8] sm:$0xf0]  ;;  %v18387_v42 = vld [vmem:[#allocation11 + $0xf60] sm:$0xf0]  ;;  %v17886_v52 = vor.u32 %v19872_v62, %v17883_v55  ;;  %v18073_v54 = vld [vmem:[#allocation11 + $0xcc8] sm:$0xf] }
 0x675   :  { %11710 = vmatpush.bf16.msra.mxu0 %v16510_v12  ;;  %v19592_v12 = vld [vmem:[#allocation11 + $0x28c] sm:$0xf]  ;;  %v8217_v50 = vpop.f32.mrf.mxu3  ;;  %v16641_v19 = vld [vmem:[#allocation11 + $0x190] sm:$0xf] }
 0x676   :  { %v16766_v18 = vor.u32 %v19592_v12, %v16763_v31  ;;  %v8251_v25 = vmax.f32 %v8216_v58, 0.0  ;;  %v17499_v33 = vld [vmem:[#allocation11 + $0x868] sm:$0xf0]  ;;  %v17918_v12 = vor.u32 %v19880_v48, %v17915_v49  ;;  %v19999_v31 = vld [vmem:[#allocation11 + $0xf44] sm:$0xf] }
 0x677   :  { %11625 = vmatpush.bf16.msra.mxu2 %v17050_v14  ;;  %v17534_v14 = vor.u32 %v19784_v47, %v17531_v59  ;;  %v17851_v58 = vld [vmem:[#allocation11 + $0xb28] sm:$0xf0]  ;;  %v18291_v47 = vld [vmem:[#allocation11 + $0xea0] sm:$0xf0]  ;;  %v18009_v49 = vld [vmem:[#allocation11 + $0xc48] sm:$0xf] }
 0x678   :  { %11723 = vmatpush.bf16.msra.mxu1 %v16798_v38  ;;  %v17819_v57 = vld [vmem:[#allocation11 + $0xae8] sm:$0xf0]  ;;  %v19967_v48 = vld [vmem:[#allocation11 + $0xe44] sm:$0xf] }
 0x679   :  { %11711 = vmatpush.bf16.msra.mxu0 %v16478_v44  ;;  %v16731_v44 = vld [vmem:[#allocation11 + $0x268] sm:$0xf0]  ;;  %v8203_v7 = vpop.f32.mrf.mxu2 }
 0x67a   :  { %v8204_v36 = vadd.f32 %v8203_v7, %v8190_v28  ;;  %v16734_v32 = vor.u32 %v19584_v39, %v16731_v44  ;;  %v18105_v39 = vld [vmem:[#allocation11 + $0xd08] sm:$0xf]  ;;  %v18390_v44 = vor.u32 %v19999_v31, %v18387_v42  ;;  %v16673_v7 = vld [vmem:[#allocation11 + $0x1d0] sm:$0xf]  ;;  %v19848_v59 = vld [vmem:[#allocation11 + $0xa8c] sm:$0xf] }
 0x67b   :  { %11626 = vmatpush.bf16.msra.mxu2 %v17018_v0  ;;  %v17502_v0 = vor.u32 %v19776_v17, %v17499_v33  ;;  %v18259_v17 = vld [vmem:[#allocation11 + $0xe60] sm:$0xf0]  ;;  %v19840_v33 = vld [vmem:[#allocation11 + $0xa4c] sm:$0xf]  ;;  %v19549_v31 = vld [vmem:[#allocation11 + $0x12c] sm:$0xf0] }
 0x67c   :  { %11724 = vmatpush.bf16.msra.mxu1 %v16766_v18  ;;  %v8218_v46 = vadd.f32 %v8217_v50, %v8204_v36  ;;  %v19768_v18 = vld [vmem:[#allocation11 + $0x80c] sm:$0xf]  ;;  %v18227_v42 = vld [vmem:[#allocation11 + $0xe20] sm:$0xf0]  ;;  %v18262_v62 = vor.u32 %v19967_v48, %v18259_v17  ;;  %v16449_v48 = vld [vmem:[#allocation11 + $0x10] sm:$0xf] }
 0x67d   :  { %11712 = vmatpush.bf16.msra.mxu0 %v16446_v4  ;;  %v17566_v4 = vor.u32 %v19792_v35, %v17563_v11  ;;  %v18355_v35 = vld [vmem:[#allocation11 + $0xf20] sm:$0xf0]  ;;  %v19864_v11 = vld [vmem:[#allocation11 + $0xb0c] sm:$0xf]  ;;  %v17470_v36 = vor.u32 %v19768_v18, %v17467_v10  ;;  %v19900_v18 = vld [vmem:[#allocation11 + $0xc24] sm:$0xf0] }
 0x67e   :  { %v8259_v63 = vmax.f32 %v8218_v46, 0.0  ;;  %v18358_v50 = vor.u32 %v19991_v30, %v18355_v35  ;;  %v17854_v41 = vor.u32 %v19864_v11, %v17851_v58  ;;  %v19924_v46 = vld [vmem:[#allocation11 + $0xce4] sm:$0xf0]  ;;  %v17723_v30 = vld [vmem:[#allocation11 + $0xa28] sm:$0xf0] }
 0x67f   :  { %11627 = vmatpush.bf16.msra.mxu2 %v16986_v8  ;;  %v19573_v8 = vld [vmem:[#allocation11 + $0x1ec] sm:$0xf0]  ;;  %v17179_v35 = vld [vmem:[#allocation11 + $0x5e8] sm:$0xf0]  ;;  %v17337_v17 = vld [vmem:[#allocation11 + $0x708] sm:$0xf] }
 0x680   :  { %11713 = vmatmul.bf16.vlgmr.msra.gmra.mxu0 %v20944_v21  ;;  %11725 = vmatpush.bf16.msra.mxu1 %v16734_v32  ;;  %v21035_v45 = vpack.c.bf16 %v8259_v63, %v8251_v25  ;;  %v16674_v53 = vor.u32 %v19573_v8, %v16673_v7  ;;  %v17822_v25 = vor.u32 %v19856_v22, %v17819_v57  ;;  %v19975_v63 = vld [vmem:[#allocation11 + $0xe84] sm:$0xf]  ;;  %v19696_v7 = vld [vmem:[#allocation11 + $0x5cc] sm:$0xf]  ;;  %v16929_v11 = vld [vmem:[#allocation11 + $0x3d0] sm:$0xf] }
 0x681   :  { %11761 = vmatpush.bf16.msrb.mxu0 %v17694_v23  ;;  %v17947_v23 = vld [vmem:[#allocation11 + $0xbe8] sm:$0xf0]  ;;  %v19637_v58 = vld [vmem:[#allocation11 + $0x3ec] sm:$0xf0]  ;;  %v19756_v22 = vld [vmem:[#allocation11 + $0x7a4] sm:$0xf0] }
 0x682   :  { %v17950_v9 = vor.u32 %v19888_v24, %v17947_v23  ;;  %11475 = vmatmul.bf16.vlgmr.msrb.gmra.mxu3 %v21035_v45  ;;  %v18074_v24 = vor.u32 %v19924_v46, %v18073_v54  ;;  %v17182_v54 = vor.u32 %v19696_v7, %v17179_v35  ;;  %v16930_v46 = vor.u32 %v19637_v58, %v16929_v11  ;;  %v19688_v57 = vld [vmem:[#allocation11 + $0x58c] sm:$0xf]  ;;  %v17665_v7 = vld [vmem:[#allocation11 + $0x990] sm:$0xf] }
 0x683   :  { %11628 = vmatpush.bf16.msra.mxu2 %v16954_v37  ;;  %11579 = vmatpush.bf16.msrb.mxu3 %v18454_v61  ;;  %v18041_v37 = vld [vmem:[#allocation11 + $0xc88] sm:$0xf]  ;;  %v17787_v61 = vld [vmem:[#allocation11 + $0xaa8] sm:$0xf0] }
 0x684   :  { %11726 = vmatpush.bf16.msra.mxu1 %v16702_v60  ;;  %v19916_v60 = vld [vmem:[#allocation11 + $0xca4] sm:$0xf0]  ;;  %v17790_v1 = vor.u32 %v19848_v59, %v17787_v61  ;;  %v19680_v61 = vld [vmem:[#allocation11 + $0x54c] sm:$0xf] }
 0x685   :  { %11762 = vmatpush.bf16.msrb.mxu0 %v17662_v51  ;;  %v18169_v51 = vld [vmem:[#allocation11 + $0xd88] sm:$0xf] }
 0x686   :  { %v18170_v38 = vor.u32 %v19948_v56, %v18169_v51  ;;  %11629 = vmatmul.bf16.vlgmr.msra.gmra.mxu2 %v20967_v34  ;;  %v18042_v51 = vor.u32 %v19916_v60, %v18041_v37  ;;  %v18294_v56 = vor.u32 %v19975_v63, %v18291_v47  ;;  %v16481_v63 = vld [vmem:[#allocation11 + $0x50] sm:$0xf]  ;;  %v17369_v47 = vld [vmem:[#allocation11 + $0x748] sm:$0xf] }
 0x687   :  { %11677 = vmatpush.bf16.msrb.mxu2 %v18202_v20  ;;  %11727 = vmatmul.bf16.vlgmr.msra.gmra.mxu1 %v20855_v15  ;;  %v16642_v20 = vor.u32 %v19565_v16, %v16641_v19  ;;  %v17147_v19 = vld [vmem:[#allocation11 + $0x5a8] sm:$0xf0]  ;;  %v16897_v16 = vld [vmem:[#allocation11 + $0x390] sm:$0xf]  ;;  %v19748_v59 = vld [vmem:[#allocation11 + $0x764] sm:$0xf0] }
 0x688   :  { %11775 = vmatpush.bf16.msrb.mxu1 %v17950_v9  ;;  %11580 = vmatpush.bf16.msrb.mxu3 %v18422_v3  ;;  %v16609_v9 = vld [vmem:[#allocation11 + $0x150] sm:$0xf]  ;;  %v17755_v3 = vld [vmem:[#allocation11 + $0xa68] sm:$0xf0]  ;;  %v17150_v60 = vor.u32 %v19688_v57, %v17147_v19 }
 0x689   :  { %11763 = vmatpush.bf16.msrb.mxu0 %v17630_v27  ;;  %v19940_v27 = vld [vmem:[#allocation11 + $0xd64] sm:$0xf0]  ;;  %v17758_v55 = vor.u32 %v19840_v33, %v17755_v3  ;;  %v19525_v37 = vld [vmem:[#allocation11 + $0x6c] sm:$0xf0]  ;;  %v19672_v3 = vld [vmem:[#allocation11 + $0x50c] sm:$0xf] }
 0x68a   :  { %v18138_v28 = vor.u32 %v19940_v27, %v18137_v43  ;;  %v19959_v27 = vld [vmem:[#allocation11 + $0xe04] sm:$0xf]  ;;  %v19740_v33 = vld [vmem:[#allocation11 + $0x724] sm:$0xf0] }
 0x68b   :  { %11678 = vmatpush.bf16.msrb.mxu2 %v18170_v38  ;;  %v16610_v38 = vor.u32 %v19557_v2, %v16609_v9  ;;  %v17115_v9 = vld [vmem:[#allocation11 + $0x568] sm:$0xf0]  ;;  %v16865_v2 = vld [vmem:[#allocation11 + $0x350] sm:$0xf] }
 0x68c   :  { %11776 = vmatpush.bf16.msrb.mxu1 %v17918_v12  ;;  %11581 = vmatpush.bf16.msrb.mxu3 %v18390_v44  ;;  %v16577_v12 = vld [vmem:[#allocation11 + $0x110] sm:$0xf] }
 0x68d   :  { %11764 = vmatpush.bf16.msrb.mxu0 %v17598_v26  ;;  %v19932_v26 = vld [vmem:[#allocation11 + $0xd24] sm:$0xf0]  ;;  %v16578_v10 = vor.u32 %v19549_v31, %v16577_v12  ;;  %v19541_v44 = vld [vmem:[#allocation11 + $0xec] sm:$0xf0]  ;;  %v17083_v12 = vld [vmem:[#allocation11 + $0x528] sm:$0xf0] }
 0x68e   :  { %v18106_v32 = vor.u32 %v19932_v26, %v18105_v39  ;;  %v16545_v39 = vld [vmem:[#allocation11 + $0xd0] sm:$0xf]  ;;  %v19764_v26 = vld [vmem:[#allocation11 + $0x7e4] sm:$0xf0] }
 0x68f   :  { %11679 = vmatpush.bf16.msrb.mxu2 %v18138_v28  ;;  %v19832_v28 = vld [vmem:[#allocation11 + $0xa0c] sm:$0xf]  ;;  %v16833_v31 = vld [vmem:[#allocation11 + $0x310] sm:$0xf] }
 0x690   :  { %11777 = vmatpush.bf16.msrb.mxu1 %v17886_v52  ;;  %11582 = vmatpush.bf16.msrb.mxu3 %v18358_v50  ;;  %v17433_v52 = vld [vmem:[#allocation11 + $0x7c8] sm:$0xf] }
 0x691   :  { %11765 = vmatpush.bf16.msrb.mxu0 %v17566_v4  ;;  %v18323_v4 = vld [vmem:[#allocation11 + $0xee0] sm:$0xf0]  ;;  %v17434_v50 = vor.u32 %v19764_v26, %v17433_v52  ;;  %v16801_v52 = vld [vmem:[#allocation11 + $0x2d0] sm:$0xf] }
 0x692   :  { %v18326_v23 = vor.u32 %v19983_v6, %v18323_v4  ;;  %11531 = vmatmul.bf16.vlgmr.msra.gmra.mxu3 %v21002_v40  ;;  %v19533_v6 = vld [vmem:[#allocation11 + $0xac] sm:$0xf0]  ;;  %v17401_v4 = vld [vmem:[#allocation11 + $0x788] sm:$0xf] }
 0x693   :  { %11680 = vmatpush.bf16.msrb.mxu2 %v18106_v32  ;;  %v17726_v32 = vor.u32 %v19832_v28, %v17723_v30  ;;  %v17305_v28 = vld [vmem:[#allocation11 + $0x6c8] sm:$0xf]  ;;  %v19664_v30 = vld [vmem:[#allocation11 + $0x4cc] sm:$0xf]  ;;  %v19605_v26 = vld [vmem:[#allocation11 + $0x2ec] sm:$0xf0] }
 0x694   :  { %11778 = vmatpush.bf16.msrb.mxu1 %v17854_v41  ;;  %11583 = vmatpush.bf16.msrb.mxu3 %v18326_v23  ;;  %v16513_v41 = vld [vmem:[#allocation11 + $0x90] sm:$0xf]  ;;  %v16802_v58 = vor.u32 %v19605_v26, %v16801_v52  ;;  %v20012_v52 = vld [vmem:[#allocation11 + $0xfa4] sm:$0xf0]  ;;  %v19944_v26 = vld [vmem:[#allocation11 + $0xd8c] sm:$0xf] }
 0x695   :  { %11766 = vmatpush.bf16.msrb.mxu0 %v17534_v14  ;;  %v19908_v14 = vld [vmem:[#allocation11 + $0xc64] sm:$0xf0]  ;;  %v16514_v23 = vor.u32 %v19533_v6, %v16513_v41  ;;  %v17019_v41 = vld [vmem:[#allocation11 + $0x4a8] sm:$0xf0]  ;;  %v16769_v6 = vld [vmem:[#allocation11 + $0x290] sm:$0xf] }
 0x696   :  { %v18010_v43 = vor.u32 %v19908_v14, %v18009_v49  ;;  %v19517_v49 = vld [vmem:[#allocation11 + $0x2c] sm:$0xf0]  ;;  %v17118_v14 = vor.u32 %v19680_v61, %v17115_v9  ;;  %v17209_v61 = vld [vmem:[#allocation11 + $0x608] sm:$0xf] }
 0x697   :  { %11681 = vmatpush.bf16.msrb.mxu2 %v18074_v24  ;;  %v19629_v24 = vld [vmem:[#allocation11 + $0x3ac] sm:$0xf0]  ;;  %v19708_v9 = vld [vmem:[#allocation11 + $0x624] sm:$0xf0] }
 0x698   :  { %11779 = vmatpush.bf16.msrb.mxu1 %v17822_v25  ;;  %11584 = vmatpush.bf16.msrb.mxu3 %v18294_v56  ;;  %v17402_v25 = vor.u32 %v19756_v22, %v17401_v4  ;;  %v16482_v56 = vor.u32 %v19525_v37, %v16481_v63  ;;  %v19813_v4 = vld [vmem:[#allocation11 + $0x96c] sm:$0xf0]  ;;  %v16987_v63 = vld [vmem:[#allocation11 + $0x468] sm:$0xf0] }
 0x699   :  { %11767 = vmatpush.bf16.msrb.mxu0 %v17502_v0  ;;  %v17977_v0 = vld [vmem:[#allocation11 + $0xc08] sm:$0xf]  ;;  %v16737_v37 = vld [vmem:[#allocation11 + $0x250] sm:$0xf] }
 0x69a   :  { %v17978_v8 = vor.u32 %v19900_v18, %v17977_v0  ;;  %v17086_v0 = vor.u32 %v19672_v3, %v17083_v12  ;;  %v20020_v3 = vld [vmem:[#allocation11 + $0xfe4] sm:$0xf0]  ;;  %v19952_v12 = vld [vmem:[#allocation11 + $0xdcc] sm:$0xf] }
 0x69b   :  { %11682 = vmatpush.bf16.msrb.mxu2 %v18042_v51  ;;  %v19621_v51 = vld [vmem:[#allocation11 + $0x36c] sm:$0xf0] }
 0x69c   :  { %11780 = vmatpush.bf16.msrb.mxu1 %v17790_v1  ;;  %11585 = vmatpush.bf16.msrb.mxu3 %v18262_v62  ;;  %v17370_v1 = vor.u32 %v19748_v59, %v17369_v47  ;;  %v16450_v62 = vor.u32 %v19517_v49, %v16449_v48  ;;  %v19805_v47 = vld [vmem:[#allocation11 + $0x92c] sm:$0xf0] }
 0x69d   :  { %11768 = vmatpush.bf16.msrb.mxu0 %v17470_v36  ;;  %v18230_v36 = vor.u32 %v19959_v27, %v18227_v42  ;;  %v17697_v27 = vld [vmem:[#allocation11 + $0x9d0] sm:$0xf] }
 0x69e   :  { %v19829_v42 = vld [vmem:[#allocation11 + $0x9ec] sm:$0xf0] }
 0x69f   :  { %11683 = vmatpush.bf16.msrb.mxu2 %v18010_v43  ;;  %v19613_v43 = vld [vmem:[#allocation11 + $0x32c] sm:$0xf0] }
 0x6a0   :  { %11769 = vmatmul.bf16.vlgmr.msrb.gmra.mxu0 %v20974_v13  ;;  %11781 = vmatpush.bf16.msrb.mxu1 %v17758_v55  ;;  %v17338_v55 = vor.u32 %v19740_v33, %v17337_v17  ;;  %v16834_v18 = vor.u32 %v19613_v43, %v16833_v31  ;;  %v16705_v48 = vld [vmem:[#allocation11 + $0x210] sm:$0xf]  ;;  %v18457_v33 = vld [vmem:[#allocation11 + $0xfc8] sm:$0xf]  ;;  %v17210_v31 = vor.u32 %v19708_v9, %v17209_v61  ;;  %v18203_v43 = vld [vmem:[#allocation11 + $0xde8] sm:$0xf0] }
 0x6a1   :  { %11817 = vmatpush.bf16.msra.mxu0 %v16674_v53  ;;  %v16546_v53 = vor.u32 %v19541_v44, %v16545_v39  ;;  %11586 = vmatpush.bf16.msrb.mxu3 %v18230_v36  ;;  %v17698_v39 = vor.u32 %v19829_v42, %v17697_v27  ;;  %v17051_v44 = vld [vmem:[#allocation11 + $0x4e8] sm:$0xf0]  ;;  %v17273_v36 = vld [vmem:[#allocation11 + $0x688] sm:$0xf]  ;;  %v19797_v17 = vld [vmem:[#allocation11 + $0x8ec] sm:$0xf0] }
 0x6a2   :  { %v17054_v11 = vor.u32 %v19664_v30, %v17051_v44  ;;  %v17953_v27 = vld [vmem:[#allocation11 + $0xbd0] sm:$0xf]  ;;  %v18206_v30 = vor.u32 %v19952_v12, %v18203_v43  ;;  %v18425_v44 = vld [vmem:[#allocation11 + $0xf88] sm:$0xf]  ;;  %v19569_v61 = vld [vmem:[#allocation11 + $0x1d4] sm:$0xf] }
 0x6a3   :  { %11684 = vmatpush.bf16.msrb.mxu2 %v17978_v8  ;;  %v19821_v8 = vld [vmem:[#allocation11 + $0x9ac] sm:$0xf0]  ;;  %v16675_v9 = vld [vmem:[#allocation11 + $0x1f0] sm:$0xf0] }
 0x6a4   :  { %11782 = vmatpush.bf16.msrb.mxu1 %v17726_v32  ;;  %11587 = vmatmul.bf16.vlgmr.msrb.gmra.mxu3 %v21035_v45  ;;  %v19724_v32 = vld [vmem:[#allocation11 + $0x6a4] sm:$0xf0]  ;;  %v19893_v42 = vld [vmem:[#allocation11 + $0xbec] sm:$0xf0]  ;;  %v19561_v12 = vld [vmem:[#allocation11 + $0x194] sm:$0xf] }
 0x6a5   :  { %11818 = vmatpush.bf16.msra.mxu0 %v16642_v20  ;;  %11635 = vmatpush.bf16.msra.mxu3 %v17434_v50  ;;  %v16898_v20 = vor.u32 %v19629_v24, %v16897_v16  ;;  %v17666_v50 = vor.u32 %v19821_v8, %v17665_v7  ;;  %v17274_v22 = vor.u32 %v19724_v32, %v17273_v36  ;;  %v17241_v16 = vld [vmem:[#allocation11 + $0x648] sm:$0xf]  ;;  %v18171_v7 = vld [vmem:[#allocation11 + $0xda8] sm:$0xf0]  ;;  %v17921_v8 = vld [vmem:[#allocation11 + $0xb90] sm:$0xf] }
 0x6a6   :  { %11685 = vmatmul.bf16.vlgmr.msrb.gmra.mxu2 %v21016_v5  ;;  %v19716_v24 = vld [vmem:[#allocation11 + $0x664] sm:$0xf0]  ;;  %v17505_v36 = vld [vmem:[#allocation11 + $0x850] sm:$0xf] }
 0x6a7   :  { %11733 = vmatpush.bf16.msra.mxu2 %v17182_v54  ;;  %11783 = vmatmul.bf16.vlgmr.msrb.gmra.mxu1 %v21004_v29  ;;  %v19597_v54 = vld [vmem:[#allocation11 + $0x2ac] sm:$0xf0]  ;;  %v17242_v59 = vor.u32 %v19716_v24, %v17241_v16 }
 0x6a8   :  { %11831 = vmatpush.bf16.msra.mxu1 %v16930_v46  ;;  %v17633_v46 = vld [vmem:[#allocation11 + $0x950] sm:$0xf]  ;;  %v16770_v19 = vor.u32 %v19597_v54, %v16769_v6  ;;  %v20004_v6 = vld [vmem:[#allocation11 + $0xf64] sm:$0xf0]  ;;  %v19936_v54 = vld [vmem:[#allocation11 + $0xd4c] sm:$0xf] }
 0x6a9   :  { %11819 = vmatpush.bf16.msra.mxu0 %v16610_v38  ;;  %11636 = vmatpush.bf16.msra.mxu3 %v17402_v25  ;;  %v16866_v38 = vor.u32 %v19621_v51, %v16865_v2  ;;  %v17634_v25 = vor.u32 %v19813_v4, %v17633_v46  ;;  %v19781_v32 = vld [vmem:[#allocation11 + $0x86c] sm:$0xf0]  ;;  %v18139_v46 = vld [vmem:[#allocation11 + $0xd68] sm:$0xf0] }
 0x6aa   :  { %v17889_v4 = vld [vmem:[#allocation11 + $0xb50] sm:$0xf] }
 0x6ab   :  { %11734 = vmatpush.bf16.msra.mxu2 %v17150_v60  ;;  %v19589_v60 = vld [vmem:[#allocation11 + $0x26c] sm:$0xf0] }
 0x6ac   :  { %11832 = vmatpush.bf16.msra.mxu1 %v16898_v20  ;;  %v17601_v20 = vld [vmem:[#allocation11 + $0x910] sm:$0xf]  ;;  %v16738_v51 = vor.u32 %v19589_v60, %v16737_v37  ;;  %v19996_v37 = vld [vmem:[#allocation11 + $0xf24] sm:$0xf0]  ;;  %v19928_v60 = vld [vmem:[#allocation11 + $0xd0c] sm:$0xf] }
 0x6ad   :  { %11820 = vmatpush.bf16.msra.mxu0 %v16578_v10  ;;  %11637 = vmatpush.bf16.msra.mxu3 %v17370_v1  ;;  %v19732_v10 = vld [vmem:[#allocation11 + $0x6e4] sm:$0xf0]  ;;  %v16955_v1 = vld [vmem:[#allocation11 + $0x428] sm:$0xf0]  ;;  %v17602_v49 = vor.u32 %v19805_v47, %v17601_v20  ;;  %v17473_v16 = vld [vmem:[#allocation11 + $0x810] sm:$0xf] }
 0x6ae   :  { %v17306_v35 = vor.u32 %v19732_v10, %v17305_v28  ;;  %v17537_v28 = vld [vmem:[#allocation11 + $0x890] sm:$0xf]  ;;  %v18107_v20 = vld [vmem:[#allocation11 + $0xd28] sm:$0xf0] }
 0x6af   :  { %11735 = vmatpush.bf16.msra.mxu2 %v17118_v14  ;;  %v19581_v14 = vld [vmem:[#allocation11 + $0x22c] sm:$0xf0] }
 0x6b0   :  { %11833 = vmatpush.bf16.msra.mxu1 %v16866_v38  ;;  %v17569_v38 = vld [vmem:[#allocation11 + $0x8d0] sm:$0xf] }
 0x6b1   :  { %11821 = vmatpush.bf16.msra.mxu0 %v16546_v53  ;;  %11638 = vmatpush.bf16.msra.mxu3 %v17338_v55  ;;  %v19656_v53 = vld [vmem:[#allocation11 + $0x48c] sm:$0xf]  ;;  %v16706_v55 = vor.u32 %v19581_v14, %v16705_v48  ;;  %v19789_v10 = vld [vmem:[#allocation11 + $0x8ac] sm:$0xf0]  ;;  %v18329_v48 = vld [vmem:[#allocation11 + $0xec8] sm:$0xf] }
 0x6b2   :  { %v17022_v57 = vor.u32 %v19656_v53, %v17019_v41  ;;  %v18174_v53 = vor.u32 %v19944_v26, %v18171_v7  ;;  %v18393_v41 = vld [vmem:[#allocation11 + $0xf48] sm:$0xf]  ;;  %v19773_v24 = vld [vmem:[#allocation11 + $0x82c] sm:$0xf0]  ;;  %v19920_v14 = vld [vmem:[#allocation11 + $0xccc] sm:$0xf] }
 0x6b3   :  { %11736 = vmatpush.bf16.msra.mxu2 %v17086_v0  ;;  %v17570_v0 = vor.u32 %v19797_v17, %v17569_v38  ;;  %v17857_v47 = vld [vmem:[#allocation11 + $0xb10] sm:$0xf]  ;;  %v16678_v38 = vor.u32 %v19569_v61, %v16675_v9  ;;  %v18075_v17 = vld [vmem:[#allocation11 + $0xce8] sm:$0xf0]  ;;  %v19633_v61 = vld [vmem:[#allocation11 + $0x3d4] sm:$0xf] }
 0x6b4   :  { %11834 = vmatpush.bf16.msra.mxu1 %v16834_v18  ;;  %v18458_v18 = vor.u32 %v20020_v3, %v18457_v33  ;;  %v17825_v33 = vld [vmem:[#allocation11 + $0xad0] sm:$0xf]  ;;  %v16931_v9 = vld [vmem:[#allocation11 + $0x3f0] sm:$0xf0] }
 0x6b5   :  { %11822 = vmatpush.bf16.msra.mxu0 %v16514_v23  ;;  %11639 = vmatpush.bf16.msra.mxu3 %v17306_v35  ;;  %v19648_v23 = vld [vmem:[#allocation11 + $0x44c] sm:$0xf]  ;;  %v19885_v35 = vld [vmem:[#allocation11 + $0xbac] sm:$0xf0] }
 0x6b6   :  { %v16990_v2 = vor.u32 %v19648_v23, %v16987_v63  ;;  %v18142_v23 = vor.u32 %v19936_v54, %v18139_v46  ;;  %v18361_v63 = vld [vmem:[#allocation11 + $0xf08] sm:$0xf]  ;;  %v19861_v3 = vld [vmem:[#allocation11 + $0xaec] sm:$0xf0] }
 0x6b7   :  { %11737 = vmatpush.bf16.msra.mxu2 %v17054_v11  ;;  %v17538_v11 = vor.u32 %v19789_v10, %v17537_v28  ;;  %v18043_v28 = vld [vmem:[#allocation11 + $0xca8] sm:$0xf0]  ;;  %v17793_v10 = vld [vmem:[#allocation11 + $0xa90] sm:$0xf]  ;;  %v18233_v54 = vld [vmem:[#allocation11 + $0xe08] sm:$0xf] }
 0x6b8   :  { %11835 = vmatpush.bf16.msra.mxu1 %v16802_v58  ;;  %v18426_v58 = vor.u32 %v20012_v52, %v18425_v44  ;;  %v16611_v44 = vld [vmem:[#allocation11 + $0x170] sm:$0xf0]  ;;  %v19964_v46 = vld [vmem:[#allocation11 + $0xe24] sm:$0xf0] }
 0x6b9   :  { %11823 = vmatpush.bf16.msra.mxu0 %v16482_v56  ;;  %11640 = vmatpush.bf16.msra.mxu3 %v17274_v22  ;;  %v19640_v56 = vld [vmem:[#allocation11 + $0x40c] sm:$0xf]  ;;  %v19877_v22 = vld [vmem:[#allocation11 + $0xb6c] sm:$0xf0] }
 0x6bb   :  { %11738 = vmatpush.bf16.msra.mxu2 %v17022_v57  ;;  %v17506_v57 = vor.u32 %v19781_v32, %v17505_v36  ;;  %v18011_v36 = vld [vmem:[#allocation11 + $0xc68] sm:$0xf0]  ;;  %v17761_v32 = vld [vmem:[#allocation11 + $0xa50] sm:$0xf] }
 0x6bc   :  { %11836 = vmatpush.bf16.msra.mxu1 %v16770_v19  ;;  %v18394_v19 = vor.u32 %v20004_v6, %v18393_v41  ;;  %v16579_v41 = vld [vmem:[#allocation11 + $0x130] sm:$0xf0] }
 0x6bd   :  { %11824 = vmatpush.bf16.msra.mxu0 %v16450_v62  ;;  %11641 = vmatpush.bf16.msra.mxu3 %v17242_v59  ;;  %v16958_v62 = vor.u32 %v19640_v56, %v16955_v1  ;;  %v19869_v59 = vld [vmem:[#allocation11 + $0xb2c] sm:$0xf0]  ;;  %v18110_v56 = vor.u32 %v19928_v60, %v18107_v20  ;;  %v17435_v60 = vld [vmem:[#allocation11 + $0x7e8] sm:$0xf0] }
 0x6be   :  { %v17858_v1 = vor.u32 %v19869_v59, %v17857_v47  ;;  %v17185_v20 = vld [vmem:[#allocation11 + $0x5d0] sm:$0xf]  ;;  %v18234_v47 = vor.u32 %v19964_v46, %v18233_v54  ;;  %v19825_v54 = vld [vmem:[#allocation11 + $0x9d4] sm:$0xf] }
 0x6bf   :  { %11739 = vmatpush.bf16.msra.mxu2 %v16990_v2  ;;  %v17474_v2 = vor.u32 %v19773_v24, %v17473_v16  ;;  %v17729_v16 = vld [vmem:[#allocation11 + $0xa10] sm:$0xf]  ;;  %v17699_v46 = vld [vmem:[#allocation11 + $0x9f0] sm:$0xf0] }
 0x6c0   :  { %11825 = vmatmul.bf16.vlgmr.msra.gmra.mxu0 %v20944_v21  ;;  %11837 = vmatpush.bf16.msra.mxu1 %v16738_v51  ;;  %v18362_v51 = vor.u32 %v19996_v37, %v18361_v63  ;;  %v16547_v63 = vld [vmem:[#allocation11 + $0xf0] sm:$0xf0]  ;;  %v19760_v37 = vld [vmem:[#allocation11 + $0x7cc] sm:$0xf]  ;;  %v19701_v59 = vld [vmem:[#allocation11 + $0x5ec] sm:$0xf0] }
 0x6c1   :  { %11873 = vmatpush.bf16.msrb.mxu0 %v17698_v39  ;;  %v17954_v39 = vor.u32 %v19893_v42, %v17953_v27  ;;  %11642 = vmatpush.bf16.msra.mxu3 %v17210_v31  ;;  %v16643_v31 = vld [vmem:[#allocation11 + $0x1b0] sm:$0xf0]  ;;  %v18078_v27 = vor.u32 %v19920_v14, %v18075_v17  ;;  %v17826_v42 = vor.u32 %v19861_v3, %v17825_v33  ;;  %v19752_v17 = vld [vmem:[#allocation11 + $0x78c] sm:$0xf]  ;;  %v17153_v3 = vld [vmem:[#allocation11 + $0x590] sm:$0xf] }
 0x6c2   :  { %v17186_v14 = vor.u32 %v19701_v59, %v17185_v20  ;;  %v17403_v33 = vld [vmem:[#allocation11 + $0x7a8] sm:$0xf0]  ;;  %v19601_v20 = vld [vmem:[#allocation11 + $0x2d4] sm:$0xf] }
 0x6c3   :  { %11740 = vmatpush.bf16.msra.mxu2 %v16958_v62  ;;  %v18297_v62 = vld [vmem:[#allocation11 + $0xe88] sm:$0xf]  ;;  %v19817_v59 = vld [vmem:[#allocation11 + $0x994] sm:$0xf] }
 0x6c4   :  { %11838 = vmatpush.bf16.msra.mxu1 %v16706_v55  ;;  %11643 = vmatmul.bf16.vlgmr.msra.gmra.mxu3 %v21002_v40  ;;  %v19980_v55 = vld [vmem:[#allocation11 + $0xea4] sm:$0xf0] }
 0x6c5   :  { %11874 = vmatpush.bf16.msrb.mxu0 %v17666_v50  ;;  %11691 = vmatpush.bf16.msrb.mxu3 %v18458_v18  ;;  %v17922_v50 = vor.u32 %v19885_v35, %v17921_v8  ;;  %v16646_v18 = vor.u32 %v19561_v12, %v16643_v31  ;;  %v18298_v52 = vor.u32 %v19980_v55, %v18297_v62  ;;  %v18265_v8 = vld [vmem:[#allocation11 + $0xe48] sm:$0xf]  ;;  %v19693_v12 = vld [vmem:[#allocation11 + $0x5ac] sm:$0xf0]  ;;  %v19625_v31 = vld [vmem:[#allocation11 + $0x394] sm:$0xf] }
 0x6c6   :  { %11741 = vmatmul.bf16.vlgmr.msra.gmra.mxu2 %v20967_v34  ;;  %v19972_v35 = vld [vmem:[#allocation11 + $0xe64] sm:$0xf0]  ;;  %v19521_v62 = vld [vmem:[#allocation11 + $0x54] sm:$0xf] }
 0x6c7   :  { %11789 = vmatpush.bf16.msrb.mxu2 %v18206_v30  ;;  %11839 = vmatmul.bf16.vlgmr.msra.gmra.mxu1 %v20855_v15  ;;  %v19853_v30 = vld [vmem:[#allocation11 + $0xaac] sm:$0xf0]  ;;  %v18266_v6 = vor.u32 %v19972_v35, %v18265_v8  ;;  %v16483_v55 = vld [vmem:[#allocation11 + $0x70] sm:$0xf0] }
 0x6c8   :  { %11887 = vmatpush.bf16.msrb.mxu1 %v17954_v39  ;;  %v19553_v39 = vld [vmem:[#allocation11 + $0x154] sm:$0xf]  ;;  %v17794_v7 = vor.u32 %v19853_v30, %v17793_v10  ;;  %v17371_v10 = vld [vmem:[#allocation11 + $0x768] sm:$0xf0]  ;;  %v17121_v30 = vld [vmem:[#allocation11 + $0x550] sm:$0xf] }
 0x6c9   :  { %11875 = vmatpush.bf16.msrb.mxu0 %v17634_v25  ;;  %11692 = vmatpush.bf16.msrb.mxu3 %v18426_v58  ;;  %v17890_v25 = vor.u32 %v19877_v22, %v17889_v4  ;;  %v16614_v58 = vor.u32 %v19553_v39, %v16611_v44  ;;  %v19685_v39 = vld [vmem:[#allocation11 + $0x56c] sm:$0xf0]  ;;  %v19617_v44 = vld [vmem:[#allocation11 + $0x354] sm:$0xf] }
 0x6ca   :  { %v19513_v8 = vld [vmem:[#allocation11 + $0x14] sm:$0xf] }
 0x6cb   :  { %11790 = vmatpush.bf16.msrb.mxu2 %v18174_v53  ;;  %v19845_v53 = vld [vmem:[#allocation11 + $0xa6c] sm:$0xf0]  ;;  %v16451_v35 = vld [vmem:[#allocation11 + $0x30] sm:$0xf0] }
 0x6cc   :  { %11888 = vmatpush.bf16.msrb.mxu1 %v17922_v50  ;;  %v19545_v50 = vld [vmem:[#allocation11 + $0x114] sm:$0xf]  ;;  %v17762_v22 = vor.u32 %v19845_v53, %v17761_v32  ;;  %v17339_v32 = vld [vmem:[#allocation11 + $0x728] sm:$0xf0]  ;;  %v17089_v53 = vld [vmem:[#allocation11 + $0x510] sm:$0xf] }
 0x6cd   :  { %11876 = vmatpush.bf16.msrb.mxu0 %v17602_v49  ;;  %11693 = vmatpush.bf16.msrb.mxu3 %v18394_v19  ;;  %v19988_v49 = vld [vmem:[#allocation11 + $0xee4] sm:$0xf0]  ;;  %v17979_v19 = vld [vmem:[#allocation11 + $0xc28] sm:$0xf0]  ;;  %v16582_v24 = vor.u32 %v19545_v50, %v16579_v41  ;;  %v19677_v50 = vld [vmem:[#allocation11 + $0x52c] sm:$0xf0] }
 0x6ce   :  { %v18330_v43 = vor.u32 %v19988_v49, %v18329_v48  ;;  %v19529_v48 = vld [vmem:[#allocation11 + $0x94] sm:$0xf] }
 0x6cf   :  { %11791 = vmatpush.bf16.msrb.mxu2 %v18142_v23  ;;  %v19837_v23 = vld [vmem:[#allocation11 + $0xa2c] sm:$0xf0]  ;;  %v16515_v49 = vld [vmem:[#allocation11 + $0xb0] sm:$0xf0] }
 0x6d0   :  { %11889 = vmatpush.bf16.msrb.mxu1 %v17890_v25  ;;  %v19537_v25 = vld [vmem:[#allocation11 + $0xd4] sm:$0xf] }
 0x6d1   :  { %11877 = vmatpush.bf16.msrb.mxu0 %v17570_v0  ;;  %11694 = vmatpush.bf16.msrb.mxu3 %v18362_v51  ;;  %v19912_v0 = vld [vmem:[#allocation11 + $0xc8c] sm:$0xf]  ;;  %v17730_v51 = vor.u32 %v19837_v23, %v17729_v16  ;;  %v19609_v41 = vld [vmem:[#allocation11 + $0x314] sm:$0xf]  ;;  %v17090_v16 = vor.u32 %v19677_v50, %v17089_v53 }
 0x6d2   :  { %v18046_v26 = vor.u32 %v19912_v0, %v18043_v28  ;;  %v17154_v0 = vor.u32 %v19693_v12, %v17153_v3  ;;  %v19744_v28 = vld [vmem:[#allocation11 + $0x74c] sm:$0xf]  ;;  %v19809_v3 = vld [vmem:[#allocation11 + $0x954] sm:$0xf] }
 0x6d3   :  { %11792 = vmatpush.bf16.msrb.mxu2 %v18110_v56  ;;  %v16550_v56 = vor.u32 %v19537_v25, %v16547_v63  ;;  %v19728_v23 = vld [vmem:[#allocation11 + $0x6cc] sm:$0xf]  ;;  %v17057_v63 = vld [vmem:[#allocation11 + $0x4d0] sm:$0xf]  ;;  %v17635_v12 = vld [vmem:[#allocation11 + $0x970] sm:$0xf0] }
 0x6d4   :  { %11890 = vmatpush.bf16.msrb.mxu1 %v17858_v1  ;;  %v17438_v1 = vor.u32 %v19760_v37, %v17435_v60  ;;  %v17307_v25 = vld [vmem:[#allocation11 + $0x6e8] sm:$0xf0]  ;;  %v17702_v37 = vor.u32 %v19825_v54, %v17699_v46  ;;  %v19669_v60 = vld [vmem:[#allocation11 + $0x4ec] sm:$0xf0]  ;;  %v17571_v54 = vld [vmem:[#allocation11 + $0x8f0] sm:$0xf0]  ;;  %v21066_v46 = vpop.f32.mrf.mxu3 }
 0x6d5   :  { %11878 = vmatpush.bf16.msrb.mxu0 %v17538_v11  ;;  %11695 = vmatpush.bf16.msrb.mxu3 %v18330_v43  ;;  %v19904_v11 = vld [vmem:[#allocation11 + $0xc4c] sm:$0xf]  ;;  %v16899_v43 = vld [vmem:[#allocation11 + $0x3b0] sm:$0xf0] }
 0x6d6   :  { %v18014_v4 = vor.u32 %v19904_v11, %v18011_v36  ;;  %v17122_v11 = vor.u32 %v19685_v39, %v17121_v30  ;;  %v19736_v36 = vld [vmem:[#allocation11 + $0x70c] sm:$0xf]  ;;  %v19585_v30 = vld [vmem:[#allocation11 + $0x254] sm:$0xf] }
 0x6d7   :  { %11793 = vmatpush.bf16.msrb.mxu2 %v18078_v27  ;;  %v16518_v27 = vor.u32 %v19529_v48, %v16515_v49  ;;  %v17275_v48 = vld [vmem:[#allocation11 + $0x6a8] sm:$0xf0]  ;;  %v17025_v49 = vld [vmem:[#allocation11 + $0x490] sm:$0xf]  ;;  %v16739_v39 = vld [vmem:[#allocation11 + $0x270] sm:$0xf0] }
 0x6d8   :  { %11891 = vmatpush.bf16.msrb.mxu1 %v17826_v42  ;;  %v17406_v42 = vor.u32 %v19752_v17, %v17403_v33  ;;  %v19593_v17 = vld [vmem:[#allocation11 + $0x294] sm:$0xf] }
 0x6d9   :  { %11879 = vmatpush.bf16.msrb.mxu0 %v17506_v57  ;;  %11696 = vmatpush.bf16.msrb.mxu3 %v18298_v52  ;;  %v19896_v57 = vld [vmem:[#allocation11 + $0xc0c] sm:$0xf]  ;;  %v16867_v52 = vld [vmem:[#allocation11 + $0x370] sm:$0xf0] }
 0x6da   :  { %v16771_v33 = vld [vmem:[#allocation11 + $0x2b0] sm:$0xf0] }
 0x6db   :  { %11794 = vmatpush.bf16.msrb.mxu2 %v18046_v26  ;;  %v16486_v26 = vor.u32 %v19521_v62, %v16483_v55  ;;  %v17243_v62 = vld [vmem:[#allocation11 + $0x668] sm:$0xf0]  ;;  %v16993_v55 = vld [vmem:[#allocation11 + $0x450] sm:$0xf] }
 0x6dc   :  { %11892 = vmatpush.bf16.msrb.mxu1 %v17794_v7  ;;  %v17374_v7 = vor.u32 %v19744_v28, %v17371_v10  ;;  %v17638_v28 = vor.u32 %v19809_v3, %v17635_v12  ;;  %v19653_v10 = vld [vmem:[#allocation11 + $0x46c] sm:$0xf0] }
 0x6dd   :  { %11880 = vmatpush.bf16.msrb.mxu0 %v17474_v2  ;;  %11697 = vmatpush.bf16.msrb.mxu3 %v18266_v6  ;;  %v17982_v2 = vor.u32 %v19896_v57, %v17979_v19  ;;  %v16835_v6 = vld [vmem:[#allocation11 + $0x330] sm:$0xf0]  ;;  %v16454_v57 = vor.u32 %v19513_v8, %v16451_v35  ;;  %v17342_v19 = vor.u32 %v19736_v36, %v17339_v32  ;;  %v17211_v8 = vld [vmem:[#allocation11 + $0x628] sm:$0xf0]  ;;  %v19645_v36 = vld [vmem:[#allocation11 + $0x42c] sm:$0xf0] }
 0x6de   :  { %v16994_v35 = vor.u32 %v19653_v10, %v16993_v55  ;;  %v19577_v32 = vld [vmem:[#allocation11 + $0x214] sm:$0xf]  ;;  %v20000_v55 = vld [vmem:[#allocation11 + $0xf4c] sm:$0xf]  ;;  %v18145_v10 = vld [vmem:[#allocation11 + $0xd50] sm:$0xf] }
 0x6df   :  { %11795 = vmatpush.bf16.msrb.mxu2 %v18014_v4  ;;  %v21053_v4 = vpop.f32.mrf.mxu0 }
 0x6e0   :  { %11881 = vmatmul.bf16.vlgmr.msrb.gmra.mxu0 %v20974_v13  ;;  %11893 = vmatpush.bf16.msrb.mxu1 %v17762_v22  ;;  %v21055_v22 = vpop.f32.mrf.mxu1 }
 0x6e1   :  { %11929 = vmatpush.bf16.msra.mxu0 %v16678_v38  ;;  %v16934_v38 = vor.u32 %v19633_v61, %v16931_v9  ;;  %11698 = vmatpush.bf16.msrb.mxu3 %v18234_v47  ;;  %v16803_v47 = vld [vmem:[#allocation11 + $0x2f0] sm:$0xf0]  ;;  %v21057_v9 = vpop.f32.mrf.mxu2 }
 0x6e2   :  { %v17667_v61 = vld [vmem:[#allocation11 + $0x9b0] sm:$0xf0] }
 0x6e3   :  { %11796 = vmatpush.bf16.msrb.mxu2 %v17982_v2  ;;  %v17310_v2 = vor.u32 %v19728_v23, %v17307_v25  ;;  %v19957_v23 = vld [vmem:[#allocation11 + $0xdec] sm:$0xf0]  ;;  %v19889_v25 = vld [vmem:[#allocation11 + $0xbd4] sm:$0xf] }
 0x6e4   :  { %11894 = vmatpush.bf16.msrb.mxu1 %v17730_v51  ;;  %11699 = vmatmul.bf16.vlgmr.msrb.gmra.mxu3 %v21035_v45  ;;  %v17058_v51 = vor.u32 %v19669_v60, %v17057_v63  ;;  %v17955_v63 = vld [vmem:[#allocation11 + $0xbf0] sm:$0xf0] }
 0x6e5   :  { %11930 = vmatpush.bf16.msra.mxu0 %v16646_v18  ;;  %11747 = vmatpush.bf16.msra.mxu3 %v17438_v1  ;;  %v16902_v18 = vor.u32 %v19625_v31, %v16899_v43  ;;  %v19720_v1 = vld [vmem:[#allocation11 + $0x68c] sm:$0xf] }
 0x6e6   :  { %11797 = vmatmul.bf16.vlgmr.msrb.gmra.mxu2 %v21016_v5  ;;  %v17278_v31 = vor.u32 %v19720_v1, %v17275_v48  ;;  %v17958_v1 = vor.u32 %v19889_v25, %v17955_v63  ;;  %v20008_v48 = vld [vmem:[#allocation11 + $0xf8c] sm:$0xf] }
 0x6e7   :  { %11845 = vmatpush.bf16.msra.mxu2 %v17186_v14  ;;  %11895 = vmatmul.bf16.vlgmr.msrb.gmra.mxu1 %v21004_v29  ;;  %v17670_v14 = vor.u32 %v19817_v59, %v17667_v61 }
 0x6e8   :  { %11943 = vmatpush.bf16.msra.mxu1 %v16934_v38  ;;  %v19661_v38 = vld [vmem:[#allocation11 + $0x4ac] sm:$0xf0] }
 0x6e9   :  { %11931 = vmatpush.bf16.msra.mxu0 %v16614_v58  ;;  %11748 = vmatpush.bf16.msra.mxu3 %v17406_v42  ;;  %v16870_v58 = vor.u32 %v19617_v44, %v16867_v52  ;;  %v17026_v43 = vor.u32 %v19661_v38, %v17025_v49  ;;  %v19712_v42 = vld [vmem:[#allocation11 + $0x64c] sm:$0xf]  ;;  %v19801_v44 = vld [vmem:[#allocation11 + $0x914] sm:$0xf]  ;;  %v21064_v53 = vpop.f32.mrf.mxu2  ;;  %v19949_v38 = vld [vmem:[#allocation11 + $0xdac] sm:$0xf0] }
 0x6ea   :  { %v17603_v52 = vld [vmem:[#allocation11 + $0x930] sm:$0xf0]  ;;  %v18427_v49 = vld [vmem:[#allocation11 + $0xfa8] sm:$0xf0] }
 0x6eb   :  { %11846 = vmatpush.bf16.msra.mxu2 %v17154_v0  ;;  %v21060_v0 = vpop.f32.mrf.mxu0  ;;  %v17606_v50 = vor.u32 %v19801_v44, %v17603_v52  ;;  %v17891_v44 = vld [vmem:[#allocation11 + $0xb70] sm:$0xf0]  ;;  %v21076_v52 = vpop.f32.mrf.mxu3 }
 0x6ec   :  { %11944 = vmatpush.bf16.msra.mxu1 %v16902_v18  ;;  %v21062_v18 = vpop.f32.mrf.mxu1 }
 0x6ed   :  { %11932 = vmatpush.bf16.msra.mxu0 %v16582_v24  ;;  %11749 = vmatpush.bf16.msra.mxu3 %v17374_v7  ;;  %v16838_v24 = vor.u32 %v19609_v41, %v16835_v6  ;;  %v19704_v7 = vld [vmem:[#allocation11 + $0x60c] sm:$0xf]  ;;  %v16707_v41 = vld [vmem:[#allocation11 + $0x230] sm:$0xf0] }
 0x6ee   :  { %v19793_v6 = vld [vmem:[#allocation11 + $0x8d4] sm:$0xf]  ;;  %v16710_v60 = vor.u32 %v19577_v32, %v16707_v41  ;;  %v18363_v32 = vld [vmem:[#allocation11 + $0xf28] sm:$0xf0] }
 0x6ef   :  { %11847 = vmatpush.bf16.msra.mxu2 %v17122_v11  ;;  %v16742_v11 = vor.u32 %v19585_v30, %v16739_v39  ;;  %v17574_v59 = vor.u32 %v19793_v6, %v17571_v54  ;;  %v19941_v30 = vld [vmem:[#allocation11 + $0xd6c] sm:$0xf0]  ;;  %v19873_v39 = vld [vmem:[#allocation11 + $0xb54] sm:$0xf] }
 0x6f0   :  { %11945 = vmatpush.bf16.msra.mxu1 %v16870_v58  ;;  %v16961_v58 = vld [vmem:[#allocation11 + $0x410] sm:$0xf] }
 0x6f1   :  { %11933 = vmatpush.bf16.msra.mxu0 %v16550_v56  ;;  %11750 = vmatpush.bf16.msra.mxu3 %v17342_v19  ;;  %v16806_v56 = vor.u32 %v19601_v20, %v16803_v47  ;;  %v18459_v19 = vld [vmem:[#allocation11 + $0xfe8] sm:$0xf0]  ;;  %v21072_v3 = vpop.f32.mrf.mxu2  ;;  %v19933_v54 = vld [vmem:[#allocation11 + $0xd2c] sm:$0xf0] }
 0x6f3   :  { %11848 = vmatpush.bf16.msra.mxu2 %v17090_v16  ;;  %v18209_v16 = vld [vmem:[#allocation11 + $0xdd0] sm:$0xf]  ;;  %v21068_v20 = vpop.f32.mrf.mxu0 }
 0x6f4   :  { %11946 = vmatpush.bf16.msra.mxu1 %v16838_v24  ;;  %v17214_v24 = vor.u32 %v19704_v7, %v17211_v8  ;;  %v21070_v47 = vpop.f32.mrf.mxu1  ;;  %v19769_v8 = vld [vmem:[#allocation11 + $0x814] sm:$0xf] }
 0x6f5   :  { %11934 = vmatpush.bf16.msra.mxu0 %v16518_v27  ;;  %11751 = vmatpush.bf16.msra.mxu3 %v17310_v2  ;;  %v16774_v27 = vor.u32 %v19593_v17, %v16771_v33  ;;  %v19785_v2 = vld [vmem:[#allocation11 + $0x894] sm:$0xf] }
 0x6f6   :  { %v19881_v17 = vld [vmem:[#allocation11 + $0xb94] sm:$0xf] }
 0x6f7   :  { %11849 = vmatpush.bf16.msra.mxu2 %v17058_v51  ;;  %v17539_v51 = vld [vmem:[#allocation11 + $0x8b0] sm:$0xf0] }
 0x6f8   :  { %11947 = vmatpush.bf16.msra.mxu1 %v16806_v56  ;;  %v18210_v56 = vor.u32 %v19957_v23, %v18209_v16  ;;  %v17923_v33 = vld [vmem:[#allocation11 + $0xbb0] sm:$0xf0]  ;;  %v17542_v12 = vor.u32 %v19785_v2, %v17539_v51  ;;  %v16681_v16 = vld [vmem:[#allocation11 + $0x1d8] sm:$0xf]  ;;  %v8780_v23 = vld [vmem:[#allocation13] sm:$0xff] }
 0x6f9   :  { %11935 = vmatpush.bf16.msra.mxu0 %v16486_v26  ;;  %11752 = vmatpush.bf16.msra.mxu3 %v17278_v31  ;;  %v17246_v26 = vor.u32 %v19712_v42, %v17243_v62  ;;  %v18430_v31 = vor.u32 %v20008_v48, %v18427_v49  ;;  %v17926_v62 = vor.u32 %v19881_v17, %v17923_v33  ;;  %v18081_v2 = vld [vmem:[#allocation11 + $0xcd0] sm:$0xf]  ;;  %v21083_v51 = vpop.f32.mrf.mxu2  ;;  %v19857_v48 = vld [vmem:[#allocation11 + $0xad4] sm:$0xf]  ;;  %v19566_v17 = vld [vmem:[#allocation11 + $0x1b4] sm:$0xf0]  ;;  %v21087_v33 = vunpack.c.l.bf16 %v8780_v23 }
 0x6fa   :  { %v17827_v49 = vld [vmem:[#allocation11 + $0xaf0] sm:$0xf0] }
 0x6fb   :  { %11850 = vmatpush.bf16.msra.mxu2 %v17026_v43  ;;  %v19777_v43 = vld [vmem:[#allocation11 + $0x854] sm:$0xf]  ;;  %v21079_v41 = vpop.f32.mrf.mxu0 }
 0x6fc   :  { %11948 = vmatpush.bf16.msra.mxu1 %v16774_v27  ;;  %v17507_v27 = vld [vmem:[#allocation11 + $0x870] sm:$0xf0]  ;;  %v21081_v6 = vpop.f32.mrf.mxu1 }
 0x6fd   :  { %11936 = vmatpush.bf16.msra.mxu0 %v16454_v57  ;;  %v20016_v57 = vld [vmem:[#allocation11 + $0xfcc] sm:$0xf]  ;;  %11753 = vmatpush.bf16.msra.mxu3 %v17246_v26  ;;  %v17510_v26 = vor.u32 %v19777_v43, %v17507_v27  ;;  %v17830_v43 = vor.u32 %v19857_v48, %v17827_v49  ;;  %v17985_v49 = vld [vmem:[#allocation11 + $0xc10] sm:$0xf] }
 0x6fe   :  { %v18462_v61 = vor.u32 %v20016_v57, %v18459_v19  ;;  %v19865_v57 = vld [vmem:[#allocation11 + $0xb14] sm:$0xf]  ;;  %v19976_v27 = vld [vmem:[#allocation11 + $0xe8c] sm:$0xf] }
 0x6ff   :  { %11851 = vmatpush.bf16.msra.mxu2 %v16994_v35  ;;  %v17475_v35 = vld [vmem:[#allocation11 + $0x830] sm:$0xf0] }
 0x700   :  { %11937 = vmatmul.bf16.vlgmr.msra.gmra.mxu0 %v20944_v21  ;;  %11949 = vmatpush.bf16.msra.mxu1 %v16742_v11  ;;  %v18146_v11 = vor.u32 %v19941_v30, %v18145_v10  ;;  %v17859_v19 = vld [vmem:[#allocation11 + $0xb30] sm:$0xf0]  ;;  %v17478_v25 = vor.u32 %v19769_v8, %v17475_v35  ;;  %v19917_v10 = vld [vmem:[#allocation11 + $0xcac] sm:$0xf0]  ;;  %v8786_v8 = vperm.slane %v21087_v33, 2 }
 0x701   :  { %11985 = vmatpush.bf16.msrb.mxu0 %v17702_v37  ;;  %v16962_v37 = vor.u32 %v19645_v36, %v16961_v58  ;;  %11754 = vmatpush.bf16.msra.mxu3 %v17214_v24  ;;  %v17894_v58 = vor.u32 %v19873_v39, %v17891_v44  ;;  %v19992_v36 = vld [vmem:[#allocation11 + $0xf0c] sm:$0xf]  ;;  %v19574_v24 = vld [vmem:[#allocation11 + $0x1f4] sm:$0xf0]  ;;  %v19849_v30 = vld [vmem:[#allocation11 + $0xa94] sm:$0xf] }
 0x702   :  { %v18366_v63 = vor.u32 %v19992_v36, %v18363_v32  ;;  %v17795_v39 = vld [vmem:[#allocation11 + $0xab0] sm:$0xf0]  ;;  %v16617_v44 = vld [vmem:[#allocation11 + $0x158] sm:$0xf]  ;;  %v19968_v32 = vld [vmem:[#allocation11 + $0xe4c] sm:$0xf] }
 0x703   :  { %11852 = vmatpush.bf16.msra.mxu2 %v16962_v37  ;;  %v17798_v36 = vor.u32 %v19849_v30, %v17795_v39 }
 0x704   :  { %11950 = vmatpush.bf16.msra.mxu1 %v16710_v60  ;;  %11755 = vmatmul.bf16.vlgmr.msra.gmra.mxu3 %v21002_v40  ;;  %v17862_v60 = vor.u32 %v19865_v57, %v17859_v19  ;;  %v11504_v35 = vpop.f32.mrf.mxu1  ;;  %v19909_v19 = vld [vmem:[#allocation11 + $0xc6c] sm:$0xf0] }
 0x705   :  { %11986 = vmatpush.bf16.msrb.mxu0 %v17670_v14  ;;  %v18177_v14 = vld [vmem:[#allocation11 + $0xd90] sm:$0xf]  ;;  %11803 = vmatpush.bf16.msrb.mxu3 %v18462_v61  ;;  %v18331_v61 = vld [vmem:[#allocation11 + $0xee8] sm:$0xf0] }
 0x706   :  { %v18178_v42 = vor.u32 %v19949_v38, %v18177_v14  ;;  %11853 = vmatmul.bf16.vlgmr.msra.gmra.mxu2 %v20967_v34  ;;  %v21085_v14 = vpop.f32.mrf.mxu3  ;;  %v16649_v38 = vld [vmem:[#allocation11 + $0x198] sm:$0xf] }
 0x707   :  { %11901 = vmatpush.bf16.msrb.mxu2 %v18210_v56  ;;  %11951 = vmatmul.bf16.vlgmr.msra.gmra.mxu1 %v20855_v15  ;;  %v16682_v56 = vor.u32 %v19574_v24, %v16681_v16  ;;  %v19841_v16 = vld [vmem:[#allocation11 + $0xa54] sm:$0xf] }
 0x708   :  { %11999 = vmatpush.bf16.msrb.mxu1 %v17958_v1  ;;  %v19925_v1 = vld [vmem:[#allocation11 + $0xcec] sm:$0xf0]  ;;  %v17763_v24 = vld [vmem:[#allocation11 + $0xa70] sm:$0xf0] }
 0x709   :  { %11987 = vmatpush.bf16.msrb.mxu0 %v17638_v28  ;;  %v18395_v28 = vld [vmem:[#allocation11 + $0xf68] sm:$0xf0]  ;;  %11804 = vmatpush.bf16.msrb.mxu3 %v18430_v31  ;;  %v18082_v31 = vor.u32 %v19925_v1, %v18081_v2  ;;  %v17766_v48 = vor.u32 %v19841_v16, %v17763_v24 }
 0x70a   :  { %v18398_v7 = vor.u32 %v20000_v55, %v18395_v28  ;;  %v11490_v55 = vpop.f32.mrf.mxu0  ;;  %v16650_v28 = vor.u32 %v19566_v17, %v16649_v38  ;;  %v19960_v2 = vld [vmem:[#allocation11 + $0xe0c] sm:$0xf]  ;;  %v19901_v38 = vld [vmem:[#allocation11 + $0xc2c] sm:$0xf0]  ;;  %v19833_v17 = vld [vmem:[#allocation11 + $0xa14] sm:$0xf] }
 0x70b   :  { %11902 = vmatpush.bf16.msrb.mxu2 %v18178_v42  ;;  %v18299_v42 = vld [vmem:[#allocation11 + $0xea8] sm:$0xf0] }
 0x70c   :  { %12000 = vmatpush.bf16.msrb.mxu1 %v17926_v62  ;;  %v18049_v62 = vld [vmem:[#allocation11 + $0xc90] sm:$0xf] }
 0x70d   :  { %11988 = vmatpush.bf16.msrb.mxu0 %v17606_v50  ;;  %v18113_v50 = vld [vmem:[#allocation11 + $0xd10] sm:$0xf]  ;;  %11805 = vmatpush.bf16.msrb.mxu3 %v18398_v7  ;;  %v8785_v7 = vperm.slane %v21087_v33, 0 }
 0x70e   :  { %v18114_v37 = vor.u32 %v19933_v54, %v18113_v50  ;;  %v18267_v50 = vld [vmem:[#allocation11 + $0xe68] sm:$0xf0]  ;;  %v18017_v54 = vld [vmem:[#allocation11 + $0xc50] sm:$0xf]  ;;  %v21092_v23 = vpop.f32.mrf.mxu3 }
 0x70f   :  { %11903 = vmatpush.bf16.msrb.mxu2 %v18146_v11  ;;  %v18302_v11 = vor.u32 %v19976_v27, %v18299_v42  ;;  %v18018_v1 = vor.u32 %v19909_v19, %v18017_v54  ;;  %v19542_v27 = vld [vmem:[#allocation11 + $0xf4] sm:$0xf0]  ;;  %v17441_v42 = vld [vmem:[#allocation11 + $0x7d0] sm:$0xf] }
 0x710   :  { %12001 = vmatpush.bf16.msrb.mxu1 %v17894_v58  ;;  %v18050_v58 = vor.u32 %v19917_v10, %v18049_v62  ;;  %v19765_v62 = vld [vmem:[#allocation11 + $0x7ec] sm:$0xf0]  ;;  %v16521_v54 = vld [vmem:[#allocation11 + $0x98] sm:$0xf] }
 0x711   :  { %11989 = vmatpush.bf16.msrb.mxu0 %v17574_v59  ;;  %v19984_v59 = vld [vmem:[#allocation11 + $0xecc] sm:$0xf]  ;;  %11806 = vmatpush.bf16.msrb.mxu3 %v18366_v63  ;;  %v19550_v63 = vld [vmem:[#allocation11 + $0x134] sm:$0xf0] }
 0x712   :  { %v11492_v30 = vpop.f32.mrf.mxu0 }
 0x713   :  { %11904 = vmatpush.bf16.msrb.mxu2 %v18114_v37  ;;  %v8801_v37 = vperm.slane %v8785_v7, 0  ;;  %v19638_v7 = vld [vmem:[#allocation11 + $0x3f4] sm:$0xf0] }
 0x714   :  { %12002 = vmatpush.bf16.msrb.mxu1 %v17862_v60  ;;  %v21094_v60 = vperm.slane %v8786_v8, 0 }
 0x715   :  { %11990 = vmatpush.bf16.msrb.mxu0 %v17542_v12  ;;  %v18334_v12 = vor.u32 %v19984_v59, %v18331_v61  ;;  %v11518_v59 = vpop.f32.mrf.mxu2  ;;  %v18270_v61 = vor.u32 %v19968_v32, %v18267_v50  ;;  %v11379_v10 = vadd.f32 %v21053_v4, %v8801_v37  ;;  %v17442_v50 = vor.u32 %v19765_v62, %v17441_v42  ;;  %v17377_v62 = vld [vmem:[#allocation11 + $0x750] sm:$0xf] }
 0x716   :  { %v11491_v8 = vadd.f32 %v11490_v55, %v21094_v60  ;;  %v11532_v24 = vpop.f32.mrf.mxu3  ;;  %v17155_v55 = vld [vmem:[#allocation11 + $0x5b0] sm:$0xf0] }
 0x717   :  { %11807 = vmatpush.bf16.msrb.mxu3 %v18334_v12  ;;  %11905 = vmatpush.bf16.msrb.mxu2 %v18082_v31  ;;  %v17731_v31 = vld [vmem:[#allocation11 + $0xa30] sm:$0xf0] }
 0x718   :  { %12003 = vmatpush.bf16.msrb.mxu1 %v17830_v43  ;;  %v16553_v43 = vld [vmem:[#allocation11 + $0xd8] sm:$0xf]  ;;  %v11505_v19 = vadd.f32 %v11504_v35, %v11491_v8 }
 0x719   :  { %11991 = vmatpush.bf16.msrb.mxu0 %v17510_v26  ;;  %v19558_v26 = vld [vmem:[#allocation11 + $0x174] sm:$0xf0]  ;;  %v16554_v32 = vor.u32 %v19542_v27, %v16553_v43 }
 0x71a   :  { %v16618_v57 = vor.u32 %v19558_v26, %v16617_v44  ;;  %v17187_v44 = vld [vmem:[#allocation11 + $0x5f0] sm:$0xf0]  ;;  %v16937_v26 = vld [vmem:[#allocation11 + $0x3d8] sm:$0xf] }
 0x71b   :  { %11808 = vmatpush.bf16.msrb.mxu3 %v18302_v11  ;;  %11906 = vmatpush.bf16.msrb.mxu2 %v18050_v58  ;;  %v17986_v11 = vor.u32 %v19901_v38, %v17985_v49  ;;  %v17734_v58 = vor.u32 %v19833_v17, %v17731_v31  ;;  %v16938_v16 = vor.u32 %v19638_v7, %v16937_v26  ;;  %v16489_v31 = vld [vmem:[#allocation11 + $0x58] sm:$0xf] }
 0x71c   :  { %12004 = vmatpush.bf16.msrb.mxu1 %v17798_v36  ;;  %v11506_v36 = vpop.f32.mrf.mxu1  ;;  %v11519_v49 = vadd.f32 %v11518_v59, %v11505_v19  ;;  %v19526_v43 = vld [vmem:[#allocation11 + $0x74] sm:$0xf0]  ;;  %v19673_v19 = vld [vmem:[#allocation11 + $0x514] sm:$0xf] }
 0x71d   :  { %11992 = vmatpush.bf16.msrb.mxu0 %v17478_v25  ;;  %v16585_v25 = vld [vmem:[#allocation11 + $0x118] sm:$0xf]  ;;  %v11520_v35 = vpop.f32.mrf.mxu2  ;;  %v16490_v8 = vor.u32 %v19526_v43, %v16489_v31 }
 0x71e   :  { %v16586_v12 = vor.u32 %v19550_v63, %v16585_v25  ;;  %v17409_v25 = vld [vmem:[#allocation11 + $0x790] sm:$0xf] }
 0x71f   :  { %11809 = vmatpush.bf16.msrb.mxu3 %v18270_v61  ;;  %11907 = vmatpush.bf16.msrb.mxu2 %v18018_v1  ;;  %v19757_v63 = vld [vmem:[#allocation11 + $0x7ac] sm:$0xf0]  ;;  %v19689_v61 = vld [vmem:[#allocation11 + $0x594] sm:$0xf]  ;;  %v19630_v1 = vld [vmem:[#allocation11 + $0x3b4] sm:$0xf0] }
 0x720   :  { %11993 = vmatmul.bf16.vlgmr.msrb.gmra.mxu0 %v20974_v13  ;;  %12005 = vmatpush.bf16.msrb.mxu1 %v17766_v48  ;;  %v11381_v48 = vadd.f32 %v21060_v0, %v8801_v37  ;;  %v17158_v27 = vor.u32 %v19689_v61, %v17155_v55  ;;  %v19681_v0 = vld [vmem:[#allocation11 + $0x554] sm:$0xf]  ;;  %v11493_v37 = vadd.f32 %v11492_v30, %v21094_v60  ;;  %v16457_v60 = vld [vmem:[#allocation11 + $0x18] sm:$0xf] }
 0x721   :  { %12041 = vmatpush.bf16.msra.mxu0 %v16682_v56  ;;  %v18235_v56 = vld [vmem:[#allocation11 + $0xe28] sm:$0xf0]  ;;  %v19518_v30 = vld [vmem:[#allocation11 + $0x34] sm:$0xf0] }
 0x722   :  { %v18238_v39 = vor.u32 %v19960_v2, %v18235_v56  ;;  %v11393_v2 = vadd.f32 %v21055_v22, %v11379_v10  ;;  %v16905_v56 = vld [vmem:[#allocation11 + $0x398] sm:$0xf]  ;;  %v11533_v22 = vadd.f32 %v11532_v24, %v11519_v49  ;;  %v17123_v10 = vld [vmem:[#allocation11 + $0x570] sm:$0xf0]  ;;  %v11395_v26 = vadd.f32 %v21062_v18, %v11381_v48  ;;  %v17313_v48 = vld [vmem:[#allocation11 + $0x6d0] sm:$0xf] }
 0x723   :  { %11908 = vmatpush.bf16.msrb.mxu2 %v17986_v11  ;;  %v16906_v42 = vor.u32 %v19630_v1, %v16905_v56  ;;  %v11507_v7 = vadd.f32 %v11506_v36, %v11493_v37  ;;  %v16841_v36 = vld [vmem:[#allocation11 + $0x318] sm:$0xf]  ;;  %v16458_v55 = vor.u32 %v19518_v30, %v16457_v60 }
 0x724   :  { %11810 = vmatpush.bf16.msrb.mxu3 %v18238_v39  ;;  %12006 = vmatpush.bf16.msrb.mxu1 %v17734_v58  ;;  %v11407_v38 = vadd.f32 %v21057_v9, %v11393_v2  ;;  %v11546_v9 = vpop.f32.mrf.mxu0  ;;  %v16873_v39 = vld [vmem:[#allocation11 + $0x358] sm:$0xf] }
 0x725   :  { %12042 = vmatpush.bf16.msra.mxu0 %v16650_v28  ;;  %v19697_v28 = vld [vmem:[#allocation11 + $0x5d4] sm:$0xf]  ;;  %v11547_v58 = vadd.f32 %v11546_v9, %v11533_v22  ;;  %v19614_v24 = vld [vmem:[#allocation11 + $0x334] sm:$0xf0] }
 0x726   :  { %v17190_v4 = vor.u32 %v19697_v28, %v17187_v44  ;;  %v19749_v28 = vld [vmem:[#allocation11 + $0x76c] sm:$0xf0]  ;;  %v11421_v59 = vadd.f32 %v21066_v46, %v11407_v38  ;;  %11909 = vmatmul.bf16.vlgmr.msrb.gmra.mxu2 %v21016_v5  ;;  %v19622_v44 = vld [vmem:[#allocation11 + $0x374] sm:$0xf0]  ;;  %v16842_v38 = vor.u32 %v19614_v24, %v16841_v36  ;;  %v19649_v36 = vld [vmem:[#allocation11 + $0x454] sm:$0xf] }
 0x727   :  { %11811 = vmatmul.bf16.vlgmr.msrb.gmra.mxu3 %v21035_v45  ;;  %12007 = vmatmul.bf16.vlgmr.msrb.gmra.mxu1 %v21004_v29  ;;  %v17378_v11 = vor.u32 %v19749_v28, %v17377_v62  ;;  %v17345_v46 = vld [vmem:[#allocation11 + $0x710] sm:$0xf]  ;;  %v17705_v61 = vld [vmem:[#allocation11 + $0x9d8] sm:$0xf] }
 0x728   :  { %11859 = vmatpush.bf16.msra.mxu3 %v17442_v50  ;;  %11957 = vmatpush.bf16.msra.mxu2 %v17190_v4  ;;  %v16874_v50 = vor.u32 %v19622_v44, %v16873_v39  ;;  %v17091_v4 = vld [vmem:[#allocation11 + $0x530] sm:$0xf0]  ;;  %v11435_v18 = vadd.f32 %v21068_v20, %v11421_v59  ;;  %v19830_v2 = vld [vmem:[#allocation11 + $0x9f4] sm:$0xf0] }
 0x729   :  { %12043 = vmatpush.bf16.msra.mxu0 %v16618_v57  ;;  %v19534_v57 = vld [vmem:[#allocation11 + $0xb4] sm:$0xf0]  ;;  %12055 = vmatpush.bf16.msra.mxu1 %v16938_v16  ;;  %v11560_v16 = vpop.f32.mrf.mxu1  ;;  %v17094_v1 = vor.u32 %v19673_v19, %v17091_v4  ;;  %v19665_v20 = vld [vmem:[#allocation11 + $0x4d4] sm:$0xf]  ;;  %v17706_v22 = vor.u32 %v19830_v2, %v17705_v61 }
 0x72a   :  { %v16522_v17 = vor.u32 %v19534_v57, %v16521_v54  ;;  %v11534_v54 = vpop.f32.mrf.mxu3  ;;  %v19741_v57 = vld [vmem:[#allocation11 + $0x72c] sm:$0xf0]  ;;  %v11561_v31 = vadd.f32 %v11560_v16, %v11547_v58  ;;  %v17673_v62 = vld [vmem:[#allocation11 + $0x998] sm:$0xf] }
 0x72b   :  { %v17346_v56 = vor.u32 %v19741_v57, %v17345_v46  ;;  %v19822_v28 = vld [vmem:[#allocation11 + $0x9b4] sm:$0xf0]  ;;  %v19717_v16 = vld [vmem:[#allocation11 + $0x66c] sm:$0xf0] }
 0x72c   :  { %11958 = vmatpush.bf16.msra.mxu2 %v17158_v27  ;;  %v16809_v27 = vld [vmem:[#allocation11 + $0x2d8] sm:$0xf] }
 0x72d   :  { %12044 = vmatpush.bf16.msra.mxu0 %v16586_v12  ;;  %v17410_v12 = vor.u32 %v19757_v63, %v17409_v25  ;;  %12056 = vmatpush.bf16.msra.mxu1 %v16906_v42  ;;  %v11409_v25 = vadd.f32 %v21064_v53, %v11395_v26  ;;  %v11521_v63 = vadd.f32 %v11520_v35, %v11507_v7  ;;  %v11574_v35 = vpop.f32.mrf.mxu2  ;;  %v19606_v42 = vld [vmem:[#allocation11 + $0x2f4] sm:$0xf0]  ;;  %v19657_v26 = vld [vmem:[#allocation11 + $0x494] sm:$0xf] }
 0x72e   :  { %v11449_v53 = vadd.f32 %v21070_v47, %v11435_v18  ;;  %v11575_v44 = vadd.f32 %v11574_v35, %v11561_v31  ;;  %v19725_v47 = vld [vmem:[#allocation11 + $0x6ac] sm:$0xf0]  ;;  %v17027_v7 = vld [vmem:[#allocation11 + $0x4b0] sm:$0xf0]  ;;  %v16777_v30 = vld [vmem:[#allocation11 + $0x298] sm:$0xf] }
 0x72f   :  { %11860 = vmatpush.bf16.msra.mxu3 %v17410_v12  ;;  %v11535_v49 = vadd.f32 %v11534_v54, %v11521_v63  ;;  %v17059_v12 = vld [vmem:[#allocation11 + $0x4f0] sm:$0xf0]  ;;  %v11423_v43 = vadd.f32 %v21076_v52, %v11409_v25  ;;  %v16810_v52 = vor.u32 %v19606_v42, %v16809_v27  ;;  %v17030_v19 = vor.u32 %v19657_v26, %v17027_v7  ;;  %v17249_v18 = vld [vmem:[#allocation11 + $0x650] sm:$0xf]  ;;  %v16745_v61 = vld [vmem:[#allocation11 + $0x258] sm:$0xf] }
 0x730   :  { %v11463_v37 = vadd.f32 %v21072_v3, %v11449_v53  ;;  %v17062_v9 = vor.u32 %v19665_v20, %v17059_v12  ;;  %v19598_v3 = vld [vmem:[#allocation11 + $0x2b4] sm:$0xf0]  ;;  %v16995_v63 = vld [vmem:[#allocation11 + $0x470] sm:$0xf0] }
 0x731   :  { %12045 = vmatpush.bf16.msra.mxu0 %v16554_v32  ;;  %v17126_v32 = vor.u32 %v19681_v0, %v17123_v10  ;;  %12057 = vmatpush.bf16.msra.mxu1 %v16874_v50  ;;  %v11548_v0 = vpop.f32.mrf.mxu0  ;;  %v17281_v10 = vld [vmem:[#allocation11 + $0x690] sm:$0xf]  ;;  %v19814_v50 = vld [vmem:[#allocation11 + $0x974] sm:$0xf0]  ;;  %v11562_v54 = vpop.f32.mrf.mxu1  ;;  %v16998_v20 = vor.u32 %v19649_v36, %v16995_v63  ;;  %v19641_v31 = vld [vmem:[#allocation11 + $0x414] sm:$0xf] }
 0x732   :  { %v11549_v39 = vadd.f32 %v11548_v0, %v11535_v49  ;;  %v11588_v60 = vpop.f32.mrf.mxu3  ;;  %v11477_v46 = vadd.f32 %v21085_v14, %v11463_v37  ;;  %v17282_v57 = vor.u32 %v19725_v47, %v17281_v10  ;;  %v19590_v2 = vld [vmem:[#allocation11 + $0x274] sm:$0xf0]  ;;  %v17250_v49 = vor.u32 %v19717_v16, %v17249_v18  ;;  %v18465_v0 = vld [vmem:[#allocation11 + $0xfd0] sm:$0xf]  ;;  %v18211_v10 = vld [vmem:[#allocation11 + $0xdf0] sm:$0xf0] }
 0x733   :  { %11861 = vmatpush.bf16.msra.mxu3 %v17378_v11  ;;  %11959 = vmatpush.bf16.msra.mxu2 %v17126_v32  ;;  %v17674_v11 = vor.u32 %v19822_v28, %v17673_v62  ;;  %v11589_v58 = vadd.f32 %v11588_v60, %v11575_v44  ;;  %v17641_v32 = vld [vmem:[#allocation11 + $0x958] sm:$0xf]  ;;  %v16746_v12 = vor.u32 %v19590_v2, %v16745_v61  ;;  %v20021_v37 = vld [vmem:[#allocation11 + $0xfec] sm:$0xf0] }
 0x734   :  { %v11563_v24 = vadd.f32 %v11562_v54, %v11549_v39  ;;  %v17642_v14 = vor.u32 %v19814_v50, %v17641_v32  ;;  %v16713_v53 = vld [vmem:[#allocation11 + $0x218] sm:$0xf]  ;;  %v18179_v32 = vld [vmem:[#allocation11 + $0xdb0] sm:$0xf0]  ;;  %v18401_v36 = vld [vmem:[#allocation11 + $0xf50] sm:$0xf] }
 0x735   :  { %12046 = vmatpush.bf16.msra.mxu0 %v16522_v17  ;;  %v19733_v17 = vld [vmem:[#allocation11 + $0x6ec] sm:$0xf0]  ;;  %12058 = vmatpush.bf16.msra.mxu1 %v16842_v38  ;;  %v12265_v4 = vpack.c.bf16 %v11589_v58, %v11477_v46  ;;  %v19582_v27 = vld [vmem:[#allocation11 + $0x234] sm:$0xf0]  ;;  %v19945_v58 = vld [vmem:[#allocation11 + $0xd94] sm:$0xf] }
 0x736   :  { %v17314_v59 = vor.u32 %v19733_v17, %v17313_v48  ;;  %v11576_v48 = vpop.f32.mrf.mxu2  ;;  %v17217_v38 = vld [vmem:[#allocation11 + $0x610] sm:$0xf]  ;;  %v17577_v42 = vld [vmem:[#allocation11 + $0x8d8] sm:$0xf]  ;;  %v16714_v26 = vor.u32 %v19582_v27, %v16713_v53  ;;  %v18182_v18 = vor.u32 %v19945_v58, %v18179_v32  ;;  %v16683_v53 = vld [vmem:[#allocation11 + $0x1f8] sm:$0xf0] }
 0x737   :  { %11862 = vmatpush.bf16.msra.mxu3 %v17346_v56  ;;  %11960 = vmatpush.bf16.msra.mxu2 %v17094_v1  ;;  %12273 = vst [vmem:[#allocation14] sm:$0xff] %v12265_v4  ;;  %v19806_v56 = vld [vmem:[#allocation11 + $0x934] sm:$0xf0]  ;;  %v19709_v17 = vld [vmem:[#allocation11 + $0x62c] sm:$0xf0] }
 0x738   :  { %v19798_v62 = vld [vmem:[#allocation11 + $0x8f4] sm:$0xf0]  ;;  %v20013_v46 = vld [vmem:[#allocation11 + $0xfac] sm:$0xf0] }
 0x739   :  { %12047 = vmatpush.bf16.msra.mxu0 %v16490_v8  ;;  %v11437_v8 = vadd.f32 %v21079_v41, %v11423_v43  ;;  %12059 = vmatpush.bf16.msra.mxu1 %v16810_v52  ;;  %v16778_v41 = vor.u32 %v19598_v3, %v16777_v30  ;;  %v16963_v43 = vld [vmem:[#allocation11 + $0x430] sm:$0xf0]  ;;  %v17961_v39 = vld [vmem:[#allocation11 + $0xbd8] sm:$0xf]  ;;  %v17578_v7 = vor.u32 %v19798_v62, %v17577_v42  ;;  %v18337_v62 = vld [vmem:[#allocation11 + $0xed0] sm:$0xf] }
 0x73a   :  { %v19894_v52 = vld [vmem:[#allocation11 + $0xbf4] sm:$0xf0]  ;;  %v16966_v47 = vor.u32 %v19641_v31, %v16963_v43  ;;  %v19570_v43 = vld [vmem:[#allocation11 + $0x1dc] sm:$0xf] }
 0x73b   :  { %11863 = vmatpush.bf16.msra.mxu3 %v17314_v59  ;;  %11961 = vmatpush.bf16.msra.mxu2 %v17062_v9  ;;  %v11451_v25 = vadd.f32 %v21081_v6, %v11437_v8  ;;  %v11577_v6 = vadd.f32 %v11576_v48, %v11563_v24  ;;  %v19953_v59 = vld [vmem:[#allocation11 + $0xdd4] sm:$0xf]  ;;  %v17218_v9 = vor.u32 %v19709_v17, %v17217_v38  ;;  %v19790_v60 = vld [vmem:[#allocation11 + $0x8b4] sm:$0xf0]  ;;  %v20005_v24 = vld [vmem:[#allocation11 + $0xf6c] sm:$0xf0] }
 0x73c   :  { %v18466_v8 = vor.u32 %v20021_v37, %v18465_v0  ;;  %v18214_v30 = vor.u32 %v19953_v59, %v18211_v10  ;;  %v17962_v3 = vor.u32 %v19894_v52, %v17961_v39  ;;  %v17929_v50 = vld [vmem:[#allocation11 + $0xb98] sm:$0xf]  ;;  %v18369_v38 = vld [vmem:[#allocation11 + $0xf10] sm:$0xf]  ;;  %v16686_v0 = vor.u32 %v19570_v43, %v16683_v53  ;;  %v18083_v37 = vld [vmem:[#allocation11 + $0xcf0] sm:$0xf0] }
 0x73d   :  { %12048 = vmatpush.bf16.msra.mxu0 %v16458_v55  ;;  %v17609_v55 = vld [vmem:[#allocation11 + $0x918] sm:$0xf]  ;;  %v11465_v1 = vadd.f32 %v21083_v51, %v11451_v25  ;;  %12060 = vmatpush.bf16.msra.mxu1 %v16778_v41  ;;  %v19937_v25 = vld [vmem:[#allocation11 + $0xd54] sm:$0xf]  ;;  %v19997_v17 = vld [vmem:[#allocation11 + $0xf2c] sm:$0xf0] }
 0x73e   :  { %v17610_v35 = vor.u32 %v19806_v56, %v17609_v55  ;;  %v19886_v54 = vld [vmem:[#allocation11 + $0xbb4] sm:$0xf0]  ;;  %v18402_v55 = vor.u32 %v20005_v24, %v18401_v36  ;;  %v19562_v10 = vld [vmem:[#allocation11 + $0x19c] sm:$0xf] }
 0x73f   :  { %11864 = vmatpush.bf16.msra.mxu3 %v17282_v57  ;;  %11962 = vmatpush.bf16.msra.mxu2 %v17030_v19  ;;  %v11479_v51 = vadd.f32 %v21092_v23, %v11465_v1  ;;  %v18433_v23 = vld [vmem:[#allocation11 + $0xf90] sm:$0xf]  ;;  %v17513_v4 = vld [vmem:[#allocation11 + $0x858] sm:$0xf]  ;;  %v17930_v16 = vor.u32 %v19886_v54, %v17929_v50  ;;  %v16651_v39 = vld [vmem:[#allocation11 + $0x1b8] sm:$0xf0] }
 0x740   :  { %12049 = vmatmul.bf16.vlgmr.msra.gmra.mxu0 %v20944_v21  ;;  %v18434_v19 = vor.u32 %v20013_v46, %v18433_v23  ;;  %v19782_v41 = vld [vmem:[#allocation11 + $0x874] sm:$0xf0]  ;;  %v16619_v46 = vld [vmem:[#allocation11 + $0x178] sm:$0xf0]  ;;  %v18273_v54 = vld [vmem:[#allocation11 + $0xe50] sm:$0xf] }
 0x741   :  { %12097 = vmatpush.bf16.msrb.mxu0 %v17706_v22  ;;  %v11590_v22 = vpop.f32.mrf.mxu3  ;;  %12061 = vmatpush.bf16.msra.mxu1 %v16746_v12  ;;  %v17897_v63 = vld [vmem:[#allocation11 + $0xb58] sm:$0xf]  ;;  %v17514_v2 = vor.u32 %v19782_v41, %v17513_v4  ;;  %v18115_v12 = vld [vmem:[#allocation11 + $0xd30] sm:$0xf0]  ;;  %v19546_v36 = vld [vmem:[#allocation11 + $0x11c] sm:$0xf] }
 0x742   :  { %v11591_v28 = vadd.f32 %v11590_v22, %v11577_v6  ;;  %v19878_v61 = vld [vmem:[#allocation11 + $0xb74] sm:$0xf0]  ;;  %v18370_v22 = vor.u32 %v19997_v17, %v18369_v38  ;;  %v18019_v41 = vld [vmem:[#allocation11 + $0xc70] sm:$0xf0]  ;;  %v16587_v24 = vld [vmem:[#allocation11 + $0x138] sm:$0xf0] }
 0x743   :  { %11865 = vmatpush.bf16.msra.mxu3 %v17250_v49  ;;  %11963 = vmatpush.bf16.msra.mxu2 %v16998_v20  ;;  %v17481_v56 = vld [vmem:[#allocation11 + $0x818] sm:$0xf]  ;;  %v17898_v49 = vor.u32 %v19878_v61, %v17897_v63  ;;  %v19929_v20 = vld [vmem:[#allocation11 + $0xd14] sm:$0xf]  ;;  %v19965_v63 = vld [vmem:[#allocation11 + $0xe2c] sm:$0xf0] }
 0x744   :  { %v12269_v44 = vpack.c.bf16 %v11591_v28, %v11479_v51  ;;  %v19774_v1 = vld [vmem:[#allocation11 + $0x834] sm:$0xf0]  ;;  %v18118_v27 = vor.u32 %v19929_v20, %v18115_v12  ;;  %v19989_v51 = vld [vmem:[#allocation11 + $0xeec] sm:$0xf0]  ;;  %v19921_v28 = vld [vmem:[#allocation11 + $0xcd4] sm:$0xf] }
 0x745   :  { %12098 = vmatpush.bf16.msrb.mxu0 %v17674_v11  ;;  %v17545_v11 = vld [vmem:[#allocation11 + $0x898] sm:$0xf]  ;;  %12062 = vmatpush.bf16.msra.mxu1 %v16714_v26  ;;  %v18338_v52 = vor.u32 %v19989_v51, %v18337_v62  ;;  %v18305_v26 = vld [vmem:[#allocation11 + $0xe90] sm:$0xf]  ;;  %v19538_v38 = vld [vmem:[#allocation11 + $0xdc] sm:$0xf] }
 0x746   :  { %12277 = vst [vmem:[#allocation14 + $0x20] sm:$0xff] %v12269_v44  ;;  %v17546_v57 = vor.u32 %v19790_v60, %v17545_v11  ;;  %v17865_v6 = vld [vmem:[#allocation11 + $0xb18] sm:$0xf]  ;;  %v18086_v44 = vor.u32 %v19921_v28, %v18083_v37  ;;  %v16654_v11 = vor.u32 %v19562_v10, %v16651_v39  ;;  %v18051_v60 = vld [vmem:[#allocation11 + $0xcb0] sm:$0xf0] }
 0x747   :  { %11866 = vmatpush.bf16.msra.mxu3 %v17218_v9  ;;  %11964 = vmatpush.bf16.msra.mxu2 %v16966_v47  ;;  %v19870_v31 = vld [vmem:[#allocation11 + $0xb34] sm:$0xf0]  ;;  %v16555_v17 = vld [vmem:[#allocation11 + $0xf8] sm:$0xf0]  ;;  %v19761_v20 = vld [vmem:[#allocation11 + $0x7d4] sm:$0xf] }
 0x748   :  { %12063 = vmatmul.bf16.vlgmr.msra.gmra.mxu1 %v20855_v15  ;;  %v17866_v42 = vor.u32 %v19870_v31, %v17865_v6  ;;  %v17833_v59 = vld [vmem:[#allocation11 + $0xad8] sm:$0xf]  ;;  %v17443_v12 = vld [vmem:[#allocation11 + $0x7f0] sm:$0xf0]  ;;  %v19634_v53 = vld [vmem:[#allocation11 + $0x3dc] sm:$0xf] }
 0x749   :  { %12099 = vmatpush.bf16.msrb.mxu0 %v17642_v14  ;;  %12111 = vmatpush.bf16.msrb.mxu1 %v17962_v3  ;;  %v18147_v14 = vld [vmem:[#allocation11 + $0xd70] sm:$0xf0]  ;;  %v19862_v9 = vld [vmem:[#allocation11 + $0xaf4] sm:$0xf0]  ;;  %v19554_v3 = vld [vmem:[#allocation11 + $0x15c] sm:$0xf]  ;;  %v17446_v62 = vor.u32 %v19761_v20, %v17443_v12 }
 0x74a   :  { %11867 = vmatmul.bf16.vlgmr.msra.gmra.mxu3 %v21002_v40  ;;  %11965 = vmatmul.bf16.vlgmr.msra.gmra.mxu2 %v20967_v34  ;;  %v18150_v48 = vor.u32 %v19937_v25, %v18147_v14  ;;  %v17834_v47 = vor.u32 %v19862_v9, %v17833_v59  ;;  %v17801_v23 = vld [vmem:[#allocation11 + $0xa98] sm:$0xf]  ;;  %v16622_v4 = vor.u32 %v19554_v3, %v16619_v46  ;;  %v18241_v14 = vld [vmem:[#allocation11 + $0xe10] sm:$0xf]  ;;  %v19530_v51 = vld [vmem:[#allocation11 + $0x9c] sm:$0xf] }
 0x74b   :  { %11915 = vmatpush.bf16.msrb.mxu3 %v18466_v8  ;;  %12013 = vmatpush.bf16.msrb.mxu2 %v18214_v30  ;;  %v19913_v8 = vld [vmem:[#allocation11 + $0xc94] sm:$0xf]  ;;  %v19854_v30 = vld [vmem:[#allocation11 + $0xab4] sm:$0xf0]  ;;  %v18242_v31 = vor.u32 %v19965_v63, %v18241_v14  ;;  %v16523_v28 = vld [vmem:[#allocation11 + $0xb8] sm:$0xf0]  ;;  %v21125_v63 = vpop.f32.mrf.mxu0 }
 0x74c   :  { %v18054_v32 = vor.u32 %v19913_v8, %v18051_v60  ;;  %v17802_v50 = vor.u32 %v19854_v30, %v17801_v23  ;;  %v17193_v6 = vld [vmem:[#allocation11 + $0x5d8] sm:$0xf]  ;;  %v19753_v59 = vld [vmem:[#allocation11 + $0x794] sm:$0xf]  ;;  %v16491_v8 = vld [vmem:[#allocation11 + $0x78] sm:$0xf0] }
 0x74d   :  { %12100 = vmatpush.bf16.msrb.mxu0 %v17610_v35  ;;  %12112 = vmatpush.bf16.msrb.mxu1 %v17930_v16  ;;  %v17482_v35 = vor.u32 %v19774_v1, %v17481_v56  ;;  %v19846_v16 = vld [vmem:[#allocation11 + $0xa74] sm:$0xf0]  ;;  %v17987_v56 = vld [vmem:[#allocation11 + $0xc30] sm:$0xf0]  ;;  %v16843_v14 = vld [vmem:[#allocation11 + $0x338] sm:$0xf0] }
 0x74e   :  { %v17737_v1 = vld [vmem:[#allocation11 + $0xa18] sm:$0xf]  ;;  %v17411_v9 = vld [vmem:[#allocation11 + $0x7b0] sm:$0xf0] }
 0x74f   :  { %11916 = vmatpush.bf16.msrb.mxu3 %v18434_v19  ;;  %12014 = vmatpush.bf16.msrb.mxu2 %v18182_v18  ;;  %v19905_v19 = vld [vmem:[#allocation11 + $0xc54] sm:$0xf]  ;;  %v17769_v18 = vld [vmem:[#allocation11 + $0xa58] sm:$0xf] }
 0x750   :  { %v18022_v61 = vor.u32 %v19905_v19, %v18019_v41  ;;  %v19702_v43 = vld [vmem:[#allocation11 + $0x5f4] sm:$0xf0]  ;;  %v19745_v23 = vld [vmem:[#allocation11 + $0x754] sm:$0xf]  ;;  %v16459_v19 = vld [vmem:[#allocation11 + $0x38] sm:$0xf0] }
 0x751   :  { %12101 = vmatpush.bf16.msrb.mxu0 %v17578_v7  ;;  %12113 = vmatpush.bf16.msrb.mxu1 %v17898_v49  ;;  %v19981_v7 = vld [vmem:[#allocation11 + $0xeac] sm:$0xf0]  ;;  %v19838_v49 = vld [vmem:[#allocation11 + $0xa34] sm:$0xf0]  ;;  %v17379_v30 = vld [vmem:[#allocation11 + $0x770] sm:$0xf0] }
 0x752   :  { %v18306_v58 = vor.u32 %v19981_v7, %v18305_v26  ;;  %v17161_v10 = vld [vmem:[#allocation11 + $0x598] sm:$0xf]  ;;  %v17414_v26 = vor.u32 %v19753_v59, %v17411_v9  ;;  %v19522_v7 = vld [vmem:[#allocation11 + $0x5c] sm:$0xf] }
 0x753   :  { %11917 = vmatpush.bf16.msrb.mxu3 %v18402_v55  ;;  %12015 = vmatpush.bf16.msrb.mxu2 %v18150_v48  ;;  %v19897_v55 = vld [vmem:[#allocation11 + $0xc14] sm:$0xf]  ;;  %v16590_v48 = vor.u32 %v19546_v36, %v16587_v24  ;;  %v19694_v39 = vld [vmem:[#allocation11 + $0x5b4] sm:$0xf0]  ;;  %v19594_v59 = vld [vmem:[#allocation11 + $0x29c] sm:$0xf] }
 0x754   :  { %v17129_v3 = vld [vmem:[#allocation11 + $0x558] sm:$0xf]  ;;  %v16779_v9 = vld [vmem:[#allocation11 + $0x2b8] sm:$0xf0] }
 0x755   :  { %12102 = vmatpush.bf16.msrb.mxu0 %v17546_v57  ;;  %12114 = vmatpush.bf16.msrb.mxu1 %v17866_v42  ;;  %v19973_v57 = vld [vmem:[#allocation11 + $0xe6c] sm:$0xf0]  ;;  %v16558_v42 = vor.u32 %v19538_v38, %v16555_v17  ;;  %v19686_v46 = vld [vmem:[#allocation11 + $0x574] sm:$0xf0]  ;;  %v17315_v38 = vld [vmem:[#allocation11 + $0x6f0] sm:$0xf0] }
 0x756   :  { %v18274_v25 = vor.u32 %v19973_v57, %v18273_v54  ;;  %v17382_v54 = vor.u32 %v19745_v23, %v17379_v30  ;;  %v19514_v57 = vld [vmem:[#allocation11 + $0x1c] sm:$0xf]  ;;  %v17097_v36 = vld [vmem:[#allocation11 + $0x518] sm:$0xf] }
 0x757   :  { %11918 = vmatpush.bf16.msrb.mxu3 %v18370_v22  ;;  %12016 = vmatpush.bf16.msrb.mxu2 %v18118_v27  ;;  %v17990_v22 = vor.u32 %v19897_v55, %v17987_v56  ;;  %v17738_v27 = vor.u32 %v19838_v49, %v17737_v1  ;;  %v19678_v24 = vld [vmem:[#allocation11 + $0x534] sm:$0xf0]  ;;  %v16462_v55 = vor.u32 %v19514_v57, %v16459_v19  ;;  %v19729_v49 = vld [vmem:[#allocation11 + $0x6d4] sm:$0xf] }
 0x758   :  { %v17098_v1 = vor.u32 %v19678_v24, %v17097_v36  ;;  %v17065_v17 = vld [vmem:[#allocation11 + $0x4d8] sm:$0xf]  ;;  %v17219_v57 = vld [vmem:[#allocation11 + $0x630] sm:$0xf0]  ;;  %v19578_v36 = vld [vmem:[#allocation11 + $0x21c] sm:$0xf] }
 0x759   :  { %12103 = vmatpush.bf16.msrb.mxu0 %v17514_v2  ;;  %12115 = vmatpush.bf16.msrb.mxu1 %v17834_v47  ;;  %v17770_v2 = vor.u32 %v19846_v16, %v17769_v18  ;;  %v16526_v47 = vor.u32 %v19530_v51, %v16523_v28  ;;  %v19737_v18 = vld [vmem:[#allocation11 + $0x714] sm:$0xf]  ;;  %v19670_v12 = vld [vmem:[#allocation11 + $0x4f4] sm:$0xf0] }
 0x75a   :  { %v17347_v16 = vld [vmem:[#allocation11 + $0x730] sm:$0xf0]  ;;  %v17033_v28 = vld [vmem:[#allocation11 + $0x498] sm:$0xf] }
 0x75b   :  { %11919 = vmatpush.bf16.msrb.mxu3 %v18338_v52  ;;  %12017 = vmatpush.bf16.msrb.mxu2 %v18086_v44  ;;  %v19626_v52 = vld [vmem:[#allocation11 + $0x39c] sm:$0xf]  ;;  %v17350_v56 = vor.u32 %v19737_v18, %v17347_v16  ;;  %v17283_v51 = vld [vmem:[#allocation11 + $0x6b0] sm:$0xf0]  ;;  %v19654_v30 = vld [vmem:[#allocation11 + $0x474] sm:$0xf0] }
 0x75c   :  { %v16907_v44 = vld [vmem:[#allocation11 + $0x3b8] sm:$0xf0]  ;;  %v16969_v18 = vld [vmem:[#allocation11 + $0x418] sm:$0xf] }
 0x75d   :  { %12104 = vmatpush.bf16.msrb.mxu0 %v17482_v35  ;;  %12116 = vmatpush.bf16.msrb.mxu1 %v17802_v50  ;;  %v16939_v35 = vld [vmem:[#allocation11 + $0x3f8] sm:$0xf0]  ;;  %v16910_v60 = vor.u32 %v19626_v52, %v16907_v44  ;;  %v16494_v50 = vor.u32 %v19522_v7, %v16491_v8  ;;  %v16782_v7 = vor.u32 %v19594_v59, %v16779_v9  ;;  %v19713_v8 = vld [vmem:[#allocation11 + $0x654] sm:$0xf]  ;;  %v19646_v16 = vld [vmem:[#allocation11 + $0x434] sm:$0xf0] }
 0x75e   :  { %v16942_v37 = vor.u32 %v19634_v53, %v16939_v35  ;;  %v19818_v53 = vld [vmem:[#allocation11 + $0x99c] sm:$0xf] }
 0x75f   :  { %11920 = vmatpush.bf16.msrb.mxu3 %v18306_v58  ;;  %12018 = vmatpush.bf16.msrb.mxu2 %v18054_v32  ;;  %v19618_v58 = vld [vmem:[#allocation11 + $0x35c] sm:$0xf] }
 0x760   :  { %12105 = vmatmul.bf16.vlgmr.msrb.gmra.mxu0 %v20974_v13  ;;  %v16875_v32 = vld [vmem:[#allocation11 + $0x378] sm:$0xf0] }
 0x761   :  { %12153 = vmatpush.bf16.msra.mxu0 %v16686_v0  ;;  %12117 = vmatpush.bf16.msrb.mxu1 %v17770_v2  ;;  %v17194_v0 = vor.u32 %v19702_v43, %v17193_v6  ;;  %v16878_v41 = vor.u32 %v19618_v58, %v16875_v32  ;;  %v17707_v2 = vld [vmem:[#allocation11 + $0x9f8] sm:$0xf0]  ;;  %v21127_v43 = vpop.f32.mrf.mxu1  ;;  %v21134_v58 = vpop.f32.mrf.mxu3 }
 0x762   :  { %v19602_v6 = vld [vmem:[#allocation11 + $0x2dc] sm:$0xf] }
 0x763   :  { %11921 = vmatpush.bf16.msrb.mxu3 %v18274_v25  ;;  %12019 = vmatpush.bf16.msrb.mxu2 %v18022_v61  ;;  %v19610_v25 = vld [vmem:[#allocation11 + $0x31c] sm:$0xf] }
 0x764   :  { %v19826_v61 = vld [vmem:[#allocation11 + $0x9dc] sm:$0xf] }
 0x765   :  { %12154 = vmatpush.bf16.msra.mxu0 %v16654_v11  ;;  %12118 = vmatpush.bf16.msrb.mxu1 %v17738_v27  ;;  %v17162_v11 = vor.u32 %v19694_v39, %v17161_v10  ;;  %v17710_v20 = vor.u32 %v19826_v61, %v17707_v2  ;;  %v17675_v35 = vld [vmem:[#allocation11 + $0x9b8] sm:$0xf0]  ;;  %v17066_v27 = vor.u32 %v19670_v12, %v17065_v17  ;;  %v21129_v10 = vpop.f32.mrf.mxu2  ;;  %v20017_v2 = vld [vmem:[#allocation11 + $0xfd4] sm:$0xf] }
 0x766   :  { %v19810_v39 = vld [vmem:[#allocation11 + $0x95c] sm:$0xf]  ;;  %v16970_v12 = vor.u32 %v19646_v16, %v16969_v18 }
 0x767   :  { %11922 = vmatpush.bf16.msrb.mxu3 %v18242_v31  ;;  %12020 = vmatpush.bf16.msrb.mxu2 %v17990_v22  ;;  %v16811_v31 = vld [vmem:[#allocation11 + $0x2f8] sm:$0xf0]  ;;  %v17318_v22 = vor.u32 %v19729_v49, %v17315_v38 }
 0x768   :  { %12119 = vmatmul.bf16.vlgmr.msrb.gmra.mxu1 %v21004_v29  ;;  %v17643_v52 = vld [vmem:[#allocation11 + $0x978] sm:$0xf0] }
 0x769   :  { %12155 = vmatpush.bf16.msra.mxu0 %v16622_v4  ;;  %12167 = vmatpush.bf16.msra.mxu1 %v16942_v37  ;;  %v17130_v4 = vor.u32 %v19686_v46, %v17129_v3  ;;  %v19662_v37 = vld [vmem:[#allocation11 + $0x4b4] sm:$0xf0]  ;;  %v17646_v23 = vor.u32 %v19810_v39, %v17643_v52  ;;  %v19586_v3 = vld [vmem:[#allocation11 + $0x25c] sm:$0xf]  ;;  %v21136_v19 = vpop.f32.mrf.mxu1  ;;  %v21144_v39 = vpop.f32.mrf.mxu3 }
 0x76a   :  { %11923 = vmatmul.bf16.vlgmr.msrb.gmra.mxu3 %v21035_v45  ;;  %12021 = vmatmul.bf16.vlgmr.msrb.gmra.mxu2 %v21016_v5  ;;  %v16747_v46 = vld [vmem:[#allocation11 + $0x278] sm:$0xf0] }
 0x76b   :  { %11971 = vmatpush.bf16.msra.mxu3 %v17446_v62  ;;  %12069 = vmatpush.bf16.msra.mxu2 %v17194_v0  ;;  %v19721_v62 = vld [vmem:[#allocation11 + $0x694] sm:$0xf]  ;;  %v17678_v0 = vor.u32 %v19818_v53, %v17675_v35  ;;  %v17611_v32 = vld [vmem:[#allocation11 + $0x938] sm:$0xf0] }
 0x76c   :  { %v17286_v44 = vor.u32 %v19721_v62, %v17283_v51  ;;  %v17579_v61 = vld [vmem:[#allocation11 + $0x8f8] sm:$0xf0]  ;;  %v20009_v62 = vld [vmem:[#allocation11 + $0xf94] sm:$0xf] }
 0x76d   :  { %12156 = vmatpush.bf16.msra.mxu0 %v16590_v48  ;;  %12168 = vmatpush.bf16.msra.mxu1 %v16910_v60  ;;  %v16846_v48 = vor.u32 %v19610_v25, %v16843_v14  ;;  %v17001_v60 = vld [vmem:[#allocation11 + $0x458] sm:$0xf]  ;;  %v16715_v25 = vld [vmem:[#allocation11 + $0x238] sm:$0xf0]  ;;  %v18435_v51 = vld [vmem:[#allocation11 + $0xfb0] sm:$0xf0] }
 0x76e   :  { %v19794_v14 = vld [vmem:[#allocation11 + $0x8dc] sm:$0xf] }
 0x76f   :  { %11972 = vmatpush.bf16.msra.mxu3 %v17414_v26  ;;  %12070 = vmatpush.bf16.msra.mxu2 %v17162_v11  ;;  %v17034_v26 = vor.u32 %v19662_v37, %v17033_v28  ;;  %v17251_v11 = vld [vmem:[#allocation11 + $0x670] sm:$0xf0]  ;;  %v19890_v49 = vld [vmem:[#allocation11 + $0xbdc] sm:$0xf]  ;;  %v18185_v28 = vld [vmem:[#allocation11 + $0xd98] sm:$0xf] }
 0x770   :  { %v17963_v38 = vld [vmem:[#allocation11 + $0xbf8] sm:$0xf0] }
 0x771   :  { %12157 = vmatpush.bf16.msra.mxu0 %v16558_v42  ;;  %12169 = vmatpush.bf16.msra.mxu1 %v16878_v41  ;;  %v16814_v42 = vor.u32 %v19602_v6, %v16811_v31  ;;  %v16750_v41 = vor.u32 %v19586_v3, %v16747_v46  ;;  %v16718_v6 = vor.u32 %v19578_v36, %v16715_v25  ;;  %v19786_v35 = vld [vmem:[#allocation11 + $0x89c] sm:$0xf]  ;;  %v21142_v9 = vpop.f32.mrf.mxu1  ;;  %v19942_v3 = vld [vmem:[#allocation11 + $0xd74] sm:$0xf0]  ;;  %v19993_v36 = vld [vmem:[#allocation11 + $0xf14] sm:$0xf] }
 0x772   :  { %v17582_v31 = vor.u32 %v19794_v14, %v17579_v61  ;;  %v19882_v37 = vld [vmem:[#allocation11 + $0xb9c] sm:$0xf]  ;;  %v18121_v25 = vld [vmem:[#allocation11 + $0xd18] sm:$0xf] }
 0x773   :  { %11973 = vmatpush.bf16.msra.mxu3 %v17382_v54  ;;  %12071 = vmatpush.bf16.msra.mxu2 %v17130_v4  ;;  %v19705_v54 = vld [vmem:[#allocation11 + $0x614] sm:$0xf]  ;;  %v17002_v4 = vor.u32 %v19654_v30, %v17001_v60  ;;  %v17931_v59 = vld [vmem:[#allocation11 + $0xbb8] sm:$0xf0]  ;;  %v18153_v30 = vld [vmem:[#allocation11 + $0xd58] sm:$0xf] }
 0x774   :  { %v20001_v60 = vld [vmem:[#allocation11 + $0xf54] sm:$0xf]  ;;  %v19874_v46 = vld [vmem:[#allocation11 + $0xb5c] sm:$0xf]  ;;  %v18154_v18 = vor.u32 %v19942_v3, %v18153_v30  ;;  %v19934_v14 = vld [vmem:[#allocation11 + $0xd34] sm:$0xf0] }
 0x775   :  { %12158 = vmatpush.bf16.msra.mxu0 %v16526_v47  ;;  %12170 = vmatpush.bf16.msra.mxu1 %v16846_v48  ;;  %v21132_v47 = vpop.f32.mrf.mxu0  ;;  %v19958_v48 = vld [vmem:[#allocation11 + $0xdf4] sm:$0xf0]  ;;  %v19866_v61 = vld [vmem:[#allocation11 + $0xb1c] sm:$0xf]  ;;  %v19969_v3 = vld [vmem:[#allocation11 + $0xe54] sm:$0xf] }
 0x777   :  { %11974 = vmatpush.bf16.msra.mxu3 %v17350_v56  ;;  %12072 = vmatpush.bf16.msra.mxu2 %v17098_v1  ;;  %v18217_v56 = vld [vmem:[#allocation11 + $0xdd8] sm:$0xf]  ;;  %v17222_v1 = vor.u32 %v19705_v54, %v17219_v57  ;;  %v19770_v57 = vld [vmem:[#allocation11 + $0x81c] sm:$0xf] }
 0x779   :  { %12159 = vmatpush.bf16.msra.mxu0 %v16494_v50  ;;  %12171 = vmatpush.bf16.msra.mxu1 %v16814_v42  ;;  %v17254_v50 = vor.u32 %v19713_v8, %v17251_v11  ;;  %v17966_v42 = vor.u32 %v19890_v49, %v17963_v38  ;;  %v17934_v11 = vor.u32 %v19882_v37, %v17931_v59  ;;  %v19985_v38 = vld [vmem:[#allocation11 + $0xed4] sm:$0xf]  ;;  %v18057_v37 = vld [vmem:[#allocation11 + $0xc98] sm:$0xf] }
 0x77a   :  { %v19918_v59 = vld [vmem:[#allocation11 + $0xcb4] sm:$0xf0] }
 0x77b   :  { %11975 = vmatpush.bf16.msra.mxu3 %v17318_v22  ;;  %12073 = vmatpush.bf16.msra.mxu2 %v17066_v27  ;;  %v17547_v22 = vld [vmem:[#allocation11 + $0x8b8] sm:$0xf0]  ;;  %v18218_v27 = vor.u32 %v19958_v48, %v18217_v56  ;;  %v18122_v48 = vor.u32 %v19934_v14, %v18121_v25  ;;  %v18243_v25 = vld [vmem:[#allocation11 + $0xe30] sm:$0xf0]  ;;  %v17993_v14 = vld [vmem:[#allocation11 + $0xc18] sm:$0xf] }
 0x77c   :  { %v17550_v52 = vor.u32 %v19786_v35, %v17547_v22  ;;  %v17835_v35 = vld [vmem:[#allocation11 + $0xaf8] sm:$0xf0] }
 0x77d   :  { %12160 = vmatpush.bf16.msra.mxu0 %v16462_v55  ;;  %12172 = vmatpush.bf16.msra.mxu1 %v16782_v7  ;;  %v18467_v55 = vld [vmem:[#allocation11 + $0xff0] sm:$0xf0]  ;;  %v21138_v17 = vpop.f32.mrf.mxu0  ;;  %v17515_v7 = vld [vmem:[#allocation11 + $0x878] sm:$0xf0] }
 0x77e   :  { %v18470_v53 = vor.u32 %v20017_v2, %v18467_v55  ;;  %v17867_v2 = vld [vmem:[#allocation11 + $0xb38] sm:$0xf0]  ;;  %v21153_v55 = vpop.f32.mrf.mxu3 }
 0x77f   :  { %11976 = vmatpush.bf16.msra.mxu3 %v17286_v44  ;;  %12074 = vmatpush.bf16.msra.mxu2 %v17034_v26  ;;  %v18438_v44 = vor.u32 %v20009_v62, %v18435_v51  ;;  %v19778_v26 = vld [vmem:[#allocation11 + $0x85c] sm:$0xf]  ;;  %v17870_v49 = vor.u32 %v19866_v61, %v17867_v2  ;;  %v19902_v61 = vld [vmem:[#allocation11 + $0xc34] sm:$0xf0] }
 0x780   :  { %12161 = vmatmul.bf16.vlgmr.msra.gmra.mxu0 %v20944_v21  ;;  %v19802_v21 = vld [vmem:[#allocation11 + $0x91c] sm:$0xf] }
 0x781   :  { %12209 = vmatpush.bf16.msrb.mxu0 %v17710_v20  ;;  %v17614_v24 = vor.u32 %v19802_v21, %v17611_v32  ;;  %v21140_v20 = vpop.f32.mrf.mxu2  ;;  %12173 = vmatpush.bf16.msra.mxu1 %v16750_v41  ;;  %v17899_v21 = vld [vmem:[#allocation11 + $0xb78] sm:$0xf0] }
 0x782   :  { %v17902_v16 = vor.u32 %v19874_v46, %v17899_v21  ;;  %v18275_v46 = vld [vmem:[#allocation11 + $0xe70] sm:$0xf0]  ;;  %v18025_v21 = vld [vmem:[#allocation11 + $0xc58] sm:$0xf]  ;;  %v19834_v2 = vld [vmem:[#allocation11 + $0xa1c] sm:$0xf] }
 0x783   :  { %11977 = vmatpush.bf16.msra.mxu3 %v17254_v50  ;;  %12075 = vmatpush.bf16.msra.mxu2 %v17002_v4  ;;  %v17518_v50 = vor.u32 %v19778_v26, %v17515_v7  ;;  %v17483_v4 = vld [vmem:[#allocation11 + $0x838] sm:$0xf0]  ;;  %v8787_v26 = vperm.slane %v21087_v33, 4  ;;  %v8788_v7 = vperm.slane %v21087_v33, 6  ;;  %v19961_v33 = vld [vmem:[#allocation11 + $0xe14] sm:$0xf] }
 0x785   :  { %12210 = vmatpush.bf16.msrb.mxu0 %v17678_v0  ;;  %v19950_v0 = vld [vmem:[#allocation11 + $0xdb4] sm:$0xf0]  ;;  %12174 = vmatpush.bf16.msra.mxu1 %v16718_v6  ;;  %v21151_v41 = vpop.f32.mrf.mxu0 }
 0x786   :  { %v18186_v8 = vor.u32 %v19950_v0, %v18185_v28  ;;  %v18089_v6 = vld [vmem:[#allocation11 + $0xcd8] sm:$0xf]  ;;  %v19977_v28 = vld [vmem:[#allocation11 + $0xe94] sm:$0xf] }
 0x787   :  { %11978 = vmatpush.bf16.msra.mxu3 %v17222_v1  ;;  %12076 = vmatpush.bf16.msra.mxu2 %v16970_v12  ;;  %v21155_v1 = vpop.f32.mrf.mxu1  ;;  %v18339_v12 = vld [vmem:[#allocation11 + $0xef0] sm:$0xf0] }
 0x788   :  { %12175 = vmatmul.bf16.vlgmr.msra.gmra.mxu1 %v20855_v15  ;;  %v17486_v15 = vor.u32 %v19770_v57, %v17483_v4  ;;  %v18342_v22 = vor.u32 %v19985_v38, %v18339_v12  ;;  %v18307_v0 = vld [vmem:[#allocation11 + $0xeb0] sm:$0xf0]  ;;  %v17771_v57 = vld [vmem:[#allocation11 + $0xa78] sm:$0xf0]  ;;  %v8803_v4 = vperm.slane %v8787_v26, 0 }
 0x789   :  { %12211 = vmatpush.bf16.msrb.mxu0 %v17646_v23  ;;  %12223 = vmatpush.bf16.msrb.mxu1 %v17966_v42  ;;  %v18403_v23 = vld [vmem:[#allocation11 + $0xf70] sm:$0xf0]  ;;  %v21148_v32 = vpop.f32.mrf.mxu2  ;;  %v19766_v38 = vld [vmem:[#allocation11 + $0x7f4] sm:$0xf0]  ;;  %v19698_v12 = vld [vmem:[#allocation11 + $0x5dc] sm:$0xf] }
 0x78a   :  { %11979 = vmatmul.bf16.vlgmr.msra.gmra.mxu3 %v21002_v40  ;;  %12077 = vmatmul.bf16.vlgmr.msra.gmra.mxu2 %v20967_v34  ;;  %v18406_v54 = vor.u32 %v20001_v60, %v18403_v23  ;;  %v21162_v60 = vpop.f32.mrf.mxu3  ;;  %v18058_v23 = vor.u32 %v19918_v59, %v18057_v37  ;;  %v17417_v59 = vld [vmem:[#allocation11 + $0x798] sm:$0xf]  ;;  %v19690_v26 = vld [vmem:[#allocation11 + $0x59c] sm:$0xf] }
 0x78b   :  { %12027 = vmatpush.bf16.msrb.mxu3 %v18470_v53  ;;  %12125 = vmatpush.bf16.msrb.mxu2 %v18218_v27  ;;  %v19858_v53 = vld [vmem:[#allocation11 + $0xadc] sm:$0xf] }
 0x78c   :  { %v17838_v51 = vor.u32 %v19858_v53, %v17835_v35  ;;  %v18246_v53 = vor.u32 %v19961_v33, %v18243_v25 }
 0x78d   :  { %12212 = vmatpush.bf16.msrb.mxu0 %v17614_v24  ;;  %12224 = vmatpush.bf16.msrb.mxu1 %v17934_v11  ;;  %v18371_v24 = vld [vmem:[#allocation11 + $0xf30] sm:$0xf0]  ;;  %v11714_v27 = vpop.f32.mrf.mxu0 }
 0x78e   :  { %v18374_v56 = vor.u32 %v19993_v36, %v18371_v24 }
 0x78f   :  { %12028 = vmatpush.bf16.msrb.mxu3 %v18438_v44  ;;  %12126 = vmatpush.bf16.msrb.mxu2 %v18186_v8  ;;  %v17803_v44 = vld [vmem:[#allocation11 + $0xab8] sm:$0xf0]  ;;  %v18310_v8 = vor.u32 %v19977_v28, %v18307_v0  ;;  %v11728_v11 = vpop.f32.mrf.mxu1 }
 0x791   :  { %12213 = vmatpush.bf16.msrb.mxu0 %v17582_v31  ;;  %12225 = vmatpush.bf16.msrb.mxu1 %v17902_v16  ;;  %v19926_v31 = vld [vmem:[#allocation11 + $0xcf4] sm:$0xf0]  ;;  %v21157_v42 = vpop.f32.mrf.mxu2 }
 0x792   :  { %v18090_v62 = vor.u32 %v19926_v31, %v18089_v6  ;;  %v17195_v6 = vld [vmem:[#allocation11 + $0x5f8] sm:$0xf0] }
 0x793   :  { %12029 = vmatpush.bf16.msrb.mxu3 %v18406_v54  ;;  %12127 = vmatpush.bf16.msrb.mxu2 %v18154_v18  ;;  %v19842_v54 = vld [vmem:[#allocation11 + $0xa5c] sm:$0xf]  ;;  %v8804_v18 = vperm.slane %v8788_v7, 0  ;;  %v17198_v37 = vor.u32 %v19698_v12, %v17195_v6 }
 0x794   :  { %v17774_v24 = vor.u32 %v19842_v54, %v17771_v57  ;;  %v17163_v7 = vld [vmem:[#allocation11 + $0x5b8] sm:$0xf0] }
 0x795   :  { %12214 = vmatpush.bf16.msrb.mxu0 %v17550_v52  ;;  %12226 = vmatpush.bf16.msrb.mxu1 %v17870_v49  ;;  %v19850_v52 = vld [vmem:[#allocation11 + $0xa9c] sm:$0xf]  ;;  %v11716_v49 = vpop.f32.mrf.mxu0  ;;  %v11715_v31 = vadd.f32 %v11714_v27, %v8804_v18 }
 0x796   :  { %v17806_v30 = vor.u32 %v19850_v52, %v17803_v44  ;;  %v19758_v44 = vld [vmem:[#allocation11 + $0x7b4] sm:$0xf0]  ;;  %v19682_v54 = vld [vmem:[#allocation11 + $0x55c] sm:$0xf] }
 0x797   :  { %12030 = vmatpush.bf16.msrb.mxu3 %v18374_v56  ;;  %12128 = vmatpush.bf16.msrb.mxu2 %v18122_v48  ;;  %v17449_v56 = vld [vmem:[#allocation11 + $0x7d8] sm:$0xf]  ;;  %v11603_v48 = vadd.f32 %v21125_v63, %v8803_v4  ;;  %v11729_v28 = vadd.f32 %v11728_v11, %v11715_v31  ;;  %v11730_v52 = vpop.f32.mrf.mxu1  ;;  %v17166_v11 = vor.u32 %v19690_v26, %v17163_v7  ;;  %v17131_v57 = vld [vmem:[#allocation11 + $0x578] sm:$0xf0] }
 0x798   :  { %v17450_v0 = vor.u32 %v19766_v38, %v17449_v56  ;;  %v19734_v38 = vld [vmem:[#allocation11 + $0x6f4] sm:$0xf0]  ;;  %v19666_v31 = vld [vmem:[#allocation11 + $0x4dc] sm:$0xf] }
 0x799   :  { %12215 = vmatpush.bf16.msrb.mxu0 %v17518_v50  ;;  %12227 = vmatpush.bf16.msrb.mxu1 %v17838_v51  ;;  %v19910_v50 = vld [vmem:[#allocation11 + $0xc74] sm:$0xf0]  ;;  %v11742_v16 = vpop.f32.mrf.mxu2  ;;  %v11617_v35 = vadd.f32 %v21127_v43, %v11603_v48 }
 0x79a   :  { %v18026_v36 = vor.u32 %v19910_v50, %v18025_v21  ;;  %v11743_v27 = vadd.f32 %v11742_v16, %v11729_v28  ;;  %v19750_v50 = vld [vmem:[#allocation11 + $0x774] sm:$0xf0] }
 0x79b   :  { %12031 = vmatpush.bf16.msrb.mxu3 %v18342_v22  ;;  %12129 = vmatpush.bf16.msrb.mxu2 %v18090_v62  ;;  %v11756_v22 = vpop.f32.mrf.mxu3  ;;  %v17994_v62 = vor.u32 %v19902_v61, %v17993_v14  ;;  %v11631_v63 = vadd.f32 %v21129_v10, %v11617_v35  ;;  %v19674_v61 = vld [vmem:[#allocation11 + $0x51c] sm:$0xf]  ;;  %v17289_v28 = vld [vmem:[#allocation11 + $0x698] sm:$0xf] }
 0x79c   :  { %v11757_v43 = vadd.f32 %v11756_v22, %v11743_v27 }
 0x79d   :  { %12216 = vmatpush.bf16.msrb.mxu0 %v17486_v15  ;;  %12228 = vmatpush.bf16.msrb.mxu1 %v17806_v30  ;;  %v17739_v15 = vld [vmem:[#allocation11 + $0xa38] sm:$0xf0]  ;;  %v17385_v30 = vld [vmem:[#allocation11 + $0x758] sm:$0xf]  ;;  %v11770_v10 = vpop.f32.mrf.mxu0 }
 0x79e   :  { %v17742_v51 = vor.u32 %v19834_v2, %v17739_v15  ;;  %v11771_v16 = vadd.f32 %v11770_v10, %v11757_v43  ;;  %v17099_v2 = vld [vmem:[#allocation11 + $0x538] sm:$0xf0] }
 0x79f   :  { %12032 = vmatpush.bf16.msrb.mxu3 %v18310_v8  ;;  %12130 = vmatpush.bf16.msrb.mxu2 %v18058_v23  ;;  %v11645_v8 = vadd.f32 %v21134_v58, %v11631_v63  ;;  %v17418_v23 = vor.u32 %v19758_v44, %v17417_v59  ;;  %v11784_v25 = vpop.f32.mrf.mxu1  ;;  %v17102_v48 = vor.u32 %v19674_v61, %v17099_v2  ;;  %v19658_v59 = vld [vmem:[#allocation11 + $0x49c] sm:$0xf]  ;;  %v18441_v61 = vld [vmem:[#allocation11 + $0xf98] sm:$0xf] }
 0x7a0   :  { %12217 = vmatmul.bf16.vlgmr.msrb.gmra.mxu0 %v20974_v13  ;;  %v18278_v13 = vor.u32 %v19969_v3, %v18275_v46  ;;  %v11605_v3 = vadd.f32 %v21132_v47, %v8803_v4  ;;  %v11717_v46 = vadd.f32 %v11716_v49, %v8804_v18  ;;  %v17386_v47 = vor.u32 %v19750_v50, %v17385_v30  ;;  %v17353_v18 = vld [vmem:[#allocation11 + $0x718] sm:$0xf]  ;;  %v17035_v63 = vld [vmem:[#allocation11 + $0x4b8] sm:$0xf0] }
 0x7a1   :  { %12229 = vmatpush.bf16.msrb.mxu1 %v17774_v24  ;;  %v11744_v21 = vpop.f32.mrf.mxu2  ;;  %v11659_v33 = vadd.f32 %v21138_v17, %v11645_v8  ;;  %v17134_v4 = vor.u32 %v19682_v54, %v17131_v57  ;;  %v17321_v49 = vld [vmem:[#allocation11 + $0x6d8] sm:$0xf]  ;;  %v11785_v12 = vadd.f32 %v11784_v25, %v11771_v16  ;;  %v17038_v27 = vor.u32 %v19658_v59, %v17035_v63  ;;  %v17003_v30 = vld [vmem:[#allocation11 + $0x478] sm:$0xf0] }
 0x7a2   :  { %v11619_v58 = vadd.f32 %v21136_v19, %v11605_v3  ;;  %v17257_v8 = vld [vmem:[#allocation11 + $0x658] sm:$0xf]  ;;  %v19642_v57 = vld [vmem:[#allocation11 + $0x41c] sm:$0xf] }
 0x7a3   :  { %12033 = vmatpush.bf16.msrb.mxu3 %v18278_v13  ;;  %12131 = vmatpush.bf16.msrb.mxu2 %v18026_v36  ;;  %v11731_v13 = vadd.f32 %v11730_v52, %v11717_v46  ;;  %v19742_v36 = vld [vmem:[#allocation11 + $0x734] sm:$0xf0]  ;;  %v11758_v14 = vpop.f32.mrf.mxu3  ;;  %v11673_v19 = vadd.f32 %v21142_v9, %v11659_v33  ;;  %v19914_v59 = vld [vmem:[#allocation11 + $0xc9c] sm:$0xf] }
 0x7a4   :  { %v11633_v24 = vadd.f32 %v21140_v20, %v11619_v58  ;;  %v17354_v56 = vor.u32 %v19742_v36, %v17353_v18  ;;  %v17067_v20 = vld [vmem:[#allocation11 + $0x4f8] sm:$0xf0]  ;;  %v19710_v50 = vld [vmem:[#allocation11 + $0x634] sm:$0xf0] }
 0x7a5   :  { %12230 = vmatpush.bf16.msrb.mxu1 %v17742_v51  ;;  %v11745_v15 = vadd.f32 %v11744_v21, %v11731_v13  ;;  %v11687_v22 = vadd.f32 %v21148_v32, %v11673_v19  ;;  %v17070_v9 = vor.u32 %v19666_v31, %v17067_v20  ;;  %v16971_v58 = vld [vmem:[#allocation11 + $0x438] sm:$0xf0]  ;;  %v18473_v13 = vld [vmem:[#allocation11 + $0xfd8] sm:$0xf] }
 0x7a6   :  { %v18219_v18 = vld [vmem:[#allocation11 + $0xdf8] sm:$0xf0]  ;;  %v20014_v2 = vld [vmem:[#allocation11 + $0xfb4] sm:$0xf0] }
 0x7a7   :  { %12034 = vmatpush.bf16.msrb.mxu3 %v18246_v53  ;;  %12132 = vmatpush.bf16.msrb.mxu2 %v17994_v62  ;;  %v11759_v17 = vadd.f32 %v11758_v14, %v11745_v15  ;;  %v11772_v53 = vpop.f32.mrf.mxu0  ;;  %v17322_v62 = vor.u32 %v19734_v38, %v17321_v49  ;;  %v11701_v52 = vadd.f32 %v21153_v55, %v11687_v22  ;;  %v11786_v26 = vpop.f32.mrf.mxu1  ;;  %v19946_v15 = vld [vmem:[#allocation11 + $0xd9c] sm:$0xf]  ;;  %v19998_v31 = vld [vmem:[#allocation11 + $0xf34] sm:$0xf0] }
 0x7a8   :  { %12231 = vmatmul.bf16.vlgmr.msrb.gmra.mxu1 %v21004_v29  ;;  %v11647_v29 = vadd.f32 %v21144_v39, %v11633_v24  ;;  %v16974_v24 = vor.u32 %v19642_v57, %v16971_v58  ;;  %v18155_v49 = vld [vmem:[#allocation11 + $0xd78] sm:$0xf0] }
 0x7a9   :  { %v11798_v6 = vpop.f32.mrf.mxu2  ;;  %v11773_v39 = vadd.f32 %v11772_v53, %v11759_v17  ;;  %v20006_v17 = vld [vmem:[#allocation11 + $0xf74] sm:$0xf0]  ;;  %v19930_v20 = vld [vmem:[#allocation11 + $0xd1c] sm:$0xf] }
 0x7aa   :  { %12035 = vmatmul.bf16.vlgmr.msrb.gmra.mxu3 %v21035_v45  ;;  %12133 = vmatmul.bf16.vlgmr.msrb.gmra.mxu2 %v21016_v5  ;;  %v11661_v35 = vadd.f32 %v21151_v41, %v11647_v29  ;;  %v11799_v51 = vadd.f32 %v11798_v6, %v11785_v12  ;;  %v18187_v29 = vld [vmem:[#allocation11 + $0xdb8] sm:$0xf0]  ;;  %v18377_v6 = vld [vmem:[#allocation11 + $0xf18] sm:$0xf] }
 0x7ab   :  { %12083 = vmatpush.bf16.msra.mxu3 %v17450_v0  ;;  %12181 = vmatpush.bf16.msra.mxu2 %v17198_v37  ;;  %v19726_v0 = vld [vmem:[#allocation11 + $0x6b4] sm:$0xf0]  ;;  %v11812_v37 = vpop.f32.mrf.mxu3  ;;  %v11787_v43 = vadd.f32 %v11786_v26, %v11773_v39  ;;  %v18190_v19 = vor.u32 %v19946_v15, %v18187_v29  ;;  %v18123_v53 = vld [vmem:[#allocation11 + $0xd38] sm:$0xf0] }
 0x7ac   :  { %v11813_v44 = vadd.f32 %v11812_v37, %v11799_v51  ;;  %v11675_v7 = vadd.f32 %v21155_v1, %v11661_v35  ;;  %v17290_v41 = vor.u32 %v19726_v0, %v17289_v28  ;;  %v17225_v1 = vld [vmem:[#allocation11 + $0x618] sm:$0xf]  ;;  %v18378_v35 = vor.u32 %v19998_v31, %v18377_v6  ;;  %v18091_v51 = vld [vmem:[#allocation11 + $0xcf8] sm:$0xf0] }
 0x7ad   :  { %v17226_v36 = vor.u32 %v19710_v50, %v17225_v1  ;;  %v18126_v22 = vor.u32 %v19930_v20, %v18123_v53  ;;  %v19990_v39 = vld [vmem:[#allocation11 + $0xef4] sm:$0xf0]  ;;  %v18059_v63 = vld [vmem:[#allocation11 + $0xcb8] sm:$0xf0] }
 0x7ae   :  { %v12266_v32 = vpack.c.bf16 %v11813_v44, %v11701_v52  ;;  %v11689_v3 = vadd.f32 %v21157_v42, %v11675_v7  ;;  %v18313_v0 = vld [vmem:[#allocation11 + $0xe98] sm:$0xf]  ;;  %v18062_v44 = vor.u32 %v19914_v59, %v18059_v63  ;;  %v19754_v1 = vld [vmem:[#allocation11 + $0x79c] sm:$0xf] }
 0x7af   :  { %12084 = vmatpush.bf16.msra.mxu3 %v17418_v23  ;;  %12182 = vmatpush.bf16.msra.mxu2 %v17166_v11  ;;  %v19718_v23 = vld [vmem:[#allocation11 + $0x674] sm:$0xf0]  ;;  %v19650_v11 = vld [vmem:[#allocation11 + $0x45c] sm:$0xf] }
 0x7b0   :  { %12274 = vst [vmem:[#allocation14 + $0x8] sm:$0xff] %v12266_v32  ;;  %v17258_v55 = vor.u32 %v19718_v23, %v17257_v8  ;;  %v17006_v10 = vor.u32 %v19650_v11, %v17003_v30  ;;  %v11703_v33 = vadd.f32 %v21162_v60, %v11689_v3  ;;  %v18442_v60 = vor.u32 %v20014_v2, %v18441_v61  ;;  %v19982_v37 = vld [vmem:[#allocation11 + $0xeb4] sm:$0xf0]  ;;  %v18027_v32 = vld [vmem:[#allocation11 + $0xc78] sm:$0xf0] }
 0x7b1   :  { %v11800_v46 = vpop.f32.mrf.mxu2  ;;  %v18314_v52 = vor.u32 %v19982_v37, %v18313_v0  ;;  %v18281_v26 = vld [vmem:[#allocation11 + $0xe58] sm:$0xf]  ;;  %v19898_v11 = vld [vmem:[#allocation11 + $0xc1c] sm:$0xf] }
 0x7b2   :  { %v11801_v21 = vadd.f32 %v11800_v46, %v11787_v43  ;;  %v19974_v7 = vld [vmem:[#allocation11 + $0xe74] sm:$0xf0]  ;;  %v17995_v30 = vld [vmem:[#allocation11 + $0xc38] sm:$0xf0] }
 0x7b3   :  { %12085 = vmatpush.bf16.msra.mxu3 %v17386_v47  ;;  %12183 = vmatpush.bf16.msra.mxu2 %v17134_v4  ;;  %v11814_v54 = vpop.f32.mrf.mxu3  ;;  %v20022_v47 = vld [vmem:[#allocation11 + $0xff4] sm:$0xf0]  ;;  %v19954_v4 = vld [vmem:[#allocation11 + $0xddc] sm:$0xf] }
 0x7b4   :  { %v11815_v16 = vadd.f32 %v11814_v54, %v11801_v21  ;;  %v18474_v25 = vor.u32 %v20022_v47, %v18473_v13  ;;  %v18222_v14 = vor.u32 %v19954_v4, %v18219_v18  ;;  %v18249_v43 = vld [vmem:[#allocation11 + $0xe18] sm:$0xf]  ;;  %v19762_v3 = vld [vmem:[#allocation11 + $0x7dc] sm:$0xf]  ;;  %v21187_v47 = vpop.f32.mrf.mxu0 }
 0x7b5   :  { %v19966_v23 = vld [vmem:[#allocation11 + $0xe34] sm:$0xf0]  ;;  %v17451_v46 = vld [vmem:[#allocation11 + $0x7f8] sm:$0xf0] }
 0x7b6   :  { %v12270_v42 = vpack.c.bf16 %v11815_v16, %v11703_v33  ;;  %v17454_v21 = vor.u32 %v19762_v3, %v17451_v46  ;;  %v17419_v50 = vld [vmem:[#allocation11 + $0x7b8] sm:$0xf0] }
 0x7b7   :  { %12086 = vmatpush.bf16.msra.mxu3 %v17354_v56  ;;  %12184 = vmatpush.bf16.msra.mxu2 %v17102_v48  ;;  %v18409_v56 = vld [vmem:[#allocation11 + $0xf58] sm:$0xf]  ;;  %v19938_v48 = vld [vmem:[#allocation11 + $0xd5c] sm:$0xf]  ;;  %v17422_v54 = vor.u32 %v19754_v1, %v17419_v50 }
 0x7b8   :  { %12278 = vst [vmem:[#allocation14 + $0x28] sm:$0xff] %v12270_v42  ;;  %v18410_v38 = vor.u32 %v20006_v17, %v18409_v56  ;;  %v18158_v12 = vor.u32 %v19938_v48, %v18155_v49  ;;  %v19746_v57 = vld [vmem:[#allocation11 + $0x75c] sm:$0xf] }
 0x7b9   :  { %v17387_v58 = vld [vmem:[#allocation11 + $0x778] sm:$0xf0]  ;;  %v21191_v61 = vpop.f32.mrf.mxu2 }
 0x7ba   :  { %v17390_v13 = vor.u32 %v19746_v57, %v17387_v58  ;;  %v19738_v33 = vld [vmem:[#allocation11 + $0x71c] sm:$0xf] }
 0x7bb   :  { %12087 = vmatpush.bf16.msra.mxu3 %v17322_v62  ;;  %12185 = vmatpush.bf16.msra.mxu2 %v17070_v9  ;;  %v18345_v62 = vld [vmem:[#allocation11 + $0xed8] sm:$0xf]  ;;  %v19922_v9 = vld [vmem:[#allocation11 + $0xcdc] sm:$0xf] }
 0x7bc   :  { %v18346_v28 = vor.u32 %v19990_v39, %v18345_v62  ;;  %v17355_v16 = vld [vmem:[#allocation11 + $0x738] sm:$0xf0]  ;;  %v21193_v29 = vpop.f32.mrf.mxu0 }
 0x7bd   :  { %v17358_v4 = vor.u32 %v19738_v33, %v17355_v16  ;;  %v19730_v18 = vld [vmem:[#allocation11 + $0x6dc] sm:$0xf] }
 0x7be   :  { %v17323_v42 = vld [vmem:[#allocation11 + $0x6f8] sm:$0xf0] }
 0x7bf   :  { %12088 = vmatpush.bf16.msra.mxu3 %v17290_v41  ;;  %12186 = vmatpush.bf16.msra.mxu2 %v17038_v27  ;;  %v19906_v41 = vld [vmem:[#allocation11 + $0xc5c] sm:$0xf]  ;;  %v18282_v27 = vor.u32 %v19974_v7, %v18281_v26 }
 0x7c0   :  { %v18030_v8 = vor.u32 %v19906_v41, %v18027_v32  ;;  %v19714_v2 = vld [vmem:[#allocation11 + $0x65c] sm:$0xf] }
 0x7c1   :  { %v17259_v15 = vld [vmem:[#allocation11 + $0x678] sm:$0xf0]  ;;  %v21201_v20 = vpop.f32.mrf.mxu2 }
 0x7c2   :  { %v19706_v56 = vld [vmem:[#allocation11 + $0x61c] sm:$0xf] }
 0x7c3   :  { %12089 = vmatpush.bf16.msra.mxu3 %v17258_v55  ;;  %12187 = vmatpush.bf16.msra.mxu2 %v17006_v10  ;;  %v18250_v55 = vor.u32 %v19966_v23, %v18249_v43  ;;  %v17998_v10 = vor.u32 %v19898_v11, %v17995_v30  ;;  %v17227_v17 = vld [vmem:[#allocation11 + $0x638] sm:$0xf0] }
 0x7c4   :  { %v20018_v49 = vld [vmem:[#allocation11 + $0xfdc] sm:$0xf]  ;;  %v21199_v31 = vpop.f32.mrf.mxu0 }
 0x7c5   :  { %v20010_v53 = vld [vmem:[#allocation11 + $0xf9c] sm:$0xf] }
 0x7c6   :  { %v19994_v0 = vld [vmem:[#allocation11 + $0xf1c] sm:$0xf] }
 0x7c7   :  { %12090 = vmatpush.bf16.msra.mxu3 %v17226_v36  ;;  %12188 = vmatpush.bf16.msra.mxu2 %v16974_v24  ;;  %v21189_v36 = vpop.f32.mrf.mxu1  ;;  %v17326_v24 = vor.u32 %v19730_v18, %v17323_v42  ;;  %v18379_v37 = vld [vmem:[#allocation11 + $0xf38] sm:$0xf0] }
 0x7c8   :  { %v18382_v63 = vor.u32 %v19994_v0, %v18379_v37  ;;  %v18347_v26 = vld [vmem:[#allocation11 + $0xef8] sm:$0xf0] }
 0x7c9   :  { %v19978_v32 = vld [vmem:[#allocation11 + $0xe9c] sm:$0xf] }
 0x7ca   :  { %12091 = vmatmul.bf16.vlgmr.msra.gmra.mxu3 %v21002_v40  ;;  %12189 = vmatmul.bf16.vlgmr.msra.gmra.mxu2 %v20967_v34  ;;  %v18094_v34 = vor.u32 %v19922_v9, %v18091_v51  ;;  %v20002_v9 = vld [vmem:[#allocation11 + $0xf5c] sm:$0xf] }
 0x7cb   :  { %12139 = vmatpush.bf16.msrb.mxu3 %v18474_v25  ;;  %12237 = vmatpush.bf16.msrb.mxu2 %v18222_v14  ;;  %v19722_v25 = vld [vmem:[#allocation11 + $0x69c] sm:$0xf] }
 0x7cc   :  { %v17291_v14 = vld [vmem:[#allocation11 + $0x6b8] sm:$0xf0]  ;;  %v21210_v59 = vpop.f32.mrf.mxu0 }
 0x7cd   :  { %v18411_v51 = vld [vmem:[#allocation11 + $0xf78] sm:$0xf0] }
 0x7ce   :  { %v19970_v30 = vld [vmem:[#allocation11 + $0xe5c] sm:$0xf] }
 0x7cf   :  { %12140 = vmatpush.bf16.msrb.mxu3 %v18442_v60  ;;  %12238 = vmatpush.bf16.msrb.mxu2 %v18190_v19  ;;  %v21195_v60 = vpop.f32.mrf.mxu3  ;;  %v17262_v19 = vor.u32 %v19714_v2, %v17259_v15  ;;  %v21197_v48 = vpop.f32.mrf.mxu1  ;;  %v18283_v3 = vld [vmem:[#allocation11 + $0xe78] sm:$0xf0] }
 0x7d0   :  { %v18286_v1 = vor.u32 %v19970_v30, %v18283_v3  ;;  %v19962_v50 = vld [vmem:[#allocation11 + $0xe1c] sm:$0xf] }
 0x7d3   :  { %12141 = vmatpush.bf16.msrb.mxu3 %v18410_v38  ;;  %12239 = vmatpush.bf16.msrb.mxu2 %v18158_v12  ;;  %v18475_v38 = vld [vmem:[#allocation11 + $0xff8] sm:$0xf0]  ;;  %v17230_v12 = vor.u32 %v19706_v56, %v17227_v17 }
 0x7d4   :  { %v18478_v6 = vor.u32 %v20018_v49, %v18475_v38  ;;  %v11938_v43 = vpop.f32.mrf.mxu0 }
 0x7d7   :  { %12142 = vmatpush.bf16.msrb.mxu3 %v18378_v35  ;;  %12240 = vmatpush.bf16.msrb.mxu2 %v18126_v22  ;;  %v18443_v35 = vld [vmem:[#allocation11 + $0xfb8] sm:$0xf0]  ;;  %v21203_v62 = vpop.f32.mrf.mxu1  ;;  %v21205_v39 = vpop.f32.mrf.mxu3 }
 0x7d8   :  { %v18446_v22 = vor.u32 %v20010_v53, %v18443_v35 }
 0x7db   :  { %12143 = vmatpush.bf16.msrb.mxu3 %v18346_v28  ;;  %12241 = vmatpush.bf16.msrb.mxu2 %v18094_v34  ;;  %v18414_v28 = vor.u32 %v20002_v9, %v18411_v51  ;;  %v21208_v34 = vpop.f32.mrf.mxu2 }
 0x7dc   :  { %v11940_v16 = vpop.f32.mrf.mxu0 }
 0x7df   :  { %12144 = vmatpush.bf16.msrb.mxu3 %v18314_v52  ;;  %12242 = vmatpush.bf16.msrb.mxu2 %v18062_v44  ;;  %v19986_v44 = vld [vmem:[#allocation11 + $0xedc] sm:$0xf]  ;;  %v21214_v7 = vpop.f32.mrf.mxu1 }
 0x7e0   :  { %v18350_v41 = vor.u32 %v19986_v44, %v18347_v26 }
 0x7e3   :  { %12145 = vmatpush.bf16.msrb.mxu3 %v18282_v27  ;;  %12243 = vmatpush.bf16.msrb.mxu2 %v18030_v8  ;;  %v20067_v27 = vld [vmem:[#allocation13] sm:$0xff]  ;;  %v11912_v23 = vpop.f32.mrf.mxu2 }
 0x7e4   :  { %v21216_v8 = vunpack.c.h.bf16 %v20067_v27  ;;  %v11994_v56 = vpop.f32.mrf.mxu0 }
 0x7e6   :  { %v8789_v46 = vperm.slane %v21216_v8, 0 }
 0x7e7   :  { %12146 = vmatpush.bf16.msrb.mxu3 %v18250_v55  ;;  %12244 = vmatpush.bf16.msrb.mxu2 %v17998_v10  ;;  %v8790_v55 = vperm.slane %v21216_v8, 2  ;;  %v11952_v10 = vpop.f32.mrf.mxu1 }
 0x7e8   :  { %v8805_v57 = vperm.slane %v8789_v46, 0 }
 0x7e9   :  { %v8806_v58 = vperm.slane %v8790_v55, 0 }
 0x7ea   :  { %12147 = vmatmul.bf16.vlgmr.msrb.gmra.mxu3 %v21035_v45  ;;  %12245 = vmatmul.bf16.vlgmr.msrb.gmra.mxu2 %v21016_v5  ;;  %v17294_v5 = vor.u32 %v19722_v25, %v17291_v14  ;;  %v11829_v49 = vadd.f32 %v21193_v29, %v8805_v57 }
 0x7eb   :  { %12195 = vmatpush.bf16.msra.mxu3 %v17454_v21  ;;  %v11939_v18 = vadd.f32 %v11938_v43, %v8806_v58 }
 0x7ec   :  { %v11843_v38 = vadd.f32 %v21197_v48, %v11829_v49  ;;  %v11996_v29 = vpop.f32.mrf.mxu0 }
 0x7ed   :  { %v21212_v52 = vpop.f32.mrf.mxu3  ;;  %v11953_v25 = vadd.f32 %v11952_v10, %v11939_v18 }
 0x7ef   :  { %12196 = vmatpush.bf16.msra.mxu3 %v17422_v54  ;;  %v18251_v54 = vld [vmem:[#allocation11 + $0xe38] sm:$0xf0]  ;;  %v11954_v14 = vpop.f32.mrf.mxu1 }
 0x7f0   :  { %v18254_v33 = vor.u32 %v19962_v50, %v18251_v54 }
 0x7f3   :  { %12197 = vmatpush.bf16.msra.mxu3 %v17390_v13  ;;  %v11966_v13 = vpop.f32.mrf.mxu2 }
 0x7f4   :  { %v11967_v2 = vadd.f32 %v11966_v13, %v11953_v25 }
 0x7f5   :  { %v11926_v21 = vpop.f32.mrf.mxu3 }
 0x7f7   :  { %12198 = vmatpush.bf16.msra.mxu3 %v17358_v4  ;;  %v11827_v4 = vadd.f32 %v21187_v47, %v8805_v57  ;;  %v11941_v47 = vadd.f32 %v11940_v16, %v8806_v58  ;;  %v12008_v53 = vpop.f32.mrf.mxu1 }
 0x7fb   :  { %12199 = vmatpush.bf16.msra.mxu3 %v17326_v24  ;;  %v11841_v24 = vadd.f32 %v21189_v36, %v11827_v4  ;;  %v11968_v17 = vpop.f32.mrf.mxu2  ;;  %v8792_v4 = vperm.slane %v21216_v8, 6 }
 0x7fd   :  { %v8808_v25 = vperm.slane %v8792_v4, 0 }
 0x7ff   :  { %12200 = vmatpush.bf16.msra.mxu3 %v17294_v5  ;;  %v11855_v5 = vadd.f32 %v21191_v61, %v11841_v24  ;;  %v11857_v61 = vadd.f32 %v21201_v20, %v11843_v38  ;;  %v12010_v20 = vpop.f32.mrf.mxu1 }
 0x801   :  { %v11869_v15 = vadd.f32 %v21195_v60, %v11855_v5 }
 0x803   :  { %12201 = vmatpush.bf16.msra.mxu3 %v17262_v19  ;;  %v11883_v36 = vadd.f32 %v21199_v31, %v11869_v15 }
 0x805   :  { %v11897_v60 = vadd.f32 %v21203_v62, %v11883_v36 }
 0x807   :  { %12202 = vmatpush.bf16.msra.mxu3 %v17230_v12  ;;  %v11955_v12 = vadd.f32 %v11954_v14, %v11941_v47  ;;  %v11911_v48 = vadd.f32 %v21208_v34, %v11897_v60  ;;  %v12050_v34 = vpop.f32.mrf.mxu0  ;;  %v12064_v3 = vpop.f32.mrf.mxu1 }
 0x809   :  { %v11925_v44 = vadd.f32 %v21212_v52, %v11911_v48 }
 0x80a   :  { %12203 = vmatmul.bf16.vlgmr.msra.gmra.mxu3 %v21002_v40  ;;  %v18315_v40 = vld [vmem:[#allocation11 + $0xeb8] sm:$0xf0] }
 0x80b   :  { %12251 = vmatpush.bf16.msrb.mxu3 %v18478_v6  ;;  %v18318_v11 = vor.u32 %v19978_v32, %v18315_v40 }
 0x80d   :  { %v11980_v42 = vpop.f32.mrf.mxu3 }
 0x80e   :  { %v11981_v19 = vadd.f32 %v11980_v42, %v11967_v2 }
 0x80f   :  { %12252 = vmatpush.bf16.msrb.mxu3 %v18446_v22  ;;  %v11969_v22 = vadd.f32 %v11968_v17, %v11955_v12  ;;  %v12052_v55 = vpop.f32.mrf.mxu0  ;;  %v12066_v10 = vpop.f32.mrf.mxu1 }
 0x810   :  { %v11995_v6 = vadd.f32 %v11994_v56, %v11981_v19 }
 0x812   :  { %v12009_v51 = vadd.f32 %v12008_v53, %v11995_v6 }
 0x813   :  { %12253 = vmatpush.bf16.msrb.mxu3 %v18414_v28  ;;  %v12022_v28 = vpop.f32.mrf.mxu2 }
 0x814   :  { %v12023_v31 = vadd.f32 %v12022_v28, %v12009_v51 }
 0x815   :  { %v11982_v35 = vpop.f32.mrf.mxu3 }
 0x816   :  { %v11983_v9 = vadd.f32 %v11982_v35, %v11969_v22 }
 0x817   :  { %12254 = vmatpush.bf16.msrb.mxu3 %v18382_v63 }
 0x818   :  { %v11997_v37 = vadd.f32 %v11996_v29, %v11983_v9 }
 0x81a   :  { %v12011_v32 = vadd.f32 %v12010_v20, %v11997_v37 }
 0x81b   :  { %12255 = vmatpush.bf16.msrb.mxu3 %v18350_v41  ;;  %v12024_v62 = vpop.f32.mrf.mxu2 }
 0x81c   :  { %v12025_v27 = vadd.f32 %v12024_v62, %v12011_v32 }
 0x81f   :  { %12256 = vmatpush.bf16.msrb.mxu3 %v18318_v11 }
 0x823   :  { %12257 = vmatpush.bf16.msrb.mxu3 %v18286_v1  ;;  %v12078_v46 = vpop.f32.mrf.mxu2  ;;  %v12106_v1 = vpop.f32.mrf.mxu0 }
 0x827   :  { %12258 = vmatpush.bf16.msrb.mxu3 %v18254_v33 }
 0x82a   :  { %12259 = vmatmul.bf16.vlgmr.msrb.gmra.mxu3 %v21035_v45  ;;  %v11871_v45 = vadd.f32 %v21205_v39, %v11857_v61 }
 0x82b   :  { %v12080_v50 = vpop.f32.mrf.mxu2  ;;  %v12108_v58 = vpop.f32.mrf.mxu0 }
 0x82c   :  { %v11885_v0 = vadd.f32 %v21210_v59, %v11871_v45 }
 0x82d   :  { %v12036_v63 = vpop.f32.mrf.mxu3 }
 0x82e   :  { %v12037_v26 = vadd.f32 %v12036_v63, %v12023_v31  ;;  %v11899_v41 = vadd.f32 %v21214_v7, %v11885_v0  ;;  %v12120_v7 = vpop.f32.mrf.mxu1 }
 0x830   :  { %v12267_v39 = vpack.c.bf16 %v12037_v26, %v11925_v44  ;;  %v11913_v40 = vadd.f32 %v11912_v23, %v11899_v41 }
 0x832   :  { %12275 = vst [vmem:[#allocation14 + $0x10] sm:$0xff] %v12267_v39  ;;  %v11927_v11 = vadd.f32 %v11926_v21, %v11913_v40  ;;  %v8791_v21 = vperm.slane %v21216_v8, 4 }
 0x833   :  { %v12134_v57 = vpop.f32.mrf.mxu2  ;;  %v12162_v33 = vpop.f32.mrf.mxu0 }
 0x834   :  { %v8807_v24 = vperm.slane %v8791_v21, 0  ;;  %v12163_v15 = vadd.f32 %v12162_v33, %v8808_v25 }
 0x835   :  { %v12038_v43 = vpop.f32.mrf.mxu3 }
 0x836   :  { %v12039_v59 = vadd.f32 %v12038_v43, %v12025_v27  ;;  %v12122_v23 = vpop.f32.mrf.mxu1  ;;  %v12051_v2 = vadd.f32 %v12050_v34, %v8807_v24  ;;  %v12053_v35 = vadd.f32 %v12052_v55, %v8807_v24 }
 0x838   :  { %v12271_v30 = vpack.c.bf16 %v12039_v59, %v11927_v11  ;;  %v12065_v56 = vadd.f32 %v12064_v3, %v12051_v2  ;;  %v12067_v61 = vadd.f32 %v12066_v10, %v12053_v35 }
 0x83a   :  { %12279 = vst [vmem:[#allocation14 + $0x30] sm:$0xff] %v12271_v30  ;;  %v12079_v47 = vadd.f32 %v12078_v46, %v12065_v56  ;;  %v12081_v28 = vadd.f32 %v12080_v50, %v12067_v61 }
 0x83b   :  { %v12136_v16 = vpop.f32.mrf.mxu2  ;;  %v12164_v5 = vpop.f32.mrf.mxu0 }
 0x83c   :  { %v12165_v8 = vadd.f32 %v12164_v5, %v8808_v25 }
 0x83e   :  { %v12176_v18 = vpop.f32.mrf.mxu1 }
 0x83f   :  { %v12177_v17 = vadd.f32 %v12176_v18, %v12163_v15 }
 0x843   :  { %v12218_v6 = vpop.f32.mrf.mxu0 }
 0x846   :  { %v12178_v49 = vpop.f32.mrf.mxu1 }
 0x847   :  { %v12179_v22 = vadd.f32 %v12178_v49, %v12165_v8 }
 0x84b   :  { %v12220_v44 = vpop.f32.mrf.mxu0 }
 0x84d   :  { %v12092_v52 = vpop.f32.mrf.mxu3  ;;  %v12190_v14 = vpop.f32.mrf.mxu2 }
 0x84e   :  { %v12191_v38 = vadd.f32 %v12190_v14, %v12177_v17  ;;  %v12093_v12 = vadd.f32 %v12092_v52, %v12079_v47  ;;  %v12232_v9 = vpop.f32.mrf.mxu1 }
 0x850   :  { %v12107_v45 = vadd.f32 %v12106_v1, %v12093_v12 }
 0x852   :  { %v12121_v48 = vadd.f32 %v12120_v7, %v12107_v45 }
 0x854   :  { %v12135_v20 = vadd.f32 %v12134_v57, %v12121_v48 }
 0x855   :  { %v12094_v54 = vpop.f32.mrf.mxu3  ;;  %v12192_v53 = vpop.f32.mrf.mxu2 }
 0x856   :  { %v12193_v29 = vadd.f32 %v12192_v53, %v12179_v22  ;;  %v12095_v0 = vadd.f32 %v12094_v54, %v12081_v28  ;;  %v12234_v27 = vpop.f32.mrf.mxu1 }
 0x858   :  { %v12109_v26 = vadd.f32 %v12108_v58, %v12095_v0 }
 0x85a   :  { %v12123_v43 = vadd.f32 %v12122_v23, %v12109_v26 }
 0x85c   :  { %v12137_v34 = vadd.f32 %v12136_v16, %v12123_v43 }
 0x86d   :  { %v12148_v13 = vpop.f32.mrf.mxu3  ;;  %v12246_v63 = vpop.f32.mrf.mxu2 }
 0x86e   :  { %v12149_v62 = vadd.f32 %v12148_v13, %v12135_v20 }
 0x875   :  { %v12150_v42 = vpop.f32.mrf.mxu3  ;;  %v12248_v30 = vpop.f32.mrf.mxu2 }
 0x876   :  { %v12151_v55 = vadd.f32 %v12150_v42, %v12137_v34 }
 0x88d   :  { %v12204_v19 = vpop.f32.mrf.mxu3 }
 0x88e   :  { %v12205_v36 = vadd.f32 %v12204_v19, %v12191_v38 }
 0x890   :  { %v12219_v60 = vadd.f32 %v12218_v6, %v12205_v36 }
 0x892   :  { %v12233_v31 = vadd.f32 %v12232_v9, %v12219_v60 }
 0x894   :  { %v12247_v39 = vadd.f32 %v12246_v63, %v12233_v31 }
 0x895   :  { %v12206_v51 = vpop.f32.mrf.mxu3 }
 0x896   :  { %v12207_v37 = vadd.f32 %v12206_v51, %v12193_v29 }
 0x898   :  { %v12221_v41 = vadd.f32 %v12220_v44, %v12207_v37 }
 0x89a   :  { %v12235_v59 = vadd.f32 %v12234_v27, %v12221_v41 }
 0x89c   :  { %v12249_v3 = vadd.f32 %v12248_v30, %v12235_v59 }
 0x8ad   :  { %v12260_v32 = vpop.f32.mrf.mxu3 }
 0x8ae   :  { %v12261_v40 = vadd.f32 %v12260_v32, %v12247_v39 }
 0x8b0   :  { %v12268_v11 = vpack.c.bf16 %v12261_v40, %v12149_v62 }
 0x8b2   :  { %12276 = vst [vmem:[#allocation14 + $0x18] sm:$0xff] %v12268_v11 }
 0x8b5   :  { %v12262_v46 = vpop.f32.mrf.mxu3 }
 0x8b6   :  { %v12263_v52 = vadd.f32 %v12262_v46, %v12249_v3 }
 0x8b8   :  { %v12272_v10 = vpack.c.bf16 %v12263_v52, %v12151_v55 }
 0x8ba   :  { %12280 = vst [vmem:[#allocation14 + $0x38] sm:$0xff] %v12272_v10 }
 0x8bb   :  { %12293 = dma.vmem_to_hbm [thread:$0]  %s12286_s6, 1024, %s12288_s14, [#allocation4], %s20271_s9, %s20271_s9, %s20272_s10  }
 0x8bc   :  { %20268 = dma.done.wait [#allocation4], 1024  }
 0x8bd   :  { %20269 = vsyncadd [#allocation4], 4294966272 }
 0x8be   :  { %12298 = vsyncpa [#allocation3], 1 }
 0x8bf   :  { %12299 = vsyncpa [#allocation6], 1 }
 0x8c0   :  { %12300 = vsyncpa [#allocation9], 1 }
 0x8c1   :  { %12301 = vsyncpa [#allocation12], 1 }
 0x8c2   :  { %12302 = vsyncpa [#allocation4], 1 }

</bundles_post_ra>
